<compile_context>
chip_gen: v7x
topology: tpu7x:2x2x1
jax: 0.10.0
libtpu: 0.0.40
codegen_flags: <defaults>
</compile_context>

<pallas_src>
import functools

import jax
import jax.numpy as jnp
from jax.experimental import pallas as pl
from jax.experimental.pallas import tpu as pltpu

LANE = 128
MAX_LANES = 4096                       # widest slab last-dim we will form
TARGET_TILE_BYTES = 2 * 1024 * 1024    # ~2 MiB per block; double-buffered in+out
                                       # = 8 MiB < 16 MiB (v5e scoped default)


# ---------------------------------------------------------------------------
# Elementwise LeakyReLU kernel
# ---------------------------------------------------------------------------
def _leaky_relu_kernel(x_ref, o_ref, *, slope):
    x = x_ref[...]
    o_ref[...] = jnp.where(x >= 0, x, x * slope)


def _choose_slab(n, sub):
    """Pick a lane-dense 2D view (R, W) of a flat length-n array.

    Fast path (zero copy): n % (sub*128) == 0 -> widest W (multiple of 128,
    <= MAX_LANES) with W | n and (n // W) % sub == 0.
    Padded path: wide W, one single flat pad up to a multiple of sub*W.
    Returns (W, R, pad) with R * W == n + pad.
    """
    if n % (sub * LANE) == 0:
        w = min(MAX_LANES, n)
        while w >= LANE:
            if n % w == 0 and (n // w) % sub == 0:
                return w, n // w, 0
            w -= LANE
    w = 1024 if n >= sub * 1024 else LANE
    total = -(-n // (sub * w)) * (sub * w)
    return w, total // w, total - n


def _choose_tile_rows(R, W, itemsize, sub):
    """Largest divisor of R that is a multiple of `sub` and keeps the block
    around TARGET_TILE_BYTES; prefer >= 2 grid steps so both v7x TCs get work."""
    max_rows = max(sub, (TARGET_TILE_BYTES // (W * itemsize)) // sub * sub)
    tile = None
    t = min(max_rows, (R // sub) * sub)
    while t >= sub:
        if R % t == 0:
            tile = t
            break
        t -= sub
    if tile is None:
        tile = R
    if tile == R and R >= 2 * sub:      # avoid a grid of 1 when we can split
        t = (R // 2) // sub * sub
        while t >= sub:
            if R % t == 0:
                tile = t
                break
            t -= sub
    return tile


def leaky_relu_pallas(x, negative_slope=0.2):
    """Elementwise LeakyReLU on an arbitrarily shaped array (f32 or bf16)."""
    orig_shape = x.shape
    dtype = x.dtype
    n = x.size
    itemsize = dtype.itemsize
    sub = 16 if itemsize == 2 else 8          # packed bf16 vreg is [16,128]

    W, R, pad = _choose_slab(n, sub)
    if pad == 0:
        x2d = x.reshape(R, W)                 # pure reshape: no HBM copy
    else:
        xf = jnp.pad(x.reshape(-1), (0, pad)) # single pad of the flat array
        x2d = xf.reshape(R, W)

    tile_rows = _choose_tile_rows(R, W, itemsize, sub)
    grid_rows = R // tile_rows

    kern = functools.partial(_leaky_relu_kernel, slope=negative_slope)
    out2d = pl.pallas_call(
        kern,
        out_shape=jax.ShapeDtypeStruct((R, W), dtype),
        grid_spec=pltpu.PrefetchScalarGridSpec(
            num_scalar_prefetch=0,
            grid=(grid_rows,),
            in_specs=[pl.BlockSpec((tile_rows, W), lambda i: (i, 0))],
            out_specs=pl.BlockSpec((tile_rows, W), lambda i: (i, 0)),
        ),
        compiler_params=pltpu.CompilerParams(
            dimension_semantics=("parallel",)),
        cost_estimate=pl.CostEstimate(
            flops=n, transcendentals=0, bytes_accessed=2 * n * itemsize),
    )(x2d)

    if pad == 0:
        return out2d.reshape(orig_shape)
    return out2d.reshape(-1)[:n].reshape(orig_shape)


# ---------------------------------------------------------------------------
# Linear (+ bias, optional fused LeakyReLU) kernel
# ---------------------------------------------------------------------------
def _linear_kernel(x_ref, w_ref, b_ref, o_ref, acc_ref, *, activate, slope):
    k = pl.program_id(1)

    @pl.when(k == 0)
    def _():
        acc_ref[...] = jnp.zeros_like(acc_ref)

    acc_ref[...] += jnp.dot(x_ref[...], w_ref[...],
                            preferred_element_type=jnp.float32)

    @pl.when(k == pl.num_programs(1) - 1)
    def _():
        y = acc_ref[...] + b_ref[...].astype(jnp.float32)
        if activate:
            y = jnp.where(y >= 0, y, y * slope)
        o_ref[...] = y.astype(o_ref.dtype)


def _pick_tile(dim, max_tile):
    """Largest multiple of 128 that divides dim and is <= max_tile, else dim."""
    if dim % 128 != 0:
        return dim
    t = min((max_tile // 128) * 128, dim)
    while t >= 128:
        if dim % t == 0:
            return t
        t -= 128
    return dim


def linear_pallas(x, w, b, *, activate=False, slope=0.2,
                  max_tk=1024, max_tn=512):
    """y = x @ w + b (optionally LeakyReLU). x:(M,K), w:(K,N), b:(N,)."""
    M, K = x.shape
    K2, N = w.shape
    assert K == K2 and b.shape == (N,)
    tk = _pick_tile(K, max_tk)
    tn = _pick_tile(N, max_tn)
    grid = (N // tn, K // tk)
    b2 = b.reshape(1, N)
    itemsize = x.dtype.itemsize

    kern = functools.partial(_linear_kernel, activate=activate, slope=slope)
    return pl.pallas_call(
        kern,
        out_shape=jax.ShapeDtypeStruct((M, N), x.dtype),
        grid_spec=pltpu.PrefetchScalarGridSpec(
            num_scalar_prefetch=0,
            grid=grid,
            in_specs=[
                pl.BlockSpec((M, tk), lambda j, k: (0, k)),
                pl.BlockSpec((tk, tn), lambda j, k: (k, j)),
                pl.BlockSpec((1, tn), lambda j, k: (0, j)),
            ],
            out_specs=pl.BlockSpec((M, tn), lambda j, k: (0, j)),
            scratch_shapes=[pltpu.VMEM((M, tn), jnp.float32)],
        ),
        compiler_params=pltpu.CompilerParams(
            dimension_semantics=("parallel", "arbitrary")),
        cost_estimate=pl.CostEstimate(
            flops=2 * M * K * N,
            transcendentals=0,
            bytes_accessed=(M * K + K * N + M * N + N) * itemsize),
    )(x, w, b2)


# ---------------------------------------------------------------------------
# Reparameterization kernel: z = mu + exp(0.5*logvar) * eps
# ---------------------------------------------------------------------------
def _reparam_kernel(mu_ref, logvar_ref, eps_ref, z_ref):
    z_ref[...] = mu_ref[...] + jnp.exp(0.5 * logvar_ref[...]) * eps_ref[...]


def reparameterize_pallas(mu, logvar, eps):
    return pl.pallas_call(
        _reparam_kernel,
        out_shape=jax.ShapeDtypeStruct(mu.shape, mu.dtype),
    )(mu, logvar, eps)


# ---------------------------------------------------------------------------
# InfModel (img_len <= 38 branch) in JAX
# ---------------------------------------------------------------------------
def conv2d(x, w, stride, padding):
    return jax.lax.conv_general_dilated(
        x, w,
        window_strides=(stride, stride),
        padding=[(padding, padding), (padding, padding)],
        dimension_numbers=("NCHW", "OIHW", "NCHW"),
    )


def batchnorm2d(x, gamma, beta, eps=1e-5):
    # Training-mode BatchNorm2d (batch statistics, default affine init).
    mean = jnp.mean(x, axis=(0, 2, 3), keepdims=True)
    var = jnp.var(x, axis=(0, 2, 3), keepdims=True)
    xhat = (x - mean) * jax.lax.rsqrt(var + eps)
    return xhat * gamma.reshape(1, -1, 1, 1) + beta.reshape(1, -1, 1, 1)


def init_params(key, num_chan=1, inner_dim=128, latent_dim=100):
    d = inner_dim
    keys = jax.random.split(key, 9)

    def conv_w(k, cout, cin):
        fan_in = cin * 4 * 4
        return jax.random.normal(k, (cout, cin, 4, 4), jnp.float32) * (fan_in ** -0.5)

    def lin(k, fin, fout):
        kw, kb = jax.random.split(k)
        w = jax.random.normal(kw, (fin, fout), jnp.float32) * (fin ** -0.5)
        b = jax.random.normal(kb, (fout,), jnp.float32) * (fin ** -0.5)
        return w, b

    return {
        "c1": conv_w(keys[0], d, num_chan),
        "c2": conv_w(keys[1], d * 2, d),
        "c3": conv_w(keys[2], d * 4, d * 2),
        "c4": conv_w(keys[3], d * 8, d * 4),
        "bn1": (jnp.ones(d), jnp.zeros(d)),
        "bn2": (jnp.ones(d * 2), jnp.zeros(d * 2)),
        "bn3": (jnp.ones(d * 4), jnp.zeros(d * 4)),
        "bn4": (jnp.ones(d * 8), jnp.zeros(d * 8)),
        "fc1": lin(keys[4], d * 9 * 8, d * 8),
        "fc2": lin(keys[5], d * 8, d * 4),
        "fc3": lin(keys[6], d * 4, d),
        "mu": lin(keys[7], d, latent_dim),
        "logvar": lin(keys[8], d, latent_dim),
    }


def inf_model_forward(params, x, eps, negative_slope=0.2):
    act = lambda t: leaky_relu_pallas(t, negative_slope)
    h = act(batchnorm2d(conv2d(x, params["c1"], 1, 0), *params["bn1"]))
    h = act(batchnorm2d(conv2d(h, params["c2"], 2, 1), *params["bn2"]))
    h = act(batchnorm2d(conv2d(h, params["c3"], 2, 1), *params["bn3"]))
    h = act(batchnorm2d(conv2d(h, params["c4"], 2, 1), *params["bn4"]))
    h = h.reshape(h.shape[0], -1)                       # Flatten
    h = linear_pallas(h, *params["fc1"], activate=True, slope=negative_slope)
    h = linear_pallas(h, *params["fc2"], activate=True, slope=negative_slope)
    z_pre = linear_pallas(h, *params["fc3"], activate=True, slope=negative_slope)
    mu = linear_pallas(z_pre, *params["mu"], activate=False)
    logvar = linear_pallas(z_pre, *params["logvar"], activate=False)
    z = reparameterize_pallas(mu, logvar, eps)          # torch.randn_like -> eps
    return z, mu, logvar


def inf_model_forward_ref(params, x, eps, negative_slope=0.2):
    lrelu = lambda t: jnp.where(t >= 0, t, negative_slope * t)

    def lin(t, w, b, act):
        y = jnp.dot(t, w, precision=jax.lax.Precision.HIGHEST) + b
        return lrelu(y) if act else y

    h = lrelu(batchnorm2d(conv2d(x, params["c1"], 1, 0), *params["bn1"]))
    h = lrelu(batchnorm2d(conv2d(h, params["c2"], 2, 1), *params["bn2"]))
    h = lrelu(batchnorm2d(conv2d(h, params["c3"], 2, 1), *params["bn3"]))
    h = lrelu(batchnorm2d(conv2d(h, params["c4"], 2, 1), *params["bn4"]))
    h = h.reshape(h.shape[0], -1)
    h = lin(h, *params["fc1"], True)
    h = lin(h, *params["fc2"], True)
    z_pre = lin(h, *params["fc3"], True)
    mu = lin(z_pre, *params["mu"], False)
    logvar = lin(z_pre, *params["logvar"], False)
    z = mu + jnp.exp(0.5 * logvar) * eps
    return z, mu, logvar


if __name__ == "__main__":
    key = jax.random.PRNGKey(0)
    pkey, xkey, ekey = jax.random.split(key, 3)

    params = init_params(pkey, num_chan=1, inner_dim=128, latent_dim=100)
    x = jax.random.normal(xkey, (2, 1, 28, 28), dtype=jnp.float32)  # FashionMNIST batch
    eps = jax.random.normal(ekey, (2, 100), dtype=jnp.float32)      # reparam noise

    fwd = jax.jit(inf_model_forward)
    z, mu, logvar = jax.block_until_ready(fwd(params, x, eps))

    z_r, mu_r, lv_r = inf_model_forward_ref(params, x, eps)
    assert z.shape == (2, 100) and mu.shape == (2, 100) and logvar.shape == (2, 100)
    assert z.dtype == x.dtype
    assert bool(jnp.all(jnp.isfinite(z)))
    assert jnp.allclose(mu, mu_r, rtol=2e-2, atol=2e-2)
    assert jnp.allclose(logvar, lv_r, rtol=2e-2, atol=2e-2)
    assert jnp.allclose(z, z_r, rtol=2e-2, atol=2e-2)

    print("KERNEL_OK")
</pallas_src>

<mosaic_0001>
module attributes {stable_mosaic.version = 11 : i64} {
  func.func @_leaky_relu_kernel(%arg0: i32, %arg1: memref<80x1024xf32, #tpu.memory_space<vmem>>, %arg2: memref<80x1024xf32, #tpu.memory_space<vmem>>) attributes {dimension_semantics = [#tpu.dimension_semantics<parallel>], iteration_bounds = array<i64: 2>, scalar_prefetch = 0 : i64, scratch_operands = 0 : i64, tpu.core_type = #tpu.core_type<tc>, window_params = [{transform_indices = @transform_0, window_bounds = array<i64: 80, 1024>}, {transform_indices = @transform_1, window_bounds = array<i64: 80, 1024>}]} {
    %c0 = arith.constant 0 : index
    %c0_0 = arith.constant 0 : index
    %0 = vector.load %arg1[%c0, %c0_0] : memref<80x1024xf32, #tpu.memory_space<vmem>>, vector<80x1024xf32>
    %cst = arith.constant 0.000000e+00 : f32
    %1 = vector.broadcast %cst : f32 to vector<80x1024xf32>
    %2 = arith.cmpf oge, %0, %1 : vector<80x1024xf32>
    %cst_1 = arith.constant 2.000000e-01 : f32
    %3 = vector.broadcast %cst_1 : f32 to vector<80x1024xf32>
    %4 = arith.mulf %0, %3 : vector<80x1024xf32>
    %5 = arith.select %2, %0, %4 : vector<80x1024xi1>, vector<80x1024xf32>
    %c0_2 = arith.constant 0 : index
    %c0_3 = arith.constant 0 : index
    %6 = vector.load %arg2[%c0_2, %c0_3] : memref<80x1024xf32, #tpu.memory_space<vmem>>, vector<80x1024xf32>
    tpu.vector_store %arg2[%c0_2, %c0_3], %5 {strides = array<i32>} : memref<80x1024xf32, #tpu.memory_space<vmem>>, vector<80x1024xf32>,
    return
  }
  func.func @transform_0(%arg0: i32) -> (i32, i32) {
    %c0_i32 = arith.constant 0 : i32
    %c0_i32_0 = arith.constant 0 : i32
    return %arg0, %c0_i32 : i32, i32
  }
  func.func @transform_1(%arg0: i32) -> (i32, i32) {
    %c0_i32 = arith.constant 0 : i32
    %c0_i32_0 = arith.constant 0 : i32
    return %arg0, %c0_i32 : i32, i32
  }
}

module attributes {stable_mosaic.version = 11 : i64} {
  func.func @_leaky_relu_kernel(%arg0: i32, %arg1: memref<8x3072xf32, #tpu.memory_space<vmem>>, %arg2: memref<8x3072xf32, #tpu.memory_space<vmem>>) attributes {dimension_semantics = [#tpu.dimension_semantics<parallel>], iteration_bounds = array<i64: 3>, scalar_prefetch = 0 : i64, scratch_operands = 0 : i64, tpu.core_type = #tpu.core_type<tc>, window_params = [{transform_indices = @transform_0, window_bounds = array<i64: 8, 3072>}, {transform_indices = @transform_1, window_bounds = array<i64: 8, 3072>}]} {
    %c0 = arith.constant 0 : index
    %c0_0 = arith.constant 0 : index
    %0 = vector.load %arg1[%c0, %c0_0] : memref<8x3072xf32, #tpu.memory_space<vmem>>, vector<8x3072xf32>
    %cst = arith.constant 0.000000e+00 : f32
    %1 = vector.broadcast %cst : f32 to vector<8x3072xf32>
    %2 = arith.cmpf oge, %0, %1 : vector<8x3072xf32>
    %cst_1 = arith.constant 2.000000e-01 : f32
    %3 = vector.broadcast %cst_1 : f32 to vector<8x3072xf32>
    %4 = arith.mulf %0, %3 : vector<8x3072xf32>
    %5 = arith.select %2, %0, %4 : vector<8x3072xi1>, vector<8x3072xf32>
    %c0_2 = arith.constant 0 : index
    %c0_3 = arith.constant 0 : index
    %6 = vector.load %arg2[%c0_2, %c0_3] : memref<8x3072xf32, #tpu.memory_space<vmem>>, vector<8x3072xf32>
    tpu.vector_store %arg2[%c0_2, %c0_3], %5 {strides = array<i32>} : memref<8x3072xf32, #tpu.memory_space<vmem>>, vector<8x3072xf32>,
    return
  }
  func.func @transform_0(%arg0: i32) -> (i32, i32) {
    %c0_i32 = arith.constant 0 : i32
    %c0_i32_0 = arith.constant 0 : i32
    return %arg0, %c0_i32 : i32, i32
  }
  func.func @transform_1(%arg0: i32) -> (i32, i32) {
    %c0_i32 = arith.constant 0 : i32
    %c0_i32_0 = arith.constant 0 : i32
    return %arg0, %c0_i32 : i32, i32
  }
}

module attributes {stable_mosaic.version = 11 : i64} {
  func.func @_leaky_relu_kernel(%arg0: i32, %arg1: memref<8x2304xf32, #tpu.memory_space<vmem>>, %arg2: memref<8x2304xf32, #tpu.memory_space<vmem>>) attributes {dimension_semantics = [#tpu.dimension_semantics<parallel>], iteration_bounds = array<i64: 2>, scalar_prefetch = 0 : i64, scratch_operands = 0 : i64, tpu.core_type = #tpu.core_type<tc>, window_params = [{transform_indices = @transform_0, window_bounds = array<i64: 8, 2304>}, {transform_indices = @transform_1, window_bounds = array<i64: 8, 2304>}]} {
    %c0 = arith.constant 0 : index
    %c0_0 = arith.constant 0 : index
    %0 = vector.load %arg1[%c0, %c0_0] : memref<8x2304xf32, #tpu.memory_space<vmem>>, vector<8x2304xf32>
    %cst = arith.constant 0.000000e+00 : f32
    %1 = vector.broadcast %cst : f32 to vector<8x2304xf32>
    %2 = arith.cmpf oge, %0, %1 : vector<8x2304xf32>
    %cst_1 = arith.constant 2.000000e-01 : f32
    %3 = vector.broadcast %cst_1 : f32 to vector<8x2304xf32>
    %4 = arith.mulf %0, %3 : vector<8x2304xf32>
    %5 = arith.select %2, %0, %4 : vector<8x2304xi1>, vector<8x2304xf32>
    %c0_2 = arith.constant 0 : index
    %c0_3 = arith.constant 0 : index
    %6 = vector.load %arg2[%c0_2, %c0_3] : memref<8x2304xf32, #tpu.memory_space<vmem>>, vector<8x2304xf32>
    tpu.vector_store %arg2[%c0_2, %c0_3], %5 {strides = array<i32>} : memref<8x2304xf32, #tpu.memory_space<vmem>>, vector<8x2304xf32>,
    return
  }
  func.func @transform_0(%arg0: i32) -> (i32, i32) {
    %c0_i32 = arith.constant 0 : i32
    %c0_i32_0 = arith.constant 0 : i32
    return %arg0, %c0_i32 : i32, i32
  }
  func.func @transform_1(%arg0: i32) -> (i32, i32) {
    %c0_i32 = arith.constant 0 : i32
    %c0_i32_0 = arith.constant 0 : i32
    return %arg0, %c0_i32 : i32, i32
  }
}

module attributes {stable_mosaic.version = 11 : i64} {
  func.func @_leaky_relu_kernel(%arg0: i32, %arg1: memref<8x2304xf32, #tpu.memory_space<vmem>>, %arg2: memref<8x2304xf32, #tpu.memory_space<vmem>>) attributes {dimension_semantics = [#tpu.dimension_semantics<parallel>], iteration_bounds = array<i64: 1>, scalar_prefetch = 0 : i64, scratch_operands = 0 : i64, tpu.core_type = #tpu.core_type<tc>, window_params = [{transform_indices = @transform_0, window_bounds = array<i64: 8, 2304>}, {transform_indices = @transform_1, window_bounds = array<i64: 8, 2304>}]} {
    %c0 = arith.constant 0 : index
    %c0_0 = arith.constant 0 : index
    %0 = vector.load %arg1[%c0, %c0_0] : memref<8x2304xf32, #tpu.memory_space<vmem>>, vector<8x2304xf32>
    %cst = arith.constant 0.000000e+00 : f32
    %1 = vector.broadcast %cst : f32 to vector<8x2304xf32>
    %2 = arith.cmpf oge, %0, %1 : vector<8x2304xf32>
    %cst_1 = arith.constant 2.000000e-01 : f32
    %3 = vector.broadcast %cst_1 : f32 to vector<8x2304xf32>
    %4 = arith.mulf %0, %3 : vector<8x2304xf32>
    %5 = arith.select %2, %0, %4 : vector<8x2304xi1>, vector<8x2304xf32>
    %c0_2 = arith.constant 0 : index
    %c0_3 = arith.constant 0 : index
    %6 = vector.load %arg2[%c0_2, %c0_3] : memref<8x2304xf32, #tpu.memory_space<vmem>>, vector<8x2304xf32>
    tpu.vector_store %arg2[%c0_2, %c0_3], %5 {strides = array<i32>} : memref<8x2304xf32, #tpu.memory_space<vmem>>, vector<8x2304xf32>,
    return
  }
  func.func @transform_0(%arg0: i32) -> (i32, i32) {
    %c0_i32 = arith.constant 0 : i32
    %c0_i32_0 = arith.constant 0 : i32
    return %arg0, %c0_i32 : i32, i32
  }
  func.func @transform_1(%arg0: i32) -> (i32, i32) {
    %c0_i32 = arith.constant 0 : i32
    %c0_i32_0 = arith.constant 0 : i32
    return %arg0, %c0_i32 : i32, i32
  }
}

module attributes {stable_mosaic.version = 11 : i64} {
  func.func @_linear_kernel(%arg0: i32, %arg1: i32, %arg2: memref<2x1024xf32, #tpu.memory_space<vmem>>, %arg3: memref<1024x512xf32, #tpu.memory_space<vmem>>, %arg4: memref<1x512xf32, #tpu.memory_space<vmem>>, %arg5: memref<2x512xf32, #tpu.memory_space<vmem>>, %arg6: memref<2x512xf32, #tpu.memory_space<vmem>>) attributes {dimension_semantics = [#tpu.dimension_semantics<parallel>, #tpu.dimension_semantics<arbitrary>], iteration_bounds = array<i64: 2, 9>, scalar_prefetch = 0 : i64, scratch_operands = 1 : i64, tpu.core_type = #tpu.core_type<tc>, window_params = [{transform_indices = @transform_0, window_bounds = array<i64: 2, 1024>}, {transform_indices = @transform_1, window_bounds = array<i64: 1024, 512>}, {transform_indices = @transform_2, window_bounds = array<i64: 1, 512>}, {transform_indices = @transform_3, window_bounds = array<i64: 2, 512>}]} {
    %c0_i32 = arith.constant 0 : i32
    %0 = arith.cmpi eq, %arg1, %c0_i32 : i32
    %1 = arith.extui %0 : i1 to i32
    %c0_i32_0 = arith.constant 0 : i32
    %2 = arith.cmpi ne, %1, %c0_i32_0 : i32
    scf.if %2 {
      %cst_9 = arith.constant 0.000000e+00 : f32
      %12 = vector.broadcast %cst_9 : f32 to vector<2x512xf32>
      %c0_10 = arith.constant 0 : index
      %c0_11 = arith.constant 0 : index
      %13 = vector.load %arg6[%c0_10, %c0_11] : memref<2x512xf32, #tpu.memory_space<vmem>>, vector<2x512xf32>
      tpu.vector_store %arg6[%c0_10, %c0_11], %12 {strides = array<i32>} : memref<2x512xf32, #tpu.memory_space<vmem>>, vector<2x512xf32>,
    } else {
    }
    %c0 = arith.constant 0 : index
    %c0_1 = arith.constant 0 : index
    %3 = vector.load %arg6[%c0, %c0_1] : memref<2x512xf32, #tpu.memory_space<vmem>>, vector<2x512xf32>
    %c0_2 = arith.constant 0 : index
    %c0_3 = arith.constant 0 : index
    %4 = vector.load %arg2[%c0_2, %c0_3] : memref<2x1024xf32, #tpu.memory_space<vmem>>, vector<2x1024xf32>
    %c0_4 = arith.constant 0 : index
    %c0_5 = arith.constant 0 : index
    %5 = vector.load %arg3[%c0_4, %c0_5] : memref<1024x512xf32, #tpu.memory_space<vmem>>, vector<1024x512xf32>
    %cst = arith.constant dense<0.000000e+00> : vector<2x512xf32>
    %6 = tpu.matmul %4, %5, %cst {dimension_numbers = #tpu.dot_dimension_numbers<[1], [0], [0], [1], [0, 0, 1, 1], [], []>} : vector<2x1024xf32>, vector<1024x512xf32>, vector<2x512xf32> -> vector<2x512xf32>
    %7 = arith.addf %3, %6 : vector<2x512xf32>
    %c0_6 = arith.constant 0 : index
    %c0_7 = arith.constant 0 : index
    %8 = vector.load %arg6[%c0_6, %c0_7] : memref<2x512xf32, #tpu.memory_space<vmem>>, vector<2x512xf32>
    tpu.vector_store %arg6[%c0_6, %c0_7], %7 {strides = array<i32>} : memref<2x512xf32, #tpu.memory_space<vmem>>, vector<2x512xf32>,
    %c8_i32 = arith.constant 8 : i32
    %9 = arith.cmpi eq, %arg1, %c8_i32 : i32
    %10 = arith.extui %9 : i1 to i32
    %c0_i32_8 = arith.constant 0 : i32
    %11 = arith.cmpi ne, %10, %c0_i32_8 : i32
    scf.if %11 {
      %c0_9 = arith.constant 0 : index
      %c0_10 = arith.constant 0 : index
      %12 = vector.load %arg6[%c0_9, %c0_10] : memref<2x512xf32, #tpu.memory_space<vmem>>, vector<2x512xf32>
      %c0_11 = arith.constant 0 : index
      %c0_12 = arith.constant 0 : index
      %13 = vector.load %arg4[%c0_11, %c0_12] : memref<1x512xf32, #tpu.memory_space<vmem>>, vector<1x512xf32>
      %14 = vector.broadcast %13 : vector<1x512xf32> to vector<2x512xf32>
      %15 = arith.addf %12, %14 : vector<2x512xf32>
      %cst_13 = arith.constant 0.000000e+00 : f32
      %16 = vector.broadcast %cst_13 : f32 to vector<2x512xf32>
      %17 = arith.cmpf oge, %15, %16 : vector<2x512xf32>
      %cst_14 = arith.constant 2.000000e-01 : f32
      %18 = vector.broadcast %cst_14 : f32 to vector<2x512xf32>
      %19 = arith.mulf %15, %18 : vector<2x512xf32>
      %20 = arith.select %17, %15, %19 : vector<2x512xi1>, vector<2x512xf32>
      %c0_15 = arith.constant 0 : index
      %c0_16 = arith.constant 0 : index
      %21 = vector.load %arg5[%c0_15, %c0_16] : memref<2x512xf32, #tpu.memory_space<vmem>>, vector<2x512xf32>
      tpu.vector_store %arg5[%c0_15, %c0_16], %20 {strides = array<i32>} : memref<2x512xf32, #tpu.memory_space<vmem>>, vector<2x512xf32>,
    } else {
    }
    return
  }
  func.func @transform_0(%arg0: i32, %arg1: i32) -> (i32, i32) {
    %c0_i32 = arith.constant 0 : i32
    %c0_i32_0 = arith.constant 0 : i32
    return %c0_i32, %arg1 : i32, i32
  }
  func.func @transform_1(%arg0: i32, %arg1: i32) -> (i32, i32) {
    %c0_i32 = arith.constant 0 : i32
    return %arg1, %arg0 : i32, i32
  }
  func.func @transform_2(%arg0: i32, %arg1: i32) -> (i32, i32) {
    %c0_i32 = arith.constant 0 : i32
    %c0_i32_0 = arith.constant 0 : i32
    return %c0_i32, %arg0 : i32, i32
  }
  func.func @transform_3(%arg0: i32, %arg1: i32) -> (i32, i32) {
    %c0_i32 = arith.constant 0 : i32
    %c0_i32_0 = arith.constant 0 : i32
    return %c0_i32, %arg0 : i32, i32
  }
}

module attributes {stable_mosaic.version = 11 : i64} {
  func.func @_linear_kernel(%arg0: i32, %arg1: i32, %arg2: memref<2x1024xf32, #tpu.memory_space<vmem>>, %arg3: memref<1024x512xf32, #tpu.memory_space<vmem>>, %arg4: memref<1x512xf32, #tpu.memory_space<vmem>>, %arg5: memref<2x512xf32, #tpu.memory_space<vmem>>, %arg6: memref<2x512xf32, #tpu.memory_space<vmem>>) attributes {dimension_semantics = [#tpu.dimension_semantics<parallel>, #tpu.dimension_semantics<arbitrary>], iteration_bounds = array<i64: 1, 1>, scalar_prefetch = 0 : i64, scratch_operands = 1 : i64, tpu.core_type = #tpu.core_type<tc>, window_params = [{transform_indices = @transform_0, window_bounds = array<i64: 2, 1024>}, {transform_indices = @transform_1, window_bounds = array<i64: 1024, 512>}, {transform_indices = @transform_2, window_bounds = array<i64: 1, 512>}, {transform_indices = @transform_3, window_bounds = array<i64: 2, 512>}]} {
    %c0_i32 = arith.constant 0 : i32
    %0 = arith.cmpi eq, %arg1, %c0_i32 : i32
    %1 = arith.extui %0 : i1 to i32
    %c0_i32_0 = arith.constant 0 : i32
    %2 = arith.cmpi ne, %1, %c0_i32_0 : i32
    scf.if %2 {
      %cst_10 = arith.constant 0.000000e+00 : f32
      %12 = vector.broadcast %cst_10 : f32 to vector<2x512xf32>
      %c0_11 = arith.constant 0 : index
      %c0_12 = arith.constant 0 : index
      %13 = vector.load %arg6[%c0_11, %c0_12] : memref<2x512xf32, #tpu.memory_space<vmem>>, vector<2x512xf32>
      tpu.vector_store %arg6[%c0_11, %c0_12], %12 {strides = array<i32>} : memref<2x512xf32, #tpu.memory_space<vmem>>, vector<2x512xf32>,
    } else {
    }
    %c0 = arith.constant 0 : index
    %c0_1 = arith.constant 0 : index
    %3 = vector.load %arg6[%c0, %c0_1] : memref<2x512xf32, #tpu.memory_space<vmem>>, vector<2x512xf32>
    %c0_2 = arith.constant 0 : index
    %c0_3 = arith.constant 0 : index
    %4 = vector.load %arg2[%c0_2, %c0_3] : memref<2x1024xf32, #tpu.memory_space<vmem>>, vector<2x1024xf32>
    %c0_4 = arith.constant 0 : index
    %c0_5 = arith.constant 0 : index
    %5 = vector.load %arg3[%c0_4, %c0_5] : memref<1024x512xf32, #tpu.memory_space<vmem>>, vector<1024x512xf32>
    %cst = arith.constant dense<0.000000e+00> : vector<2x512xf32>
    %6 = tpu.matmul %4, %5, %cst {dimension_numbers = #tpu.dot_dimension_numbers<[1], [0], [0], [1], [0, 0, 1, 1], [], []>} : vector<2x1024xf32>, vector<1024x512xf32>, vector<2x512xf32> -> vector<2x512xf32>
    %7 = arith.addf %3, %6 : vector<2x512xf32>
    %c0_6 = arith.constant 0 : index
    %c0_7 = arith.constant 0 : index
    %8 = vector.load %arg6[%c0_6, %c0_7] : memref<2x512xf32, #tpu.memory_space<vmem>>, vector<2x512xf32>
    tpu.vector_store %arg6[%c0_6, %c0_7], %7 {strides = array<i32>} : memref<2x512xf32, #tpu.memory_space<vmem>>, vector<2x512xf32>,
    %c0_i32_8 = arith.constant 0 : i32
    %9 = arith.cmpi eq, %arg1, %c0_i32_8 : i32
    %10 = arith.extui %9 : i1 to i32
    %c0_i32_9 = arith.constant 0 : i32
    %11 = arith.cmpi ne, %10, %c0_i32_9 : i32
    scf.if %11 {
      %c0_10 = arith.constant 0 : index
      %c0_11 = arith.constant 0 : index
      %12 = vector.load %arg6[%c0_10, %c0_11] : memref<2x512xf32, #tpu.memory_space<vmem>>, vector<2x512xf32>
      %c0_12 = arith.constant 0 : index
      %c0_13 = arith.constant 0 : index
      %13 = vector.load %arg4[%c0_12, %c0_13] : memref<1x512xf32, #tpu.memory_space<vmem>>, vector<1x512xf32>
      %14 = vector.broadcast %13 : vector<1x512xf32> to vector<2x512xf32>
      %15 = arith.addf %12, %14 : vector<2x512xf32>
      %cst_14 = arith.constant 0.000000e+00 : f32
      %16 = vector.broadcast %cst_14 : f32 to vector<2x512xf32>
      %17 = arith.cmpf oge, %15, %16 : vector<2x512xf32>
      %cst_15 = arith.constant 2.000000e-01 : f32
      %18 = vector.broadcast %cst_15 : f32 to vector<2x512xf32>
      %19 = arith.mulf %15, %18 : vector<2x512xf32>
      %20 = arith.select %17, %15, %19 : vector<2x512xi1>, vector<2x512xf32>
      %c0_16 = arith.constant 0 : index
      %c0_17 = arith.constant 0 : index
      %21 = vector.load %arg5[%c0_16, %c0_17] : memref<2x512xf32, #tpu.memory_space<vmem>>, vector<2x512xf32>
      tpu.vector_store %arg5[%c0_16, %c0_17], %20 {strides = array<i32>} : memref<2x512xf32, #tpu.memory_space<vmem>>, vector<2x512xf32>,
    } else {
    }
    return
  }
  func.func @transform_0(%arg0: i32, %arg1: i32) -> (i32, i32) {
    %c0_i32 = arith.constant 0 : i32
    %c0_i32_0 = arith.constant 0 : i32
    return %c0_i32, %arg1 : i32, i32
  }
  func.func @transform_1(%arg0: i32, %arg1: i32) -> (i32, i32) {
    %c0_i32 = arith.constant 0 : i32
    return %arg1, %arg0 : i32, i32
  }
  func.func @transform_2(%arg0: i32, %arg1: i32) -> (i32, i32) {
    %c0_i32 = arith.constant 0 : i32
    %c0_i32_0 = arith.constant 0 : i32
    return %c0_i32, %arg0 : i32, i32
  }
  func.func @transform_3(%arg0: i32, %arg1: i32) -> (i32, i32) {
    %c0_i32 = arith.constant 0 : i32
    %c0_i32_0 = arith.constant 0 : i32
    return %c0_i32, %arg0 : i32, i32
  }
}

module attributes {stable_mosaic.version = 11 : i64} {
  func.func @_linear_kernel(%arg0: i32, %arg1: i32, %arg2: memref<2x512xf32, #tpu.memory_space<vmem>>, %arg3: memref<512x128xf32, #tpu.memory_space<vmem>>, %arg4: memref<1x128xf32, #tpu.memory_space<vmem>>, %arg5: memref<2x128xf32, #tpu.memory_space<vmem>>, %arg6: memref<2x128xf32, #tpu.memory_space<vmem>>) attributes {dimension_semantics = [#tpu.dimension_semantics<parallel>, #tpu.dimension_semantics<arbitrary>], iteration_bounds = array<i64: 1, 1>, scalar_prefetch = 0 : i64, scratch_operands = 1 : i64, tpu.core_type = #tpu.core_type<tc>, window_params = [{transform_indices = @transform_0, window_bounds = array<i64: 2, 512>}, {transform_indices = @transform_1, window_bounds = array<i64: 512, 128>}, {transform_indices = @transform_2, window_bounds = array<i64: 1, 128>}, {transform_indices = @transform_3, window_bounds = array<i64: 2, 128>}]} {
    %c0_i32 = arith.constant 0 : i32
    %0 = arith.cmpi eq, %arg1, %c0_i32 : i32
    %1 = arith.extui %0 : i1 to i32
    %c0_i32_0 = arith.constant 0 : i32
    %2 = arith.cmpi ne, %1, %c0_i32_0 : i32
    scf.if %2 {
      %cst_10 = arith.constant 0.000000e+00 : f32
      %12 = vector.broadcast %cst_10 : f32 to vector<2x128xf32>
      %c0_11 = arith.constant 0 : index
      %c0_12 = arith.constant 0 : index
      %13 = vector.load %arg6[%c0_11, %c0_12] : memref<2x128xf32, #tpu.memory_space<vmem>>, vector<2x128xf32>
      tpu.vector_store %arg6[%c0_11, %c0_12], %12 {strides = array<i32>} : memref<2x128xf32, #tpu.memory_space<vmem>>, vector<2x128xf32>,
    } else {
    }
    %c0 = arith.constant 0 : index
    %c0_1 = arith.constant 0 : index
    %3 = vector.load %arg6[%c0, %c0_1] : memref<2x128xf32, #tpu.memory_space<vmem>>, vector<2x128xf32>
    %c0_2 = arith.constant 0 : index
    %c0_3 = arith.constant 0 : index
    %4 = vector.load %arg2[%c0_2, %c0_3] : memref<2x512xf32, #tpu.memory_space<vmem>>, vector<2x512xf32>
    %c0_4 = arith.constant 0 : index
    %c0_5 = arith.constant 0 : index
    %5 = vector.load %arg3[%c0_4, %c0_5] : memref<512x128xf32, #tpu.memory_space<vmem>>, vector<512x128xf32>
    %cst = arith.constant dense<0.000000e+00> : vector<2x128xf32>
    %6 = tpu.matmul %4, %5, %cst {dimension_numbers = #tpu.dot_dimension_numbers<[1], [0], [0], [1], [0, 0, 1, 1], [], []>} : vector<2x512xf32>, vector<512x128xf32>, vector<2x128xf32> -> vector<2x128xf32>
    %7 = arith.addf %3, %6 : vector<2x128xf32>
    %c0_6 = arith.constant 0 : index
    %c0_7 = arith.constant 0 : index
    %8 = vector.load %arg6[%c0_6, %c0_7] : memref<2x128xf32, #tpu.memory_space<vmem>>, vector<2x128xf32>
    tpu.vector_store %arg6[%c0_6, %c0_7], %7 {strides = array<i32>} : memref<2x128xf32, #tpu.memory_space<vmem>>, vector<2x128xf32>,
    %c0_i32_8 = arith.constant 0 : i32
    %9 = arith.cmpi eq, %arg1, %c0_i32_8 : i32
    %10 = arith.extui %9 : i1 to i32
    %c0_i32_9 = arith.constant 0 : i32
    %11 = arith.cmpi ne, %10, %c0_i32_9 : i32
    scf.if %11 {
      %c0_10 = arith.constant 0 : index
      %c0_11 = arith.constant 0 : index
      %12 = vector.load %arg6[%c0_10, %c0_11] : memref<2x128xf32, #tpu.memory_space<vmem>>, vector<2x128xf32>
      %c0_12 = arith.constant 0 : index
      %c0_13 = arith.constant 0 : index
      %13 = vector.load %arg4[%c0_12, %c0_13] : memref<1x128xf32, #tpu.memory_space<vmem>>, vector<1x128xf32>
      %14 = vector.broadcast %13 : vector<1x128xf32> to vector<2x128xf32>
      %15 = arith.addf %12, %14 : vector<2x128xf32>
      %cst_14 = arith.constant 0.000000e+00 : f32
      %16 = vector.broadcast %cst_14 : f32 to vector<2x128xf32>
      %17 = arith.cmpf oge, %15, %16 : vector<2x128xf32>
      %cst_15 = arith.constant 2.000000e-01 : f32
      %18 = vector.broadcast %cst_15 : f32 to vector<2x128xf32>
      %19 = arith.mulf %15, %18 : vector<2x128xf32>
      %20 = arith.select %17, %15, %19 : vector<2x128xi1>, vector<2x128xf32>
      %c0_16 = arith.constant 0 : index
      %c0_17 = arith.constant 0 : index
      %21 = vector.load %arg5[%c0_16, %c0_17] : memref<2x128xf32, #tpu.memory_space<vmem>>, vector<2x128xf32>
      tpu.vector_store %arg5[%c0_16, %c0_17], %20 {strides = array<i32>} : memref<2x128xf32, #tpu.memory_space<vmem>>, vector<2x128xf32>,
    } else {
    }
    return
  }
  func.func @transform_0(%arg0: i32, %arg1: i32) -> (i32, i32) {
    %c0_i32 = arith.constant 0 : i32
    %c0_i32_0 = arith.constant 0 : i32
    return %c0_i32, %arg1 : i32, i32
  }
  func.func @transform_1(%arg0: i32, %arg1: i32) -> (i32, i32) {
    %c0_i32 = arith.constant 0 : i32
    return %arg1, %arg0 : i32, i32
  }
  func.func @transform_2(%arg0: i32, %arg1: i32) -> (i32, i32) {
    %c0_i32 = arith.constant 0 : i32
    %c0_i32_0 = arith.constant 0 : i32
    return %c0_i32, %arg0 : i32, i32
  }
  func.func @transform_3(%arg0: i32, %arg1: i32) -> (i32, i32) {
    %c0_i32 = arith.constant 0 : i32
    %c0_i32_0 = arith.constant 0 : i32
    return %c0_i32, %arg0 : i32, i32
  }
}

module attributes {stable_mosaic.version = 11 : i64} {
  func.func @_linear_kernel(%arg0: i32, %arg1: i32, %arg2: memref<2x128xf32, #tpu.memory_space<vmem>>, %arg3: memref<128x100xf32, #tpu.memory_space<vmem>>, %arg4: memref<1x100xf32, #tpu.memory_space<vmem>>, %arg5: memref<2x100xf32, #tpu.memory_space<vmem>>, %arg6: memref<2x100xf32, #tpu.memory_space<vmem>>) attributes {dimension_semantics = [#tpu.dimension_semantics<parallel>, #tpu.dimension_semantics<arbitrary>], iteration_bounds = array<i64: 1, 1>, scalar_prefetch = 0 : i64, scratch_operands = 1 : i64, tpu.core_type = #tpu.core_type<tc>, window_params = [{transform_indices = @transform_0, window_bounds = array<i64: 2, 128>}, {transform_indices = @transform_1, window_bounds = array<i64: 128, 100>}, {transform_indices = @transform_2, window_bounds = array<i64: 1, 100>}, {transform_indices = @transform_3, window_bounds = array<i64: 2, 100>}]} {
    %c0_i32 = arith.constant 0 : i32
    %0 = arith.cmpi eq, %arg1, %c0_i32 : i32
    %1 = arith.extui %0 : i1 to i32
    %c0_i32_0 = arith.constant 0 : i32
    %2 = arith.cmpi ne, %1, %c0_i32_0 : i32
    scf.if %2 {
      %cst_10 = arith.constant 0.000000e+00 : f32
      %12 = vector.broadcast %cst_10 : f32 to vector<2x100xf32>
      %c0_11 = arith.constant 0 : index
      %c0_12 = arith.constant 0 : index
      %13 = vector.load %arg6[%c0_11, %c0_12] : memref<2x100xf32, #tpu.memory_space<vmem>>, vector<2x100xf32>
      tpu.vector_store %arg6[%c0_11, %c0_12], %12 {strides = array<i32>} : memref<2x100xf32, #tpu.memory_space<vmem>>, vector<2x100xf32>,
    } else {
    }
    %c0 = arith.constant 0 : index
    %c0_1 = arith.constant 0 : index
    %3 = vector.load %arg6[%c0, %c0_1] : memref<2x100xf32, #tpu.memory_space<vmem>>, vector<2x100xf32>
    %c0_2 = arith.constant 0 : index
    %c0_3 = arith.constant 0 : index
    %4 = vector.load %arg2[%c0_2, %c0_3] : memref<2x128xf32, #tpu.memory_space<vmem>>, vector<2x128xf32>
    %c0_4 = arith.constant 0 : index
    %c0_5 = arith.constant 0 : index
    %5 = vector.load %arg3[%c0_4, %c0_5] : memref<128x100xf32, #tpu.memory_space<vmem>>, vector<128x100xf32>
    %cst = arith.constant dense<0.000000e+00> : vector<2x100xf32>
    %6 = tpu.matmul %4, %5, %cst {dimension_numbers = #tpu.dot_dimension_numbers<[1], [0], [0], [1], [0, 0, 1, 1], [], []>} : vector<2x128xf32>, vector<128x100xf32>, vector<2x100xf32> -> vector<2x100xf32>
    %7 = arith.addf %3, %6 : vector<2x100xf32>
    %c0_6 = arith.constant 0 : index
    %c0_7 = arith.constant 0 : index
    %8 = vector.load %arg6[%c0_6, %c0_7] : memref<2x100xf32, #tpu.memory_space<vmem>>, vector<2x100xf32>
    tpu.vector_store %arg6[%c0_6, %c0_7], %7 {strides = array<i32>} : memref<2x100xf32, #tpu.memory_space<vmem>>, vector<2x100xf32>,
    %c0_i32_8 = arith.constant 0 : i32
    %9 = arith.cmpi eq, %arg1, %c0_i32_8 : i32
    %10 = arith.extui %9 : i1 to i32
    %c0_i32_9 = arith.constant 0 : i32
    %11 = arith.cmpi ne, %10, %c0_i32_9 : i32
    scf.if %11 {
      %c0_10 = arith.constant 0 : index
      %c0_11 = arith.constant 0 : index
      %12 = vector.load %arg6[%c0_10, %c0_11] : memref<2x100xf32, #tpu.memory_space<vmem>>, vector<2x100xf32>
      %c0_12 = arith.constant 0 : index
      %c0_13 = arith.constant 0 : index
      %13 = vector.load %arg4[%c0_12, %c0_13] : memref<1x100xf32, #tpu.memory_space<vmem>>, vector<1x100xf32>
      %14 = vector.broadcast %13 : vector<1x100xf32> to vector<2x100xf32>
      %15 = arith.addf %12, %14 : vector<2x100xf32>
      %c0_14 = arith.constant 0 : index
      %c0_15 = arith.constant 0 : index
      %16 = vector.load %arg5[%c0_14, %c0_15] : memref<2x100xf32, #tpu.memory_space<vmem>>, vector<2x100xf32>
      tpu.vector_store %arg5[%c0_14, %c0_15], %15 {strides = array<i32>} : memref<2x100xf32, #tpu.memory_space<vmem>>, vector<2x100xf32>,
    } else {
    }
    return
  }
  func.func @transform_0(%arg0: i32, %arg1: i32) -> (i32, i32) {
    %c0_i32 = arith.constant 0 : i32
    %c0_i32_0 = arith.constant 0 : i32
    return %c0_i32, %arg1 : i32, i32
  }
  func.func @transform_1(%arg0: i32, %arg1: i32) -> (i32, i32) {
    %c0_i32 = arith.constant 0 : i32
    return %arg1, %arg0 : i32, i32
  }
  func.func @transform_2(%arg0: i32, %arg1: i32) -> (i32, i32) {
    %c0_i32 = arith.constant 0 : i32
    %c0_i32_0 = arith.constant 0 : i32
    return %c0_i32, %arg0 : i32, i32
  }
  func.func @transform_3(%arg0: i32, %arg1: i32) -> (i32, i32) {
    %c0_i32 = arith.constant 0 : i32
    %c0_i32_0 = arith.constant 0 : i32
    return %c0_i32, %arg0 : i32, i32
  }
}

module attributes {stable_mosaic.version = 11 : i64} {
  func.func @_reparam_kernel(%arg0: memref<2x100xf32, #tpu.memory_space<vmem>>, %arg1: memref<2x100xf32, #tpu.memory_space<vmem>>, %arg2: memref<2x100xf32, #tpu.memory_space<vmem>>, %arg3: memref<2x100xf32, #tpu.memory_space<vmem>>) attributes {dimension_semantics = [], scalar_prefetch = 0 : i64, scratch_operands = 0 : i64, tpu.core_type = #tpu.core_type<tc>} {
    %c0 = arith.constant 0 : index
    %c0_0 = arith.constant 0 : index
    %0 = vector.load %arg0[%c0, %c0_0] : memref<2x100xf32, #tpu.memory_space<vmem>>, vector<2x100xf32>
    %c0_1 = arith.constant 0 : index
    %c0_2 = arith.constant 0 : index
    %1 = vector.load %arg1[%c0_1, %c0_2] : memref<2x100xf32, #tpu.memory_space<vmem>>, vector<2x100xf32>
    %cst = arith.constant 5.000000e-01 : f32
    %2 = vector.broadcast %cst : f32 to vector<2x100xf32>
    %3 = arith.mulf %2, %1 : vector<2x100xf32>
    %4 = math.exp %3 : vector<2x100xf32>
    %c0_3 = arith.constant 0 : index
    %c0_4 = arith.constant 0 : index
    %5 = vector.load %arg2[%c0_3, %c0_4] : memref<2x100xf32, #tpu.memory_space<vmem>>, vector<2x100xf32>
    %6 = arith.mulf %4, %5 : vector<2x100xf32>
    %7 = arith.addf %0, %6 : vector<2x100xf32>
    %c0_5 = arith.constant 0 : index
    %c0_6 = arith.constant 0 : index
    %8 = vector.load %arg3[%c0_5, %c0_6] : memref<2x100xf32, #tpu.memory_space<vmem>>, vector<2x100xf32>
    tpu.vector_store %arg3[%c0_5, %c0_6], %7 {strides = array<i32>} : memref<2x100xf32, #tpu.memory_space<vmem>>, vector<2x100xf32>,
    return
  }
}

</mosaic_0001>

<bundles_post_ra>
// kernel: inf_model_forward.10
= control target key start
LH: loop header
LB: loop body
LE: loop exit
PB: predicated region body
PF: predicated region fallthrough
CT: control target
= control target key end

     0   :  { %6 = vsyncpa [#allocation3], 0  ;;  %s1166_s0 = inlined_call_operand.hbm [shape: f32[160,1024], index: 0, kind: input, shape index: {}]   ;;  %s1167_s1 = inlined_call_operand.hbm [shape: f32[160,1024], index: 1, kind: output, shape index: {}]  }
   0x1   :  { %8 = vsyncpa [#allocation3 + $0x1], 0 }
   0x2   :  { %9 = vsyncpa [#allocation4], 0 }
   0x3   :  { %11 = vsyncpa [#allocation4 + $0x1], 0  ;;  %s808_s6 = smov 0   ;;  %s810_s7 = smov 0  }
   0x4   :  { %s812_s8 = smov 0   ;;  %s814_s9 = smov 0  }
   0x5 LB: > { %s829_s10 = sadd.s32 4294967295, %s790_s9   ;;  %s626_s11 = sadd.s32 4294967294, %s790_s9   ;;  %s790_s9 = sphi %s814_s9, %s1179_s9   ;;  %s786_s8 = sphi %s812_s8, %s1178_s8   ;;  %s782_s7 = sphi %s810_s7, %s1177_s7   ;;  %s778_s6 = sphi %s808_s6, %s1176_s6  }
   0x6   : > { %s833_s12 = sadd.s32 1, %s790_s9   ;;  %s24_s13 = sadd.s32 1, %s786_s8 }
   0x7   : > { %s21_s14 = ssub.s32 %s790_s9, %s833_s12  ;;  %p31_p0 = scmp.ne.s32.totalorder %s786_s8, %s782_s7 }
   0x8   : > { %p22_p1 = scmp.eq.s32.totalorder %s21_s14, 0  ;;  %p32_p2 = scmp.eq.s32.totalorder %s790_s9, 0 }
   0x9   : > { %p37_p3 = scmp.ne.s32.totalorder %s782_s7, %s778_s6  ;;  %p38_p4 = scmp.eq.s32.totalorder %s829_s10, 0 }
   0xa   : > { %s845_s15 = scalar_select %p22_p1, %s786_s8, %s24_s13  }
   0xb   : > { %p33_p5 = por %p32_p2, %p31_p0  ;;  %p847_p6 = por %p38_p4, %p37_p3 }
   0xc   : > { %p61_p7 = scmp.eq.s32.totalorder %s829_s10, 1  ;;  %p67_p8 = scmp.eq.s32.totalorder %s626_s11, 1 }
   0xd   : > { %p656_p10 = scmp.lt.s32.totalorder %s790_s9, 2  ;;  %s87_s19 = sand.u32 1, %s786_s8  }
   0xe   : > { %p854_p11 = por %p61_p7, %p31_p0  ;;  %p858_p12 = por %p67_p8, %p37_p3 }
   0xf   : > { %s640_s20 = smul.u32 10240, %s790_s9  ;;  %p869_p13 = pnand %p656_p10, %p33_p5 }
  0x10   : > { %s1170_s17 = scalar_select %p854_p11, 1, 0 }
  0x11   : > { %s1171_s18 = scalar_select %p858_p12, 1, 0 }
  0x12   : > { %s642_s21 = smul.u32 640, %s87_s19  ;;  %s867_s24 = scalar_lea.hbm %s1166_s0, %s640_s20 }
  0x13   : > { %s875_s28 = scalar_lea.sflag [#allocation3], %s87_s19  ;;  %s694_s29 = scalar_lea.hbm %s867_s24, 10240 }
  0x14   : > { %s91_s26 = scalar_lea.vmem [#allocation2], %s642_s21  ;;  %p695_p0 = scmp.ne.s32.totalorder %s867_s24, %s694_s29 }
  0x15   : > { %s99_s27 = sshll.u32 %s91_s26, 4  ;;  %p696_p1 = pneg %p869_p13  ;;  %s873_s27 = int_to_ptr.vmem [resolvable:$true] %s99_s27 }
  0x16   : > { %s699_s3 = scalar_lea.hbm %s1166_s0, 20480  ;;  %p700_p4 = scmp.lt.u32.totalorder %s867_s24, %s1166_s0 }
  0x17   : > { %p697_p2 = pnand %p696_p1, %p695_p0  ;;  %p701_p5 = scmp.lt.u32.totalorder %s699_s3, %s694_s29 }
  0x18   : > { %p703_p8 = scmp.lt.u32.totalorder %s694_s29, %s867_s24 }
  0x19   : > { %p698_p3 = pneg %p697_p2  ;;  %p702_p7 = por %p701_p5, %p700_p4 }
  0x1b   : > { %p704_p10 = por %p703_p8, %p702_p7 }
  0x1d   : > { %p705_p9 = pnand %p704_p10, %p698_p3 }
  0x1f   : > { %708 = shalt.err (!%p705_p9)
}
  0x20   : > { %s709_s11 = scalar_lea.vmem %s873_s27, 10240  ;;  %s792_s13 = smov [#allocation2]  }
  0x21   : > { %p710_p0 = scmp.ne.s32.totalorder %s873_s27, %s709_s11  ;;  %s714_s14 = sshll.u32 %s792_s13, 4  ;;  %s715_s14 = int_to_ptr.vmem [resolvable:$false] %s714_s14 }
  0x22   : > { %s716_s19 = scalar_lea.vmem %s715_s14, 20480  ;;  %p717_p11 = scmp.lt.s32.totalorder %s873_s27, %s715_s14 }
  0x23   : > { %p712_p2 = pnand %p710_p0, %p696_p1  ;;  %p718_p4 = scmp.lt.s32.totalorder %s716_s19, %s709_s11 }
  0x25   : > { %p713_p12 = pneg %p712_p2  ;;  %p719_p5 = por %p718_p4, %p717_p11 }
  0x27   : > { %p720_p7 = pnand %p719_p5, %p713_p12 }
  0x29   : > { %723 = shalt.err (!%p720_p7)
}
  0x2a   : > { %s793_s20 = smov 1024   ;;  %s794_s21 = smov 64  }
  0x2b   : > { %651 = dma.hbm_to_vmem [thread:$0]  (!%p869_p13), %s867_s24, 10240, %s873_s27, %s875_s28, %s793_s20, %s793_s20, %s794_s21  }
  0x2c   : > { %p631_p9 = scmp.ge.s32.totalorder %s790_s9, 1  ;;  %p107_p1 = scmp.lt.s32.totalorder %s790_s9, 3 }
  0x2e   : > { %p108_p3 = pnand %p631_p9, %p107_p1 }
  0x2f   : > { %s906_s22 = sand.u32 (!%p108_p3), 1, %s782_s7  }
  0x30   : > { %111 = sbr.rel (%p108_p3) target bundleno = 147 (0x93), region = 24  ;;  %s114_s26 = scalar_lea.sflag (!%p108_p3), [#allocation3], %s906_s22 }
  0x31   : > { %s643_s23 = smul.u32 (!%p108_p3), 640, %s906_s22 }
  0x33   : > { %s910_s29 = scalar_lea.vmem (!%p108_p3), [#allocation2], %s643_s23 }
  0x37   : > { %769 = dma.done.wait (%p847_p6), %s114_s26, 10240  }
  0x38   : > { %771 = vsyncadd (%p847_p6), %s114_s26, 4294957056  ;;  %v138_v0 = vld [vmem:[%s910_s29] sm:$0xff]  ;;  %v139_v1 = vld [vmem:[%s910_s29 + $0x8] sm:$0xff]  ;;  %s925_s16 = scalar_lea.vmem [#allocation5], %s643_s23  ;;  %s641_s24 = smul.u32 10240, %s829_s10 }
  0x39   : > { %v140_v2 = vld [vmem:[%s910_s29 + $0x10] sm:$0xff]  ;;  %vm218_vm0 = vcmp.ge.f32.partialorder %v138_v0, 0.0  ;;  %v298_v3 = vmul.f32 0.2, %v138_v0  ;;  %vm219_vm1 = vcmp.ge.f32.partialorder %v139_v1, 0.0  ;;  %v141_v6 = vld [vmem:[%s910_s29 + $0x18] sm:$0xff] }
  0x3a   : > { %v299_v4 = vmul.f32 0.2, %v139_v1  ;;  %vm220_vm2 = vcmp.ge.f32.partialorder %v140_v2, 0.0  ;;  %v300_v5 = vmul.f32 0.2, %v140_v2  ;;  %v142_v7 = vld [vmem:[%s910_s29 + $0x20] sm:$0xff]  ;;  %s1119_s30 = scalar_lea.hbm %s1167_s1, %s641_s24 }
  0x3b   : > { %v143_v8 = vld [vmem:[%s910_s29 + $0x28] sm:$0xff]  ;;  %v378_v9 = vsel %vm218_vm0, %v138_v0, %v298_v3  ;;  %vm221_vm3 = vcmp.ge.f32.partialorder %v141_v6, 0.0  ;;  %v301_v11 = vmul.f32 0.2, %v141_v6  ;;  %v144_v12 = vld [vmem:[%s910_s29 + $0x30] sm:$0xff]  ;;  %v145_v13 = vld [vmem:[%s910_s29 + $0x38] sm:$0xff] }
  0x3c   : > { %v379_v10 = vsel %vm219_vm1, %v139_v1, %v299_v4  ;;  %v146_v14 = vld [vmem:[%s910_s29 + $0x40] sm:$0xff]  ;;  %458 = vst [vmem:[%s925_s16] sm:$0xff] %v378_v9  ;;  %v380_v15 = vsel %vm220_vm2, %v140_v2, %v300_v5  ;;  %vm222_vm4 = vcmp.ge.f32.partialorder %v142_v7, 0.0  ;;  %v302_v16 = vmul.f32 0.2, %v142_v7  ;;  %v147_v17 = vld [vmem:[%s910_s29 + $0x48] sm:$0xff]  ;;  %v148_v21 = vld [vmem:[%s910_s29 + $0x50] sm:$0xff] }
  0x3d   : > { %459 = vst [vmem:[%s925_s16 + $0x8] sm:$0xff] %v379_v10  ;;  %vm223_vm5 = vcmp.ge.f32.partialorder %v143_v8, 0.0  ;;  %460 = vst [vmem:[%s925_s16 + $0x10] sm:$0xff] %v380_v15  ;;  %v381_v18 = vsel %vm221_vm3, %v141_v6, %v301_v11  ;;  %v303_v19 = vmul.f32 0.2, %v143_v8  ;;  %vm224_vm6 = vcmp.ge.f32.partialorder %v144_v12, 0.0 }
  0x3e   : > { %v304_v20 = vmul.f32 0.2, %v144_v12  ;;  %461 = vst [vmem:[%s925_s16 + $0x18] sm:$0xff] %v381_v18  ;;  %v382_v22 = vsel %vm222_vm4, %v142_v7, %v302_v16  ;;  %vm225_vm7 = vcmp.ge.f32.partialorder %v145_v13, 0.0  ;;  %v305_v23 = vmul.f32 0.2, %v145_v13 }
  0x3f   : > { %vm226_vm8 = vcmp.ge.f32.partialorder %v146_v14, 0.0  ;;  %v149_v24 = vld [vmem:[%s910_s29 + $0x58] sm:$0xff]  ;;  %v150_v25 = vld [vmem:[%s910_s29 + $0x60] sm:$0xff]  ;;  %462 = vst [vmem:[%s925_s16 + $0x20] sm:$0xff] %v382_v22  ;;  %v383_v26 = vsel %vm223_vm5, %v143_v8, %v303_v19  ;;  %v306_v28 = vmul.f32 0.2, %v146_v14 }
  0x40   : > { %v384_v27 = vsel %vm224_vm6, %v144_v12, %v304_v20  ;;  %vm227_vm9 = vcmp.ge.f32.partialorder %v147_v17, 0.0  ;;  %v151_v29 = vld [vmem:[%s910_s29 + $0x68] sm:$0xff]  ;;  %463 = vst [vmem:[%s925_s16 + $0x28] sm:$0xff] %v383_v26  ;;  %v385_v30 = vsel %vm225_vm7, %v145_v13, %v305_v23  ;;  %v307_v31 = vmul.f32 0.2, %v147_v17  ;;  %v152_v33 = vld [vmem:[%s910_s29 + $0x70] sm:$0xff] }
  0x41   : > { %464 = vst [vmem:[%s925_s16 + $0x30] sm:$0xff] %v384_v27  ;;  %vm228_vm10 = vcmp.ge.f32.partialorder %v148_v21, 0.0  ;;  %v308_v32 = vmul.f32 0.2, %v148_v21  ;;  %465 = vst [vmem:[%s925_s16 + $0x38] sm:$0xff] %v385_v30  ;;  %v386_v34 = vsel %vm226_vm8, %v146_v14, %v306_v28  ;;  %vm229_vm11 = vcmp.ge.f32.partialorder %v149_v24, 0.0 }
  0x42   : > { %v309_v35 = vmul.f32 0.2, %v149_v24  ;;  %vm230_vm12 = vcmp.ge.f32.partialorder %v150_v25, 0.0  ;;  %v153_v36 = vld [vmem:[%s910_s29 + $0x78] sm:$0xff]  ;;  %v154_v37 = vld [vmem:[%s910_s29 + $0x80] sm:$0xff]  ;;  %466 = vst [vmem:[%s925_s16 + $0x40] sm:$0xff] %v386_v34  ;;  %v387_v38 = vsel %vm227_vm9, %v147_v17, %v307_v31 }
  0x43   : > { %v388_v39 = vsel %vm228_vm10, %v148_v21, %v308_v32  ;;  %v310_v40 = vmul.f32 0.2, %v150_v25  ;;  %vm231_vm13 = vcmp.ge.f32.partialorder %v151_v29, 0.0  ;;  %v155_v41 = vld [vmem:[%s910_s29 + $0x88] sm:$0xff]  ;;  %467 = vst [vmem:[%s925_s16 + $0x48] sm:$0xff] %v387_v38  ;;  %vm232_vm14 = vcmp.ge.f32.partialorder %v152_v33, 0.0 }
  0x44   : > { %468 = vst [vmem:[%s925_s16 + $0x50] sm:$0xff] %v388_v39  ;;  %v389_v42 = vsel %vm229_vm11, %v149_v24, %v309_v35  ;;  %v311_v43 = vmul.f32 0.2, %v151_v29  ;;  %v312_v44 = vmul.f32 0.2, %v152_v33  ;;  %v156_v45 = vld [vmem:[%s910_s29 + $0x90] sm:$0xff] }
  0x45   : > { %469 = vst [vmem:[%s925_s16 + $0x58] sm:$0xff] %v389_v42  ;;  %v390_v46 = vsel %vm230_vm12, %v150_v25, %v310_v40  ;;  %vm233_vm15 = vcmp.ge.f32.partialorder %v153_v36, 0.0  ;;  %v313_v47 = vmul.f32 0.2, %v153_v36  ;;  %vm234_vm0 = vcmp.ge.f32.partialorder %v154_v37, 0.0  ;;  %v157_v48 = vld [vmem:[%s910_s29 + $0x98] sm:$0xff] }
  0x46   : > { %v158_v49 = vld [vmem:[%s910_s29 + $0xa0] sm:$0xff]  ;;  %470 = vst [vmem:[%s925_s16 + $0x60] sm:$0xff] %v390_v46  ;;  %v391_v50 = vsel %vm231_vm13, %v151_v29, %v311_v43  ;;  %v392_v51 = vsel %vm232_vm14, %v152_v33, %v312_v44  ;;  %v314_v52 = vmul.f32 0.2, %v154_v37  ;;  %vm235_vm1 = vcmp.ge.f32.partialorder %v155_v41, 0.0  ;;  %v159_v53 = vld [vmem:[%s910_s29 + $0xa8] sm:$0xff] }
  0x47   : > { %471 = vst [vmem:[%s925_s16 + $0x68] sm:$0xff] %v391_v50  ;;  %472 = vst [vmem:[%s925_s16 + $0x70] sm:$0xff] %v392_v51  ;;  %v393_v54 = vsel %vm233_vm15, %v153_v36, %v313_v47  ;;  %v315_v55 = vmul.f32 0.2, %v155_v41  ;;  %vm236_vm2 = vcmp.ge.f32.partialorder %v156_v45, 0.0  ;;  %v160_v57 = vld [vmem:[%s910_s29 + $0xb0] sm:$0xff] }
  0x48   : > { %v316_v56 = vmul.f32 0.2, %v156_v45  ;;  %473 = vst [vmem:[%s925_s16 + $0x78] sm:$0xff] %v393_v54  ;;  %v394_v58 = vsel %vm234_vm0, %v154_v37, %v314_v52  ;;  %vm237_vm3 = vcmp.ge.f32.partialorder %v157_v48, 0.0  ;;  %v317_v59 = vmul.f32 0.2, %v157_v48 }
  0x49   : > { %vm238_vm4 = vcmp.ge.f32.partialorder %v158_v49, 0.0  ;;  %v161_v60 = vld [vmem:[%s910_s29 + $0xb8] sm:$0xff]  ;;  %v162_v61 = vld [vmem:[%s910_s29 + $0xc0] sm:$0xff]  ;;  %474 = vst [vmem:[%s925_s16 + $0x80] sm:$0xff] %v394_v58  ;;  %v395_v62 = vsel %vm235_vm1, %v155_v41, %v315_v55  ;;  %v318_v0 = vmul.f32 0.2, %v158_v49 }
  0x4a   : > { %v396_v63 = vsel %vm236_vm2, %v156_v45, %v316_v56  ;;  %vm239_vm5 = vcmp.ge.f32.partialorder %v159_v53, 0.0  ;;  %v163_v1 = vld [vmem:[%s910_s29 + $0xc8] sm:$0xff]  ;;  %475 = vst [vmem:[%s925_s16 + $0x88] sm:$0xff] %v395_v62  ;;  %v397_v2 = vsel %vm237_vm3, %v157_v48, %v317_v59  ;;  %v319_v3 = vmul.f32 0.2, %v159_v53  ;;  %v164_v5 = vld [vmem:[%s910_s29 + $0xd0] sm:$0xff] }
  0x4b   : > { %476 = vst [vmem:[%s925_s16 + $0x90] sm:$0xff] %v396_v63  ;;  %vm240_vm6 = vcmp.ge.f32.partialorder %v160_v57, 0.0  ;;  %v320_v4 = vmul.f32 0.2, %v160_v57  ;;  %477 = vst [vmem:[%s925_s16 + $0x98] sm:$0xff] %v397_v2  ;;  %v398_v6 = vsel %vm238_vm4, %v158_v49, %v318_v0  ;;  %vm241_vm7 = vcmp.ge.f32.partialorder %v161_v60, 0.0 }
  0x4c   : > { %v321_v7 = vmul.f32 0.2, %v161_v60  ;;  %vm242_vm8 = vcmp.ge.f32.partialorder %v162_v61, 0.0  ;;  %v165_v8 = vld [vmem:[%s910_s29 + $0xd8] sm:$0xff]  ;;  %v166_v9 = vld [vmem:[%s910_s29 + $0xe0] sm:$0xff]  ;;  %478 = vst [vmem:[%s925_s16 + $0xa0] sm:$0xff] %v398_v6  ;;  %v399_v10 = vsel %vm239_vm5, %v159_v53, %v319_v3 }
  0x4d   : > { %v400_v11 = vsel %vm240_vm6, %v160_v57, %v320_v4  ;;  %v322_v12 = vmul.f32 0.2, %v162_v61  ;;  %vm243_vm9 = vcmp.ge.f32.partialorder %v163_v1, 0.0  ;;  %v167_v13 = vld [vmem:[%s910_s29 + $0xe8] sm:$0xff]  ;;  %479 = vst [vmem:[%s925_s16 + $0xa8] sm:$0xff] %v399_v10  ;;  %vm244_vm10 = vcmp.ge.f32.partialorder %v164_v5, 0.0 }
  0x4e   : > { %480 = vst [vmem:[%s925_s16 + $0xb0] sm:$0xff] %v400_v11  ;;  %v401_v14 = vsel %vm241_vm7, %v161_v60, %v321_v7  ;;  %v323_v15 = vmul.f32 0.2, %v163_v1  ;;  %v324_v16 = vmul.f32 0.2, %v164_v5  ;;  %v168_v17 = vld [vmem:[%s910_s29 + $0xf0] sm:$0xff] }
  0x4f   : > { %481 = vst [vmem:[%s925_s16 + $0xb8] sm:$0xff] %v401_v14  ;;  %v402_v18 = vsel %vm242_vm8, %v162_v61, %v322_v12  ;;  %vm245_vm11 = vcmp.ge.f32.partialorder %v165_v8, 0.0  ;;  %v325_v19 = vmul.f32 0.2, %v165_v8  ;;  %vm246_vm12 = vcmp.ge.f32.partialorder %v166_v9, 0.0  ;;  %v169_v20 = vld [vmem:[%s910_s29 + $0xf8] sm:$0xff] }
  0x50   : > { %v170_v21 = vld [vmem:[%s910_s29 + $0x100] sm:$0xff]  ;;  %482 = vst [vmem:[%s925_s16 + $0xc0] sm:$0xff] %v402_v18  ;;  %v403_v22 = vsel %vm243_vm9, %v163_v1, %v323_v15  ;;  %v404_v23 = vsel %vm244_vm10, %v164_v5, %v324_v16  ;;  %v326_v24 = vmul.f32 0.2, %v166_v9  ;;  %vm247_vm13 = vcmp.ge.f32.partialorder %v167_v13, 0.0  ;;  %v171_v25 = vld [vmem:[%s910_s29 + $0x108] sm:$0xff] }
  0x51   : > { %483 = vst [vmem:[%s925_s16 + $0xc8] sm:$0xff] %v403_v22  ;;  %484 = vst [vmem:[%s925_s16 + $0xd0] sm:$0xff] %v404_v23  ;;  %v405_v26 = vsel %vm245_vm11, %v165_v8, %v325_v19  ;;  %v327_v27 = vmul.f32 0.2, %v167_v13  ;;  %vm248_vm14 = vcmp.ge.f32.partialorder %v168_v17, 0.0  ;;  %v172_v29 = vld [vmem:[%s910_s29 + $0x110] sm:$0xff] }
  0x52   : > { %v328_v28 = vmul.f32 0.2, %v168_v17  ;;  %485 = vst [vmem:[%s925_s16 + $0xd8] sm:$0xff] %v405_v26  ;;  %v406_v30 = vsel %vm246_vm12, %v166_v9, %v326_v24  ;;  %vm249_vm15 = vcmp.ge.f32.partialorder %v169_v20, 0.0  ;;  %v329_v31 = vmul.f32 0.2, %v169_v20 }
  0x53   : > { %vm250_vm0 = vcmp.ge.f32.partialorder %v170_v21, 0.0  ;;  %v173_v32 = vld [vmem:[%s910_s29 + $0x118] sm:$0xff]  ;;  %v174_v33 = vld [vmem:[%s910_s29 + $0x120] sm:$0xff]  ;;  %486 = vst [vmem:[%s925_s16 + $0xe0] sm:$0xff] %v406_v30  ;;  %v407_v34 = vsel %vm247_vm13, %v167_v13, %v327_v27  ;;  %v330_v36 = vmul.f32 0.2, %v170_v21 }
  0x54   : > { %v408_v35 = vsel %vm248_vm14, %v168_v17, %v328_v28  ;;  %vm251_vm1 = vcmp.ge.f32.partialorder %v171_v25, 0.0  ;;  %v175_v37 = vld [vmem:[%s910_s29 + $0x128] sm:$0xff]  ;;  %487 = vst [vmem:[%s925_s16 + $0xe8] sm:$0xff] %v407_v34  ;;  %v409_v38 = vsel %vm249_vm15, %v169_v20, %v329_v31  ;;  %v331_v39 = vmul.f32 0.2, %v171_v25  ;;  %v176_v41 = vld [vmem:[%s910_s29 + $0x130] sm:$0xff] }
  0x55   : > { %488 = vst [vmem:[%s925_s16 + $0xf0] sm:$0xff] %v408_v35  ;;  %vm252_vm2 = vcmp.ge.f32.partialorder %v172_v29, 0.0  ;;  %v332_v40 = vmul.f32 0.2, %v172_v29  ;;  %489 = vst [vmem:[%s925_s16 + $0xf8] sm:$0xff] %v409_v38  ;;  %v410_v42 = vsel %vm250_vm0, %v170_v21, %v330_v36  ;;  %vm253_vm3 = vcmp.ge.f32.partialorder %v173_v32, 0.0 }
  0x56   : > { %v333_v43 = vmul.f32 0.2, %v173_v32  ;;  %vm254_vm4 = vcmp.ge.f32.partialorder %v174_v33, 0.0  ;;  %v177_v44 = vld [vmem:[%s910_s29 + $0x138] sm:$0xff]  ;;  %v178_v45 = vld [vmem:[%s910_s29 + $0x140] sm:$0xff]  ;;  %490 = vst [vmem:[%s925_s16 + $0x100] sm:$0xff] %v410_v42  ;;  %v411_v46 = vsel %vm251_vm1, %v171_v25, %v331_v39 }
  0x57   : > { %v412_v47 = vsel %vm252_vm2, %v172_v29, %v332_v40  ;;  %v334_v48 = vmul.f32 0.2, %v174_v33  ;;  %vm255_vm5 = vcmp.ge.f32.partialorder %v175_v37, 0.0  ;;  %v179_v49 = vld [vmem:[%s910_s29 + $0x148] sm:$0xff]  ;;  %491 = vst [vmem:[%s925_s16 + $0x108] sm:$0xff] %v411_v46  ;;  %vm256_vm6 = vcmp.ge.f32.partialorder %v176_v41, 0.0 }
  0x58   : > { %492 = vst [vmem:[%s925_s16 + $0x110] sm:$0xff] %v412_v47  ;;  %v413_v50 = vsel %vm253_vm3, %v173_v32, %v333_v43  ;;  %v335_v51 = vmul.f32 0.2, %v175_v37  ;;  %v336_v52 = vmul.f32 0.2, %v176_v41  ;;  %v180_v53 = vld [vmem:[%s910_s29 + $0x150] sm:$0xff] }
  0x59   : > { %493 = vst [vmem:[%s925_s16 + $0x118] sm:$0xff] %v413_v50  ;;  %v414_v54 = vsel %vm254_vm4, %v174_v33, %v334_v48  ;;  %vm257_vm7 = vcmp.ge.f32.partialorder %v177_v44, 0.0  ;;  %v337_v55 = vmul.f32 0.2, %v177_v44  ;;  %vm258_vm8 = vcmp.ge.f32.partialorder %v178_v45, 0.0  ;;  %v181_v56 = vld [vmem:[%s910_s29 + $0x158] sm:$0xff] }
  0x5a   : > { %v182_v57 = vld [vmem:[%s910_s29 + $0x160] sm:$0xff]  ;;  %494 = vst [vmem:[%s925_s16 + $0x120] sm:$0xff] %v414_v54  ;;  %v415_v58 = vsel %vm255_vm5, %v175_v37, %v335_v51  ;;  %v416_v59 = vsel %vm256_vm6, %v176_v41, %v336_v52  ;;  %v338_v60 = vmul.f32 0.2, %v178_v45  ;;  %vm259_vm9 = vcmp.ge.f32.partialorder %v179_v49, 0.0  ;;  %v183_v61 = vld [vmem:[%s910_s29 + $0x168] sm:$0xff] }
  0x5b   : > { %495 = vst [vmem:[%s925_s16 + $0x128] sm:$0xff] %v415_v58  ;;  %496 = vst [vmem:[%s925_s16 + $0x130] sm:$0xff] %v416_v59  ;;  %v417_v62 = vsel %vm257_vm7, %v177_v44, %v337_v55  ;;  %v339_v63 = vmul.f32 0.2, %v179_v49  ;;  %vm260_vm10 = vcmp.ge.f32.partialorder %v180_v53, 0.0  ;;  %v184_v1 = vld [vmem:[%s910_s29 + $0x170] sm:$0xff] }
  0x5c   : > { %v340_v0 = vmul.f32 0.2, %v180_v53  ;;  %497 = vst [vmem:[%s925_s16 + $0x138] sm:$0xff] %v417_v62  ;;  %v418_v2 = vsel %vm258_vm8, %v178_v45, %v338_v60  ;;  %vm261_vm11 = vcmp.ge.f32.partialorder %v181_v56, 0.0  ;;  %v341_v3 = vmul.f32 0.2, %v181_v56 }
  0x5d   : > { %vm262_vm12 = vcmp.ge.f32.partialorder %v182_v57, 0.0  ;;  %v185_v4 = vld [vmem:[%s910_s29 + $0x178] sm:$0xff]  ;;  %v186_v5 = vld [vmem:[%s910_s29 + $0x180] sm:$0xff]  ;;  %498 = vst [vmem:[%s925_s16 + $0x140] sm:$0xff] %v418_v2  ;;  %v419_v6 = vsel %vm259_vm9, %v179_v49, %v339_v63  ;;  %v342_v8 = vmul.f32 0.2, %v182_v57 }
  0x5e   : > { %v420_v7 = vsel %vm260_vm10, %v180_v53, %v340_v0  ;;  %vm263_vm13 = vcmp.ge.f32.partialorder %v183_v61, 0.0  ;;  %v187_v9 = vld [vmem:[%s910_s29 + $0x188] sm:$0xff]  ;;  %499 = vst [vmem:[%s925_s16 + $0x148] sm:$0xff] %v419_v6  ;;  %v421_v10 = vsel %vm261_vm11, %v181_v56, %v341_v3  ;;  %v343_v11 = vmul.f32 0.2, %v183_v61  ;;  %v188_v13 = vld [vmem:[%s910_s29 + $0x190] sm:$0xff] }
  0x5f   : > { %500 = vst [vmem:[%s925_s16 + $0x150] sm:$0xff] %v420_v7  ;;  %vm264_vm14 = vcmp.ge.f32.partialorder %v184_v1, 0.0  ;;  %v344_v12 = vmul.f32 0.2, %v184_v1  ;;  %501 = vst [vmem:[%s925_s16 + $0x158] sm:$0xff] %v421_v10  ;;  %v422_v14 = vsel %vm262_vm12, %v182_v57, %v342_v8  ;;  %vm265_vm15 = vcmp.ge.f32.partialorder %v185_v4, 0.0 }
  0x60   : > { %v345_v15 = vmul.f32 0.2, %v185_v4  ;;  %vm266_vm0 = vcmp.ge.f32.partialorder %v186_v5, 0.0  ;;  %v189_v16 = vld [vmem:[%s910_s29 + $0x198] sm:$0xff]  ;;  %v190_v17 = vld [vmem:[%s910_s29 + $0x1a0] sm:$0xff]  ;;  %502 = vst [vmem:[%s925_s16 + $0x160] sm:$0xff] %v422_v14  ;;  %v423_v18 = vsel %vm263_vm13, %v183_v61, %v343_v11 }
  0x61   : > { %v424_v19 = vsel %vm264_vm14, %v184_v1, %v344_v12  ;;  %v346_v20 = vmul.f32 0.2, %v186_v5  ;;  %vm267_vm1 = vcmp.ge.f32.partialorder %v187_v9, 0.0  ;;  %v191_v21 = vld [vmem:[%s910_s29 + $0x1a8] sm:$0xff]  ;;  %503 = vst [vmem:[%s925_s16 + $0x168] sm:$0xff] %v423_v18  ;;  %vm268_vm2 = vcmp.ge.f32.partialorder %v188_v13, 0.0 }
  0x62   : > { %504 = vst [vmem:[%s925_s16 + $0x170] sm:$0xff] %v424_v19  ;;  %v425_v22 = vsel %vm265_vm15, %v185_v4, %v345_v15  ;;  %v347_v23 = vmul.f32 0.2, %v187_v9  ;;  %v348_v24 = vmul.f32 0.2, %v188_v13  ;;  %v192_v25 = vld [vmem:[%s910_s29 + $0x1b0] sm:$0xff] }
  0x63   : > { %505 = vst [vmem:[%s925_s16 + $0x178] sm:$0xff] %v425_v22  ;;  %v426_v26 = vsel %vm266_vm0, %v186_v5, %v346_v20  ;;  %vm269_vm3 = vcmp.ge.f32.partialorder %v189_v16, 0.0  ;;  %v349_v27 = vmul.f32 0.2, %v189_v16  ;;  %vm270_vm4 = vcmp.ge.f32.partialorder %v190_v17, 0.0  ;;  %v193_v28 = vld [vmem:[%s910_s29 + $0x1b8] sm:$0xff] }
  0x64   : > { %v194_v29 = vld [vmem:[%s910_s29 + $0x1c0] sm:$0xff]  ;;  %506 = vst [vmem:[%s925_s16 + $0x180] sm:$0xff] %v426_v26  ;;  %v427_v30 = vsel %vm267_vm1, %v187_v9, %v347_v23  ;;  %v428_v31 = vsel %vm268_vm2, %v188_v13, %v348_v24  ;;  %v350_v32 = vmul.f32 0.2, %v190_v17  ;;  %vm271_vm5 = vcmp.ge.f32.partialorder %v191_v21, 0.0  ;;  %v195_v33 = vld [vmem:[%s910_s29 + $0x1c8] sm:$0xff] }
  0x65   : > { %507 = vst [vmem:[%s925_s16 + $0x188] sm:$0xff] %v427_v30  ;;  %508 = vst [vmem:[%s925_s16 + $0x190] sm:$0xff] %v428_v31  ;;  %v429_v34 = vsel %vm269_vm3, %v189_v16, %v349_v27  ;;  %v351_v35 = vmul.f32 0.2, %v191_v21  ;;  %vm272_vm6 = vcmp.ge.f32.partialorder %v192_v25, 0.0  ;;  %v196_v37 = vld [vmem:[%s910_s29 + $0x1d0] sm:$0xff] }
  0x66   : > { %v352_v36 = vmul.f32 0.2, %v192_v25  ;;  %509 = vst [vmem:[%s925_s16 + $0x198] sm:$0xff] %v429_v34  ;;  %v430_v38 = vsel %vm270_vm4, %v190_v17, %v350_v32  ;;  %vm273_vm7 = vcmp.ge.f32.partialorder %v193_v28, 0.0  ;;  %v353_v39 = vmul.f32 0.2, %v193_v28 }
  0x67   : > { %vm274_vm8 = vcmp.ge.f32.partialorder %v194_v29, 0.0  ;;  %v197_v40 = vld [vmem:[%s910_s29 + $0x1d8] sm:$0xff]  ;;  %v198_v41 = vld [vmem:[%s910_s29 + $0x1e0] sm:$0xff]  ;;  %510 = vst [vmem:[%s925_s16 + $0x1a0] sm:$0xff] %v430_v38  ;;  %v431_v42 = vsel %vm271_vm5, %v191_v21, %v351_v35  ;;  %v354_v44 = vmul.f32 0.2, %v194_v29 }
  0x68   : > { %v432_v43 = vsel %vm272_vm6, %v192_v25, %v352_v36  ;;  %vm275_vm9 = vcmp.ge.f32.partialorder %v195_v33, 0.0  ;;  %v199_v45 = vld [vmem:[%s910_s29 + $0x1e8] sm:$0xff]  ;;  %511 = vst [vmem:[%s925_s16 + $0x1a8] sm:$0xff] %v431_v42  ;;  %v433_v46 = vsel %vm273_vm7, %v193_v28, %v353_v39  ;;  %v355_v47 = vmul.f32 0.2, %v195_v33  ;;  %v200_v49 = vld [vmem:[%s910_s29 + $0x1f0] sm:$0xff] }
  0x69   : > { %512 = vst [vmem:[%s925_s16 + $0x1b0] sm:$0xff] %v432_v43  ;;  %vm276_vm10 = vcmp.ge.f32.partialorder %v196_v37, 0.0  ;;  %v356_v48 = vmul.f32 0.2, %v196_v37  ;;  %513 = vst [vmem:[%s925_s16 + $0x1b8] sm:$0xff] %v433_v46  ;;  %v434_v50 = vsel %vm274_vm8, %v194_v29, %v354_v44  ;;  %vm277_vm11 = vcmp.ge.f32.partialorder %v197_v40, 0.0 }
  0x6a   : > { %v357_v51 = vmul.f32 0.2, %v197_v40  ;;  %vm278_vm12 = vcmp.ge.f32.partialorder %v198_v41, 0.0  ;;  %v201_v52 = vld [vmem:[%s910_s29 + $0x1f8] sm:$0xff]  ;;  %v202_v53 = vld [vmem:[%s910_s29 + $0x200] sm:$0xff]  ;;  %514 = vst [vmem:[%s925_s16 + $0x1c0] sm:$0xff] %v434_v50  ;;  %v435_v54 = vsel %vm275_vm9, %v195_v33, %v355_v47 }
  0x6b   : > { %v436_v55 = vsel %vm276_vm10, %v196_v37, %v356_v48  ;;  %v358_v56 = vmul.f32 0.2, %v198_v41  ;;  %vm279_vm13 = vcmp.ge.f32.partialorder %v199_v45, 0.0  ;;  %v203_v57 = vld [vmem:[%s910_s29 + $0x208] sm:$0xff]  ;;  %515 = vst [vmem:[%s925_s16 + $0x1c8] sm:$0xff] %v435_v54  ;;  %vm280_vm14 = vcmp.ge.f32.partialorder %v200_v49, 0.0 }
  0x6c   : > { %516 = vst [vmem:[%s925_s16 + $0x1d0] sm:$0xff] %v436_v55  ;;  %v437_v58 = vsel %vm277_vm11, %v197_v40, %v357_v51  ;;  %v359_v59 = vmul.f32 0.2, %v199_v45  ;;  %v360_v60 = vmul.f32 0.2, %v200_v49  ;;  %v204_v61 = vld [vmem:[%s910_s29 + $0x210] sm:$0xff] }
  0x6d   : > { %517 = vst [vmem:[%s925_s16 + $0x1d8] sm:$0xff] %v437_v58  ;;  %v438_v62 = vsel %vm278_vm12, %v198_v41, %v358_v56  ;;  %vm281_vm15 = vcmp.ge.f32.partialorder %v201_v52, 0.0  ;;  %v361_v63 = vmul.f32 0.2, %v201_v52  ;;  %vm282_vm0 = vcmp.ge.f32.partialorder %v202_v53, 0.0  ;;  %v205_v0 = vld [vmem:[%s910_s29 + $0x218] sm:$0xff] }
  0x6e   : > { %v206_v1 = vld [vmem:[%s910_s29 + $0x220] sm:$0xff]  ;;  %518 = vst [vmem:[%s925_s16 + $0x1e0] sm:$0xff] %v438_v62  ;;  %v439_v2 = vsel %vm279_vm13, %v199_v45, %v359_v59  ;;  %v440_v3 = vsel %vm280_vm14, %v200_v49, %v360_v60  ;;  %v362_v4 = vmul.f32 0.2, %v202_v53  ;;  %vm283_vm1 = vcmp.ge.f32.partialorder %v203_v57, 0.0  ;;  %v207_v5 = vld [vmem:[%s910_s29 + $0x228] sm:$0xff] }
  0x6f   : > { %519 = vst [vmem:[%s925_s16 + $0x1e8] sm:$0xff] %v439_v2  ;;  %520 = vst [vmem:[%s925_s16 + $0x1f0] sm:$0xff] %v440_v3  ;;  %v441_v6 = vsel %vm281_vm15, %v201_v52, %v361_v63  ;;  %v363_v7 = vmul.f32 0.2, %v203_v57  ;;  %vm284_vm2 = vcmp.ge.f32.partialorder %v204_v61, 0.0  ;;  %v208_v9 = vld [vmem:[%s910_s29 + $0x230] sm:$0xff] }
  0x70   : > { %v364_v8 = vmul.f32 0.2, %v204_v61  ;;  %521 = vst [vmem:[%s925_s16 + $0x1f8] sm:$0xff] %v441_v6  ;;  %v442_v10 = vsel %vm282_vm0, %v202_v53, %v362_v4  ;;  %vm285_vm3 = vcmp.ge.f32.partialorder %v205_v0, 0.0  ;;  %v365_v11 = vmul.f32 0.2, %v205_v0 }
  0x71   : > { %vm286_vm4 = vcmp.ge.f32.partialorder %v206_v1, 0.0  ;;  %v209_v12 = vld [vmem:[%s910_s29 + $0x238] sm:$0xff]  ;;  %v210_v13 = vld [vmem:[%s910_s29 + $0x240] sm:$0xff]  ;;  %522 = vst [vmem:[%s925_s16 + $0x200] sm:$0xff] %v442_v10  ;;  %v443_v14 = vsel %vm283_vm1, %v203_v57, %v363_v7  ;;  %v366_v16 = vmul.f32 0.2, %v206_v1 }
  0x72   : > { %v444_v15 = vsel %vm284_vm2, %v204_v61, %v364_v8  ;;  %vm287_vm5 = vcmp.ge.f32.partialorder %v207_v5, 0.0  ;;  %v211_v17 = vld [vmem:[%s910_s29 + $0x248] sm:$0xff]  ;;  %523 = vst [vmem:[%s925_s16 + $0x208] sm:$0xff] %v443_v14  ;;  %v445_v18 = vsel %vm285_vm3, %v205_v0, %v365_v11  ;;  %v367_v19 = vmul.f32 0.2, %v207_v5  ;;  %v212_v21 = vld [vmem:[%s910_s29 + $0x250] sm:$0xff] }
  0x73   : > { %524 = vst [vmem:[%s925_s16 + $0x210] sm:$0xff] %v444_v15  ;;  %vm288_vm6 = vcmp.ge.f32.partialorder %v208_v9, 0.0  ;;  %v368_v20 = vmul.f32 0.2, %v208_v9  ;;  %525 = vst [vmem:[%s925_s16 + $0x218] sm:$0xff] %v445_v18  ;;  %v446_v22 = vsel %vm286_vm4, %v206_v1, %v366_v16  ;;  %vm289_vm7 = vcmp.ge.f32.partialorder %v209_v12, 0.0 }
  0x74   : > { %v369_v23 = vmul.f32 0.2, %v209_v12  ;;  %vm290_vm8 = vcmp.ge.f32.partialorder %v210_v13, 0.0  ;;  %v213_v24 = vld [vmem:[%s910_s29 + $0x258] sm:$0xff]  ;;  %v214_v25 = vld [vmem:[%s910_s29 + $0x260] sm:$0xff]  ;;  %526 = vst [vmem:[%s925_s16 + $0x220] sm:$0xff] %v446_v22  ;;  %v447_v26 = vsel %vm287_vm5, %v207_v5, %v367_v19 }
  0x75   : > { %v448_v27 = vsel %vm288_vm6, %v208_v9, %v368_v20  ;;  %v370_v28 = vmul.f32 0.2, %v210_v13  ;;  %vm291_vm9 = vcmp.ge.f32.partialorder %v211_v17, 0.0  ;;  %v215_v29 = vld [vmem:[%s910_s29 + $0x268] sm:$0xff]  ;;  %527 = vst [vmem:[%s925_s16 + $0x228] sm:$0xff] %v447_v26  ;;  %vm292_vm10 = vcmp.ge.f32.partialorder %v212_v21, 0.0 }
  0x76   : > { %528 = vst [vmem:[%s925_s16 + $0x230] sm:$0xff] %v448_v27  ;;  %v449_v30 = vsel %vm289_vm7, %v209_v12, %v369_v23  ;;  %v371_v31 = vmul.f32 0.2, %v211_v17  ;;  %v372_v32 = vmul.f32 0.2, %v212_v21  ;;  %v216_v33 = vld [vmem:[%s910_s29 + $0x270] sm:$0xff] }
  0x77   : > { %529 = vst [vmem:[%s925_s16 + $0x238] sm:$0xff] %v449_v30  ;;  %v450_v34 = vsel %vm290_vm8, %v210_v13, %v370_v28  ;;  %vm293_vm11 = vcmp.ge.f32.partialorder %v213_v24, 0.0  ;;  %v373_v35 = vmul.f32 0.2, %v213_v24  ;;  %vm294_vm12 = vcmp.ge.f32.partialorder %v214_v25, 0.0  ;;  %v217_v36 = vld [vmem:[%s910_s29 + $0x278] sm:$0xff] }
  0x78   : > { %s553_s25 = sshll.u32 %s925_s16, 4  ;;  %530 = vst [vmem:[%s925_s16 + $0x240] sm:$0xff] %v450_v34  ;;  %v451_v37 = vsel %vm291_vm9, %v211_v17, %v371_v31  ;;  %v452_v38 = vsel %vm292_vm10, %v212_v21, %v372_v32  ;;  %v374_v39 = vmul.f32 0.2, %v214_v25  ;;  %vm295_vm13 = vcmp.ge.f32.partialorder %v215_v29, 0.0  ;;  %s539_s2 = scalar_lea.sflag [#allocation4], %s906_s22  ;;  %s1111_s25 = int_to_ptr.vmem [resolvable:$true] %s553_s25 }
  0x79   : > { %531 = vst [vmem:[%s925_s16 + $0x248] sm:$0xff] %v451_v37  ;;  %532 = vst [vmem:[%s925_s16 + $0x250] sm:$0xff] %v452_v38  ;;  %v453_v40 = vsel %vm293_vm11, %v213_v24, %v373_v35  ;;  %v375_v41 = vmul.f32 0.2, %v215_v29  ;;  %vm296_vm14 = vcmp.ge.f32.partialorder %v216_v33, 0.0  ;;  %vm297_vm15 = vcmp.ge.f32.partialorder %v217_v36, 0.0 }
  0x7a   : > { %v376_v42 = vmul.f32 0.2, %v216_v33  ;;  %533 = vst [vmem:[%s925_s16 + $0x258] sm:$0xff] %v453_v40  ;;  %v454_v43 = vsel %vm294_vm12, %v214_v25, %v374_v39  ;;  %v377_v44 = vmul.f32 0.2, %v217_v36  ;;  %s724_s3 = scalar_lea.vmem %s1111_s25, 10240 }
  0x7b   : > { %534 = vst [vmem:[%s925_s16 + $0x260] sm:$0xff] %v454_v43  ;;  %v455_v45 = vsel %vm295_vm13, %v215_v29, %v375_v41  ;;  %p725_p6 = scmp.ne.s32.totalorder %s1111_s25, %s724_s3  ;;  %p1173_p11 = scmp.ne.s32.totalorder %s1170_s17, 0 }
  0x7c   : > { %v456_v46 = vsel %vm296_vm14, %v216_v33, %v376_v42  ;;  %535 = vst [vmem:[%s925_s16 + $0x268] sm:$0xff] %v455_v45  ;;  %v457_v47 = vsel %vm297_vm15, %v217_v36, %v377_v44  ;;  %s795_s4 = smov [#allocation5]  }
  0x7d   : > { %536 = vst [vmem:[%s925_s16 + $0x270] sm:$0xff] %v456_v46  ;;  %537 = vst [vmem:[%s925_s16 + $0x278] sm:$0xff] %v457_v47  ;;  %p726_p12 = pnand %p725_p6, %p1173_p11  ;;  %s728_s5 = sshll.u32 %s795_s4, 4  ;;  %s729_s5 = int_to_ptr.vmem [resolvable:$false] %s728_s5 }
  0x7e   : > { %s730_s11 = scalar_lea.vmem %s729_s5, 20480  ;;  %p731_p8 = scmp.lt.s32.totalorder %s1111_s25, %s729_s5 }
  0x7f   : > { %p727_p13 = pneg %p726_p12  ;;  %p732_p10 = scmp.lt.s32.totalorder %s730_s11, %s724_s3 }
  0x81   : > { %p733_p0 = por %p732_p10, %p731_p8 }
  0x83   : > { %p734_p2 = pnand %p733_p0, %p727_p13 }
  0x85   : > { %737 = shalt.err (!%p734_p2)
}
  0x86   : > { %s738_s10 = scalar_lea.hbm %s1119_s30, 10240  ;;  %s742_s19 = scalar_lea.hbm %s1167_s1, 20480 }
  0x87   : > { %p739_p4 = scmp.ne.s32.totalorder %s1119_s30, %s738_s10  ;;  %p743_p9 = scmp.lt.u32.totalorder %s1119_s30, %s1167_s1 }
  0x88   : > { %p744_p1 = scmp.lt.u32.totalorder %s742_s19, %s738_s10  ;;  %p746_p6 = scmp.lt.u32.totalorder %s738_s10, %s1119_s30 }
  0x89   : > { %p740_p5 = pnand %p739_p4, %p1173_p11 }
  0x8a   : > { %p745_p3 = por %p744_p1, %p743_p9 }
  0x8b   : > { %p741_p7 = pneg %p740_p5 }
  0x8c   : > { %p747_p12 = por %p746_p6, %p745_p3 }
  0x8e   : > { %p748_p13 = pnand %p747_p12, %p741_p7 }
  0x90   : > { %751 = shalt.err (!%p748_p13)
}
  0x91   : > { %s796_s23 = smov 1024   ;;  %s797_s26 = smov 64  }
  0x92   : > { %646 = dma.vmem_to_hbm [thread:$0]  (%p1173_p11), %s1111_s25, 10240, %s1119_s30, %s539_s2, %s796_s23, %s796_s23, %s797_s26  }
  0x93 PF: > { %s568_s29 = sand.u32 1, %s778_s6   ;;  %p1174_p8 = scmp.ne.s32.totalorder %s1171_s18, 0 }
  0x94   : > { %p1175_p10 = scmp.ge.s32.totalorder %s790_s9, 2  ;;  %s569_s16 = scalar_lea.sflag [#allocation4], %s568_s29 }
  0x96   : > { %p653_p0 = pnand %p1175_p10, %p1174_p8 }
  0x98   : > { %773 = dma.done.wait (!%p653_p0), %s569_s16, 10240  }
  0x99   : > { %775 = vsyncadd (!%p653_p0), %s569_s16, 4294957056  ;;  %p14_p2 = scmp.ge.s32.totalorder %s833_s12, 4   ;;  %s1176_s6 = smov %s782_s7 }
  0x9a   : > { %s1177_s7 = smov %s786_s8  ;;  %s1178_s8 = smov %s845_s15 }
  0x9b   : > { %s1179_s9 = smov %s833_s12  ;;  %16 = sbr.rel (!%p14_p2) target bundleno = 5 (0x5), region = 69 }
  0xa2   :  { %574 = vsyncpa [#allocation3], 1 }
  0xa3   :  { %576 = vsyncpa [#allocation3 + $0x1], 1 }
  0xa4   :  { %577 = vsyncpa [#allocation4], 1 }
  0xa5   :  { %579 = vsyncpa [#allocation4 + $0x1], 1 }

// kernel: inf_model_forward.11
= control target key start
LH: loop header
LB: loop body
LE: loop exit
PB: predicated region body
PF: predicated region fallthrough
CT: control target
= control target key end

     0   :  { %6 = vsyncpa [#allocation3], 0  ;;  %s720_s0 = inlined_call_operand.hbm [shape: f32[24,3072], index: 0, kind: input, shape index: {}]   ;;  %s721_s1 = inlined_call_operand.hbm [shape: f32[24,3072], index: 1, kind: output, shape index: {}]  }
   0x1   :  { %8 = vsyncpa [#allocation3 + $0x1], 0 }
   0x2   :  { %9 = vsyncpa [#allocation4], 0 }
   0x3   :  { %11 = vsyncpa [#allocation4 + $0x1], 0  ;;  %s506_s6 = smov 0   ;;  %s508_s7 = smov 0  }
   0x4   :  { %s510_s8 = smov 0   ;;  %s512_s9 = smov 0  }
   0x5 LB: > { %s527_s10 = sadd.s32 4294967295, %s492_s9   ;;  %s338_s11 = sadd.s32 4294967294, %s492_s9   ;;  %s492_s9 = sphi %s512_s9, %s734_s9   ;;  %s488_s8 = sphi %s510_s8, %s733_s8   ;;  %s484_s7 = sphi %s508_s7, %s732_s7   ;;  %s480_s6 = sphi %s506_s6, %s731_s6  }
   0x6   : > { %s531_s12 = sadd.s32 1, %s492_s9   ;;  %s24_s13 = sadd.s32 1, %s488_s8 }
   0x7   : > { %s21_s14 = ssub.s32 %s492_s9, %s531_s12  ;;  %p31_p0 = scmp.ne.s32.totalorder %s488_s8, %s484_s7 }
   0x8   : > { %p22_p1 = scmp.eq.s32.totalorder %s21_s14, 0  ;;  %p32_p2 = scmp.eq.s32.totalorder %s492_s9, 0 }
   0x9   : > { %p37_p3 = scmp.ne.s32.totalorder %s484_s7, %s480_s6  ;;  %p38_p4 = scmp.eq.s32.totalorder %s527_s10, 0 }
   0xa   : > { %s543_s15 = scalar_select %p22_p1, %s488_s8, %s24_s13  }
   0xb   : > { %p33_p5 = por %p32_p2, %p31_p0  ;;  %p545_p6 = por %p38_p4, %p37_p3 }
   0xc   : > { %p61_p7 = scmp.eq.s32.totalorder %s527_s10, 2  ;;  %p67_p8 = scmp.eq.s32.totalorder %s338_s11, 2 }
   0xd   : > { %p362_p9 = scmp.lt.s32.totalorder %s492_s9, 3  ;;  %s87_s19 = sand.u32 1, %s488_s8  }
   0xe   : > { %p551_p10 = por %p61_p7, %p31_p0  ;;  %p555_p11 = por %p67_p8, %p37_p3 }
   0xf   : > { %s347_s20 = smul.u32 3072, %s492_s9  ;;  %p566_p12 = pnand %p362_p9, %p33_p5 }
  0x10   : > { %s724_s17 = scalar_select %p551_p10, 1, 0 }
  0x11   : > { %s725_s18 = scalar_select %p555_p11, 1, 0 }
  0x12   : > { %s346_s21 = smul.u32 192, %s87_s19  ;;  %s564_s24 = scalar_lea.hbm %s720_s0, %s347_s20 }
  0x13   : > { %s88_s28 = scalar_lea.sflag [#allocation3], %s87_s19  ;;  %s396_s29 = scalar_lea.hbm %s564_s24, 3072 }
  0x14   : > { %s91_s26 = scalar_lea.vmem [#allocation2], %s346_s21  ;;  %p397_p1 = scmp.ne.s32.totalorder %s564_s24, %s396_s29 }
  0x15   : > { %s99_s27 = sshll.u32 %s91_s26, 4  ;;  %p398_p2 = pneg %p566_p12  ;;  %s571_s27 = int_to_ptr.vmem [resolvable:$true] %s99_s27 }
  0x16   : > { %s401_s3 = scalar_lea.hbm %s720_s0, 9216  ;;  %p402_p5 = scmp.lt.u32.totalorder %s564_s24, %s720_s0 }
  0x17   : > { %p399_p3 = pnand %p398_p2, %p397_p1  ;;  %p403_p7 = scmp.lt.u32.totalorder %s401_s3, %s396_s29 }
  0x18   : > { %p405_p9 = scmp.lt.u32.totalorder %s396_s29, %s564_s24 }
  0x19   : > { %p400_p4 = pneg %p399_p3  ;;  %p404_p8 = por %p403_p7, %p402_p5 }
  0x1b   : > { %p406_p13 = por %p405_p9, %p404_p8 }
  0x1d   : > { %p407_p0 = pnand %p406_p13, %p400_p4 }
  0x1f   : > { %410 = shalt.err (!%p407_p0)
}
  0x20   : > { %s411_s11 = scalar_lea.vmem %s571_s27, 3072  ;;  %s494_s13 = smov [#allocation2]  }
  0x21   : > { %p412_p1 = scmp.ne.s32.totalorder %s571_s27, %s411_s11  ;;  %s416_s14 = sshll.u32 %s494_s13, 4  ;;  %s417_s14 = int_to_ptr.vmem [resolvable:$false] %s416_s14 }
  0x22   : > { %s418_s19 = scalar_lea.vmem %s417_s14, 6144  ;;  %p419_p10 = scmp.lt.s32.totalorder %s571_s27, %s417_s14 }
  0x23   : > { %p414_p3 = pnand %p412_p1, %p398_p2  ;;  %p420_p5 = scmp.lt.s32.totalorder %s418_s19, %s411_s11 }
  0x25   : > { %p415_p11 = pneg %p414_p3  ;;  %p421_p7 = por %p420_p5, %p419_p10 }
  0x27   : > { %p422_p8 = pnand %p421_p7, %p415_p11 }
  0x29   : > { %425 = shalt.err (!%p422_p8)
}
  0x2a   : > { %357 = dma.hbm_to_vmem [thread:$0]  (!%p566_p12), %s564_s24, 3072, %s571_s27, %s88_s28  }
  0x2b   : > { %p727_p13 = scmp.lt.s32.totalorder %s492_s9, 4  ;;  %p728_p0 = scmp.ge.s32.totalorder %s492_s9, 1 }
  0x2d   : > { %p105_p2 = pnand %p728_p0, %p727_p13 }
  0x2e   : > { %s604_s20 = sand.u32 (!%p105_p2), 1, %s484_s7  }
  0x2f   : > { %108 = sbr.rel (%p105_p2) target bundleno = 98 (0x62), region = 24  ;;  %s111_s22 = scalar_lea.sflag (!%p105_p2), [#allocation3], %s604_s20 }
  0x30   : > { %s348_s21 = smul.u32 (!%p105_p2), 192, %s604_s20 }
  0x32   : > { %s608_s23 = scalar_lea.vmem (!%p105_p2), [#allocation2], %s348_s21 }
  0x36   : > { %471 = dma.done.wait (%p545_p6), %s111_s22, 3072  }
  0x37   : > { %473 = vsyncadd (%p545_p6), %s111_s22, 4294964224  ;;  %v133_v0 = vld [vmem:[%s608_s23] sm:$0xff]  ;;  %v134_v1 = vld [vmem:[%s608_s23 + $0x8] sm:$0xff]  ;;  %s623_s16 = scalar_lea.vmem [#allocation5], %s348_s21  ;;  %s349_s24 = smul.u32 3072, %s527_s10 }
  0x38   : > { %v135_v2 = vld [vmem:[%s608_s23 + $0x10] sm:$0xff]  ;;  %vm157_vm0 = vcmp.ge.f32.partialorder %v133_v0, 0.0  ;;  %v181_v3 = vmul.f32 0.2, %v133_v0  ;;  %vm158_vm1 = vcmp.ge.f32.partialorder %v134_v1, 0.0  ;;  %v136_v6 = vld [vmem:[%s608_s23 + $0x18] sm:$0xff] }
  0x39   : > { %v182_v4 = vmul.f32 0.2, %v134_v1  ;;  %vm159_vm2 = vcmp.ge.f32.partialorder %v135_v2, 0.0  ;;  %v183_v5 = vmul.f32 0.2, %v135_v2  ;;  %v137_v7 = vld [vmem:[%s608_s23 + $0x20] sm:$0xff]  ;;  %s674_s27 = scalar_lea.hbm %s721_s1, %s349_s24 }
  0x3a   : > { %v138_v8 = vld [vmem:[%s608_s23 + $0x28] sm:$0xff]  ;;  %v205_v9 = vsel %vm157_vm0, %v133_v0, %v181_v3  ;;  %vm160_vm3 = vcmp.ge.f32.partialorder %v136_v6, 0.0  ;;  %v184_v11 = vmul.f32 0.2, %v136_v6  ;;  %v139_v12 = vld [vmem:[%s608_s23 + $0x30] sm:$0xff]  ;;  %v140_v13 = vld [vmem:[%s608_s23 + $0x38] sm:$0xff] }
  0x3b   : > { %v206_v10 = vsel %vm158_vm1, %v134_v1, %v182_v4  ;;  %v141_v14 = vld [vmem:[%s608_s23 + $0x40] sm:$0xff]  ;;  %229 = vst [vmem:[%s623_s16] sm:$0xff] %v205_v9  ;;  %v207_v15 = vsel %vm159_vm2, %v135_v2, %v183_v5  ;;  %vm161_vm4 = vcmp.ge.f32.partialorder %v137_v7, 0.0  ;;  %v185_v16 = vmul.f32 0.2, %v137_v7  ;;  %v142_v17 = vld [vmem:[%s608_s23 + $0x48] sm:$0xff]  ;;  %v143_v21 = vld [vmem:[%s608_s23 + $0x50] sm:$0xff] }
  0x3c   : > { %230 = vst [vmem:[%s623_s16 + $0x8] sm:$0xff] %v206_v10  ;;  %vm162_vm5 = vcmp.ge.f32.partialorder %v138_v8, 0.0  ;;  %231 = vst [vmem:[%s623_s16 + $0x10] sm:$0xff] %v207_v15  ;;  %v208_v18 = vsel %vm160_vm3, %v136_v6, %v184_v11  ;;  %v186_v19 = vmul.f32 0.2, %v138_v8  ;;  %vm163_vm6 = vcmp.ge.f32.partialorder %v139_v12, 0.0 }
  0x3d   : > { %v187_v20 = vmul.f32 0.2, %v139_v12  ;;  %232 = vst [vmem:[%s623_s16 + $0x18] sm:$0xff] %v208_v18  ;;  %v209_v22 = vsel %vm161_vm4, %v137_v7, %v185_v16  ;;  %vm164_vm7 = vcmp.ge.f32.partialorder %v140_v13, 0.0  ;;  %v188_v23 = vmul.f32 0.2, %v140_v13 }
  0x3e   : > { %vm165_vm8 = vcmp.ge.f32.partialorder %v141_v14, 0.0  ;;  %v144_v24 = vld [vmem:[%s608_s23 + $0x58] sm:$0xff]  ;;  %v145_v25 = vld [vmem:[%s608_s23 + $0x60] sm:$0xff]  ;;  %233 = vst [vmem:[%s623_s16 + $0x20] sm:$0xff] %v209_v22  ;;  %v210_v26 = vsel %vm162_vm5, %v138_v8, %v186_v19  ;;  %v189_v28 = vmul.f32 0.2, %v141_v14 }
  0x3f   : > { %v211_v27 = vsel %vm163_vm6, %v139_v12, %v187_v20  ;;  %vm166_vm9 = vcmp.ge.f32.partialorder %v142_v17, 0.0  ;;  %v146_v29 = vld [vmem:[%s608_s23 + $0x68] sm:$0xff]  ;;  %234 = vst [vmem:[%s623_s16 + $0x28] sm:$0xff] %v210_v26  ;;  %v212_v30 = vsel %vm164_vm7, %v140_v13, %v188_v23  ;;  %v190_v31 = vmul.f32 0.2, %v142_v17  ;;  %v147_v33 = vld [vmem:[%s608_s23 + $0x70] sm:$0xff] }
  0x40   : > { %235 = vst [vmem:[%s623_s16 + $0x30] sm:$0xff] %v211_v27  ;;  %vm167_vm10 = vcmp.ge.f32.partialorder %v143_v21, 0.0  ;;  %v191_v32 = vmul.f32 0.2, %v143_v21  ;;  %236 = vst [vmem:[%s623_s16 + $0x38] sm:$0xff] %v212_v30  ;;  %v213_v34 = vsel %vm165_vm8, %v141_v14, %v189_v28  ;;  %vm168_vm11 = vcmp.ge.f32.partialorder %v144_v24, 0.0 }
  0x41   : > { %v192_v35 = vmul.f32 0.2, %v144_v24  ;;  %vm169_vm12 = vcmp.ge.f32.partialorder %v145_v25, 0.0  ;;  %v148_v36 = vld [vmem:[%s608_s23 + $0x78] sm:$0xff]  ;;  %v149_v37 = vld [vmem:[%s608_s23 + $0x80] sm:$0xff]  ;;  %237 = vst [vmem:[%s623_s16 + $0x40] sm:$0xff] %v213_v34  ;;  %v214_v38 = vsel %vm166_vm9, %v142_v17, %v190_v31 }
  0x42   : > { %v215_v39 = vsel %vm167_vm10, %v143_v21, %v191_v32  ;;  %v193_v40 = vmul.f32 0.2, %v145_v25  ;;  %vm170_vm13 = vcmp.ge.f32.partialorder %v146_v29, 0.0  ;;  %v150_v41 = vld [vmem:[%s608_s23 + $0x88] sm:$0xff]  ;;  %238 = vst [vmem:[%s623_s16 + $0x48] sm:$0xff] %v214_v38  ;;  %vm171_vm14 = vcmp.ge.f32.partialorder %v147_v33, 0.0 }
  0x43   : > { %239 = vst [vmem:[%s623_s16 + $0x50] sm:$0xff] %v215_v39  ;;  %v216_v42 = vsel %vm168_vm11, %v144_v24, %v192_v35  ;;  %v194_v43 = vmul.f32 0.2, %v146_v29  ;;  %v195_v44 = vmul.f32 0.2, %v147_v33  ;;  %v151_v45 = vld [vmem:[%s608_s23 + $0x90] sm:$0xff] }
  0x44   : > { %240 = vst [vmem:[%s623_s16 + $0x58] sm:$0xff] %v216_v42  ;;  %v217_v46 = vsel %vm169_vm12, %v145_v25, %v193_v40  ;;  %vm172_vm15 = vcmp.ge.f32.partialorder %v148_v36, 0.0  ;;  %v196_v47 = vmul.f32 0.2, %v148_v36  ;;  %vm173_vm0 = vcmp.ge.f32.partialorder %v149_v37, 0.0  ;;  %v152_v48 = vld [vmem:[%s608_s23 + $0x98] sm:$0xff] }
  0x45   : > { %v153_v49 = vld [vmem:[%s608_s23 + $0xa0] sm:$0xff]  ;;  %241 = vst [vmem:[%s623_s16 + $0x60] sm:$0xff] %v217_v46  ;;  %v218_v50 = vsel %vm170_vm13, %v146_v29, %v194_v43  ;;  %v219_v51 = vsel %vm171_vm14, %v147_v33, %v195_v44  ;;  %v197_v52 = vmul.f32 0.2, %v149_v37  ;;  %vm174_vm1 = vcmp.ge.f32.partialorder %v150_v41, 0.0  ;;  %v154_v53 = vld [vmem:[%s608_s23 + $0xa8] sm:$0xff] }
  0x46   : > { %242 = vst [vmem:[%s623_s16 + $0x68] sm:$0xff] %v218_v50  ;;  %243 = vst [vmem:[%s623_s16 + $0x70] sm:$0xff] %v219_v51  ;;  %v220_v54 = vsel %vm172_vm15, %v148_v36, %v196_v47  ;;  %v198_v55 = vmul.f32 0.2, %v150_v41  ;;  %vm175_vm2 = vcmp.ge.f32.partialorder %v151_v45, 0.0  ;;  %v155_v57 = vld [vmem:[%s608_s23 + $0xb0] sm:$0xff] }
  0x47   : > { %v199_v56 = vmul.f32 0.2, %v151_v45  ;;  %244 = vst [vmem:[%s623_s16 + $0x78] sm:$0xff] %v220_v54  ;;  %v221_v58 = vsel %vm173_vm0, %v149_v37, %v197_v52  ;;  %vm176_vm3 = vcmp.ge.f32.partialorder %v152_v48, 0.0  ;;  %v200_v59 = vmul.f32 0.2, %v152_v48 }
  0x48   : > { %vm177_vm4 = vcmp.ge.f32.partialorder %v153_v49, 0.0  ;;  %v156_v60 = vld [vmem:[%s608_s23 + $0xb8] sm:$0xff]  ;;  %245 = vst [vmem:[%s623_s16 + $0x80] sm:$0xff] %v221_v58  ;;  %v222_v61 = vsel %vm174_vm1, %v150_v41, %v198_v55  ;;  %v201_v63 = vmul.f32 0.2, %v153_v49  ;;  %vm178_vm5 = vcmp.ge.f32.partialorder %v154_v53, 0.0 }
  0x49   : > { %v223_v62 = vsel %vm175_vm2, %v151_v45, %v199_v56  ;;  %s268_s25 = sshll.u32 %s623_s16, 4  ;;  %246 = vst [vmem:[%s623_s16 + $0x88] sm:$0xff] %v222_v61  ;;  %v224_v0 = vsel %vm176_vm3, %v152_v48, %v200_v59  ;;  %v202_v1 = vmul.f32 0.2, %v154_v53  ;;  %vm179_vm6 = vcmp.ge.f32.partialorder %v155_v57, 0.0  ;;  %s254_s28 = scalar_lea.sflag [#allocation4], %s604_s20  ;;  %s676_s25 = int_to_ptr.vmem [resolvable:$true] %s268_s25 }
  0x4a   : > { %247 = vst [vmem:[%s623_s16 + $0x90] sm:$0xff] %v223_v62  ;;  %v203_v2 = vmul.f32 0.2, %v155_v57  ;;  %248 = vst [vmem:[%s623_s16 + $0x98] sm:$0xff] %v224_v0  ;;  %v225_v3 = vsel %vm177_vm4, %v153_v49, %v201_v63  ;;  %vm180_vm7 = vcmp.ge.f32.partialorder %v156_v60, 0.0  ;;  %s426_s29 = scalar_lea.vmem %s676_s25, 3072 }
  0x4b   : > { %v204_v4 = vmul.f32 0.2, %v156_v60  ;;  %249 = vst [vmem:[%s623_s16 + $0xa0] sm:$0xff] %v225_v3  ;;  %v226_v5 = vsel %vm178_vm5, %v154_v53, %v202_v1  ;;  %p427_p6 = scmp.ne.s32.totalorder %s676_s25, %s426_s29  ;;  %p729_p10 = scmp.ne.s32.totalorder %s724_s17, 0 }
  0x4c   : > { %v227_v6 = vsel %vm179_vm6, %v155_v57, %v203_v2  ;;  %250 = vst [vmem:[%s623_s16 + $0xa8] sm:$0xff] %v226_v5  ;;  %s495_s30 = smov [#allocation5]  }
  0x4d   : > { %251 = vst [vmem:[%s623_s16 + $0xb0] sm:$0xff] %v227_v6  ;;  %v228_v7 = vsel %vm180_vm7, %v156_v60, %v204_v4  ;;  %p428_p11 = pnand %p427_p6, %p729_p10  ;;  %s430_s2 = sshll.u32 %s495_s30, 4  ;;  %s431_s2 = int_to_ptr.vmem [resolvable:$false] %s430_s2 }
  0x4e   : > { %252 = vst [vmem:[%s623_s16 + $0xb8] sm:$0xff] %v228_v7  ;;  %s432_s3 = scalar_lea.vmem %s431_s2, 6144  ;;  %p433_p4 = scmp.lt.s32.totalorder %s676_s25, %s431_s2 }
  0x4f   : > { %p429_p12 = pneg %p428_p11  ;;  %p434_p9 = scmp.lt.s32.totalorder %s432_s3, %s426_s29 }
  0x51   : > { %p435_p1 = por %p434_p9, %p433_p4 }
  0x53   : > { %p436_p3 = pnand %p435_p1, %p429_p12 }
  0x55   : > { %439 = shalt.err (!%p436_p3)
}
  0x56   : > { %s440_s4 = scalar_lea.hbm %s674_s27, 3072  ;;  %s444_s13 = scalar_lea.hbm %s721_s1, 9216 }
  0x57   : > { %p441_p5 = scmp.ne.s32.totalorder %s674_s27, %s440_s4  ;;  %p445_p13 = scmp.lt.u32.totalorder %s674_s27, %s721_s1 }
  0x58   : > { %p446_p0 = scmp.lt.u32.totalorder %s444_s13, %s440_s4  ;;  %p448_p6 = scmp.lt.u32.totalorder %s440_s4, %s674_s27 }
  0x59   : > { %p442_p7 = pnand %p441_p5, %p729_p10 }
  0x5a   : > { %p447_p2 = por %p446_p0, %p445_p13 }
  0x5b   : > { %p443_p8 = pneg %p442_p7 }
  0x5c   : > { %p449_p11 = por %p448_p6, %p447_p2 }
  0x5e   : > { %p450_p12 = pnand %p449_p11, %p443_p8 }
  0x60   : > { %453 = shalt.err (!%p450_p12)
}
  0x61   : > { %352 = dma.vmem_to_hbm [thread:$0]  (%p729_p10), %s676_s25, 3072, %s674_s27, %s254_s28  }
  0x62 PF: > { %p363_p4 = scmp.ge.s32.totalorder %s492_s9, 2  ;;  %s280_s20 = sand.u32 1, %s480_s6  }
  0x63   : > { %p730_p9 = scmp.ne.s32.totalorder %s725_s18, 0  ;;  %s281_s21 = scalar_lea.sflag [#allocation4], %s280_s20 }
  0x65   : > { %p359_p1 = pnand %p363_p4, %p730_p9 }
  0x67   : > { %475 = dma.done.wait (!%p359_p1), %s281_s21, 3072  }
  0x68   : > { %477 = vsyncadd (!%p359_p1), %s281_s21, 4294964224  ;;  %p14_p3 = scmp.ge.s32.totalorder %s531_s12, 5   ;;  %s731_s6 = smov %s484_s7 }
  0x69   : > { %s732_s7 = smov %s488_s8  ;;  %s733_s8 = smov %s543_s15 }
  0x6a   : > { %s734_s9 = smov %s531_s12  ;;  %16 = sbr.rel (!%p14_p3) target bundleno = 5 (0x5), region = 69 }
  0x71   :  { %286 = vsyncpa [#allocation3], 1 }
  0x72   :  { %288 = vsyncpa [#allocation3 + $0x1], 1 }
  0x73   :  { %289 = vsyncpa [#allocation4], 1 }
  0x74   :  { %291 = vsyncpa [#allocation4 + $0x1], 1 }

// kernel: inf_model_forward.12
= control target key start
LH: loop header
LB: loop body
LE: loop exit
PB: predicated region body
PF: predicated region fallthrough
CT: control target
= control target key end

     0   :  { %6 = vsyncpa [#allocation3], 0  ;;  %s677_s0 = inlined_call_operand.hbm [shape: f32[16,2304], index: 0, kind: input, shape index: {}]   ;;  %s678_s1 = inlined_call_operand.hbm [shape: f32[16,2304], index: 1, kind: output, shape index: {}]  }
   0x1   :  { %8 = vsyncpa [#allocation3 + $0x1], 0 }
   0x2   :  { %9 = vsyncpa [#allocation4], 0 }
   0x3   :  { %11 = vsyncpa [#allocation4 + $0x1], 0  ;;  %s476_s6 = smov 0   ;;  %s478_s7 = smov 0  }
   0x4   :  { %s480_s8 = smov 0   ;;  %s482_s9 = smov 0  }
   0x5 LB: > { %s497_s10 = sadd.s32 4294967295, %s462_s9   ;;  %s308_s11 = sadd.s32 4294967294, %s462_s9   ;;  %s462_s9 = sphi %s482_s9, %s692_s9   ;;  %s458_s8 = sphi %s480_s8, %s691_s8   ;;  %s454_s7 = sphi %s478_s7, %s690_s7   ;;  %s450_s6 = sphi %s476_s6, %s689_s6  }
   0x6   : > { %s501_s12 = sadd.s32 1, %s462_s9   ;;  %s24_s13 = sadd.s32 1, %s458_s8 }
   0x7   : > { %s21_s14 = ssub.s32 %s462_s9, %s501_s12  ;;  %p31_p0 = scmp.ne.s32.totalorder %s458_s8, %s454_s7 }
   0x8   : > { %p22_p1 = scmp.eq.s32.totalorder %s21_s14, 0  ;;  %p32_p2 = scmp.eq.s32.totalorder %s462_s9, 0 }
   0x9   : > { %p37_p3 = scmp.ne.s32.totalorder %s454_s7, %s450_s6  ;;  %p38_p4 = scmp.eq.s32.totalorder %s497_s10, 0 }
   0xa   : > { %s513_s15 = scalar_select %p22_p1, %s458_s8, %s24_s13  }
   0xb   : > { %p33_p5 = por %p32_p2, %p31_p0  ;;  %p515_p6 = por %p38_p4, %p37_p3 }
   0xc   : > { %p61_p7 = scmp.eq.s32.totalorder %s497_s10, 1  ;;  %p67_p8 = scmp.eq.s32.totalorder %s308_s11, 1 }
   0xd   : > { %p332_p10 = scmp.lt.s32.totalorder %s462_s9, 2  ;;  %s87_s19 = sand.u32 1, %s458_s8  }
   0xe   : > { %p522_p11 = por %p61_p7, %p31_p0  ;;  %p526_p12 = por %p67_p8, %p37_p3 }
   0xf   : > { %s317_s20 = smul.u32 2304, %s462_s9  ;;  %p537_p13 = pnand %p332_p10, %p33_p5 }
  0x10   : > { %s681_s17 = scalar_select %p522_p11, 1, 0 }
  0x11   : > { %s682_s18 = scalar_select %p526_p12, 1, 0 }
  0x12   : > { %s316_s21 = smul.u32 144, %s87_s19  ;;  %s535_s24 = scalar_lea.hbm %s677_s0, %s317_s20 }
  0x13   : > { %s88_s28 = scalar_lea.sflag [#allocation3], %s87_s19  ;;  %s366_s29 = scalar_lea.hbm %s535_s24, 2304 }
  0x14   : > { %s91_s26 = scalar_lea.vmem [#allocation2], %s316_s21  ;;  %p367_p2 = scmp.ne.s32.totalorder %s535_s24, %s366_s29 }
  0x15   : > { %s99_s27 = sshll.u32 %s91_s26, 4  ;;  %p368_p3 = pneg %p537_p13  ;;  %s542_s27 = int_to_ptr.vmem [resolvable:$true] %s99_s27 }
  0x16   : > { %s371_s3 = scalar_lea.hbm %s677_s0, 4608  ;;  %p372_p7 = scmp.lt.u32.totalorder %s535_s24, %s677_s0 }
  0x17   : > { %p369_p4 = pnand %p368_p3, %p367_p2  ;;  %p373_p8 = scmp.lt.u32.totalorder %s371_s3, %s366_s29 }
  0x18   : > { %p375_p9 = scmp.lt.u32.totalorder %s366_s29, %s535_s24 }
  0x19   : > { %p370_p5 = pneg %p369_p4  ;;  %p374_p10 = por %p373_p8, %p372_p7 }
  0x1b   : > { %p376_p0 = por %p375_p9, %p374_p10 }
  0x1d   : > { %p377_p1 = pnand %p376_p0, %p370_p5 }
  0x1f   : > { %380 = shalt.err (!%p377_p1)
}
  0x20   : > { %s381_s11 = scalar_lea.vmem %s542_s27, 2304  ;;  %s464_s13 = smov [#allocation2]  }
  0x21   : > { %p382_p2 = scmp.ne.s32.totalorder %s542_s27, %s381_s11  ;;  %s386_s14 = sshll.u32 %s464_s13, 4  ;;  %s387_s14 = int_to_ptr.vmem [resolvable:$false] %s386_s14 }
  0x22   : > { %s388_s19 = scalar_lea.vmem %s387_s14, 4608  ;;  %p389_p11 = scmp.lt.s32.totalorder %s542_s27, %s387_s14 }
  0x23   : > { %p384_p4 = pnand %p382_p2, %p368_p3  ;;  %p390_p7 = scmp.lt.s32.totalorder %s388_s19, %s381_s11 }
  0x25   : > { %p385_p12 = pneg %p384_p4  ;;  %p391_p8 = por %p390_p7, %p389_p11 }
  0x27   : > { %p392_p9 = pnand %p391_p8, %p385_p12 }
  0x29   : > { %395 = shalt.err (!%p392_p9)
}
  0x2a   : > { %327 = dma.hbm_to_vmem [thread:$0]  (!%p537_p13), %s535_s24, 2304, %s542_s27, %s88_s28  }
  0x2b   : > { %p684_p0 = scmp.lt.s32.totalorder %s462_s9, 3  ;;  %p685_p1 = scmp.ge.s32.totalorder %s462_s9, 1 }
  0x2d   : > { %p105_p3 = pnand %p685_p1, %p684_p0 }
  0x2e   : > { %s575_s20 = sand.u32 (!%p105_p3), 1, %s454_s7  }
  0x2f   : > { %108 = sbr.rel (%p105_p3) target bundleno = 93 (0x5d), region = 24  ;;  %s111_s22 = scalar_lea.sflag (!%p105_p3), [#allocation3], %s575_s20 }
  0x30   : > { %s318_s21 = smul.u32 (!%p105_p3), 144, %s575_s20 }
  0x32   : > { %s579_s23 = scalar_lea.vmem (!%p105_p3), [#allocation2], %s318_s21 }
  0x36   : > { %441 = dma.done.wait (%p515_p6), %s111_s22, 2304  }
  0x37   : > { %443 = vsyncadd (%p515_p6), %s111_s22, 4294964992  ;;  %v133_v0 = vld [vmem:[%s579_s23] sm:$0xff]  ;;  %v134_v1 = vld [vmem:[%s579_s23 + $0x8] sm:$0xff]  ;;  %s594_s16 = scalar_lea.vmem [#allocation5], %s318_s21  ;;  %s319_s24 = smul.u32 2304, %s497_s10 }
  0x38   : > { %v135_v2 = vld [vmem:[%s579_s23 + $0x10] sm:$0xff]  ;;  %vm151_vm0 = vcmp.ge.f32.partialorder %v133_v0, 0.0  ;;  %v169_v3 = vmul.f32 0.2, %v133_v0  ;;  %vm152_vm1 = vcmp.ge.f32.partialorder %v134_v1, 0.0  ;;  %v136_v6 = vld [vmem:[%s579_s23 + $0x18] sm:$0xff] }
  0x39   : > { %v170_v4 = vmul.f32 0.2, %v134_v1  ;;  %vm153_vm2 = vcmp.ge.f32.partialorder %v135_v2, 0.0  ;;  %v171_v5 = vmul.f32 0.2, %v135_v2  ;;  %v137_v7 = vld [vmem:[%s579_s23 + $0x20] sm:$0xff]  ;;  %s631_s27 = scalar_lea.hbm %s678_s1, %s319_s24 }
  0x3a   : > { %v138_v8 = vld [vmem:[%s579_s23 + $0x28] sm:$0xff]  ;;  %v187_v9 = vsel %vm151_vm0, %v133_v0, %v169_v3  ;;  %vm154_vm3 = vcmp.ge.f32.partialorder %v136_v6, 0.0  ;;  %v172_v11 = vmul.f32 0.2, %v136_v6  ;;  %v139_v12 = vld [vmem:[%s579_s23 + $0x30] sm:$0xff]  ;;  %v140_v13 = vld [vmem:[%s579_s23 + $0x38] sm:$0xff] }
  0x3b   : > { %v188_v10 = vsel %vm152_vm1, %v134_v1, %v170_v4  ;;  %v141_v14 = vld [vmem:[%s579_s23 + $0x40] sm:$0xff]  ;;  %205 = vst [vmem:[%s594_s16] sm:$0xff] %v187_v9  ;;  %v189_v15 = vsel %vm153_vm2, %v135_v2, %v171_v5  ;;  %vm155_vm4 = vcmp.ge.f32.partialorder %v137_v7, 0.0  ;;  %v173_v16 = vmul.f32 0.2, %v137_v7  ;;  %v142_v17 = vld [vmem:[%s579_s23 + $0x48] sm:$0xff]  ;;  %v143_v21 = vld [vmem:[%s579_s23 + $0x50] sm:$0xff] }
  0x3c   : > { %206 = vst [vmem:[%s594_s16 + $0x8] sm:$0xff] %v188_v10  ;;  %vm156_vm5 = vcmp.ge.f32.partialorder %v138_v8, 0.0  ;;  %207 = vst [vmem:[%s594_s16 + $0x10] sm:$0xff] %v189_v15  ;;  %v190_v18 = vsel %vm154_vm3, %v136_v6, %v172_v11  ;;  %v174_v19 = vmul.f32 0.2, %v138_v8  ;;  %vm157_vm6 = vcmp.ge.f32.partialorder %v139_v12, 0.0 }
  0x3d   : > { %v175_v20 = vmul.f32 0.2, %v139_v12  ;;  %208 = vst [vmem:[%s594_s16 + $0x18] sm:$0xff] %v190_v18  ;;  %v191_v22 = vsel %vm155_vm4, %v137_v7, %v173_v16  ;;  %vm158_vm7 = vcmp.ge.f32.partialorder %v140_v13, 0.0  ;;  %v176_v23 = vmul.f32 0.2, %v140_v13 }
  0x3e   : > { %vm159_vm8 = vcmp.ge.f32.partialorder %v141_v14, 0.0  ;;  %v144_v24 = vld [vmem:[%s579_s23 + $0x58] sm:$0xff]  ;;  %v145_v25 = vld [vmem:[%s579_s23 + $0x60] sm:$0xff]  ;;  %209 = vst [vmem:[%s594_s16 + $0x20] sm:$0xff] %v191_v22  ;;  %v192_v26 = vsel %vm156_vm5, %v138_v8, %v174_v19  ;;  %v177_v28 = vmul.f32 0.2, %v141_v14 }
  0x3f   : > { %v193_v27 = vsel %vm157_vm6, %v139_v12, %v175_v20  ;;  %vm160_vm9 = vcmp.ge.f32.partialorder %v142_v17, 0.0  ;;  %v146_v29 = vld [vmem:[%s579_s23 + $0x68] sm:$0xff]  ;;  %210 = vst [vmem:[%s594_s16 + $0x28] sm:$0xff] %v192_v26  ;;  %v194_v30 = vsel %vm158_vm7, %v140_v13, %v176_v23  ;;  %v178_v31 = vmul.f32 0.2, %v142_v17  ;;  %v147_v33 = vld [vmem:[%s579_s23 + $0x70] sm:$0xff] }
  0x40   : > { %211 = vst [vmem:[%s594_s16 + $0x30] sm:$0xff] %v193_v27  ;;  %vm161_vm10 = vcmp.ge.f32.partialorder %v143_v21, 0.0  ;;  %v179_v32 = vmul.f32 0.2, %v143_v21  ;;  %212 = vst [vmem:[%s594_s16 + $0x38] sm:$0xff] %v194_v30  ;;  %v195_v34 = vsel %vm159_vm8, %v141_v14, %v177_v28  ;;  %vm162_vm11 = vcmp.ge.f32.partialorder %v144_v24, 0.0 }
  0x41   : > { %v180_v35 = vmul.f32 0.2, %v144_v24  ;;  %vm163_vm12 = vcmp.ge.f32.partialorder %v145_v25, 0.0  ;;  %v148_v36 = vld [vmem:[%s579_s23 + $0x78] sm:$0xff]  ;;  %v149_v37 = vld [vmem:[%s579_s23 + $0x80] sm:$0xff]  ;;  %213 = vst [vmem:[%s594_s16 + $0x40] sm:$0xff] %v195_v34  ;;  %v196_v38 = vsel %vm160_vm9, %v142_v17, %v178_v31 }
  0x42   : > { %v197_v39 = vsel %vm161_vm10, %v143_v21, %v179_v32  ;;  %v181_v40 = vmul.f32 0.2, %v145_v25  ;;  %vm164_vm13 = vcmp.ge.f32.partialorder %v146_v29, 0.0  ;;  %v150_v41 = vld [vmem:[%s579_s23 + $0x88] sm:$0xff]  ;;  %214 = vst [vmem:[%s594_s16 + $0x48] sm:$0xff] %v196_v38  ;;  %vm165_vm14 = vcmp.ge.f32.partialorder %v147_v33, 0.0 }
  0x43   : > { %215 = vst [vmem:[%s594_s16 + $0x50] sm:$0xff] %v197_v39  ;;  %v198_v42 = vsel %vm162_vm11, %v144_v24, %v180_v35  ;;  %v182_v43 = vmul.f32 0.2, %v146_v29  ;;  %v183_v44 = vmul.f32 0.2, %v147_v33  ;;  %vm166_vm15 = vcmp.ge.f32.partialorder %v148_v36, 0.0 }
  0x44   : > { %216 = vst [vmem:[%s594_s16 + $0x58] sm:$0xff] %v198_v42  ;;  %v199_v45 = vsel %vm163_vm12, %v145_v25, %v181_v40  ;;  %v184_v46 = vmul.f32 0.2, %v148_v36  ;;  %vm167_vm0 = vcmp.ge.f32.partialorder %v149_v37, 0.0  ;;  %s238_s25 = sshll.u32 %s594_s16, 4  ;;  %vm168_vm1 = vcmp.ge.f32.partialorder %v150_v41, 0.0  ;;  %s633_s25 = int_to_ptr.vmem [resolvable:$true] %s238_s25 }
  0x45   : > { %217 = vst [vmem:[%s594_s16 + $0x60] sm:$0xff] %v199_v45  ;;  %v200_v47 = vsel %vm164_vm13, %v146_v29, %v182_v43  ;;  %v201_v48 = vsel %vm165_vm14, %v147_v33, %v183_v44  ;;  %v185_v49 = vmul.f32 0.2, %v149_v37  ;;  %v186_v51 = vmul.f32 0.2, %v150_v41  ;;  %s224_s28 = scalar_lea.sflag [#allocation4], %s575_s20 }
  0x46   : > { %218 = vst [vmem:[%s594_s16 + $0x68] sm:$0xff] %v200_v47  ;;  %219 = vst [vmem:[%s594_s16 + $0x70] sm:$0xff] %v201_v48  ;;  %v202_v50 = vsel %vm166_vm15, %v148_v36, %v184_v46  ;;  %s396_s29 = scalar_lea.vmem %s633_s25, 2304  ;;  %p686_p11 = scmp.ne.s32.totalorder %s681_s17, 0 }
  0x47   : > { %220 = vst [vmem:[%s594_s16 + $0x78] sm:$0xff] %v202_v50  ;;  %v203_v52 = vsel %vm167_vm0, %v149_v37, %v185_v49  ;;  %v204_v53 = vsel %vm168_vm1, %v150_v41, %v186_v51  ;;  %p397_p6 = scmp.ne.s32.totalorder %s633_s25, %s396_s29  ;;  %s465_s30 = smov [#allocation5]  }
  0x48   : > { %221 = vst [vmem:[%s594_s16 + $0x80] sm:$0xff] %v203_v52  ;;  %222 = vst [vmem:[%s594_s16 + $0x88] sm:$0xff] %v204_v53  ;;  %s400_s2 = sshll.u32 %s465_s30, 4  ;;  %s401_s2 = int_to_ptr.vmem [resolvable:$false] %s400_s2 }
  0x49   : > { %p398_p12 = pnand %p397_p6, %p686_p11  ;;  %s402_s3 = scalar_lea.vmem %s401_s2, 4608 }
  0x4a   : > { %p403_p5 = scmp.lt.s32.totalorder %s633_s25, %s401_s2  ;;  %p404_p10 = scmp.lt.s32.totalorder %s402_s3, %s396_s29 }
  0x4b   : > { %p399_p13 = pneg %p398_p12 }
  0x4c   : > { %p405_p2 = por %p404_p10, %p403_p5 }
  0x4e   : > { %p406_p4 = pnand %p405_p2, %p399_p13 }
  0x50   : > { %409 = shalt.err (!%p406_p4)
}
  0x51   : > { %s410_s4 = scalar_lea.hbm %s631_s27, 2304  ;;  %s414_s13 = scalar_lea.hbm %s678_s1, 4608 }
  0x52   : > { %p411_p7 = scmp.ne.s32.totalorder %s631_s27, %s410_s4  ;;  %p415_p0 = scmp.lt.u32.totalorder %s631_s27, %s678_s1 }
  0x53   : > { %p416_p1 = scmp.lt.u32.totalorder %s414_s13, %s410_s4  ;;  %p418_p6 = scmp.lt.u32.totalorder %s410_s4, %s631_s27 }
  0x54   : > { %p412_p8 = pnand %p411_p7, %p686_p11 }
  0x55   : > { %p417_p3 = por %p416_p1, %p415_p0 }
  0x56   : > { %p413_p9 = pneg %p412_p8 }
  0x57   : > { %p419_p12 = por %p418_p6, %p417_p3 }
  0x59   : > { %p420_p13 = pnand %p419_p12, %p413_p9 }
  0x5b   : > { %423 = shalt.err (!%p420_p13)
}
  0x5c   : > { %322 = dma.vmem_to_hbm [thread:$0]  (%p686_p11), %s633_s25, 2304, %s631_s27, %s224_s28  }
  0x5d PF: > { %s250_s20 = sand.u32 1, %s450_s6   ;;  %p687_p5 = scmp.ne.s32.totalorder %s682_s18, 0 }
  0x5e   : > { %p688_p10 = scmp.ge.s32.totalorder %s462_s9, 2  ;;  %s251_s21 = scalar_lea.sflag [#allocation4], %s250_s20 }
  0x60   : > { %p329_p2 = pnand %p688_p10, %p687_p5 }
  0x62   : > { %445 = dma.done.wait (!%p329_p2), %s251_s21, 2304  }
  0x63   : > { %447 = vsyncadd (!%p329_p2), %s251_s21, 4294964992  ;;  %p14_p4 = scmp.ge.s32.totalorder %s501_s12, 4   ;;  %s689_s6 = smov %s454_s7 }
  0x64   : > { %s690_s7 = smov %s458_s8  ;;  %s691_s8 = smov %s513_s15 }
  0x65   : > { %s692_s9 = smov %s501_s12  ;;  %16 = sbr.rel (!%p14_p4) target bundleno = 5 (0x5), region = 69 }
  0x6c   :  { %256 = vsyncpa [#allocation3], 1 }
  0x6d   :  { %258 = vsyncpa [#allocation3 + $0x1], 1 }
  0x6e   :  { %259 = vsyncpa [#allocation4], 1 }
  0x6f   :  { %261 = vsyncpa [#allocation4 + $0x1], 1 }

// kernel: inf_model_forward.13
= control target key start
LH: loop header
LB: loop body
LE: loop exit
PB: predicated region body
PF: predicated region fallthrough
CT: control target
= control target key end

     0   :  { %6 = vsyncpa [#allocation3], 0  ;;  %s217_s0 = inlined_call_operand.hbm [shape: f32[8,2304], index: 0, kind: input, shape index: {}]   ;;  %s218_s1 = inlined_call_operand.hbm [shape: f32[8,2304], index: 1, kind: output, shape index: {}]  }
   0x1   :  { %7 = vsyncpa [#allocation4], 0  ;;  %s176_s6 = smov [#allocation2]   ;;  %s128_s10 = scalar_lea.hbm %s217_s0, 2304 }
   0x2   :  { %s14_s7 = sshll.u32 %s176_s6, 4  ;;  %p129_p0 = scmp.ne.s32.totalorder %s217_s0, %s128_s10  ;;  %s15_s7 = int_to_ptr.vmem [resolvable:$true] %s14_s7 }
   0x3   :  { %p132_p1 = scmp.lt.u32.totalorder %s128_s10, %s217_s0 }
   0x5   :  { %p134_p2 = pnand %p132_p1, %p129_p0 }
   0x7   :  { %137 = shalt.err (!%p134_p2)
}
   0x8   :  { %s138_s15 = scalar_lea.vmem %s15_s7, 2304  ;;  %p143_p4 = scmp.lt.s32.totalorder %s15_s7, %s15_s7 }
   0x9   :  { %p139_p3 = scmp.ne.s32.totalorder %s15_s7, %s138_s15  ;;  %p144_p5 = scmp.lt.s32.totalorder %s138_s15, %s138_s15 }
   0xb   :  { %p145_p6 = por %p144_p5, %p143_p4 }
   0xd   :  { %p146_p7 = pnand %p145_p6, %p139_p3 }
   0xf   :  { %149 = shalt.err (!%p146_p7)
}
  0x10   :  { %17 = dma.hbm_to_vmem [thread:$0]  %s217_s0, 2304, %s15_s7, [#allocation3]  }
  0x11   :  { %172 = dma.done.wait [#allocation3], 2304  }
  0x12   :  { %173 = vsyncadd [#allocation3], 4294964992  ;;  %v21_v0 = vld [vmem:[#allocation2] sm:$0xff]  ;;  %v22_v1 = vld [vmem:[#allocation2 + $0x8] sm:$0xff]  ;;  %s177_s0 = smov [#allocation5]  }
  0x13   :  { %v23_v2 = vld [vmem:[#allocation2 + $0x10] sm:$0xff]  ;;  %vm39_vm0 = vcmp.ge.f32.partialorder %v21_v0, 0.0  ;;  %v57_v3 = vmul.f32 0.2, %v21_v0  ;;  %vm40_vm1 = vcmp.ge.f32.partialorder %v22_v1, 0.0  ;;  %v24_v6 = vld [vmem:[#allocation2 + $0x18] sm:$0xff] }
  0x14   :  { %v58_v4 = vmul.f32 0.2, %v22_v1  ;;  %vm41_vm2 = vcmp.ge.f32.partialorder %v23_v2, 0.0  ;;  %v59_v5 = vmul.f32 0.2, %v23_v2  ;;  %v25_v7 = vld [vmem:[#allocation2 + $0x20] sm:$0xff] }
  0x15   :  { %v26_v8 = vld [vmem:[#allocation2 + $0x28] sm:$0xff]  ;;  %v75_v9 = vsel %vm39_vm0, %v21_v0, %v57_v3  ;;  %vm42_vm3 = vcmp.ge.f32.partialorder %v24_v6, 0.0  ;;  %v60_v11 = vmul.f32 0.2, %v24_v6  ;;  %v27_v12 = vld [vmem:[#allocation2 + $0x30] sm:$0xff]  ;;  %v28_v13 = vld [vmem:[#allocation2 + $0x38] sm:$0xff] }
  0x16   :  { %v76_v10 = vsel %vm40_vm1, %v22_v1, %v58_v4  ;;  %v29_v14 = vld [vmem:[#allocation2 + $0x40] sm:$0xff]  ;;  %93 = vst [vmem:[#allocation5] sm:$0xff] %v75_v9  ;;  %v77_v15 = vsel %vm41_vm2, %v23_v2, %v59_v5  ;;  %vm43_vm4 = vcmp.ge.f32.partialorder %v25_v7, 0.0  ;;  %v61_v16 = vmul.f32 0.2, %v25_v7  ;;  %v30_v17 = vld [vmem:[#allocation2 + $0x48] sm:$0xff] }
  0x17   :  { %94 = vst [vmem:[#allocation5 + $0x8] sm:$0xff] %v76_v10  ;;  %vm44_vm5 = vcmp.ge.f32.partialorder %v26_v8, 0.0  ;;  %95 = vst [vmem:[#allocation5 + $0x10] sm:$0xff] %v77_v15  ;;  %v78_v18 = vsel %vm42_vm3, %v24_v6, %v60_v11  ;;  %v62_v19 = vmul.f32 0.2, %v26_v8  ;;  %vm45_vm6 = vcmp.ge.f32.partialorder %v27_v12, 0.0 }
  0x18   :  { %v63_v20 = vmul.f32 0.2, %v27_v12  ;;  %v31_v21 = vld [vmem:[#allocation2 + $0x50] sm:$0xff]  ;;  %96 = vst [vmem:[#allocation5 + $0x18] sm:$0xff] %v78_v18  ;;  %v79_v22 = vsel %vm43_vm4, %v25_v7, %v61_v16  ;;  %vm46_vm7 = vcmp.ge.f32.partialorder %v28_v13, 0.0  ;;  %vm47_vm8 = vcmp.ge.f32.partialorder %v29_v14, 0.0 }
  0x19   :  { %v64_v23 = vmul.f32 0.2, %v28_v13  ;;  %v32_v24 = vld [vmem:[#allocation2 + $0x58] sm:$0xff]  ;;  %v33_v25 = vld [vmem:[#allocation2 + $0x60] sm:$0xff]  ;;  %97 = vst [vmem:[#allocation5 + $0x20] sm:$0xff] %v79_v22  ;;  %v80_v26 = vsel %vm44_vm5, %v26_v8, %v62_v19  ;;  %vm48_vm9 = vcmp.ge.f32.partialorder %v30_v17, 0.0 }
  0x1a   :  { %v81_v27 = vsel %vm45_vm6, %v27_v12, %v63_v20  ;;  %v65_v28 = vmul.f32 0.2, %v29_v14  ;;  %v34_v29 = vld [vmem:[#allocation2 + $0x68] sm:$0xff]  ;;  %98 = vst [vmem:[#allocation5 + $0x28] sm:$0xff] %v80_v26  ;;  %v66_v31 = vmul.f32 0.2, %v30_v17 }
  0x1b   :  { %99 = vst [vmem:[#allocation5 + $0x30] sm:$0xff] %v81_v27  ;;  %v82_v30 = vsel %vm46_vm7, %v28_v13, %v64_v23  ;;  %vm49_vm10 = vcmp.ge.f32.partialorder %v31_v21, 0.0  ;;  %v67_v32 = vmul.f32 0.2, %v31_v21  ;;  %v35_v33 = vld [vmem:[#allocation2 + $0x70] sm:$0xff]  ;;  %vm50_vm11 = vcmp.ge.f32.partialorder %v32_v24, 0.0 }
  0x1c   :  { %100 = vst [vmem:[#allocation5 + $0x38] sm:$0xff] %v82_v30  ;;  %v83_v34 = vsel %vm47_vm8, %v29_v14, %v65_v28  ;;  %v68_v35 = vmul.f32 0.2, %v32_v24  ;;  %vm51_vm12 = vcmp.ge.f32.partialorder %v33_v25, 0.0  ;;  %v36_v36 = vld [vmem:[#allocation2 + $0x78] sm:$0xff]  ;;  %v37_v37 = vld [vmem:[#allocation2 + $0x80] sm:$0xff]  ;;  %v84_v38 = vsel %vm48_vm9, %v30_v17, %v66_v31 }
  0x1d   :  { %101 = vst [vmem:[#allocation5 + $0x40] sm:$0xff] %v83_v34  ;;  %v85_v39 = vsel %vm49_vm10, %v31_v21, %v67_v32  ;;  %v69_v40 = vmul.f32 0.2, %v33_v25  ;;  %vm52_vm13 = vcmp.ge.f32.partialorder %v34_v29, 0.0  ;;  %v38_v41 = vld [vmem:[#allocation2 + $0x88] sm:$0xff]  ;;  %102 = vst [vmem:[#allocation5 + $0x48] sm:$0xff] %v84_v38 }
  0x1e   :  { %103 = vst [vmem:[#allocation5 + $0x50] sm:$0xff] %v85_v39  ;;  %v86_v42 = vsel %vm50_vm11, %v32_v24, %v68_v35  ;;  %v70_v43 = vmul.f32 0.2, %v34_v29  ;;  %vm53_vm14 = vcmp.ge.f32.partialorder %v35_v33, 0.0  ;;  %v71_v44 = vmul.f32 0.2, %v35_v33 }
  0x1f   :  { %104 = vst [vmem:[#allocation5 + $0x58] sm:$0xff] %v86_v42  ;;  %v87_v45 = vsel %vm51_vm12, %v33_v25, %v69_v40  ;;  %vm54_vm15 = vcmp.ge.f32.partialorder %v36_v36, 0.0  ;;  %v72_v46 = vmul.f32 0.2, %v36_v36  ;;  %vm55_vm0 = vcmp.ge.f32.partialorder %v37_v37, 0.0  ;;  %s117_s18 = sshll.u32 %s177_s0, 4  ;;  %s118_s18 = int_to_ptr.vmem [resolvable:$true] %s117_s18 }
  0x20   :  { %105 = vst [vmem:[#allocation5 + $0x60] sm:$0xff] %v87_v45  ;;  %v88_v47 = vsel %vm52_vm13, %v34_v29, %v70_v43  ;;  %v89_v48 = vsel %vm53_vm14, %v35_v33, %v71_v44  ;;  %v73_v49 = vmul.f32 0.2, %v37_v37  ;;  %vm56_vm1 = vcmp.ge.f32.partialorder %v38_v41, 0.0  ;;  %s150_s19 = scalar_lea.vmem %s118_s18, 2304  ;;  %p155_p9 = scmp.lt.s32.totalorder %s118_s18, %s118_s18 }
  0x21   :  { %106 = vst [vmem:[#allocation5 + $0x68] sm:$0xff] %v88_v47  ;;  %107 = vst [vmem:[#allocation5 + $0x70] sm:$0xff] %v89_v48  ;;  %v90_v50 = vsel %vm54_vm15, %v36_v36, %v72_v46  ;;  %v74_v51 = vmul.f32 0.2, %v38_v41  ;;  %p151_p8 = scmp.ne.s32.totalorder %s118_s18, %s150_s19  ;;  %p156_p10 = scmp.lt.s32.totalorder %s150_s19, %s150_s19 }
  0x22   :  { %108 = vst [vmem:[#allocation5 + $0x78] sm:$0xff] %v90_v50  ;;  %v91_v52 = vsel %vm55_vm0, %v37_v37, %v73_v49 }
  0x23   :  { %109 = vst [vmem:[#allocation5 + $0x80] sm:$0xff] %v91_v52  ;;  %v92_v53 = vsel %vm56_vm1, %v38_v41, %v74_v51  ;;  %p157_p11 = por %p156_p10, %p155_p9 }
  0x24   :  { %110 = vst [vmem:[#allocation5 + $0x88] sm:$0xff] %v92_v53 }
  0x25   :  { %p158_p12 = pnand %p157_p11, %p151_p8 }
  0x27   :  { %161 = shalt.err (!%p158_p12)
}
  0x28   :  { %s162_s22 = scalar_lea.hbm %s218_s1, 2304 }
  0x29   :  { %p163_p13 = scmp.ne.s32.totalorder %s218_s1, %s162_s22  ;;  %p166_p0 = scmp.lt.u32.totalorder %s162_s22, %s218_s1 }
  0x2b   :  { %p168_p1 = pnand %p166_p0, %p163_p13 }
  0x2d   :  { %171 = shalt.err (!%p168_p1)
}
  0x2e   :  { %120 = dma.vmem_to_hbm [thread:$0]  %s118_s18, 2304, %s218_s1, [#allocation4]  }
  0x2f   :  { %174 = dma.done.wait [#allocation4], 2304  }
  0x30   :  { %175 = vsyncadd [#allocation4], 4294964992 }
  0x31   :  { %124 = vsyncpa [#allocation3], 1 }
  0x32   :  { %125 = vsyncpa [#allocation4], 1 }

// kernel: inf_model_forward.14
= control target key start
LH: loop header
LB: loop body
LE: loop exit
PB: predicated region body
PF: predicated region fallthrough
CT: control target
= control target key end

     0   :  { %s3576_s0 = inlined_call_operand.hbm [shape: f32[2,9216], index: 0, kind: input, shape index: {}]   ;;  %s3577_s1 = inlined_call_operand.hbm [shape: f32[9216,1024], index: 1, kind: input, shape index: {}]   ;;  %s3578_s2 = inlined_call_operand.hbm [shape: f32[1,1024], index: 2, kind: input, shape index: {}]   ;;  %s3579_s3 = inlined_call_operand.hbm [shape: f32[2,1024], index: 3, kind: output, shape index: {}]  }
   0x1   :  { %3592 = sst [smem:[#allocation20_spill]] %s3576_s0 }
   0x2   :  { %3593 = sst [smem:[#allocation21_spill]] %s3577_s1 }
   0x3   :  { %3594 = sst [smem:[#allocation22_spill]] %s3579_s3 }
   0x4   :  { %8 = vsyncpa [#allocation4], 0 }
   0x5   :  { %10 = vsyncpa [#allocation4 + $0x1], 0 }
   0x6   :  { %11 = vsyncpa [#allocation7], 0 }
   0x7   :  { %13 = vsyncpa [#allocation7 + $0x1], 0 }
   0x8   :  { %14 = vsyncpa [#allocation5], 0 }
   0x9   :  { %16 = vsyncpa [#allocation5 + $0x1], 0  ;;  %s2601_s12 = smov 0   ;;  %s2603_s13 = smov 0  }
   0xa   :  { %s2605_s14 = smov 0   ;;  %s2607_s15 = smov 0  }
   0xb   :  { %s2609_s16 = smov 0   ;;  %s2611_s17 = smov 0  }
   0xc   :  { %s2613_s18 = smov 0   ;;  %s2615_s19 = smov 0  }
   0xd   :  { %s2617_s20 = smov 0   ;;  %s2619_s21 = smov 0  }
   0xe   :  { %s2621_s22 = smov 0   ;;  %s2623_s23 = smov 0  }
   0xf   :  { %s2625_s24 = smov 0   ;;  %s2627_s25 = smov 0  }
  0x10 LB: > { %3595 = sst [smem:[#allocation14_spill]] %s2550_s20  ;;  %p3581_p0 = scmp.eq.s32.totalorder %s2570_s25, 0  ;;  %s2570_s25 = sphi %s2627_s25, %s22_s25   ;;  %s2566_s24 = sphi %s2625_s24, %s3636_s24   ;;  %s2562_s23 = sphi %s2623_s23, %s3646_s23   ;;  %s2558_s22 = sphi %s2621_s22, %s3634_s22   ;;  %s2554_s21 = sphi %s2619_s21, %s3645_s21   ;;  %s2550_s20 = sphi %s2617_s20, %s3633_s20   ;;  %s2546_s19 = sphi %s2615_s19, %s3644_s19   ;;  %s2542_s18 = sphi %s2613_s18, %s3643_s18   ;;  %s2538_s17 = sphi %s2611_s17, %s3642_s17   ;;  %s2534_s16 = sphi %s2609_s16, %s3641_s16   ;;  %s2530_s15 = sphi %s2607_s15, %s3640_s15   ;;  %s2526_s14 = sphi %s2605_s14, %s3639_s14   ;;  %s2522_s13 = sphi %s2603_s13, %s3638_s13   ;;  %s2518_s12 = sphi %s2601_s12, %s3637_s12  }
  0x11   : > { %3596 = sst [smem:[#allocation15_spill]] %s2558_s22  ;;  %p76_p1 = scmp.ne.s32.totalorder %s2538_s17, %s2534_s16 }
  0x12   : > { %3597 = sst [smem:[#allocation16_spill]] %s2566_s24  ;;  %p3580_p4 = scmp.lt.s32.totalorder %s2570_s25, 18 }
  0x13   : > { %p78_p3 = por %p76_p1, %p3581_p0  ;;  %s177_s28 = sand.u32 1, %s2570_s25  }
  0x14   : > { %s179_s29 = sand.u32 1, %s2538_s17   ;;  %s1637_s4 = sshll.u32 %s2566_s24, 2 }
  0x15   : > { %s1635_s30 = sshll.u32 %s179_s29, 12  ;;  %s1656_s5 = sshll.u32 %s2562_s23, 10 }
  0x16   : > { %s181_s6 = scalar_lea.vmem [#allocation6], %s1635_s30  ;;  %s188_s8 = sadd.s32 %s1656_s5, %s1637_s4 }
  0x17   : > { %s191_s7 = sshll.u32 %s181_s6, 4  ;;  %s1639_s9 = sshll.u32 %s188_s8, 7  ;;  %s2685_s7 = int_to_ptr.vmem [resolvable:$true] %s191_s7 }
  0x18   : > { %p2689_p5 = pnand %p3580_p4, %p78_p3  ;;  %s3599_s1 = sld [smem:[#allocation21_spill]] }
  0x19   : > { %p1643_p6 = scmp.ge.s32.totalorder %s2570_s25, 1  ;;  %s2699_s29 = scalar_lea.sflag [#allocation7], %s177_s28 }
  0x1a   : > { %p2328_p8 = pneg %p2689_p5 }
  0x1e   : > { %s2696_s26 = scalar_lea.hbm %s3599_s1, %s1639_s9  ;;  %s2331_s5 = scalar_lea.hbm %s3599_s1, 1179648 }
  0x1f   : > { %s2326_s30 = scalar_lea.hbm %s2696_s26, 65536  ;;  %p2332_p11 = scmp.lt.u32.totalorder %s2696_s26, %s3599_s1 }
  0x20   : > { %p2327_p7 = scmp.ne.s32.totalorder %s2696_s26, %s2326_s30  ;;  %p2333_p12 = scmp.lt.u32.totalorder %s2331_s5, %s2326_s30 }
  0x21   : > { %p2335_p1 = scmp.lt.u32.totalorder %s2326_s30, %s2696_s26 }
  0x22   : > { %p2329_p9 = pnand %p2328_p8, %p2327_p7  ;;  %p2334_p13 = por %p2333_p12, %p2332_p11 }
  0x24   : > { %p2330_p10 = pneg %p2329_p9  ;;  %p2336_p3 = por %p2335_p1, %p2334_p13 }
  0x26   : > { %p2337_p4 = pnand %p2336_p3, %p2330_p10 }
  0x28   : > { %2340 = shalt.err (!%p2337_p4)
}
  0x29   : > { %s2341_s28 = scalar_lea.vmem %s2685_s7, 65536  ;;  %s2572_s9 = smov [#allocation6]  }
  0x2a   : > { %p2342_p7 = scmp.ne.s32.totalorder %s2685_s7, %s2341_s28  ;;  %s2346_s11 = sshll.u32 %s2572_s9, 4  ;;  %s2347_s11 = int_to_ptr.vmem [resolvable:$false] %s2346_s11 }
  0x2b   : > { %s2348_s27 = scalar_lea.vmem %s2347_s11, 131072  ;;  %p2349_p0 = scmp.lt.s32.totalorder %s2685_s7, %s2347_s11 }
  0x2c   : > { %p2344_p9 = pnand %p2342_p7, %p2328_p8  ;;  %p2350_p11 = scmp.lt.s32.totalorder %s2348_s27, %s2341_s28 }
  0x2e   : > { %p2345_p2 = pneg %p2344_p9  ;;  %p2351_p12 = por %p2350_p11, %p2349_p0 }
  0x30   : > { %p2352_p13 = pnand %p2351_p12, %p2345_p2 }
  0x32   : > { %2355 = shalt.err (!%p2352_p13)
}
  0x33   : > { %s2573_s30 = smov 1024   ;;  %s2574_s4 = smov 512  }
  0x34   : > { %s2575_s5 = smov 32   ;;  %p218_p0 = scmp.lt.s32.totalorder %s2570_s25, 19 }
  0x35   : > { %2197 = dma.hbm_to_vmem [thread:$0]  (!%p2689_p5), %s2696_s26, 65536, %s2685_s7, %s2699_s29, %s2573_s30, %s2574_s4, %s2575_s5  }
  0x36   : > { %p2730_p2 = pnand %p1643_p6, %p218_p0  ;;  %s2735_s8 = sadd.s32 4294967295, %s2570_s25  }
  0x37   : > { %s31_s28 = sadd.s32 1, %s2562_s23  ;;  %s41_s9 = sadd.s32 1, %s2550_s20 }
  0x38   : > { %s3600_s6 = scalar_select %p2730_p2, 1, 0 }
  0x39   : > { %p32_p4 = scmp.ge.s32.totalorder %s31_s28, 9  ;;  %p48_p5 = scmp.ne.s32.totalorder %s2550_s20, %s2546_s19 }
  0x3a   : > { %p54_p8 = scmp.ne.s32.totalorder %s2546_s19, %s2542_s18  ;;  %s3602_s26 = sadd.s32 1, %s2566_s24 }
  0x3b   : > { %s3648_s28 = smov (%p32_p4, %s31_s28), 0  ;;  %s3650_s26 = smov (!%p32_p4, %s3602_s26), %s2566_s24 }
  0x3c   : > { %3601 = sst [smem:[#allocation17_spill]] %s3648_s28  ;;  %s38_s7 = ssub.s32 %s2562_s23, %s3648_s28 }
  0x3d   : > { %p3603_p6 = scmp.eq.s32.totalorder %s2570_s25, 0  ;;  %p36_p1 = scmp.ge.s32.totalorder %s3650_s26, 2 }
  0x3e   : > { %p39_p3 = scmp.eq.s32.totalorder %s38_s7, 0  ;;  %p3585_p7 = scmp.eq.s32.totalorder %s2735_s8, 0 }
  0x3f   : > { %p2752_p10 = por %p3603_p6, %p48_p5  ;;  %s158_s18 = sand.u32 1, %s2550_s20  }
  0x40   : > { %s3652_s26 = smov (%p36_p1, %s3650_s26), 0  ;;  %p2765_p9 = por %p3585_p7, %p54_p8 }
  0x41   : > { %3605 = sst [smem:[#allocation18_spill]] %s3652_s26  ;;  %s2771_s30 = ssub.s32 %s2566_s24, %s3652_s26 }
  0x42   : > { %s2761_s11 = scalar_select %p39_p3, %s2550_s20, %s41_s9  }
  0x43   : > { %s3607_s27 = scalar_select %p2765_p9, 1, 0 }
  0x44   : > { %3606 = sst [smem:[#allocation19_spill]] %s2761_s11  ;;  %s66_s4 = sor.u32 %s2771_s30, %s38_s7 }
  0x45   : > { %p3608_p11 = scmp.ne.s32.totalorder %s2534_s16, %s2530_s15  ;;  %p67_p13 = scmp.eq.s32.totalorder %s66_s4, 0 }
  0x46   : > { %s1632_s1 = sshll.u32 %s158_s18, 4  ;;  %s1655_s28 = sshll.u32 %s2562_s23, 8 }
  0x47   : > { %p2779_p12 = por %p3608_p11, %p3585_p7  ;;  %s3610_s9 = sadd.s32 1, %s2538_s17 }
  0x48   : > { %s2787_s11 = scalar_select %p67_p13, %s2538_s17, %s3610_s9  }
  0x49   : > { %s3609_s5 = scalar_select %p2779_p12, 1, 0 }
  0x4a   : > { %s3611_s0 = sld [smem:[#allocation20_spill]]  ;;  %s162_s15 = scalar_lea.vmem [#allocation3], %s1632_s1 }
  0x4b   : > { %s170_s7 = sshll.u32 %s162_s15, 4  ;;  %p3612_p0 = scmp.lt.s32.totalorder %s2570_s25, 18  ;;  %s2802_s7 = int_to_ptr.vmem [resolvable:$true] %s170_s7 }
  0x4c   : > { %s159_s9 = scalar_lea.sflag [#allocation4], %s158_s18 }
  0x4d   : > { %p2798_p4 = pnand %p3612_p0, %p2752_p10 }
  0x4f   : > { %p2358_p8 = pneg %p2798_p4 }
  0x50   : > { %s2792_s22 = scalar_lea.hbm %s3611_s0, %s1655_s28  ;;  %s2361_s28 = scalar_lea.hbm %s3611_s0, 2304 }
  0x51   : > { %s2356_s3 = scalar_lea.hbm %s2792_s22, 256  ;;  %p2362_p10 = scmp.lt.u32.totalorder %s2792_s22, %s3611_s0 }
  0x52   : > { %p2357_p5 = scmp.ne.s32.totalorder %s2792_s22, %s2356_s3  ;;  %p2363_p3 = scmp.lt.u32.totalorder %s2361_s28, %s2356_s3 }
  0x53   : > { %p2365_p13 = scmp.lt.u32.totalorder %s2356_s3, %s2792_s22 }
  0x54   : > { %p2359_p6 = pnand %p2358_p8, %p2357_p5  ;;  %p2364_p11 = por %p2363_p3, %p2362_p10 }
  0x56   : > { %p2360_p1 = pneg %p2359_p6  ;;  %p2366_p0 = por %p2365_p13, %p2364_p11 }
  0x58   : > { %p2367_p7 = pnand %p2366_p0, %p2360_p1 }
  0x5a   : > { %2370 = shalt.err (!%p2367_p7)
}
  0x5b   : > { %s2371_s18 = scalar_lea.vmem %s2802_s7, 256  ;;  %s2576_s1 = smov [#allocation3]  }
  0x5c   : > { %p2372_p5 = scmp.ne.s32.totalorder %s2802_s7, %s2371_s18  ;;  %s2376_s20 = sshll.u32 %s2576_s1, 4  ;;  %s2377_s20 = int_to_ptr.vmem [resolvable:$false] %s2376_s20 }
  0x5d   : > { %s2378_s10 = scalar_lea.vmem %s2377_s20, 512  ;;  %p2379_p9 = scmp.lt.s32.totalorder %s2802_s7, %s2377_s20 }
  0x5e   : > { %p2374_p6 = pnand %p2372_p5, %p2358_p8  ;;  %p2380_p10 = scmp.lt.s32.totalorder %s2378_s10, %s2371_s18 }
  0x60   : > { %p2375_p12 = pneg %p2374_p6  ;;  %p2381_p3 = por %p2380_p10, %p2379_p9 }
  0x62   : > { %p2382_p11 = pnand %p2381_p3, %p2375_p12 }
  0x64   : > { %2385 = shalt.err (!%p2382_p11)
}
  0x65   : > { %2194 = dma.hbm_to_vmem [thread:$0]  (!%p2798_p4), %s2792_s22, 256, %s2802_s7, %s159_s9  }
  0x66   : > { %s1629_s3 = sadd.s32 4294967294, %s2570_s25   ;;  %p93_p7 = scmp.eq.s32.totalorder %s2771_s30, 0 }
  0x67   : > { %s95_s28 = sadd.s32 1, %s2526_s14  ;;  %p102_p9 = scmp.ne.s32.totalorder %s2526_s14, %s2522_s13 }
  0x68   : > { %s2835_s4 = scalar_select %p93_p7, %s2526_s14, %s95_s28  }
  0x69   : > { %p3614_p12 = scmp.eq.s32.totalorder %s2570_s25, 0  ;;  %p108_p1 = scmp.ne.s32.totalorder %s2522_s13, %s2518_s12 }
  0x6a   : > { %p132_p13 = scmp.eq.s32.totalorder %s2735_s8, 17  ;;  %p138_p0 = scmp.eq.s32.totalorder %s1629_s3, 17 }
  0x6b   : > { %p2839_p8 = por %p102_p9, %p3614_p12  ;;  %p3616_p5 = scmp.eq.s32.totalorder %s2735_s8, 0 }
  0x6c   : > { %s203_s22 = sand.u32 1, %s2526_s14   ;;  %p2853_p4 = por %p132_p13, %p102_p9 }
  0x6d   : > { %p2848_p6 = por %p108_p1, %p3616_p5  ;;  %p2857_p10 = por %p138_p0, %p108_p1 }
  0x6e   : > { %s3618_s30 = scalar_select %p2853_p4, 1, 0 }
  0x6f   : > { %s3617_s18 = scalar_select %p2848_p6, 1, 0 }
  0x70   : > { %s3619_s7 = scalar_select %p2857_p10, 1, 0 }
  0x71   : > { %s1640_s9 = sshll.u32 %s203_s22, 2  ;;  %s1657_s1 = sshll.u32 %s2566_s24, 6 }
  0x72   : > { %s2865_s3 = scalar_lea.hbm %s3578_s2, %s1657_s1  ;;  %s205_s28 = scalar_lea.vmem [#allocation8], %s1640_s9 }
  0x73   : > { %s213_s0 = sshll.u32 %s205_s28, 4  ;;  %p3620_p3 = scmp.lt.s32.totalorder %s2570_s25, 18  ;;  %s214_s0 = int_to_ptr.vmem [resolvable:$true] %s213_s0 }
  0x74   : > { %s2386_s22 = scalar_lea.hbm %s2865_s3, 64  ;;  %s2391_s15 = scalar_lea.hbm %s3578_s2, 128 }
  0x75   : > { %p2871_p11 = pnand %p3620_p3, %p2839_p8  ;;  %p2387_p7 = scmp.ne.s32.totalorder %s2865_s3, %s2386_s22 }
  0x76   : > { %p2392_p8 = scmp.lt.u32.totalorder %s2865_s3, %s3578_s2  ;;  %p2393_p13 = scmp.lt.u32.totalorder %s2391_s15, %s2386_s22 }
  0x77   : > { %p2388_p9 = pneg %p2871_p11  ;;  %p2395_p5 = scmp.lt.u32.totalorder %s2386_s22, %s2865_s3 }
  0x78   : > { %p2394_p0 = por %p2393_p13, %p2392_p8 }
  0x79   : > { %p2389_p12 = pnand %p2388_p9, %p2387_p7 }
  0x7a   : > { %p2396_p3 = por %p2395_p5, %p2394_p0 }
  0x7b   : > { %p2390_p1 = pneg %p2389_p12 }
  0x7d   : > { %p2397_p10 = pnand %p2396_p3, %p2390_p1 }
  0x7f   : > { %2400 = shalt.err (!%p2397_p10)
}
  0x80   : > { %s2401_s28 = scalar_lea.vmem %s214_s0, 64  ;;  %s2577_s24 = smov [#allocation8]  }
  0x81   : > { %p2402_p4 = scmp.ne.s32.totalorder %s214_s0, %s2401_s28  ;;  %s2406_s1 = sshll.u32 %s2577_s24, 4  ;;  %s2407_s1 = int_to_ptr.vmem [resolvable:$false] %s2406_s1 }
  0x82   : > { %s2408_s9 = scalar_lea.vmem %s2407_s1, 128  ;;  %p2409_p6 = scmp.lt.s32.totalorder %s214_s0, %s2407_s1 }
  0x83   : > { %p2404_p7 = pnand %p2402_p4, %p2388_p9  ;;  %p2410_p2 = scmp.lt.s32.totalorder %s2408_s9, %s2401_s28 }
  0x85   : > { %p2405_p12 = pneg %p2404_p7  ;;  %p2411_p8 = por %p2410_p2, %p2409_p6 }
  0x87   : > { %p2412_p13 = pnand %p2411_p8, %p2405_p12 }
  0x89   : > { %2415 = shalt.err (!%p2412_p13)
}
  0x8a   : > { %2200 = dma.hbm_to_vmem [thread:$0]  (!%p2871_p11), %s2865_s3, 64, %s214_s0, %s2699_s29  }
  0x8b   : > { %p3622_p10 = scmp.ne.s32.totalorder %s3600_s6, 0 }
  0x8c   : > { %s224_s22 = sand.u32 (!%p3622_p10), 1, %s2546_s19   ;;  %p3623_p4 = scmp.ne.s32.totalorder (!%p3622_p10), %s3607_s27, 0 }
  0x8d   : > { %222 = sbr.rel (%p3622_p10) target bundleno = 690 (0x2b2), region = 32  ;;  %s2900_s15 = sshll.u32 (!%p3622_p10), %s224_s22, 4 }
  0x8e   : > { %s225_s24 = scalar_lea.sflag (!%p3622_p10), [#allocation4], %s224_s22  ;;  %s228_s20 = scalar_lea.vmem (!%p3622_p10), [#allocation3], %s2900_s15 }
  0x94   : > { %2501 = dma.done.wait (%p3623_p4), %s225_s24, 256  }
  0x95   : > { %2503 = vsyncadd (%p3623_p4), %s225_s24, 4294967040  ;;  %s233_s0 = sand.u32 1, %s2735_s8   ;;  %s235_s29 = sand.u32 1, %s2534_s16  }
  0x96   : > { %s1645_s6 = sshll.u32 %s235_s29, 12  ;;  %s234_s26 = scalar_lea.sflag [#allocation7], %s233_s0 }
  0x97   : > { %s2909_s3 = scalar_lea.vmem [#allocation6], %s1645_s6  ;;  %p3624_p2 = scmp.ne.s32.totalorder %s3609_s5, 0 }
  0x99   : > { %2505 = dma.done.wait (%p3624_p2), %s234_s26, 65536  }
  0x9a   : > { %2507 = vsyncadd (%p3624_p2), %s234_s26, 4294901760  ;;  %s2916_s10 = sand.u32 1, %s2522_s13   ;;  %p3625_p6 = scmp.ne.s32.totalorder %s3617_s18, 0 }
  0x9b   : > { %s1646_s27 = sshll.u32 %s2916_s10, 2 }
  0x9c   : > { %s2919_s28 = scalar_lea.vmem [#allocation8], %s1646_s27 }
  0x9d   : > { %2509 = dma.done.wait (%p3625_p6), %s234_s26, 64  }
  0x9e   : > { %2511 = vsyncadd (%p3625_p6), %s234_s26, 4294967232  ;;  %s1647_s8 = sshll.u32 %s2916_s10, 3  ;;  %p1648_p11 = scmp.ne.s32.totalorder %s2554_s21, 0 }
  0x9f   : > { %s2926_s1 = scalar_lea.vmem [#allocation9], %s1647_s8  ;;  %v2578_v0 = vmov (!%p1648_p11), 0.0  }
  0xa0   : > { %287 = sbr.rel (%p1648_p11) target bundleno = 167 (0xa7), region = 48  ;;  %288 = vst [vmem:[#allocation2] sm:$0xff] (!%p1648_p11), %v2578_v0 }
  0xa7 PF: > { %v293_v1 = vld [vmem:[%s2909_s3 + $0x8] sm:$0xff]  ;;  %v295_v3 = vld [vmem:[%s2909_s3 + $0x18] sm:$0xff]  ;;  %v292_v6 = vld [vmem:[%s2909_s3] sm:$0xff]  ;;  %p1649_p9 = scmp.ne.s32.totalorder %s2554_s21, 8 }
  0xa8   : > { %v297_v2 = vld [vmem:[%s2909_s3 + $0x28] sm:$0xff]  ;;  %v299_v5 = vld [vmem:[%s2909_s3 + $0x38] sm:$0xff]  ;;  %v296_v7 = vld [vmem:[%s2909_s3 + $0x20] sm:$0xff] }
  0xa9   : > { %v1659_v4 = vpack.c.bf16 %v297_v2, %v293_v1  ;;  %v1915_v8 = vpack.c.bf16 %v299_v5, %v295_v3  ;;  %v1661_v9 = vpack.c.bf16 %v296_v7, %v292_v6  ;;  %v294_v10 = vld [vmem:[%s2909_s3 + $0x10] sm:$0xff]  ;;  %v301_v12 = vld [vmem:[%s2909_s3 + $0x48] sm:$0xff]  ;;  %v303_v15 = vld [vmem:[%s2909_s3 + $0x58] sm:$0xff] }
  0xaa   : > { %v298_v11 = vld [vmem:[%s2909_s3 + $0x30] sm:$0xff]  ;;  %v305_v14 = vld [vmem:[%s2909_s3 + $0x68] sm:$0xff]  ;;  %v307_v16 = vld [vmem:[%s2909_s3 + $0x78] sm:$0xff] }
  0xab   : > { %1660 = vmatprep.subr.bf16.mxu0 %v1659_v4  ;;  %v1917_v13 = vpack.c.bf16 %v298_v11, %v294_v10  ;;  %1916 = vmatprep.subr.bf16.mxu1 %v1915_v8  ;;  %v1663_v17 = vpack.c.bf16 %v305_v14, %v301_v12  ;;  %v1919_v18 = vpack.c.bf16 %v307_v16, %v303_v15  ;;  %v300_v19 = vld [vmem:[%s2909_s3 + $0x40] sm:$0xff]  ;;  %v302_v21 = vld [vmem:[%s2909_s3 + $0x50] sm:$0xff]  ;;  %v309_v24 = vld [vmem:[%s2909_s3 + $0x88] sm:$0xff] }
  0xac   : > { %1662 = vmatpush1.bf16.msra.mxu0 %v1661_v9  ;;  %v304_v20 = vld [vmem:[%s2909_s3 + $0x60] sm:$0xff]  ;;  %v306_v23 = vld [vmem:[%s2909_s3 + $0x70] sm:$0xff]  ;;  %v313_v25 = vld [vmem:[%s2909_s3 + $0xa8] sm:$0xff] }
  0xad   : > { %1918 = vmatpush1.bf16.msra.mxu1 %v1917_v13  ;;  %v1665_v22 = vpack.c.bf16 %v304_v20, %v300_v19  ;;  %1664 = vmatprep.subr.bf16.mxu0 %v1663_v17  ;;  %v1921_v26 = vpack.c.bf16 %v306_v23, %v302_v21  ;;  %v1667_v27 = vpack.c.bf16 %v313_v25, %v309_v24  ;;  %v311_v28 = vld [vmem:[%s2909_s3 + $0x98] sm:$0xff]  ;;  %v308_v30 = vld [vmem:[%s2909_s3 + $0x80] sm:$0xff]  ;;  %v310_v33 = vld [vmem:[%s2909_s3 + $0x90] sm:$0xff] }
  0xae   : > { %1920 = vmatprep.subr.bf16.mxu1 %v1919_v18  ;;  %v315_v29 = vld [vmem:[%s2909_s3 + $0xb8] sm:$0xff]  ;;  %v312_v32 = vld [vmem:[%s2909_s3 + $0xa0] sm:$0xff]  ;;  %v314_v34 = vld [vmem:[%s2909_s3 + $0xb0] sm:$0xff] }
  0xaf   : > { %v1923_v31 = vpack.c.bf16 %v315_v29, %v311_v28  ;;  %v1669_v35 = vpack.c.bf16 %v312_v32, %v308_v30  ;;  %v317_v36 = vld [vmem:[%s2909_s3 + $0xc8] sm:$0xff]  ;;  %v319_v38 = vld [vmem:[%s2909_s3 + $0xd8] sm:$0xff]  ;;  %v1925_v39 = vpack.c.bf16 %v314_v34, %v310_v33  ;;  %v316_v42 = vld [vmem:[%s2909_s3 + $0xc0] sm:$0xff] }
  0xb0   : > { %1666 = vmatpush1.bf16.msra.mxu0 %v1665_v22  ;;  %v321_v37 = vld [vmem:[%s2909_s3 + $0xe8] sm:$0xff]  ;;  %v323_v41 = vld [vmem:[%s2909_s3 + $0xf8] sm:$0xff]  ;;  %v320_v43 = vld [vmem:[%s2909_s3 + $0xe0] sm:$0xff] }
  0xb1   : > { %1922 = vmatpush1.bf16.msra.mxu1 %v1921_v26  ;;  %1668 = vmatprep.subr.bf16.mxu0 %v1667_v27  ;;  %v1671_v40 = vpack.c.bf16 %v321_v37, %v317_v36  ;;  %v1927_v44 = vpack.c.bf16 %v323_v41, %v319_v38  ;;  %v318_v45 = vld [vmem:[%s2909_s3 + $0xd0] sm:$0xff]  ;;  %v325_v47 = vld [vmem:[%s2909_s3 + $0x108] sm:$0xff]  ;;  %v327_v49 = vld [vmem:[%s2909_s3 + $0x118] sm:$0xff]  ;;  %v1673_v51 = vpack.c.bf16 %v320_v43, %v316_v42 }
  0xb2   : > { %1924 = vmatprep.subr.bf16.mxu1 %v1923_v31  ;;  %v322_v46 = vld [vmem:[%s2909_s3 + $0xf0] sm:$0xff]  ;;  %v329_v48 = vld [vmem:[%s2909_s3 + $0x128] sm:$0xff]  ;;  %v331_v50 = vld [vmem:[%s2909_s3 + $0x138] sm:$0xff] }
  0xb3   : > { %v1929_v52 = vpack.c.bf16 %v322_v46, %v318_v45  ;;  %v1675_v53 = vpack.c.bf16 %v329_v48, %v325_v47  ;;  %v324_v54 = vld [vmem:[%s2909_s3 + $0x100] sm:$0xff]  ;;  %v326_v56 = vld [vmem:[%s2909_s3 + $0x110] sm:$0xff]  ;;  %v1931_v57 = vpack.c.bf16 %v331_v50, %v327_v49  ;;  %v333_v59 = vld [vmem:[%s2909_s3 + $0x148] sm:$0xff]  ;;  %v2579_v47 = vmov 1983009808  }
  0xb4   : > { %1670 = vmatpush1.bf16.msra.mxu0 %v1669_v35  ;;  %v328_v55 = vld [vmem:[%s2909_s3 + $0x120] sm:$0xff]  ;;  %v330_v58 = vld [vmem:[%s2909_s3 + $0x130] sm:$0xff]  ;;  %v337_v60 = vld [vmem:[%s2909_s3 + $0x168] sm:$0xff]  ;;  %v808_v48 = vunpack.c.l.s4 %v2579_v47  ;;  %v810_v49 = vlaneseq }
  0xb5   : > { %1926 = vmatpush1.bf16.msra.mxu1 %v1925_v39  ;;  %1672 = vmatprep.subr.bf16.mxu0 %v1671_v40  ;;  %v335_v61 = vld [vmem:[%s2909_s3 + $0x158] sm:$0xff]  ;;  %v1677_v63 = vpack.c.bf16 %v328_v55, %v324_v54  ;;  %v1933_v0 = vpack.c.bf16 %v330_v58, %v326_v56  ;;  %v1679_v1 = vpack.c.bf16 %v337_v60, %v333_v59  ;;  %v332_v2 = vld [vmem:[%s2909_s3 + $0x140] sm:$0xff]  ;;  %v334_v4 = vld [vmem:[%s2909_s3 + $0x150] sm:$0xff] }
  0xb6   : > { %1928 = vmatprep.subr.bf16.mxu1 %v1927_v44  ;;  %v339_v62 = vld [vmem:[%s2909_s3 + $0x178] sm:$0xff]  ;;  %v336_v3 = vld [vmem:[%s2909_s3 + $0x160] sm:$0xff]  ;;  %v338_v6 = vld [vmem:[%s2909_s3 + $0x170] sm:$0xff] }
  0xb7   : > { %v1935_v5 = vpack.c.bf16 %v339_v62, %v335_v61  ;;  %v341_v7 = vld [vmem:[%s2909_s3 + $0x188] sm:$0xff]  ;;  %v343_v9 = vld [vmem:[%s2909_s3 + $0x198] sm:$0xff]  ;;  %v1681_v11 = vpack.c.bf16 %v336_v3, %v332_v2  ;;  %v1937_v12 = vpack.c.bf16 %v338_v6, %v334_v4  ;;  %v340_v14 = vld [vmem:[%s2909_s3 + $0x180] sm:$0xff]  ;;  %v809_v62 = vunpack.c.0.s8 %v808_v48 }
  0xb8   : > { %1674 = vmatpush1.bf16.msra.mxu0 %v1673_v51  ;;  %v345_v8 = vld [vmem:[%s2909_s3 + $0x1a8] sm:$0xff]  ;;  %v347_v10 = vld [vmem:[%s2909_s3 + $0x1b8] sm:$0xff]  ;;  %v344_v15 = vld [vmem:[%s2909_s3 + $0x1a0] sm:$0xff] }
  0xb9   : > { %1930 = vmatpush1.bf16.msra.mxu1 %v1929_v52  ;;  %1676 = vmatprep.subr.bf16.mxu0 %v1675_v53  ;;  %v1683_v13 = vpack.c.bf16 %v345_v8, %v341_v7  ;;  %v342_v16 = vld [vmem:[%s2909_s3 + $0x190] sm:$0xff]  ;;  %v1939_v17 = vpack.c.bf16 %v347_v10, %v343_v9  ;;  %v349_v19 = vld [vmem:[%s2909_s3 + $0x1c8] sm:$0xff]  ;;  %v351_v21 = vld [vmem:[%s2909_s3 + $0x1d8] sm:$0xff]  ;;  %v1685_v23 = vpack.c.bf16 %v344_v15, %v340_v14 }
  0xba   : > { %1932 = vmatprep.subr.bf16.mxu1 %v1931_v57  ;;  %v346_v18 = vld [vmem:[%s2909_s3 + $0x1b0] sm:$0xff]  ;;  %v353_v20 = vld [vmem:[%s2909_s3 + $0x1e8] sm:$0xff]  ;;  %v355_v22 = vld [vmem:[%s2909_s3 + $0x1f8] sm:$0xff] }
  0xbb   : > { %v1941_v24 = vpack.c.bf16 %v346_v18, %v342_v16  ;;  %v1687_v25 = vpack.c.bf16 %v353_v20, %v349_v19  ;;  %v348_v26 = vld [vmem:[%s2909_s3 + $0x1c0] sm:$0xff]  ;;  %v350_v28 = vld [vmem:[%s2909_s3 + $0x1d0] sm:$0xff]  ;;  %v1943_v29 = vpack.c.bf16 %v355_v22, %v351_v21  ;;  %v357_v31 = vld [vmem:[%s2909_s3 + $0x208] sm:$0xff] }
  0xbc   : > { %1678 = vmatpush1.bf16.msra.mxu0 %v1677_v63  ;;  %v352_v27 = vld [vmem:[%s2909_s3 + $0x1e0] sm:$0xff]  ;;  %v354_v30 = vld [vmem:[%s2909_s3 + $0x1f0] sm:$0xff]  ;;  %v361_v32 = vld [vmem:[%s2909_s3 + $0x228] sm:$0xff]  ;;  %v3013_v63 = vshrl.u32 %v810_v49, 7 }
  0xbd   : > { %1934 = vmatpush1.bf16.msra.mxu1 %v1933_v0  ;;  %1680 = vmatprep.subr.bf16.mxu0 %v1679_v1  ;;  %v359_v33 = vld [vmem:[%s2909_s3 + $0x218] sm:$0xff]  ;;  %v1689_v35 = vpack.c.bf16 %v352_v27, %v348_v26  ;;  %v1945_v36 = vpack.c.bf16 %v354_v30, %v350_v28  ;;  %v1691_v37 = vpack.c.bf16 %v361_v32, %v357_v31  ;;  %v356_v38 = vld [vmem:[%s2909_s3 + $0x200] sm:$0xff]  ;;  %v358_v40 = vld [vmem:[%s2909_s3 + $0x210] sm:$0xff] }
  0xbe   : > { %1936 = vmatprep.subr.bf16.mxu1 %v1935_v5  ;;  %v363_v34 = vld [vmem:[%s2909_s3 + $0x238] sm:$0xff]  ;;  %v360_v39 = vld [vmem:[%s2909_s3 + $0x220] sm:$0xff]  ;;  %v362_v42 = vld [vmem:[%s2909_s3 + $0x230] sm:$0xff] }
  0xbf   : > { %v1947_v41 = vpack.c.bf16 %v363_v34, %v359_v33  ;;  %v365_v43 = vld [vmem:[%s2909_s3 + $0x248] sm:$0xff]  ;;  %v367_v45 = vld [vmem:[%s2909_s3 + $0x258] sm:$0xff]  ;;  %v1693_v50 = vpack.c.bf16 %v360_v39, %v356_v38  ;;  %v1949_v51 = vpack.c.bf16 %v362_v42, %v358_v40  ;;  %v364_v53 = vld [vmem:[%s2909_s3 + $0x240] sm:$0xff] }
  0xc0   : > { %1682 = vmatpush1.bf16.msra.mxu0 %v1681_v11  ;;  %v369_v44 = vld [vmem:[%s2909_s3 + $0x268] sm:$0xff]  ;;  %v371_v46 = vld [vmem:[%s2909_s3 + $0x278] sm:$0xff]  ;;  %v368_v54 = vld [vmem:[%s2909_s3 + $0x260] sm:$0xff] }
  0xc1   : > { %1938 = vmatpush1.bf16.msra.mxu1 %v1937_v12  ;;  %1684 = vmatprep.subr.bf16.mxu0 %v1683_v13  ;;  %v1695_v52 = vpack.c.bf16 %v369_v44, %v365_v43  ;;  %v366_v55 = vld [vmem:[%s2909_s3 + $0x250] sm:$0xff]  ;;  %v1951_v56 = vpack.c.bf16 %v371_v46, %v367_v45  ;;  %v373_v58 = vld [vmem:[%s2909_s3 + $0x288] sm:$0xff]  ;;  %v375_v60 = vld [vmem:[%s2909_s3 + $0x298] sm:$0xff]  ;;  %v1697_v0 = vpack.c.bf16 %v368_v54, %v364_v53 }
  0xc2   : > { %1940 = vmatprep.subr.bf16.mxu1 %v1939_v17  ;;  %v370_v57 = vld [vmem:[%s2909_s3 + $0x270] sm:$0xff]  ;;  %v377_v59 = vld [vmem:[%s2909_s3 + $0x2a8] sm:$0xff]  ;;  %v379_v61 = vld [vmem:[%s2909_s3 + $0x2b8] sm:$0xff]  ;;  %v3024_v12 = vsub.s32 %v809_v62, %v3013_v63 }
  0xc3   : > { %v1953_v1 = vpack.c.bf16 %v370_v57, %v366_v55  ;;  %v1699_v2 = vpack.c.bf16 %v377_v59, %v373_v58  ;;  %v372_v3 = vld [vmem:[%s2909_s3 + $0x280] sm:$0xff]  ;;  %v374_v5 = vld [vmem:[%s2909_s3 + $0x290] sm:$0xff]  ;;  %v1955_v6 = vpack.c.bf16 %v379_v61, %v375_v60  ;;  %v381_v8 = vld [vmem:[%s2909_s3 + $0x2c8] sm:$0xff] }
  0xc4   : > { %1686 = vmatpush1.bf16.msra.mxu0 %v1685_v23  ;;  %v376_v4 = vld [vmem:[%s2909_s3 + $0x2a0] sm:$0xff]  ;;  %v378_v7 = vld [vmem:[%s2909_s3 + $0x2b0] sm:$0xff]  ;;  %v385_v9 = vld [vmem:[%s2909_s3 + $0x2e8] sm:$0xff] }
  0xc5   : > { %1942 = vmatpush1.bf16.msra.mxu1 %v1941_v24  ;;  %1688 = vmatprep.subr.bf16.mxu0 %v1687_v25  ;;  %v383_v10 = vld [vmem:[%s2909_s3 + $0x2d8] sm:$0xff]  ;;  %v1701_v13 = vpack.c.bf16 %v376_v4, %v372_v3  ;;  %v380_v14 = vld [vmem:[%s2909_s3 + $0x2c0] sm:$0xff]  ;;  %v1957_v15 = vpack.c.bf16 %v378_v7, %v374_v5  ;;  %v1703_v16 = vpack.c.bf16 %v385_v9, %v381_v8  ;;  %v382_v18 = vld [vmem:[%s2909_s3 + $0x2d0] sm:$0xff] }
  0xc6   : > { %1944 = vmatprep.subr.bf16.mxu1 %v1943_v29  ;;  %v387_v11 = vld [vmem:[%s2909_s3 + $0x2f8] sm:$0xff]  ;;  %v384_v17 = vld [vmem:[%s2909_s3 + $0x2e0] sm:$0xff]  ;;  %v386_v19 = vld [vmem:[%s2909_s3 + $0x2f0] sm:$0xff] }
  0xc7   : > { %v1959_v20 = vpack.c.bf16 %v387_v11, %v383_v10  ;;  %v389_v21 = vld [vmem:[%s2909_s3 + $0x308] sm:$0xff]  ;;  %v3034_v23 = vld [vmem:[%s228_s20] sm:$0xff]  ;;  %v391_v24 = vld [vmem:[%s2909_s3 + $0x318] sm:$0xff]  ;;  %v1705_v27 = vpack.c.bf16 %v384_v17, %v380_v14  ;;  %v1961_v28 = vpack.c.bf16 %v386_v19, %v382_v18 }
  0xc8   : > { %1690 = vmatpush1.bf16.msra.mxu0 %v1689_v35  ;;  %v393_v22 = vld [vmem:[%s2909_s3 + $0x328] sm:$0xff]  ;;  %v395_v25 = vld [vmem:[%s2909_s3 + $0x338] sm:$0xff]  ;;  %v3040_v26 = vrot.slane %v3034_v23, %v3024_v12  ;;  %v388_v30 = vld [vmem:[%s2909_s3 + $0x300] sm:$0xff]  ;;  %v806_v9 = vcombine.high %v3034_v23, %v3034_v23 }
  0xc9   : > { %1946 = vmatpush1.bf16.msra.mxu1 %v1945_v36  ;;  %1692 = vmatprep.subr.bf16.mxu0 %v1691_v37  ;;  %v1707_v29 = vpack.c.bf16 %v393_v22, %v389_v21  ;;  %v392_v31 = vld [vmem:[%s2909_s3 + $0x320] sm:$0xff]  ;;  %v390_v32 = vld [vmem:[%s2909_s3 + $0x310] sm:$0xff]  ;;  %v1963_v34 = vpack.c.bf16 %v395_v25, %v391_v24  ;;  %v397_v36 = vld [vmem:[%s2909_s3 + $0x348] sm:$0xff] }
  0xca   : > { %1948 = vmatprep.subr.bf16.mxu1 %v1947_v41  ;;  %v821_v33 = vcombine.high %v3040_v26, %v3040_v26  ;;  %v394_v35 = vld [vmem:[%s2909_s3 + $0x330] sm:$0xff]  ;;  %v401_v37 = vld [vmem:[%s2909_s3 + $0x368] sm:$0xff]  ;;  %v399_v38 = vld [vmem:[%s2909_s3 + $0x358] sm:$0xff]  ;;  %v1709_v40 = vpack.c.bf16 %v392_v31, %v388_v30  ;;  %v3085_v25 = vrot.slane %v806_v9, %v3024_v12 }
  0xcb   : > { %v403_v39 = vld [vmem:[%s2909_s3 + $0x378] sm:$0xff]  ;;  %v1965_v41 = vpack.c.bf16 %v394_v35, %v390_v32  ;;  %v1711_v42 = vpack.c.bf16 %v401_v37, %v397_v36  ;;  %v396_v43 = vld [vmem:[%s2909_s3 + $0x340] sm:$0xff]  ;;  %v398_v45 = vld [vmem:[%s2909_s3 + $0x350] sm:$0xff] }
  0xcc   : > { %1694 = vmatpush1.bf16.msra.mxu0 %v1693_v50  ;;  %912 = vmatprep.mubr.f32.mxu0 %v821_v33  ;;  %v400_v44 = vld [vmem:[%s2909_s3 + $0x360] sm:$0xff]  ;;  %v1967_v46 = vpack.c.bf16 %v403_v39, %v399_v38  ;;  %v402_v47 = vld [vmem:[%s2909_s3 + $0x370] sm:$0xff]  ;;  %v405_v48 = vld [vmem:[%s2909_s3 + $0x388] sm:$0xff]  ;;  %v822_v39 = vcombine.high %v3085_v25, %v3085_v25 }
  0xcd   : > { %1950 = vmatpush1.bf16.msra.mxu1 %v1949_v51  ;;  %1696 = vmatprep.subr.bf16.mxu0 %v1695_v52  ;;  %v409_v49 = vld [vmem:[%s2909_s3 + $0x3a8] sm:$0xff]  ;;  %v407_v50 = vld [vmem:[%s2909_s3 + $0x398] sm:$0xff]  ;;  %v1713_v52 = vpack.c.bf16 %v400_v44, %v396_v43  ;;  %v1969_v53 = vpack.c.bf16 %v402_v47, %v398_v45  ;;  %v404_v55 = vld [vmem:[%s2909_s3 + $0x380] sm:$0xff] }
  0xce   : > { %1952 = vmatprep.subr.bf16.mxu1 %v1951_v56  ;;  %1196 = vmatprep.mubr.f32.mxu1 %v821_v33  ;;  %v411_v51 = vld [vmem:[%s2909_s3 + $0x3b8] sm:$0xff]  ;;  %v1715_v54 = vpack.c.bf16 %v409_v49, %v405_v48  ;;  %v408_v56 = vld [vmem:[%s2909_s3 + $0x3a0] sm:$0xff]  ;;  %v406_v57 = vld [vmem:[%s2909_s3 + $0x390] sm:$0xff] }
  0xcf   : > { %v1971_v58 = vpack.c.bf16 %v411_v51, %v407_v50  ;;  %v410_v59 = vld [vmem:[%s2909_s3 + $0x3b0] sm:$0xff]  ;;  %v413_v60 = vld [vmem:[%s2909_s3 + $0x3c8] sm:$0xff]  ;;  %v415_v62 = vld [vmem:[%s2909_s3 + $0x3d8] sm:$0xff] }
  0xd0   : > { %1698 = vmatpush1.bf16.msra.mxu0 %v1697_v0  ;;  %v417_v61 = vld [vmem:[%s2909_s3 + $0x3e8] sm:$0xff]  ;;  %v419_v0 = vld [vmem:[%s2909_s3 + $0x3f8] sm:$0xff]  ;;  %v412_v4 = vld [vmem:[%s2909_s3 + $0x3c0] sm:$0xff] }
  0xd1   : > { %1954 = vmatpush1.bf16.msra.mxu1 %v1953_v1  ;;  %1700 = vmatprep.subr.bf16.mxu0 %v1699_v2  ;;  %v1717_v1 = vpack.c.bf16 %v408_v56, %v404_v55  ;;  %v1973_v2 = vpack.c.bf16 %v410_v59, %v406_v57  ;;  %v1719_v3 = vpack.c.bf16 %v417_v61, %v413_v60  ;;  %v416_v5 = vld [vmem:[%s2909_s3 + $0x3e0] sm:$0xff]  ;;  %v418_v8 = vld [vmem:[%s2909_s3 + $0x3f0] sm:$0xff]  ;;  %v421_v10 = vld [vmem:[%s2909_s3 + $0x408] sm:$0xff] }
  0xd2   : > { %1956 = vmatprep.subr.bf16.mxu1 %v1955_v6  ;;  %v414_v6 = vld [vmem:[%s2909_s3 + $0x3d0] sm:$0xff]  ;;  %v1975_v7 = vpack.c.bf16 %v419_v0, %v415_v62  ;;  %v425_v11 = vld [vmem:[%s2909_s3 + $0x428] sm:$0xff]  ;;  %v427_v14 = vld [vmem:[%s2909_s3 + $0x438] sm:$0xff] }
  0xd3   : > { %v1723_v17 = vpack.c.bf16 %v425_v11, %v421_v10  ;;  %v420_v18 = vld [vmem:[%s2909_s3 + $0x400] sm:$0xff]  ;;  %v426_v22 = vld [vmem:[%s2909_s3 + $0x430] sm:$0xff]  ;;  %v429_v23 = vld [vmem:[%s2909_s3 + $0x448] sm:$0xff] }
  0xd4   : > { %1702 = vmatpush1.bf16.msra.mxu0 %v1701_v13  ;;  %v423_v13 = vld [vmem:[%s2909_s3 + $0x418] sm:$0xff]  ;;  %v424_v19 = vld [vmem:[%s2909_s3 + $0x420] sm:$0xff]  ;;  %v433_v24 = vld [vmem:[%s2909_s3 + $0x468] sm:$0xff] }
  0xd5   : > { %1958 = vmatpush1.bf16.msra.mxu1 %v1957_v15  ;;  %1704 = vmatprep.subr.bf16.mxu0 %v1703_v16  ;;  %v1721_v15 = vpack.c.bf16 %v416_v5, %v412_v4  ;;  %v1977_v16 = vpack.c.bf16 %v418_v8, %v414_v6  ;;  %v1979_v21 = vpack.c.bf16 %v427_v14, %v423_v13  ;;  %v428_v32 = vld [vmem:[%s2909_s3 + $0x440] sm:$0xff]  ;;  %v434_v36 = vld [vmem:[%s2909_s3 + $0x470] sm:$0xff]  ;;  %v437_v37 = vld [vmem:[%s2909_s3 + $0x488] sm:$0xff] }
  0xd6   : > { %1960 = vmatprep.subr.bf16.mxu1 %v1959_v20  ;;  %v422_v20 = vld [vmem:[%s2909_s3 + $0x410] sm:$0xff]  ;;  %v1727_v31 = vpack.c.bf16 %v433_v24, %v429_v23  ;;  %v432_v33 = vld [vmem:[%s2909_s3 + $0x460] sm:$0xff]  ;;  %v441_v38 = vld [vmem:[%s2909_s3 + $0x4a8] sm:$0xff] }
  0xd7   : > { %v1981_v30 = vpack.c.bf16 %v426_v22, %v422_v20  ;;  %v1731_v44 = vpack.c.bf16 %v441_v38, %v437_v37  ;;  %v436_v45 = vld [vmem:[%s2909_s3 + $0x480] sm:$0xff]  ;;  %v438_v47 = vld [vmem:[%s2909_s3 + $0x490] sm:$0xff]  ;;  %v445_v50 = vld [vmem:[%s2909_s3 + $0x4c8] sm:$0xff] }
  0xd8   : > { %1706 = vmatpush1.bf16.msra.mxu0 %v1705_v27  ;;  %v431_v27 = vld [vmem:[%s2909_s3 + $0x458] sm:$0xff]  ;;  %v442_v49 = vld [vmem:[%s2909_s3 + $0x4b0] sm:$0xff]  ;;  %v449_v51 = vld [vmem:[%s2909_s3 + $0x4e8] sm:$0xff] }
  0xd9   : > { %1962 = vmatpush1.bf16.msra.mxu1 %v1961_v28  ;;  %1708 = vmatprep.subr.bf16.mxu0 %v1707_v29  ;;  %v435_v28 = vld [vmem:[%s2909_s3 + $0x478] sm:$0xff]  ;;  %v1725_v29 = vpack.c.bf16 %v424_v19, %v420_v18  ;;  %v1735_v55 = vpack.c.bf16 %v449_v51, %v445_v50  ;;  %v444_v56 = vld [vmem:[%s2909_s3 + $0x4c0] sm:$0xff]  ;;  %v450_v60 = vld [vmem:[%s2909_s3 + $0x4f0] sm:$0xff] }
  0xda   : > { %1964 = vmatprep.subr.bf16.mxu1 %v1963_v34  ;;  %v430_v34 = vld [vmem:[%s2909_s3 + $0x450] sm:$0xff]  ;;  %v1983_v35 = vpack.c.bf16 %v435_v28, %v431_v27  ;;  %v448_v57 = vld [vmem:[%s2909_s3 + $0x4e0] sm:$0xff]  ;;  %v453_v61 = vld [vmem:[%s2909_s3 + $0x508] sm:$0xff] }
  0xdb   : > { %v1985_v43 = vpack.c.bf16 %v434_v36, %v430_v34  ;;  %v457_v62 = vld [vmem:[%s2909_s3 + $0x528] sm:$0xff]  ;;  %v455_v0 = vld [vmem:[%s2909_s3 + $0x518] sm:$0xff]  ;;  %v452_v5 = vld [vmem:[%s2909_s3 + $0x500] sm:$0xff] }
  0xdc   : > { %1710 = vmatpush1.bf16.msra.mxu0 %v1709_v40  ;;  %v439_v40 = vld [vmem:[%s2909_s3 + $0x498] sm:$0xff]  ;;  %v1739_v4 = vpack.c.bf16 %v457_v62, %v453_v61  ;;  %v456_v6 = vld [vmem:[%s2909_s3 + $0x520] sm:$0xff]  ;;  %v458_v9 = vld [vmem:[%s2909_s3 + $0x530] sm:$0xff] }
  0xdd   : > { %1966 = vmatpush1.bf16.msra.mxu1 %v1965_v41  ;;  %1712 = vmatprep.subr.bf16.mxu0 %v1711_v42  ;;  %v443_v41 = vld [vmem:[%s2909_s3 + $0x4b8] sm:$0xff]  ;;  %v1729_v42 = vpack.c.bf16 %v432_v33, %v428_v32  ;;  %v461_v10 = vld [vmem:[%s2909_s3 + $0x548] sm:$0xff]  ;;  %v460_v18 = vld [vmem:[%s2909_s3 + $0x540] sm:$0xff] }
  0xde   : > { %1968 = vmatprep.subr.bf16.mxu1 %v1967_v46  ;;  %v440_v46 = vld [vmem:[%s2909_s3 + $0x4a0] sm:$0xff]  ;;  %v1987_v48 = vpack.c.bf16 %v443_v41, %v439_v40  ;;  %v465_v11 = vld [vmem:[%s2909_s3 + $0x568] sm:$0xff]  ;;  %v463_v13 = vld [vmem:[%s2909_s3 + $0x558] sm:$0xff] }
  0xdf   : > { %v467_v14 = vld [vmem:[%s2909_s3 + $0x578] sm:$0xff]  ;;  %v464_v19 = vld [vmem:[%s2909_s3 + $0x560] sm:$0xff]  ;;  %v462_v20 = vld [vmem:[%s2909_s3 + $0x550] sm:$0xff] }
  0xe0   : > { %1714 = vmatpush1.bf16.msra.mxu0 %v1713_v52  ;;  %v451_v52 = vld [vmem:[%s2909_s3 + $0x4f8] sm:$0xff]  ;;  %v466_v22 = vld [vmem:[%s2909_s3 + $0x570] sm:$0xff]  ;;  %v469_v23 = vld [vmem:[%s2909_s3 + $0x588] sm:$0xff] }
  0xe1   : > { %1970 = vmatpush1.bf16.msra.mxu1 %v1969_v53  ;;  %1716 = vmatprep.subr.bf16.mxu0 %v1715_v54  ;;  %v1733_v53 = vpack.c.bf16 %v440_v46, %v436_v45  ;;  %v1989_v54 = vpack.c.bf16 %v442_v49, %v438_v47  ;;  %v473_v24 = vld [vmem:[%s2909_s3 + $0x5a8] sm:$0xff]  ;;  %v471_v27 = vld [vmem:[%s2909_s3 + $0x598] sm:$0xff]  ;;  %v468_v32 = vld [vmem:[%s2909_s3 + $0x580] sm:$0xff] }
  0xe2   : > { %1972 = vmatprep.subr.bf16.mxu1 %v1971_v58  ;;  %v446_v58 = vld [vmem:[%s2909_s3 + $0x4d0] sm:$0xff]  ;;  %v475_v28 = vld [vmem:[%s2909_s3 + $0x5b8] sm:$0xff]  ;;  %v472_v33 = vld [vmem:[%s2909_s3 + $0x5a0] sm:$0xff] }
  0xe3   : > { %v470_v34 = vld [vmem:[%s2909_s3 + $0x590] sm:$0xff]  ;;  %v477_v37 = vld [vmem:[%s2909_s3 + $0x5c8] sm:$0xff]  ;;  %v483_v40 = vld [vmem:[%s2909_s3 + $0x5f8] sm:$0xff]  ;;  %v1749_v41 = vpack.c.bf16 %v472_v33, %v468_v32 }
  0xe4   : > { %1718 = vmatpush1.bf16.msra.mxu0 %v1717_v1  ;;  %v459_v1 = vld [vmem:[%s2909_s3 + $0x538] sm:$0xff]  ;;  %v474_v36 = vld [vmem:[%s2909_s3 + $0x5b0] sm:$0xff]  ;;  %v481_v38 = vld [vmem:[%s2909_s3 + $0x5e8] sm:$0xff] }
  0xe5   : > { %1974 = vmatpush1.bf16.msra.mxu1 %v1973_v2  ;;  %1720 = vmatprep.subr.bf16.mxu0 %v1719_v3  ;;  %v1737_v2 = vpack.c.bf16 %v448_v57, %v444_v56  ;;  %v1993_v3 = vpack.c.bf16 %v450_v60, %v446_v58  ;;  %v1995_v8 = vpack.c.bf16 %v459_v1, %v455_v0  ;;  %v480_v45 = vld [vmem:[%s2909_s3 + $0x5e0] sm:$0xff]  ;;  %v478_v46 = vld [vmem:[%s2909_s3 + $0x5d0] sm:$0xff]  ;;  %v485_v49 = vld [vmem:[%s2909_s3 + $0x608] sm:$0xff] }
  0xe6   : > { %1976 = vmatprep.subr.bf16.mxu1 %v1975_v7  ;;  %v454_v7 = vld [vmem:[%s2909_s3 + $0x510] sm:$0xff]  ;;  %v489_v50 = vld [vmem:[%s2909_s3 + $0x628] sm:$0xff]  ;;  %v487_v51 = vld [vmem:[%s2909_s3 + $0x618] sm:$0xff] }
  0xe7   : > { %v488_v56 = vld [vmem:[%s2909_s3 + $0x620] sm:$0xff]  ;;  %v486_v57 = vld [vmem:[%s2909_s3 + $0x610] sm:$0xff]  ;;  %v493_v60 = vld [vmem:[%s2909_s3 + $0x648] sm:$0xff] }
  0xe8   : > { %1722 = vmatpush1.bf16.msra.mxu0 %v1721_v15  ;;  %v1741_v15 = vpack.c.bf16 %v456_v6, %v452_v5  ;;  %v497_v61 = vld [vmem:[%s2909_s3 + $0x668] sm:$0xff]  ;;  %v495_v62 = vld [vmem:[%s2909_s3 + $0x658] sm:$0xff]  ;;  %v496_v5 = vld [vmem:[%s2909_s3 + $0x660] sm:$0xff] }
  0xe9   : > { %1978 = vmatpush1.bf16.msra.mxu1 %v1977_v16  ;;  %1724 = vmatprep.subr.bf16.mxu0 %v1723_v17  ;;  %v1997_v16 = vpack.c.bf16 %v458_v9, %v454_v7  ;;  %v1743_v17 = vpack.c.bf16 %v465_v11, %v461_v10  ;;  %v499_v0 = vld [vmem:[%s2909_s3 + $0x678] sm:$0xff]  ;;  %v494_v6 = vld [vmem:[%s2909_s3 + $0x650] sm:$0xff]  ;;  %v501_v9 = vld [vmem:[%s2909_s3 + $0x688] sm:$0xff] }
  0xea   : > { %1980 = vmatprep.subr.bf16.mxu1 %v1979_v21  ;;  %v1999_v21 = vpack.c.bf16 %v467_v14, %v463_v13  ;;  %v2015_v7 = vpack.c.bf16 %v499_v0, %v495_v62  ;;  %v505_v10 = vld [vmem:[%s2909_s3 + $0x6a8] sm:$0xff]  ;;  %v503_v11 = vld [vmem:[%s2909_s3 + $0x698] sm:$0xff]  ;;  %v512_v32 = vld [vmem:[%s2909_s3 + $0x6e0] sm:$0xff] }
  0xeb   : > { %913 = vmatmul.mubr.f32.vlgmr.msra.gmra.mrb[0].mxu0 %v3040_v26  ;;  %v507_v13 = vld [vmem:[%s2909_s3 + $0x6b8] sm:$0xff]  ;;  %v510_v33 = vld [vmem:[%s2909_s3 + $0x6d0] sm:$0xff] }
  0xec   : > { %1726 = vmatpush1.bf16.msra.mxu0 %v1725_v29  ;;  %1197 = vmatmul.mubr.f32.vlgmr.msra.gmra.mrb[0].mxu1 %v3040_v26  ;;  %v447_v26 = vld [vmem:[%s2909_s3 + $0x4d8] sm:$0xff]  ;;  %v1745_v29 = vpack.c.bf16 %v464_v19, %v460_v18  ;;  %v504_v18 = vld [vmem:[%s2909_s3 + $0x6a0] sm:$0xff]  ;;  %v502_v19 = vld [vmem:[%s2909_s3 + $0x690] sm:$0xff] }
  0xed   : > { %1982 = vmatpush1.bf16.msra.mxu1 %v1981_v30  ;;  %1728 = vmatprep.subr.bf16.mxu0 %v1727_v31  ;;  %v1991_v59 = vpack.c.bf16 %v451_v52, %v447_v26  ;;  %v2001_v30 = vpack.c.bf16 %v466_v22, %v462_v20  ;;  %v1747_v31 = vpack.c.bf16 %v473_v24, %v469_v23  ;;  %v491_v26 = vld [vmem:[%s2909_s3 + $0x638] sm:$0xff]  ;;  %v509_v22 = vld [vmem:[%s2909_s3 + $0x6c8] sm:$0xff] }
  0xee   : > { %1984 = vmatprep.subr.bf16.mxu1 %v1983_v35  ;;  %983 = vmatprep.mubr.f32.mxu0 %v822_v39  ;;  %v2003_v35 = vpack.c.bf16 %v475_v28, %v471_v27  ;;  %v2011_v58 = vpack.c.bf16 %v491_v26, %v487_v51  ;;  %v2019_v20 = vpack.c.bf16 %v507_v13, %v503_v11  ;;  %v513_v23 = vld [vmem:[%s2909_s3 + $0x6e8] sm:$0xff]  ;;  %v511_v24 = vld [vmem:[%s2909_s3 + $0x6d8] sm:$0xff] }
  0xef   : > { %1267 = vmatprep.mubr.f32.mxu1 %v822_v39  ;;  %v479_v39 = vld [vmem:[%s2909_s3 + $0x5d8] sm:$0xff] }
  0xf0   : > { %1730 = vmatpush1.bf16.msra.mxu0 %v1729_v42  ;;  %v2005_v42 = vpack.c.bf16 %v474_v36, %v470_v34  ;;  %v2007_v47 = vpack.c.bf16 %v483_v40, %v479_v39  ;;  %v515_v27 = vld [vmem:[%s2909_s3 + $0x6f8] sm:$0xff]  ;;  %v517_v36 = vld [vmem:[%s2909_s3 + $0x708] sm:$0xff] }
  0xf1   : > { %1986 = vmatpush1.bf16.msra.mxu1 %v1985_v43  ;;  %1732 = vmatprep.subr.bf16.mxu0 %v1731_v44  ;;  %v1751_v43 = vpack.c.bf16 %v481_v38, %v477_v37  ;;  %v476_v44 = vld [vmem:[%s2909_s3 + $0x5c0] sm:$0xff]  ;;  %v2023_v34 = vpack.c.bf16 %v515_v27, %v511_v24  ;;  %v521_v37 = vld [vmem:[%s2909_s3 + $0x728] sm:$0xff]  ;;  %v519_v38 = vld [vmem:[%s2909_s3 + $0x718] sm:$0xff] }
  0xf2   : > { %1988 = vmatprep.subr.bf16.mxu1 %v1987_v48  ;;  %v482_v48 = vld [vmem:[%s2909_s3 + $0x5f0] sm:$0xff]  ;;  %v1753_v52 = vpack.c.bf16 %v480_v45, %v476_v44  ;;  %v523_v39 = vld [vmem:[%s2909_s3 + $0x738] sm:$0xff]  ;;  %v520_v44 = vld [vmem:[%s2909_s3 + $0x720] sm:$0xff] }
  0xf3   : > { %v518_v45 = vld [vmem:[%s2909_s3 + $0x710] sm:$0xff]  ;;  %v531_v51 = vld [vmem:[%s2909_s3 + $0x778] sm:$0xff] }
  0xf4   : > { %1734 = vmatpush1.bf16.msra.mxu0 %v1733_v53  ;;  %v2009_v53 = vpack.c.bf16 %v482_v48, %v478_v46  ;;  %v2027_v46 = vpack.c.bf16 %v523_v39, %v519_v38  ;;  %v525_v48 = vld [vmem:[%s2909_s3 + $0x748] sm:$0xff]  ;;  %v539_v62 = vld [vmem:[%s2909_s3 + $0x7b8] sm:$0xff] }
  0xf5   : > { %1990 = vmatpush1.bf16.msra.mxu1 %v1989_v54  ;;  %1736 = vmatprep.subr.bf16.mxu0 %v1735_v55  ;;  %v1755_v54 = vpack.c.bf16 %v489_v50, %v485_v49  ;;  %v484_v55 = vld [vmem:[%s2909_s3 + $0x600] sm:$0xff]  ;;  %v529_v49 = vld [vmem:[%s2909_s3 + $0x768] sm:$0xff]  ;;  %v527_v50 = vld [vmem:[%s2909_s3 + $0x758] sm:$0xff] }
  0xf6   : > { %1992 = vmatprep.subr.bf16.mxu1 %v1991_v59  ;;  %v490_v59 = vld [vmem:[%s2909_s3 + $0x630] sm:$0xff]  ;;  %v1757_v1 = vpack.c.bf16 %v488_v56, %v484_v55  ;;  %v528_v55 = vld [vmem:[%s2909_s3 + $0x760] sm:$0xff]  ;;  %v547_v11 = vld [vmem:[%s2909_s3 + $0x7f8] sm:$0xff] }
  0xf7   : > { %v526_v56 = vld [vmem:[%s2909_s3 + $0x750] sm:$0xff]  ;;  %v555_v24 = vld [vmem:[%s2909_s3 + $0x838] sm:$0xff] }
  0xf8   : > { %1738 = vmatpush1.bf16.msra.mxu0 %v1737_v2  ;;  %v2013_v2 = vpack.c.bf16 %v490_v59, %v486_v57  ;;  %v2031_v57 = vpack.c.bf16 %v531_v51, %v527_v50  ;;  %v533_v59 = vld [vmem:[%s2909_s3 + $0x788] sm:$0xff]  ;;  %v563_v38 = vld [vmem:[%s2909_s3 + $0x878] sm:$0xff] }
  0xf9   : > { %1994 = vmatpush1.bf16.msra.mxu1 %v1993_v3  ;;  %1740 = vmatprep.subr.bf16.mxu0 %v1739_v4  ;;  %v1759_v3 = vpack.c.bf16 %v497_v61, %v493_v60  ;;  %v492_v4 = vld [vmem:[%s2909_s3 + $0x640] sm:$0xff]  ;;  %v537_v60 = vld [vmem:[%s2909_s3 + $0x7a8] sm:$0xff]  ;;  %v535_v61 = vld [vmem:[%s2909_s3 + $0x798] sm:$0xff] }
  0xfa   : > { %1996 = vmatprep.subr.bf16.mxu1 %v1995_v8  ;;  %v498_v8 = vld [vmem:[%s2909_s3 + $0x670] sm:$0xff]  ;;  %v1761_v14 = vpack.c.bf16 %v496_v5, %v492_v4  ;;  %v536_v4 = vld [vmem:[%s2909_s3 + $0x7a0] sm:$0xff]  ;;  %v569_v50 = vld [vmem:[%s2909_s3 + $0x8a8] sm:$0xff] }
  0xfb   : > { %v534_v5 = vld [vmem:[%s2909_s3 + $0x790] sm:$0xff]  ;;  %v567_v51 = vld [vmem:[%s2909_s3 + $0x898] sm:$0xff] }
  0xfc   : > { %1742 = vmatpush1.bf16.msra.mxu0 %v1741_v15  ;;  %v2017_v15 = vpack.c.bf16 %v498_v8, %v494_v6  ;;  %v2035_v6 = vpack.c.bf16 %v539_v62, %v535_v61  ;;  %v541_v8 = vld [vmem:[%s2909_s3 + $0x7c8] sm:$0xff] }
  0xfd   : > { %1998 = vmatpush1.bf16.msra.mxu1 %v1997_v16  ;;  %1744 = vmatprep.subr.bf16.mxu0 %v1743_v17  ;;  %v1763_v16 = vpack.c.bf16 %v505_v10, %v501_v9  ;;  %v500_v17 = vld [vmem:[%s2909_s3 + $0x680] sm:$0xff]  ;;  %v545_v9 = vld [vmem:[%s2909_s3 + $0x7e8] sm:$0xff]  ;;  %v543_v10 = vld [vmem:[%s2909_s3 + $0x7d8] sm:$0xff] }
  0xfe   : > { %2000 = vmatprep.subr.bf16.mxu1 %v1999_v21  ;;  %v506_v21 = vld [vmem:[%s2909_s3 + $0x6b0] sm:$0xff]  ;;  %v1765_v28 = vpack.c.bf16 %v504_v18, %v500_v17  ;;  %v544_v17 = vld [vmem:[%s2909_s3 + $0x7e0] sm:$0xff]  ;;  %v573_v61 = vld [vmem:[%s2909_s3 + $0x8c8] sm:$0xff] }
  0xff   : > { %v542_v18 = vld [vmem:[%s2909_s3 + $0x7d0] sm:$0xff]  ;;  %v577_v62 = vld [vmem:[%s2909_s3 + $0x8e8] sm:$0xff] }
 0x100   : > { %1746 = vmatpush1.bf16.msra.mxu0 %v1745_v29  ;;  %v2021_v29 = vpack.c.bf16 %v506_v21, %v502_v19  ;;  %v2039_v19 = vpack.c.bf16 %v547_v11, %v543_v10  ;;  %v549_v21 = vld [vmem:[%s2909_s3 + $0x808] sm:$0xff]  ;;  %v583_v11 = vld [vmem:[%s2909_s3 + $0x918] sm:$0xff] }
 0x101   : > { %2002 = vmatpush1.bf16.msra.mxu1 %v2001_v30  ;;  %1748 = vmatprep.subr.bf16.mxu0 %v1747_v31  ;;  %v1767_v30 = vpack.c.bf16 %v513_v23, %v509_v22  ;;  %v508_v31 = vld [vmem:[%s2909_s3 + $0x6c0] sm:$0xff]  ;;  %v553_v22 = vld [vmem:[%s2909_s3 + $0x828] sm:$0xff]  ;;  %v551_v23 = vld [vmem:[%s2909_s3 + $0x818] sm:$0xff] }
 0x102   : > { %2004 = vmatprep.subr.bf16.mxu1 %v2003_v35  ;;  %v514_v35 = vld [vmem:[%s2909_s3 + $0x6f0] sm:$0xff]  ;;  %v1769_v40 = vpack.c.bf16 %v512_v32, %v508_v31  ;;  %v552_v31 = vld [vmem:[%s2909_s3 + $0x820] sm:$0xff]  ;;  %v585_v10 = vld [vmem:[%s2909_s3 + $0x928] sm:$0xff] }
 0x103   : > { %v550_v32 = vld [vmem:[%s2909_s3 + $0x810] sm:$0xff] }
 0x104   : > { %1750 = vmatpush1.bf16.msra.mxu0 %v1749_v41  ;;  %v2025_v41 = vpack.c.bf16 %v514_v35, %v510_v33  ;;  %v2043_v33 = vpack.c.bf16 %v555_v24, %v551_v23  ;;  %v557_v35 = vld [vmem:[%s2909_s3 + $0x848] sm:$0xff]  ;;  %v591_v24 = vld [vmem:[%s2909_s3 + $0x958] sm:$0xff] }
 0x105   : > { %2006 = vmatpush1.bf16.msra.mxu1 %v2005_v42  ;;  %1752 = vmatprep.subr.bf16.mxu0 %v1751_v43  ;;  %v1771_v42 = vpack.c.bf16 %v521_v37, %v517_v36  ;;  %v516_v43 = vld [vmem:[%s2909_s3 + $0x700] sm:$0xff]  ;;  %v561_v36 = vld [vmem:[%s2909_s3 + $0x868] sm:$0xff]  ;;  %v559_v37 = vld [vmem:[%s2909_s3 + $0x858] sm:$0xff] }
 0x106   : > { %2008 = vmatprep.subr.bf16.mxu1 %v2007_v47  ;;  %v522_v47 = vld [vmem:[%s2909_s3 + $0x730] sm:$0xff]  ;;  %v1773_v26 = vpack.c.bf16 %v520_v44, %v516_v43  ;;  %v556_v43 = vld [vmem:[%s2909_s3 + $0x840] sm:$0xff]  ;;  %v593_v23 = vld [vmem:[%s2909_s3 + $0x968] sm:$0xff] }
 0x107   : > { %v560_v44 = vld [vmem:[%s2909_s3 + $0x860] sm:$0xff] }
 0x108   : > { %1754 = vmatpush1.bf16.msra.mxu0 %v1753_v52  ;;  %v2029_v52 = vpack.c.bf16 %v522_v47, %v518_v45  ;;  %v558_v45 = vld [vmem:[%s2909_s3 + $0x850] sm:$0xff]  ;;  %v2047_v47 = vpack.c.bf16 %v563_v38, %v559_v37  ;;  %v601_v37 = vld [vmem:[%s2909_s3 + $0x9a8] sm:$0xff]  ;;  %v599_v38 = vld [vmem:[%s2909_s3 + $0x998] sm:$0xff] }
 0x109   : > { %2010 = vmatpush1.bf16.msra.mxu1 %v2009_v53  ;;  %1756 = vmatprep.subr.bf16.mxu0 %v1755_v54  ;;  %v1775_v53 = vpack.c.bf16 %v529_v49, %v525_v48  ;;  %v524_v54 = vld [vmem:[%s2909_s3 + $0x740] sm:$0xff]  ;;  %v562_v48 = vld [vmem:[%s2909_s3 + $0x870] sm:$0xff]  ;;  %v565_v49 = vld [vmem:[%s2909_s3 + $0x888] sm:$0xff] }
 0x10a   : > { %2012 = vmatprep.subr.bf16.mxu1 %v2011_v58  ;;  %v530_v58 = vld [vmem:[%s2909_s3 + $0x770] sm:$0xff]  ;;  %v1777_v0 = vpack.c.bf16 %v528_v55, %v524_v54  ;;  %v2049_v54 = vpack.c.bf16 %v562_v48, %v558_v45  ;;  %v1795_v55 = vpack.c.bf16 %v569_v50, %v565_v49  ;;  %v600_v45 = vld [vmem:[%s2909_s3 + $0x9a0] sm:$0xff]  ;;  %v605_v50 = vld [vmem:[%s2909_s3 + $0x9c8] sm:$0xff] }
 0x10b   : > { %v602_v49 = vld [vmem:[%s2909_s3 + $0x9b0] sm:$0xff] }
 0x10c   : > { %1758 = vmatpush1.bf16.msra.mxu0 %v1757_v1  ;;  %v2033_v1 = vpack.c.bf16 %v530_v58, %v526_v56  ;;  %v564_v56 = vld [vmem:[%s2909_s3 + $0x880] sm:$0xff]  ;;  %v566_v58 = vld [vmem:[%s2909_s3 + $0x890] sm:$0xff] }
 0x10d   : > { %2014 = vmatpush1.bf16.msra.mxu1 %v2013_v2  ;;  %1760 = vmatprep.subr.bf16.mxu0 %v1759_v3  ;;  %v1779_v2 = vpack.c.bf16 %v537_v60, %v533_v59  ;;  %v532_v3 = vld [vmem:[%s2909_s3 + $0x780] sm:$0xff]  ;;  %v570_v60 = vld [vmem:[%s2909_s3 + $0x8b0] sm:$0xff] }
 0x10e   : > { %2016 = vmatprep.subr.bf16.mxu1 %v2015_v7  ;;  %v538_v7 = vld [vmem:[%s2909_s3 + $0x7b0] sm:$0xff]  ;;  %v1781_v13 = vpack.c.bf16 %v536_v4, %v532_v3  ;;  %v1799_v3 = vpack.c.bf16 %v577_v62, %v573_v61  ;;  %v572_v4 = vld [vmem:[%s2909_s3 + $0x8c0] sm:$0xff]  ;;  %v613_v61 = vld [vmem:[%s2909_s3 + $0xa08] sm:$0xff] }
 0x10f   : > { %v617_v62 = vld [vmem:[%s2909_s3 + $0xa28] sm:$0xff] }
 0x110   : > { %1762 = vmatpush1.bf16.msra.mxu0 %v1761_v14  ;;  %v2037_v14 = vpack.c.bf16 %v538_v7, %v534_v5  ;;  %v576_v5 = vld [vmem:[%s2909_s3 + $0x8e0] sm:$0xff] }
 0x111   : > { %2018 = vmatpush1.bf16.msra.mxu1 %v2017_v15  ;;  %1764 = vmatprep.subr.bf16.mxu0 %v1763_v16  ;;  %v1783_v15 = vpack.c.bf16 %v545_v9, %v541_v8  ;;  %v540_v16 = vld [vmem:[%s2909_s3 + $0x7c0] sm:$0xff]  ;;  %v578_v8 = vld [vmem:[%s2909_s3 + $0x8f0] sm:$0xff]  ;;  %v581_v9 = vld [vmem:[%s2909_s3 + $0x908] sm:$0xff] }
 0x112   : > { %2020 = vmatprep.subr.bf16.mxu1 %v2019_v20  ;;  %v546_v20 = vld [vmem:[%s2909_s3 + $0x7f0] sm:$0xff]  ;;  %v1785_v27 = vpack.c.bf16 %v544_v17, %v540_v16  ;;  %v1803_v16 = vpack.c.bf16 %v585_v10, %v581_v9  ;;  %v580_v17 = vld [vmem:[%s2909_s3 + $0x900] sm:$0xff]  ;;  %v621_v9 = vld [vmem:[%s2909_s3 + $0xa48] sm:$0xff] }
 0x113   : > { %v625_v10 = vld [vmem:[%s2909_s3 + $0xa68] sm:$0xff] }
 0x114   : > { %1766 = vmatpush1.bf16.msra.mxu0 %v1765_v28  ;;  %v2041_v28 = vpack.c.bf16 %v546_v20, %v542_v18  ;;  %v584_v18 = vld [vmem:[%s2909_s3 + $0x920] sm:$0xff] }
 0x115   : > { %2022 = vmatpush1.bf16.msra.mxu1 %v2021_v29  ;;  %1768 = vmatprep.subr.bf16.mxu0 %v1767_v30  ;;  %v1787_v29 = vpack.c.bf16 %v553_v22, %v549_v21  ;;  %v548_v30 = vld [vmem:[%s2909_s3 + $0x800] sm:$0xff]  ;;  %v586_v21 = vld [vmem:[%s2909_s3 + $0x930] sm:$0xff]  ;;  %v589_v22 = vld [vmem:[%s2909_s3 + $0x948] sm:$0xff] }
 0x116   : > { %2024 = vmatprep.subr.bf16.mxu1 %v2023_v34  ;;  %v554_v34 = vld [vmem:[%s2909_s3 + $0x830] sm:$0xff]  ;;  %v1789_v39 = vpack.c.bf16 %v552_v31, %v548_v30  ;;  %v1807_v30 = vpack.c.bf16 %v593_v23, %v589_v22  ;;  %v588_v31 = vld [vmem:[%s2909_s3 + $0x940] sm:$0xff]  ;;  %v629_v22 = vld [vmem:[%s2909_s3 + $0xa88] sm:$0xff] }
 0x117   : > { %v633_v23 = vld [vmem:[%s2909_s3 + $0xaa8] sm:$0xff] }
 0x118   : > { %1770 = vmatpush1.bf16.msra.mxu0 %v1769_v40  ;;  %v3223_v40 = vld [vmem:[%s228_s20 + $0x8] sm:$0xff] }
 0x119   : > { %2026 = vmatpush1.bf16.msra.mxu1 %v2025_v41  ;;  %1772 = vmatprep.subr.bf16.mxu0 %v1771_v42  ;;  %v2045_v41 = vpack.c.bf16 %v554_v34, %v550_v32  ;;  %v1791_v42 = vpack.c.bf16 %v561_v36, %v557_v35  ;;  %v592_v32 = vld [vmem:[%s2909_s3 + $0x960] sm:$0xff]  ;;  %v594_v35 = vld [vmem:[%s2909_s3 + $0x970] sm:$0xff]  ;;  %v597_v36 = vld [vmem:[%s2909_s3 + $0x988] sm:$0xff] }
 0x11a   : > { %2028 = vmatprep.subr.bf16.mxu1 %v2027_v46  ;;  %v3230_v46 = vrot.slane %v3223_v40, %v3024_v12 }
 0x11c   : > { %1774 = vmatpush1.bf16.msra.mxu0 %v1773_v26  ;;  %v571_v26 = vld [vmem:[%s2909_s3 + $0x8b8] sm:$0xff] }
 0x11d   : > { %2030 = vmatpush1.bf16.msra.mxu1 %v2029_v52  ;;  %1776 = vmatprep.subr.bf16.mxu0 %v1775_v53  ;;  %v838_v52 = vcombine.high %v3230_v46, %v3230_v46  ;;  %v1793_v53 = vpack.c.bf16 %v560_v44, %v556_v43  ;;  %v2051_v59 = vpack.c.bf16 %v571_v26, %v567_v51  ;;  %v596_v44 = vld [vmem:[%s2909_s3 + $0x980] sm:$0xff]  ;;  %v609_v51 = vld [vmem:[%s2909_s3 + $0x9e8] sm:$0xff]  ;;  %v607_v26 = vld [vmem:[%s2909_s3 + $0x9d8] sm:$0xff] }
 0x11e   : > { %2032 = vmatprep.subr.bf16.mxu1 %v2031_v57  ;;  %v568_v57 = vld [vmem:[%s2909_s3 + $0x8a0] sm:$0xff]  ;;  %v1811_v43 = vpack.c.bf16 %v601_v37, %v597_v36  ;;  %v637_v36 = vld [vmem:[%s2909_s3 + $0xac8] sm:$0xff] }
 0x11f   : > { %v641_v37 = vld [vmem:[%s2909_s3 + $0xae8] sm:$0xff] }
 0x120   : > { %1778 = vmatpush1.bf16.msra.mxu0 %v1777_v0  ;;  %v579_v0 = vld [vmem:[%s2909_s3 + $0x8f8] sm:$0xff] }
 0x121   : > { %2034 = vmatpush1.bf16.msra.mxu1 %v2033_v1  ;;  %1780 = vmatprep.subr.bf16.mxu0 %v1779_v2  ;;  %v1797_v1 = vpack.c.bf16 %v568_v57, %v564_v56  ;;  %v2053_v2 = vpack.c.bf16 %v570_v60, %v566_v58  ;;  %v604_v56 = vld [vmem:[%s2909_s3 + $0x9c0] sm:$0xff]  ;;  %v606_v58 = vld [vmem:[%s2909_s3 + $0x9d0] sm:$0xff] }
 0x122   : > { %2036 = vmatprep.subr.bf16.mxu1 %v2035_v6  ;;  %v574_v6 = vld [vmem:[%s2909_s3 + $0x8d0] sm:$0xff]  ;;  %v608_v57 = vld [vmem:[%s2909_s3 + $0x9e0] sm:$0xff] }
 0x123   : > { %v610_v60 = vld [vmem:[%s2909_s3 + $0x9f0] sm:$0xff] }
 0x124   : > { %1782 = vmatpush1.bf16.msra.mxu0 %v1781_v13  ;;  %v587_v13 = vld [vmem:[%s2909_s3 + $0x938] sm:$0xff] }
 0x125   : > { %2038 = vmatpush1.bf16.msra.mxu1 %v2037_v14  ;;  %1784 = vmatprep.subr.bf16.mxu0 %v1783_v15  ;;  %v1801_v14 = vpack.c.bf16 %v576_v5, %v572_v4  ;;  %v2057_v15 = vpack.c.bf16 %v578_v8, %v574_v6  ;;  %v2059_v20 = vpack.c.bf16 %v587_v13, %v583_v11  ;;  %v612_v4 = vld [vmem:[%s2909_s3 + $0xa00] sm:$0xff]  ;;  %v614_v6 = vld [vmem:[%s2909_s3 + $0xa10] sm:$0xff]  ;;  %v623_v11 = vld [vmem:[%s2909_s3 + $0xa58] sm:$0xff] }
 0x126   : > { %2040 = vmatprep.subr.bf16.mxu1 %v2039_v19  ;;  %v582_v19 = vld [vmem:[%s2909_s3 + $0x910] sm:$0xff]  ;;  %v616_v5 = vld [vmem:[%s2909_s3 + $0xa20] sm:$0xff]  ;;  %v627_v13 = vld [vmem:[%s2909_s3 + $0xa78] sm:$0xff] }
 0x127   : > { %v618_v8 = vld [vmem:[%s2909_s3 + $0xa30] sm:$0xff] }
 0x128   : > { %1786 = vmatpush1.bf16.msra.mxu0 %v1785_v27  ;;  %v595_v27 = vld [vmem:[%s2909_s3 + $0x978] sm:$0xff] }
 0x129   : > { %2042 = vmatpush1.bf16.msra.mxu1 %v2041_v28  ;;  %1788 = vmatprep.subr.bf16.mxu0 %v1787_v29  ;;  %v1805_v28 = vpack.c.bf16 %v584_v18, %v580_v17  ;;  %v2061_v29 = vpack.c.bf16 %v586_v21, %v582_v19  ;;  %v2063_v34 = vpack.c.bf16 %v595_v27, %v591_v24  ;;  %v620_v17 = vld [vmem:[%s2909_s3 + $0xa40] sm:$0xff]  ;;  %v622_v19 = vld [vmem:[%s2909_s3 + $0xa50] sm:$0xff]  ;;  %v631_v24 = vld [vmem:[%s2909_s3 + $0xa98] sm:$0xff] }
 0x12a   : > { %2044 = vmatprep.subr.bf16.mxu1 %v2043_v33  ;;  %v590_v33 = vld [vmem:[%s2909_s3 + $0x950] sm:$0xff]  ;;  %v624_v18 = vld [vmem:[%s2909_s3 + $0xa60] sm:$0xff]  ;;  %v635_v27 = vld [vmem:[%s2909_s3 + $0xab8] sm:$0xff] }
 0x12b   : > { %984 = vmatmul.mubr.f32.vlgmr.msra.gmra.mrb[0].mxu0 %v3085_v25  ;;  %v626_v21 = vld [vmem:[%s2909_s3 + $0xa70] sm:$0xff] }
 0x12c   : > { %1790 = vmatpush1.bf16.msra.mxu0 %v1789_v39  ;;  %1268 = vmatmul.mubr.f32.vlgmr.msra.gmra.mrb[0].mxu1 %v3085_v25  ;;  %v575_v25 = vld [vmem:[%s2909_s3 + $0x8d8] sm:$0xff] }
 0x12d   : > { %2046 = vmatpush1.bf16.msra.mxu1 %v2045_v41  ;;  %1792 = vmatprep.subr.bf16.mxu0 %v1791_v42  ;;  %v2055_v7 = vpack.c.bf16 %v579_v0, %v575_v25  ;;  %v603_v39 = vld [vmem:[%s2909_s3 + $0x9b8] sm:$0xff]  ;;  %v1809_v41 = vpack.c.bf16 %v592_v32, %v588_v31  ;;  %v2065_v42 = vpack.c.bf16 %v594_v35, %v590_v33  ;;  %v628_v31 = vld [vmem:[%s2909_s3 + $0xa80] sm:$0xff]  ;;  %v630_v33 = vld [vmem:[%s2909_s3 + $0xa90] sm:$0xff] }
 0x12e   : > { %2048 = vmatprep.subr.bf16.mxu1 %v2047_v47  ;;  %1054 = vmatprep.mubr.f32.mxu0 %v838_v52  ;;  %v598_v47 = vld [vmem:[%s2909_s3 + $0x990] sm:$0xff]  ;;  %v2067_v48 = vpack.c.bf16 %v603_v39, %v599_v38  ;;  %v615_v25 = vld [vmem:[%s2909_s3 + $0xa18] sm:$0xff]  ;;  %v632_v32 = vld [vmem:[%s2909_s3 + $0xaa0] sm:$0xff] }
 0x12f   : > { %1338 = vmatprep.mubr.f32.mxu1 %v838_v52  ;;  %v611_v52 = vld [vmem:[%s2909_s3 + $0x9f8] sm:$0xff]  ;;  %v634_v35 = vld [vmem:[%s2909_s3 + $0xab0] sm:$0xff] }
 0x130   : > { %1794 = vmatpush1.bf16.msra.mxu0 %v1793_v53  ;;  %v1813_v53 = vpack.c.bf16 %v600_v45, %v596_v44  ;;  %v619_v0 = vld [vmem:[%s2909_s3 + $0xa38] sm:$0xff]  ;;  %v636_v44 = vld [vmem:[%s2909_s3 + $0xac0] sm:$0xff] }
 0x131   : > { %2050 = vmatpush1.bf16.msra.mxu1 %v2049_v54  ;;  %1796 = vmatprep.subr.bf16.mxu0 %v1795_v55  ;;  %v2069_v54 = vpack.c.bf16 %v602_v49, %v598_v47  ;;  %v1815_v55 = vpack.c.bf16 %v609_v51, %v605_v50  ;;  %v639_v38 = vld [vmem:[%s2909_s3 + $0xad8] sm:$0xff]  ;;  %v640_v45 = vld [vmem:[%s2909_s3 + $0xae0] sm:$0xff]  ;;  %v638_v47 = vld [vmem:[%s2909_s3 + $0xad0] sm:$0xff] }
 0x132   : > { %2052 = vmatprep.subr.bf16.mxu1 %v2051_v59  ;;  %v2071_v59 = vpack.c.bf16 %v611_v52, %v607_v26  ;;  %v643_v39 = vld [vmem:[%s2909_s3 + $0xaf8] sm:$0xff]  ;;  %v642_v49 = vld [vmem:[%s2909_s3 + $0xaf0] sm:$0xff]  ;;  %v645_v50 = vld [vmem:[%s2909_s3 + $0xb08] sm:$0xff] }
 0x133   : > { %v649_v51 = vld [vmem:[%s2909_s3 + $0xb28] sm:$0xff]  ;;  %v647_v26 = vld [vmem:[%s2909_s3 + $0xb18] sm:$0xff] }
 0x134   : > { %1798 = vmatpush1.bf16.msra.mxu0 %v1797_v1  ;;  %v1817_v1 = vpack.c.bf16 %v608_v57, %v604_v56  ;;  %v651_v52 = vld [vmem:[%s2909_s3 + $0xb38] sm:$0xff]  ;;  %v644_v56 = vld [vmem:[%s2909_s3 + $0xb00] sm:$0xff] }
 0x135   : > { %2054 = vmatpush1.bf16.msra.mxu1 %v2053_v2  ;;  %1800 = vmatprep.subr.bf16.mxu0 %v1799_v3  ;;  %v2073_v2 = vpack.c.bf16 %v610_v60, %v606_v58  ;;  %v1819_v3 = vpack.c.bf16 %v617_v62, %v613_v61  ;;  %v648_v57 = vld [vmem:[%s2909_s3 + $0xb20] sm:$0xff]  ;;  %v646_v58 = vld [vmem:[%s2909_s3 + $0xb10] sm:$0xff]  ;;  %v653_v61 = vld [vmem:[%s2909_s3 + $0xb48] sm:$0xff] }
 0x136   : > { %2056 = vmatprep.subr.bf16.mxu1 %v2055_v7  ;;  %v2075_v7 = vpack.c.bf16 %v619_v0, %v615_v25  ;;  %v650_v60 = vld [vmem:[%s2909_s3 + $0xb30] sm:$0xff]  ;;  %v657_v62 = vld [vmem:[%s2909_s3 + $0xb68] sm:$0xff]  ;;  %v655_v25 = vld [vmem:[%s2909_s3 + $0xb58] sm:$0xff] }
 0x137   : > { %v659_v0 = vld [vmem:[%s2909_s3 + $0xb78] sm:$0xff] }
 0x138   : > { %1802 = vmatpush1.bf16.msra.mxu0 %v1801_v14  ;;  %v1821_v14 = vpack.c.bf16 %v616_v5, %v612_v4  ;;  %v652_v4 = vld [vmem:[%s2909_s3 + $0xb40] sm:$0xff] }
 0x139   : > { %2058 = vmatpush1.bf16.msra.mxu1 %v2057_v15  ;;  %1804 = vmatprep.subr.bf16.mxu0 %v1803_v16  ;;  %v2077_v15 = vpack.c.bf16 %v618_v8, %v614_v6  ;;  %v1823_v16 = vpack.c.bf16 %v625_v10, %v621_v9  ;;  %v656_v5 = vld [vmem:[%s2909_s3 + $0xb60] sm:$0xff]  ;;  %v654_v6 = vld [vmem:[%s2909_s3 + $0xb50] sm:$0xff]  ;;  %v661_v9 = vld [vmem:[%s2909_s3 + $0xb88] sm:$0xff] }
 0x13a   : > { %2060 = vmatprep.subr.bf16.mxu1 %v2059_v20  ;;  %v2079_v20 = vpack.c.bf16 %v627_v13, %v623_v11  ;;  %v658_v8 = vld [vmem:[%s2909_s3 + $0xb70] sm:$0xff]  ;;  %v665_v10 = vld [vmem:[%s2909_s3 + $0xba8] sm:$0xff]  ;;  %v663_v11 = vld [vmem:[%s2909_s3 + $0xb98] sm:$0xff] }
 0x13b   : > { %v667_v13 = vld [vmem:[%s2909_s3 + $0xbb8] sm:$0xff] }
 0x13c   : > { %1806 = vmatpush1.bf16.msra.mxu0 %v1805_v28  ;;  %v1825_v28 = vpack.c.bf16 %v624_v18, %v620_v17  ;;  %v660_v17 = vld [vmem:[%s2909_s3 + $0xb80] sm:$0xff] }
 0x13d   : > { %2062 = vmatpush1.bf16.msra.mxu1 %v2061_v29  ;;  %1808 = vmatprep.subr.bf16.mxu0 %v1807_v30  ;;  %v2081_v29 = vpack.c.bf16 %v626_v21, %v622_v19  ;;  %v1827_v30 = vpack.c.bf16 %v633_v23, %v629_v22  ;;  %v664_v18 = vld [vmem:[%s2909_s3 + $0xba0] sm:$0xff]  ;;  %v662_v19 = vld [vmem:[%s2909_s3 + $0xb90] sm:$0xff]  ;;  %v669_v22 = vld [vmem:[%s2909_s3 + $0xbc8] sm:$0xff] }
 0x13e   : > { %2064 = vmatprep.subr.bf16.mxu1 %v2063_v34  ;;  %v2083_v34 = vpack.c.bf16 %v635_v27, %v631_v24  ;;  %v666_v21 = vld [vmem:[%s2909_s3 + $0xbb0] sm:$0xff]  ;;  %v673_v23 = vld [vmem:[%s2909_s3 + $0xbe8] sm:$0xff]  ;;  %v671_v24 = vld [vmem:[%s2909_s3 + $0xbd8] sm:$0xff] }
 0x13f   : > { %v675_v27 = vld [vmem:[%s2909_s3 + $0xbf8] sm:$0xff] }
 0x140   : > { %1810 = vmatpush1.bf16.msra.mxu0 %v1809_v41  ;;  %v1829_v41 = vpack.c.bf16 %v632_v32, %v628_v31  ;;  %v668_v31 = vld [vmem:[%s2909_s3 + $0xbc0] sm:$0xff] }
 0x141   : > { %2066 = vmatpush1.bf16.msra.mxu1 %v2065_v42  ;;  %1812 = vmatprep.subr.bf16.mxu0 %v1811_v43  ;;  %v2085_v42 = vpack.c.bf16 %v634_v35, %v630_v33  ;;  %v1831_v43 = vpack.c.bf16 %v641_v37, %v637_v36  ;;  %v672_v32 = vld [vmem:[%s2909_s3 + $0xbe0] sm:$0xff]  ;;  %v670_v33 = vld [vmem:[%s2909_s3 + $0xbd0] sm:$0xff]  ;;  %v677_v36 = vld [vmem:[%s2909_s3 + $0xc08] sm:$0xff] }
 0x142   : > { %2068 = vmatprep.subr.bf16.mxu1 %v2067_v48  ;;  %v2087_v48 = vpack.c.bf16 %v643_v39, %v639_v38  ;;  %v674_v35 = vld [vmem:[%s2909_s3 + $0xbf0] sm:$0xff]  ;;  %v681_v37 = vld [vmem:[%s2909_s3 + $0xc28] sm:$0xff]  ;;  %v823_v38 = vcombine.high %v3223_v40, %v3223_v40  ;;  %v679_v39 = vld [vmem:[%s2909_s3 + $0xc18] sm:$0xff] }
 0x143   : > { %v682_v40 = vld [vmem:[%s2909_s3 + $0xc30] sm:$0xff] }
 0x144   : > { %1814 = vmatpush1.bf16.msra.mxu0 %v1813_v53  ;;  %v1833_v53 = vpack.c.bf16 %v640_v45, %v636_v44  ;;  %v1851_v44 = vpack.c.bf16 %v681_v37, %v677_v36  ;;  %v676_v45 = vld [vmem:[%s2909_s3 + $0xc00] sm:$0xff]  ;;  %v714_v36 = vld [vmem:[%s2909_s3 + $0xd30] sm:$0xff]  ;;  %v717_v37 = vld [vmem:[%s2909_s3 + $0xd48] sm:$0xff] }
 0x145   : > { %2070 = vmatpush1.bf16.msra.mxu1 %v2069_v54  ;;  %1816 = vmatprep.subr.bf16.mxu0 %v1815_v55  ;;  %v2089_v54 = vpack.c.bf16 %v642_v49, %v638_v47  ;;  %v1835_v55 = vpack.c.bf16 %v649_v51, %v645_v50  ;;  %v680_v47 = vld [vmem:[%s2909_s3 + $0xc20] sm:$0xff]  ;;  %v685_v50 = vld [vmem:[%s2909_s3 + $0xc48] sm:$0xff] }
 0x146   : > { %2072 = vmatprep.subr.bf16.mxu1 %v2071_v59  ;;  %v2091_v59 = vpack.c.bf16 %v651_v52, %v647_v26  ;;  %v689_v51 = vld [vmem:[%s2909_s3 + $0xc68] sm:$0xff]  ;;  %v3362_v26 = vrot.slane %v823_v38, %v3024_v12  ;;  %v687_v52 = vld [vmem:[%s2909_s3 + $0xc58] sm:$0xff] }
 0x147   : > { %v721_v38 = vld [vmem:[%s2909_s3 + $0xd68] sm:$0xff] }
 0x148   : > { %1818 = vmatpush1.bf16.msra.mxu0 %v1817_v1  ;;  %v1837_v1 = vpack.c.bf16 %v648_v57, %v644_v56  ;;  %v1855_v56 = vpack.c.bf16 %v689_v51, %v685_v50  ;;  %v684_v57 = vld [vmem:[%s2909_s3 + $0xc40] sm:$0xff]  ;;  %v725_v50 = vld [vmem:[%s2909_s3 + $0xd88] sm:$0xff] }
 0x149   : > { %2074 = vmatpush1.bf16.msra.mxu1 %v2073_v2  ;;  %1820 = vmatprep.subr.bf16.mxu0 %v1819_v3  ;;  %v2093_v2 = vpack.c.bf16 %v650_v60, %v646_v58  ;;  %v1839_v3 = vpack.c.bf16 %v657_v62, %v653_v61  ;;  %v688_v58 = vld [vmem:[%s2909_s3 + $0xc60] sm:$0xff]  ;;  %v690_v61 = vld [vmem:[%s2909_s3 + $0xc70] sm:$0xff]  ;;  %v693_v62 = vld [vmem:[%s2909_s3 + $0xc88] sm:$0xff] }
 0x14a   : > { %2076 = vmatprep.subr.bf16.mxu1 %v2075_v7  ;;  %v2095_v7 = vpack.c.bf16 %v659_v0, %v655_v25  ;;  %v697_v25 = vld [vmem:[%s2909_s3 + $0xca8] sm:$0xff]  ;;  %v839_v0 = vcombine.high %v3362_v26, %v3362_v26 }
 0x14b   : > { %v729_v51 = vld [vmem:[%s2909_s3 + $0xda8] sm:$0xff] }
 0x14c   : > { %1822 = vmatpush1.bf16.msra.mxu0 %v1821_v14  ;;  %v1841_v14 = vpack.c.bf16 %v656_v5, %v652_v4  ;;  %v1859_v5 = vpack.c.bf16 %v697_v25, %v693_v62  ;;  %v733_v62 = vld [vmem:[%s2909_s3 + $0xdc8] sm:$0xff] }
 0x14d   : > { %2078 = vmatpush1.bf16.msra.mxu1 %v2077_v15  ;;  %1824 = vmatprep.subr.bf16.mxu0 %v1823_v16  ;;  %v2097_v15 = vpack.c.bf16 %v658_v8, %v654_v6  ;;  %v1843_v16 = vpack.c.bf16 %v665_v10, %v661_v9  ;;  %v692_v6 = vld [vmem:[%s2909_s3 + $0xc80] sm:$0xff]  ;;  %v694_v8 = vld [vmem:[%s2909_s3 + $0xc90] sm:$0xff]  ;;  %v737_v25 = vld [vmem:[%s2909_s3 + $0xde8] sm:$0xff] }
 0x14e   : > { %2080 = vmatprep.subr.bf16.mxu1 %v2079_v20  ;;  %v2099_v20 = vpack.c.bf16 %v667_v13, %v663_v11  ;;  %v698_v10 = vld [vmem:[%s2909_s3 + $0xcb0] sm:$0xff]  ;;  %v701_v11 = vld [vmem:[%s2909_s3 + $0xcc8] sm:$0xff] }
 0x14f   : > { %v705_v13 = vld [vmem:[%s2909_s3 + $0xce8] sm:$0xff] }
 0x150   : > { %1826 = vmatpush1.bf16.msra.mxu0 %v1825_v28  ;;  %v1845_v28 = vpack.c.bf16 %v664_v18, %v660_v17  ;;  %v1863_v17 = vpack.c.bf16 %v705_v13, %v701_v11  ;;  %v700_v18 = vld [vmem:[%s2909_s3 + $0xcc0] sm:$0xff]  ;;  %v745_v11 = vld [vmem:[%s2909_s3 + $0xe28] sm:$0xff]  ;;  %v743_v13 = vld [vmem:[%s2909_s3 + $0xe18] sm:$0xff] }
 0x151   : > { %2082 = vmatpush1.bf16.msra.mxu1 %v2081_v29  ;;  %1828 = vmatprep.subr.bf16.mxu0 %v1827_v30  ;;  %v2101_v29 = vpack.c.bf16 %v666_v21, %v662_v19  ;;  %v1847_v30 = vpack.c.bf16 %v673_v23, %v669_v22  ;;  %v704_v19 = vld [vmem:[%s2909_s3 + $0xce0] sm:$0xff]  ;;  %v706_v22 = vld [vmem:[%s2909_s3 + $0xcf0] sm:$0xff]  ;;  %v709_v23 = vld [vmem:[%s2909_s3 + $0xd08] sm:$0xff] }
 0x152   : > { %2084 = vmatprep.subr.bf16.mxu1 %v2083_v34  ;;  %v2103_v34 = vpack.c.bf16 %v675_v27, %v671_v24  ;;  %v713_v24 = vld [vmem:[%s2909_s3 + $0xd28] sm:$0xff]  ;;  %v711_v27 = vld [vmem:[%s2909_s3 + $0xd18] sm:$0xff] }
 0x154   : > { %1830 = vmatpush1.bf16.msra.mxu0 %v1829_v41  ;;  %v683_v41 = vld [vmem:[%s2909_s3 + $0xc38] sm:$0xff] }
 0x155   : > { %2086 = vmatpush1.bf16.msra.mxu1 %v2085_v42  ;;  %1832 = vmatprep.subr.bf16.mxu0 %v1831_v43  ;;  %v1849_v42 = vpack.c.bf16 %v672_v32, %v668_v31  ;;  %v2105_v43 = vpack.c.bf16 %v674_v35, %v670_v33  ;;  %v2107_v49 = vpack.c.bf16 %v683_v41, %v679_v39  ;;  %v708_v32 = vld [vmem:[%s2909_s3 + $0xd00] sm:$0xff]  ;;  %v719_v39 = vld [vmem:[%s2909_s3 + $0xd58] sm:$0xff] }
 0x156   : > { %2088 = vmatprep.subr.bf16.mxu1 %v2087_v48  ;;  %v678_v48 = vld [vmem:[%s2909_s3 + $0xc10] sm:$0xff]  ;;  %v1867_v31 = vpack.c.bf16 %v713_v24, %v709_v23  ;;  %v712_v33 = vld [vmem:[%s2909_s3 + $0xd20] sm:$0xff]  ;;  %v723_v41 = vld [vmem:[%s2909_s3 + $0xd78] sm:$0xff] }
 0x157   : > { %v753_v23 = vld [vmem:[%s2909_s3 + $0xe68] sm:$0xff]  ;;  %v751_v24 = vld [vmem:[%s2909_s3 + $0xe58] sm:$0xff] }
 0x158   : > { %1834 = vmatpush1.bf16.msra.mxu0 %v1833_v53  ;;  %v691_v53 = vld [vmem:[%s2909_s3 + $0xc78] sm:$0xff] }
 0x159   : > { %2090 = vmatpush1.bf16.msra.mxu1 %v2089_v54  ;;  %1836 = vmatprep.subr.bf16.mxu0 %v1835_v55  ;;  %v1853_v54 = vpack.c.bf16 %v680_v47, %v676_v45  ;;  %v2109_v55 = vpack.c.bf16 %v682_v40, %v678_v48  ;;  %v2111_v60 = vpack.c.bf16 %v691_v53, %v687_v52  ;;  %v716_v45 = vld [vmem:[%s2909_s3 + $0xd40] sm:$0xff]  ;;  %v718_v48 = vld [vmem:[%s2909_s3 + $0xd50] sm:$0xff]  ;;  %v727_v52 = vld [vmem:[%s2909_s3 + $0xd98] sm:$0xff] }
 0x15a   : > { %2092 = vmatprep.subr.bf16.mxu1 %v2091_v59  ;;  %v686_v59 = vld [vmem:[%s2909_s3 + $0xc50] sm:$0xff]  ;;  %v720_v47 = vld [vmem:[%s2909_s3 + $0xd60] sm:$0xff]  ;;  %v731_v53 = vld [vmem:[%s2909_s3 + $0xdb8] sm:$0xff] }
 0x15b   : > { %v2113_v4 = vpack.c.bf16 %v690_v61, %v686_v59  ;;  %v722_v40 = vld [vmem:[%s2909_s3 + $0xd70] sm:$0xff] }
 0x15c   : > { %1838 = vmatpush1.bf16.msra.mxu0 %v1837_v1  ;;  %v695_v1 = vld [vmem:[%s2909_s3 + $0xc98] sm:$0xff]  ;;  %v726_v59 = vld [vmem:[%s2909_s3 + $0xd90] sm:$0xff] }
 0x15d   : > { %2094 = vmatpush1.bf16.msra.mxu1 %v2093_v2  ;;  %1840 = vmatprep.subr.bf16.mxu0 %v1839_v3  ;;  %v699_v2 = vld [vmem:[%s2909_s3 + $0xcb8] sm:$0xff]  ;;  %v1857_v3 = vpack.c.bf16 %v688_v58, %v684_v57  ;;  %v724_v57 = vld [vmem:[%s2909_s3 + $0xd80] sm:$0xff]  ;;  %v730_v61 = vld [vmem:[%s2909_s3 + $0xdb0] sm:$0xff] }
 0x15e   : > { %2096 = vmatprep.subr.bf16.mxu1 %v2095_v7  ;;  %v696_v7 = vld [vmem:[%s2909_s3 + $0xca0] sm:$0xff]  ;;  %v2115_v9 = vpack.c.bf16 %v699_v2, %v695_v1  ;;  %v739_v1 = vld [vmem:[%s2909_s3 + $0xdf8] sm:$0xff] }
 0x15f   : > { %v728_v58 = vld [vmem:[%s2909_s3 + $0xda0] sm:$0xff] }
 0x160   : > { %1842 = vmatpush1.bf16.msra.mxu0 %v1841_v14  ;;  %v707_v14 = vld [vmem:[%s2909_s3 + $0xcf8] sm:$0xff]  ;;  %v1877_v2 = vpack.c.bf16 %v728_v58, %v724_v57  ;;  %v768_v57 = vld [vmem:[%s2909_s3 + $0xee0] sm:$0xff]  ;;  %v766_v58 = vld [vmem:[%s2909_s3 + $0xed0] sm:$0xff] }
 0x161   : > { %2098 = vmatpush1.bf16.msra.mxu1 %v2097_v15  ;;  %1844 = vmatprep.subr.bf16.mxu0 %v1843_v16  ;;  %v1861_v15 = vpack.c.bf16 %v696_v7, %v692_v6  ;;  %v2117_v16 = vpack.c.bf16 %v698_v10, %v694_v8  ;;  %v736_v6 = vld [vmem:[%s2909_s3 + $0xde0] sm:$0xff]  ;;  %v734_v7 = vld [vmem:[%s2909_s3 + $0xdd0] sm:$0xff]  ;;  %v741_v10 = vld [vmem:[%s2909_s3 + $0xe08] sm:$0xff] }
 0x162   : > { %2100 = vmatprep.subr.bf16.mxu1 %v2099_v20  ;;  %v702_v20 = vld [vmem:[%s2909_s3 + $0xcd0] sm:$0xff] }
 0x164   : > { %1846 = vmatpush1.bf16.msra.mxu0 %v1845_v28  ;;  %v715_v28 = vld [vmem:[%s2909_s3 + $0xd38] sm:$0xff] }
 0x165   : > { %2102 = vmatpush1.bf16.msra.mxu1 %v2101_v29  ;;  %1848 = vmatprep.subr.bf16.mxu0 %v1847_v30  ;;  %v1865_v29 = vpack.c.bf16 %v704_v19, %v700_v18  ;;  %v2121_v30 = vpack.c.bf16 %v706_v22, %v702_v20  ;;  %v2123_v35 = vpack.c.bf16 %v715_v28, %v711_v27  ;;  %v744_v18 = vld [vmem:[%s2909_s3 + $0xe20] sm:$0xff]  ;;  %v742_v19 = vld [vmem:[%s2909_s3 + $0xe10] sm:$0xff]  ;;  %v749_v22 = vld [vmem:[%s2909_s3 + $0xe48] sm:$0xff] }
 0x166   : > { %2104 = vmatprep.subr.bf16.mxu1 %v2103_v34  ;;  %v710_v34 = vld [vmem:[%s2909_s3 + $0xd10] sm:$0xff]  ;;  %v755_v27 = vld [vmem:[%s2909_s3 + $0xe78] sm:$0xff] }
 0x168   : > { %1850 = vmatpush1.bf16.msra.mxu0 %v1849_v42  ;;  %v1869_v42 = vpack.c.bf16 %v712_v33, %v708_v32  ;;  %v752_v32 = vld [vmem:[%s2909_s3 + $0xe60] sm:$0xff]  ;;  %v750_v33 = vld [vmem:[%s2909_s3 + $0xe50] sm:$0xff] }
 0x169   : > { %2106 = vmatpush1.bf16.msra.mxu1 %v2105_v43  ;;  %1852 = vmatprep.subr.bf16.mxu0 %v1851_v44  ;;  %v2125_v43 = vpack.c.bf16 %v714_v36, %v710_v34  ;;  %v1871_v44 = vpack.c.bf16 %v721_v38, %v717_v37  ;;  %v2143_v34 = vpack.c.bf16 %v755_v27, %v751_v24  ;;  %v757_v36 = vld [vmem:[%s2909_s3 + $0xe88] sm:$0xff]  ;;  %v759_v38 = vld [vmem:[%s2909_s3 + $0xe98] sm:$0xff] }
 0x16a   : > { %2108 = vmatprep.subr.bf16.mxu1 %v2107_v49  ;;  %v2127_v49 = vpack.c.bf16 %v723_v41, %v719_v39  ;;  %v761_v37 = vld [vmem:[%s2909_s3 + $0xea8] sm:$0xff]  ;;  %v763_v39 = vld [vmem:[%s2909_s3 + $0xeb8] sm:$0xff] }
 0x16b   : > { %1055 = vmatmul.mubr.f32.vlgmr.msra.gmra.mrb[0].mxu0 %v3230_v46  ;;  %v795_v24 = vld [vmem:[%s2909_s3 + $0xfb8] sm:$0xff] }
 0x16c   : > { %1854 = vmatpush1.bf16.msra.mxu0 %v1853_v54  ;;  %1339 = vmatmul.mubr.f32.vlgmr.msra.gmra.mrb[0].mxu1 %v3230_v46  ;;  %v703_v46 = vld [vmem:[%s2909_s3 + $0xcd8] sm:$0xff]  ;;  %v1873_v54 = vpack.c.bf16 %v720_v47, %v716_v45  ;;  %v760_v45 = vld [vmem:[%s2909_s3 + $0xea0] sm:$0xff]  ;;  %v758_v47 = vld [vmem:[%s2909_s3 + $0xe90] sm:$0xff] }
 0x16d   : > { %2110 = vmatpush1.bf16.msra.mxu1 %v2109_v55  ;;  %1856 = vmatprep.subr.bf16.mxu0 %v1855_v56  ;;  %v2119_v21 = vpack.c.bf16 %v707_v14, %v703_v46  ;;  %v2129_v55 = vpack.c.bf16 %v722_v40, %v718_v48  ;;  %v1875_v56 = vpack.c.bf16 %v729_v51, %v725_v50  ;;  %v747_v46 = vld [vmem:[%s2909_s3 + $0xe38] sm:$0xff]  ;;  %v765_v40 = vld [vmem:[%s2909_s3 + $0xec8] sm:$0xff] }
 0x16e   : > { %2112 = vmatprep.subr.bf16.mxu1 %v2111_v60  ;;  %1125 = vmatprep.mubr.f32.mxu0 %v839_v0  ;;  %v2131_v60 = vpack.c.bf16 %v731_v53, %v727_v52  ;;  %v2139_v20 = vpack.c.bf16 %v747_v46, %v743_v13  ;;  %v2147_v48 = vpack.c.bf16 %v763_v39, %v759_v38  ;;  %v769_v50 = vld [vmem:[%s2909_s3 + $0xee8] sm:$0xff]  ;;  %v767_v51 = vld [vmem:[%s2909_s3 + $0xed8] sm:$0xff] }
 0x16f   : > { %1409 = vmatprep.mubr.f32.mxu1 %v839_v0  ;;  %v735_v0 = vld [vmem:[%s2909_s3 + $0xdd8] sm:$0xff] }
 0x170   : > { %1858 = vmatpush1.bf16.msra.mxu0 %v1857_v3  ;;  %v2133_v3 = vpack.c.bf16 %v730_v61, %v726_v59  ;;  %v2135_v8 = vpack.c.bf16 %v739_v1, %v735_v0  ;;  %v771_v52 = vld [vmem:[%s2909_s3 + $0xef8] sm:$0xff]  ;;  %v773_v61 = vld [vmem:[%s2909_s3 + $0xf08] sm:$0xff] }
 0x171   : > { %2114 = vmatpush1.bf16.msra.mxu1 %v2113_v4  ;;  %1860 = vmatprep.subr.bf16.mxu0 %v1859_v5  ;;  %v1879_v4 = vpack.c.bf16 %v737_v25, %v733_v62  ;;  %v732_v5 = vld [vmem:[%s2909_s3 + $0xdc0] sm:$0xff]  ;;  %v2151_v59 = vpack.c.bf16 %v771_v52, %v767_v51  ;;  %v777_v62 = vld [vmem:[%s2909_s3 + $0xf28] sm:$0xff]  ;;  %v775_v25 = vld [vmem:[%s2909_s3 + $0xf18] sm:$0xff] }
 0x172   : > { %2116 = vmatprep.subr.bf16.mxu1 %v2115_v9  ;;  %v738_v9 = vld [vmem:[%s2909_s3 + $0xdf0] sm:$0xff]  ;;  %v1881_v14 = vpack.c.bf16 %v736_v6, %v732_v5  ;;  %v779_v0 = vld [vmem:[%s2909_s3 + $0xf38] sm:$0xff]  ;;  %v776_v5 = vld [vmem:[%s2909_s3 + $0xf20] sm:$0xff] }
 0x173   : > { %v774_v6 = vld [vmem:[%s2909_s3 + $0xf10] sm:$0xff]  ;;  %v787_v13 = vld [vmem:[%s2909_s3 + $0xf78] sm:$0xff] }
 0x174   : > { %1862 = vmatpush1.bf16.msra.mxu0 %v1861_v15  ;;  %v2137_v15 = vpack.c.bf16 %v738_v9, %v734_v7  ;;  %v2155_v7 = vpack.c.bf16 %v779_v0, %v775_v25  ;;  %v781_v9 = vld [vmem:[%s2909_s3 + $0xf48] sm:$0xff]  ;;  %v803_v38 = vld [vmem:[%s2909_s3 + $0xff8] sm:$0xff]  ;;  %v1457_v25 = vsub.s32 (!%p1649_p9), 2, %v3013_v63  ;;  %v1461_v0 = vsub.s32 (!%p1649_p9), 3, %v3013_v63 }
 0x175   : > { %2118 = vmatpush1.bf16.msra.mxu1 %v2117_v16  ;;  %1864 = vmatprep.subr.bf16.mxu0 %v1863_v17  ;;  %v1883_v16 = vpack.c.bf16 %v745_v11, %v741_v10  ;;  %v740_v17 = vld [vmem:[%s2909_s3 + $0xe00] sm:$0xff]  ;;  %v785_v10 = vld [vmem:[%s2909_s3 + $0xf68] sm:$0xff]  ;;  %v783_v11 = vld [vmem:[%s2909_s3 + $0xf58] sm:$0xff] }
 0x176   : > { %2120 = vmatprep.subr.bf16.mxu1 %v2119_v21  ;;  %v746_v21 = vld [vmem:[%s2909_s3 + $0xe30] sm:$0xff]  ;;  %v1885_v28 = vpack.c.bf16 %v744_v18, %v740_v17  ;;  %v784_v17 = vld [vmem:[%s2909_s3 + $0xf60] sm:$0xff] }
 0x177   : > { %v782_v18 = vld [vmem:[%s2909_s3 + $0xf50] sm:$0xff] }
 0x178   : > { %1866 = vmatpush1.bf16.msra.mxu0 %v1865_v29  ;;  %v2141_v29 = vpack.c.bf16 %v746_v21, %v742_v19  ;;  %v2159_v19 = vpack.c.bf16 %v787_v13, %v783_v11  ;;  %v789_v21 = vld [vmem:[%s2909_s3 + $0xf88] sm:$0xff] }
 0x179   : > { %2122 = vmatpush1.bf16.msra.mxu1 %v2121_v30  ;;  %1868 = vmatprep.subr.bf16.mxu0 %v1867_v31  ;;  %v1887_v30 = vpack.c.bf16 %v753_v23, %v749_v22  ;;  %v748_v31 = vld [vmem:[%s2909_s3 + $0xe40] sm:$0xff]  ;;  %v793_v22 = vld [vmem:[%s2909_s3 + $0xfa8] sm:$0xff]  ;;  %v791_v23 = vld [vmem:[%s2909_s3 + $0xf98] sm:$0xff] }
 0x17a   : > { %2124 = vmatprep.subr.bf16.mxu1 %v2123_v35  ;;  %v754_v35 = vld [vmem:[%s2909_s3 + $0xe70] sm:$0xff]  ;;  %v1889_v41 = vpack.c.bf16 %v752_v32, %v748_v31  ;;  %v792_v31 = vld [vmem:[%s2909_s3 + $0xfa0] sm:$0xff] }
 0x17b   : > { %v790_v32 = vld [vmem:[%s2909_s3 + $0xf90] sm:$0xff] }
 0x17c   : > { %1870 = vmatpush1.bf16.msra.mxu0 %v1869_v42  ;;  %v2145_v42 = vpack.c.bf16 %v754_v35, %v750_v33  ;;  %v2163_v33 = vpack.c.bf16 %v795_v24, %v791_v23  ;;  %v797_v35 = vld [vmem:[%s2909_s3 + $0xfc8] sm:$0xff] }
 0x17d   : > { %2126 = vmatpush1.bf16.msra.mxu1 %v2125_v43  ;;  %1872 = vmatprep.subr.bf16.mxu0 %v1871_v44  ;;  %v1891_v43 = vpack.c.bf16 %v761_v37, %v757_v36  ;;  %v756_v44 = vld [vmem:[%s2909_s3 + $0xe80] sm:$0xff]  ;;  %v801_v36 = vld [vmem:[%s2909_s3 + $0xfe8] sm:$0xff]  ;;  %v799_v37 = vld [vmem:[%s2909_s3 + $0xfd8] sm:$0xff] }
 0x17e   : > { %2128 = vmatprep.subr.bf16.mxu1 %v2127_v49  ;;  %v762_v49 = vld [vmem:[%s2909_s3 + $0xeb0] sm:$0xff]  ;;  %v1893_v53 = vpack.c.bf16 %v760_v45, %v756_v44  ;;  %v800_v44 = vld [vmem:[%s2909_s3 + $0xfe0] sm:$0xff]  ;;  %v2167_v45 = vpack.c.bf16 %v803_v38, %v799_v37 }
 0x180   : > { %1874 = vmatpush1.bf16.msra.mxu0 %v1873_v54  ;;  %v2149_v54 = vpack.c.bf16 %v762_v49, %v758_v47  ;;  %v798_v47 = vld [vmem:[%s2909_s3 + $0xfd0] sm:$0xff] }
 0x181   : > { %2130 = vmatpush1.bf16.msra.mxu1 %v2129_v55  ;;  %1876 = vmatprep.subr.bf16.mxu0 %v1875_v56  ;;  %v1895_v55 = vpack.c.bf16 %v769_v50, %v765_v40  ;;  %v764_v56 = vld [vmem:[%s2909_s3 + $0xec0] sm:$0xff] }
 0x182   : > { %2132 = vmatprep.subr.bf16.mxu1 %v2131_v60  ;;  %v770_v60 = vld [vmem:[%s2909_s3 + $0xef0] sm:$0xff]  ;;  %v1897_v1 = vpack.c.bf16 %v768_v57, %v764_v56 }
 0x184   : > { %1878 = vmatpush1.bf16.msra.mxu0 %v1877_v2  ;;  %v2153_v2 = vpack.c.bf16 %v770_v60, %v766_v58  ;;  %v289_v58 = vld [vmem:[#allocation2] sm:$0xff] }
 0x185   : > { %2134 = vmatpush1.bf16.msra.mxu1 %v2133_v3  ;;  %1880 = vmatprep.subr.bf16.mxu0 %v1879_v4  ;;  %v1899_v3 = vpack.c.bf16 %v777_v62, %v773_v61  ;;  %v772_v4 = vld [vmem:[%s2909_s3 + $0xf00] sm:$0xff]  ;;  %v1453_v62 = vsub.s32 (!%p1649_p9), 1, %v3013_v63 }
 0x186   : > { %2136 = vmatprep.subr.bf16.mxu1 %v2135_v8  ;;  %v778_v8 = vld [vmem:[%s2909_s3 + $0xf30] sm:$0xff]  ;;  %v1901_v46 = vpack.c.bf16 %v776_v5, %v772_v4  ;;  %v1445_v61 = vld [vmem:[%s2919_s28] sm:$0xf] (!%p1649_p9) }
 0x187   : > { %v1462_v4 = vrot.slane (!%p1649_p9), %v1445_v61, %v1461_v0 }
 0x188   : > { %1882 = vmatpush1.bf16.msra.mxu0 %v1881_v14  ;;  %v2157_v14 = vpack.c.bf16 %v778_v8, %v774_v6 }
 0x189   : > { %2138 = vmatpush1.bf16.msra.mxu1 %v2137_v15  ;;  %1884 = vmatprep.subr.bf16.mxu0 %v1883_v16  ;;  %v1903_v15 = vpack.c.bf16 %v785_v10, %v781_v9  ;;  %v780_v16 = vld [vmem:[%s2909_s3 + $0xf40] sm:$0xff] }
 0x18a   : > { %2140 = vmatprep.subr.bf16.mxu1 %v2139_v20  ;;  %v786_v20 = vld [vmem:[%s2909_s3 + $0xf70] sm:$0xff]  ;;  %v1905_v27 = vpack.c.bf16 %v784_v17, %v780_v16 }
 0x18c   : > { %1886 = vmatpush1.bf16.msra.mxu0 %v1885_v28  ;;  %v2161_v28 = vpack.c.bf16 %v786_v20, %v782_v18 }
 0x18d   : > { %2142 = vmatpush1.bf16.msra.mxu1 %v2141_v29  ;;  %1888 = vmatprep.subr.bf16.mxu0 %v1887_v30  ;;  %v1907_v29 = vpack.c.bf16 %v793_v22, %v789_v21  ;;  %v788_v30 = vld [vmem:[%s2909_s3 + $0xf80] sm:$0xff] }
 0x18e   : > { %2144 = vmatprep.subr.bf16.mxu1 %v2143_v34  ;;  %v794_v34 = vld [vmem:[%s2909_s3 + $0xfb0] sm:$0xff]  ;;  %v1909_v39 = vpack.c.bf16 %v792_v31, %v788_v30 }
 0x190   : > { %1890 = vmatpush1.bf16.msra.mxu0 %v1889_v41  ;;  %v2165_v41 = vpack.c.bf16 %v794_v34, %v790_v32 }
 0x191   : > { %2146 = vmatpush1.bf16.msra.mxu1 %v2145_v42  ;;  %1892 = vmatprep.subr.bf16.mxu0 %v1891_v43  ;;  %v1911_v42 = vpack.c.bf16 %v801_v36, %v797_v35  ;;  %v796_v43 = vld [vmem:[%s2909_s3 + $0xfc0] sm:$0xff] }
 0x192   : > { %2148 = vmatprep.subr.bf16.mxu1 %v2147_v48  ;;  %v802_v48 = vld [vmem:[%s2909_s3 + $0xff0] sm:$0xff]  ;;  %v1913_v49 = vpack.c.bf16 %v800_v44, %v796_v43 }
 0x193   : > { %v2169_v40 = vpack.c.bf16 %v802_v48, %v798_v47 }
 0x194   : > { %1894 = vmatpush1.bf16.msra.mxu0 %v1893_v53 }
 0x195   : > { %2150 = vmatpush1.bf16.msra.mxu1 %v2149_v54  ;;  %1896 = vmatprep.subr.bf16.mxu0 %v1895_v55 }
 0x196   : > { %2152 = vmatprep.subr.bf16.mxu1 %v2151_v59 }
 0x198   : > { %1898 = vmatpush1.bf16.msra.mxu0 %v1897_v1 }
 0x199   : > { %2154 = vmatpush1.bf16.msra.mxu1 %v2153_v2  ;;  %1900 = vmatprep.subr.bf16.mxu0 %v1899_v3  ;;  %v1454_v2 = vrot.slane (!%p1649_p9), %v1445_v61, %v1453_v62  ;;  %v1458_v3 = vrot.slane (!%p1649_p9), %v1445_v61, %v1457_v25 }
 0x19a   : > { %2156 = vmatprep.subr.bf16.mxu1 %v2155_v7 }
 0x19b   : > { %v1464_v6 = vcombine.low (!%p1649_p9), %v1458_v3, %v1462_v4 }
 0x19c   : > { %1902 = vmatpush1.bf16.msra.mxu0 %v1901_v46 }
 0x19d   : > { %2158 = vmatpush1.bf16.msra.mxu1 %v2157_v14  ;;  %1904 = vmatprep.subr.bf16.mxu0 %v1903_v15  ;;  %v1478_v8 = vrot.slane (!%p1649_p9), %v1464_v6, %v3024_v12 }
 0x19e   : > { %2160 = vmatprep.subr.bf16.mxu1 %v2159_v19 }
 0x1a0   : > { %1906 = vmatpush1.bf16.msra.mxu0 %v1905_v27 }
 0x1a1   : > { %2162 = vmatpush1.bf16.msra.mxu1 %v2161_v28  ;;  %1908 = vmatprep.subr.bf16.mxu0 %v1907_v29 }
 0x1a2   : > { %2164 = vmatprep.subr.bf16.mxu1 %v2163_v33 }
 0x1a4   : > { %1910 = vmatpush1.bf16.msra.mxu0 %v1909_v39 }
 0x1a5   : > { %2166 = vmatpush1.bf16.msra.mxu1 %v2165_v41  ;;  %1912 = vmatprep.subr.bf16.mxu0 %v1911_v42 }
 0x1a6   : > { %2168 = vmatprep.subr.bf16.mxu1 %v2167_v45 }
 0x1a8   : > { %1914 = vmatpush1.bf16.msra.mxu0 %v1913_v49 }
 0x1a9   : > { %2170 = vmatpush1.bf16.msra.mxu1 %v2169_v40 }
 0x1ab   : > { %1126 = vmatmul.mubr.f32.vlgmr.msra.gmra.mrb[0].mxu0 %v3362_v26 }
 0x1ac   : > { %1410 = vmatmul.mubr.f32.vlgmr.msra.gmra.mrb[0].mxu1 %v3362_v26  ;;  %v1449_v26 = vsub.s32 (!%p1649_p9), 0, %v3013_v63 }
 0x1ae   : > { %v1450_v1 = vrot.slane (!%p1649_p9), %v1445_v61, %v1449_v26 }
 0x1b0   : > { %v1463_v5 = vcombine.low (!%p1649_p9), %v1450_v1, %v1454_v2 }
 0x1b2   : > { %v1471_v7 = vrot.slane (!%p1649_p9), %v1463_v5, %v3024_v12 }
 0x1b4   : > { %v1479_v10 = vcombine.low (!%p1649_p9), %v1471_v7, %v1478_v8 }
 0x27e   : > { %v1127_v50 = vpop.f32.mrb[0].mxu0 }
 0x27f   : > { %v1411_v51 = vpop.f32.mrb[0].mxu1  ;;  %v1129_v52 = vpop.f32.mrb[1].mxu0 }
 0x280   : > { %v1420_v53 = vcombine.low %v1127_v50, %v1129_v52  ;;  %v1413_v54 = vpop.f32.mrb[1].mxu1 }
 0x281   : > { %v1421_v55 = vcombine.low %v1411_v51, %v1413_v54 }
 0x282   : > { %v1428_v56 = vrot.slane %v1420_v53, %v3024_v12 }
 0x283   : > { %v1435_v57 = vrot.slane %v1421_v55, %v3024_v12  ;;  %1443 = sbr.rel (%p1649_p9) target bundleno = 663 (0x297), region = 52 }
 0x285   : > { %v1436_v59 = vcombine.low %v1428_v56, %v1435_v57 }
 0x287   : > { %v1438_v60 = vadd.f32 %v1436_v59, %v289_v58 }
 0x289   : > { %1439 = vst [vmem:[#allocation2] sm:$0xff] %v1438_v60 }
 0x290   : > { %v1444_v9 = vld [vmem:[#allocation2] sm:$0xff] }
 0x291   : > { %v1481_v11 = vadd.f32 %v1479_v10, %v1444_v9 }
 0x293   : > { %vm1482_vm0 = vcmp.ge.f32.partialorder %v1481_v11, 0.0  ;;  %v1483_v13 = vmul.f32 0.2, %v1481_v11 }
 0x295   : > { %v1484_v46 = vsel %vm1482_vm0, %v1481_v11, %v1483_v13 }
 0x296   : > { %1485 = vst [vmem:[%s2926_s1] sm:$0xff] %v1484_v46 }
 0x297 PF: > { %s3626_s21 = sld [smem:[#allocation15_spill]]  ;;  %s3627_s22 = sld [smem:[#allocation22_spill]] }
 0x298   : > { %s1501_s24 = sshll.u32 %s2926_s1, 4  ;;  %s1487_s20 = scalar_lea.sflag [#allocation5], %s2916_s10  ;;  %s1502_s24 = int_to_ptr.vmem [resolvable:$true] %s1501_s24 }
 0x299   : > { %s2416_s29 = scalar_lea.vmem %s1502_s24, 128  ;;  %p3629_p0 = scmp.ne.s32.totalorder %s3618_s30, 0 }
 0x29a   : > { %p2417_p1 = scmp.ne.s32.totalorder %s1502_s24, %s2416_s29  ;;  %s2580_s6 = smov [#allocation9]  }
 0x29b   : > { %s2420_s26 = sshll.u32 %s2580_s6, 4  ;;  %s2421_s26 = int_to_ptr.vmem [resolvable:$false] %s2420_s26 }
 0x29c   : > { %p2418_p5 = pnand %p2417_p1, %p3629_p0  ;;  %s2422_s3 = scalar_lea.vmem %s2421_s26, 256 }
 0x29d   : > { %s1658_s5 = sshll.u32 %s3626_s21, 7  ;;  %s3628_s0 = smov %s3627_s22 }
 0x29e   : > { %s3503_s15 = scalar_lea.hbm %s3627_s22, %s1658_s5  ;;  %p2419_p3 = pneg %p2418_p5 }
 0x29f   : > { %p2423_p7 = scmp.lt.s32.totalorder %s1502_s24, %s2421_s26  ;;  %p2424_p12 = scmp.lt.s32.totalorder %s2422_s3, %s2416_s29 }
 0x2a1   : > { %p2425_p8 = por %p2424_p12, %p2423_p7 }
 0x2a3   : > { %p2426_p13 = pnand %p2425_p8, %p2419_p3 }
 0x2a5   : > { %2429 = shalt.err (!%p2426_p13)
}
 0x2a6   : > { %s2430_s10 = scalar_lea.hbm %s3503_s15, 128  ;;  %s2434_s8 = scalar_lea.hbm %s3628_s0, 256 }
 0x2a7   : > { %p2431_p10 = scmp.ne.s32.totalorder %s3503_s15, %s2430_s10  ;;  %p2435_p6 = scmp.lt.u32.totalorder %s3503_s15, %s3628_s0 }
 0x2a8   : > { %p2436_p11 = scmp.lt.u32.totalorder %s2434_s8, %s2430_s10  ;;  %p2438_p1 = scmp.lt.u32.totalorder %s2430_s10, %s3503_s15 }
 0x2a9   : > { %p2432_p4 = pnand %p2431_p10, %p3629_p0 }
 0x2aa   : > { %p2437_p9 = por %p2436_p11, %p2435_p6 }
 0x2ab   : > { %p2433_p2 = pneg %p2432_p4 }
 0x2ac   : > { %p2439_p5 = por %p2438_p1, %p2437_p9 }
 0x2ae   : > { %p2440_p3 = pnand %p2439_p5, %p2433_p2 }
 0x2b0   : > { %2443 = shalt.err (!%p2440_p3)
}
 0x2b1   : > { %2189 = dma.vmem_to_hbm [thread:$0]  (%p3629_p0), %s1502_s24, 128, %s3503_s15, %s1487_s20  }
 0x2b2 PF: > { %p2206_p7 = scmp.ge.s32.totalorder %s2570_s25, 2  ;;  %s1513_s5 = sand.u32 1, %s2518_s12  }
 0x2b3   : > { %p3630_p12 = scmp.ne.s32.totalorder %s3619_s7, 0  ;;  %s1514_s18 = scalar_lea.sflag [#allocation5], %s1513_s5 }
 0x2b5   : > { %p2202_p8 = pnand %p2206_p7, %p3630_p12 }
 0x2b7   : > { %2513 = dma.done.wait (!%p2202_p8), %s1514_s18, 128  }
 0x2b8   : > { %2515 = vsyncadd (!%p2202_p8), %s1514_s18, 4294967168  ;;  %s22_s25 = sadd.s32 1, %s2570_s25   ;;  %s3632_s30 = sld [smem:[#allocation14_spill]] }
 0x2b9   : > { %p3529_p13 = scmp.ge.s32.totalorder %s22_s25, 20   ;;  %s3633_s20 = sld [smem:[#allocation19_spill]] }
 0x2ba   : > { %s3634_s22 = sld [smem:[#allocation16_spill]]  ;;  %s3635_s7 = sld [smem:[#allocation17_spill]] }
 0x2bb   : > { %s3636_s24 = sld [smem:[#allocation18_spill]]  ;;  %s3637_s12 = smov %s2522_s13 }
 0x2bc   : > { %s3638_s13 = smov %s2526_s14  ;;  %s3639_s14 = smov %s2835_s4 }
 0x2bd   : > { %s3640_s15 = smov %s2534_s16  ;;  %s3641_s16 = smov %s2538_s17 }
 0x2be   : > { %s3642_s17 = smov %s2787_s11  ;;  %s3643_s18 = smov %s2546_s19 }
 0x2bf   : > { %s3644_s19 = smov %s3632_s30  ;;  %s3645_s21 = smov %s2562_s23 }
 0x2c0   : > { %s3646_s23 = smov %s3635_s7  ;;  %21 = sbr.rel (!%p3529_p13) target bundleno = 16 (0x10), region = 109 }
 0x2c7   :  { %1519 = vsyncpa [#allocation4], 1 }
 0x2c8   :  { %1521 = vsyncpa [#allocation4 + $0x1], 1 }
 0x2c9   :  { %1522 = vsyncpa [#allocation7], 1 }
 0x2ca   :  { %1524 = vsyncpa [#allocation7 + $0x1], 1 }
 0x2cb   :  { %1525 = vsyncpa [#allocation5], 1 }
 0x2cc   :  { %1527 = vsyncpa [#allocation5 + $0x1], 1 }

// kernel: inf_model_forward.15
= control target key start
LH: loop header
LB: loop body
LE: loop exit
PB: predicated region body
PF: predicated region fallthrough
CT: control target
= control target key end

     0   :  { %8 = vsyncpa [#allocation4], 0  ;;  %s2022_s0 = inlined_call_operand.hbm [shape: f32[2,1024], index: 0, kind: input, shape index: {}]   ;;  %s2023_s1 = inlined_call_operand.hbm [shape: f32[1024,512], index: 1, kind: input, shape index: {}]   ;;  %s2024_s2 = inlined_call_operand.hbm [shape: f32[1,512], index: 2, kind: input, shape index: {}]   ;;  %s2025_s3 = inlined_call_operand.hbm [shape: f32[2,512], index: 3, kind: output, shape index: {}]  }
   0x1   :  { %9 = vsyncpa [#allocation7], 0 }
   0x2   :  { %10 = vsyncpa [#allocation5], 0  ;;  %s1896_s12 = smov [#allocation6]   ;;  %s1802_s16 = scalar_lea.hbm %s2023_s1, 65536 }
   0x3   :  { %s26_s13 = sshll.u32 %s1896_s12, 4  ;;  %p1803_p0 = scmp.ne.s32.totalorder %s2023_s1, %s1802_s16  ;;  %s27_s13 = int_to_ptr.vmem [resolvable:$true] %s26_s13 }
   0x4   :  { %p1806_p1 = scmp.lt.u32.totalorder %s1802_s16, %s2023_s1 }
   0x6   :  { %p1808_p2 = pnand %p1806_p1, %p1803_p0 }
   0x8   :  { %1811 = shalt.err (!%p1808_p2)
}
   0x9   :  { %s1812_s21 = scalar_lea.vmem %s27_s13, 65536  ;;  %p1817_p4 = scmp.lt.s32.totalorder %s27_s13, %s27_s13 }
   0xa   :  { %p1813_p3 = scmp.ne.s32.totalorder %s27_s13, %s1812_s21  ;;  %p1818_p5 = scmp.lt.s32.totalorder %s1812_s21, %s1812_s21 }
   0xc   :  { %p1819_p6 = por %p1818_p5, %p1817_p4 }
   0xe   :  { %p1820_p7 = pnand %p1819_p6, %p1813_p3 }
  0x10   :  { %1823 = shalt.err (!%p1820_p7)
}
  0x11   :  { %s1897_s22 = smov 512   ;;  %s1898_s23 = smov 32  }
  0x12   :  { %32 = dma.hbm_to_vmem [thread:$0]  %s2023_s1, 65536, %s27_s13, [#allocation7], %s1897_s22, %s1897_s22, %s1898_s23  }
  0x13   :  { %s1899_s26 = smov [#allocation3]   ;;  %s1900_s28 = smov [#allocation8]  }
  0x14   :  { %s17_s27 = sshll.u32 %s1899_s26, 4  ;;  %s39_s29 = sshll.u32 %s1900_s28, 4  ;;  %s18_s27 = int_to_ptr.vmem [resolvable:$true] %s17_s27  ;;  %s40_s29 = int_to_ptr.vmem [resolvable:$true] %s39_s29 }
  0x15   :  { %s1824_s5 = scalar_lea.hbm %s2022_s0, 256 }
  0x16   :  { %p1825_p8 = scmp.ne.s32.totalorder %s2022_s0, %s1824_s5  ;;  %p1828_p9 = scmp.lt.u32.totalorder %s1824_s5, %s2022_s0 }
  0x18   :  { %p1830_p10 = pnand %p1828_p9, %p1825_p8 }
  0x1a   :  { %1833 = shalt.err (!%p1830_p10)
}
  0x1b   :  { %s1834_s1 = scalar_lea.vmem %s18_s27, 256  ;;  %p1839_p12 = scmp.lt.s32.totalorder %s18_s27, %s18_s27 }
  0x1c   :  { %p1835_p11 = scmp.ne.s32.totalorder %s18_s27, %s1834_s1  ;;  %p1840_p13 = scmp.lt.s32.totalorder %s1834_s1, %s1834_s1 }
  0x1e   :  { %p1841_p0 = por %p1840_p13, %p1839_p12 }
  0x20   :  { %p1842_p1 = pnand %p1841_p0, %p1835_p11 }
  0x22   :  { %1845 = shalt.err (!%p1842_p1)
}
  0x23   :  { %20 = dma.hbm_to_vmem [thread:$0]  %s2022_s0, 256, %s18_s27, [#allocation4]  }
  0x24   :  { %s1846_s14 = scalar_lea.hbm %s2024_s2, 64 }
  0x25   :  { %p1847_p2 = scmp.ne.s32.totalorder %s2024_s2, %s1846_s14  ;;  %p1850_p3 = scmp.lt.u32.totalorder %s1846_s14, %s2024_s2 }
  0x27   :  { %p1852_p4 = pnand %p1850_p3, %p1847_p2 }
  0x29   :  { %1855 = shalt.err (!%p1852_p4)
}
  0x2a   :  { %s1856_s19 = scalar_lea.vmem %s40_s29, 64  ;;  %p1861_p6 = scmp.lt.s32.totalorder %s40_s29, %s40_s29 }
  0x2b   :  { %p1857_p5 = scmp.ne.s32.totalorder %s40_s29, %s1856_s19  ;;  %p1862_p7 = scmp.lt.s32.totalorder %s1856_s19, %s1856_s19 }
  0x2d   :  { %p1863_p8 = por %p1862_p7, %p1861_p6 }
  0x2f   :  { %p1864_p9 = pnand %p1863_p8, %p1857_p5 }
  0x31   :  { %1867 = shalt.err (!%p1864_p9)
}
  0x32   :  { %42 = dma.hbm_to_vmem [thread:$0]  %s2024_s2, 64, %s40_s29, [#allocation7]  }
  0x33   :  { %1890 = dma.done.wait [#allocation4], 256  }
  0x34   :  { %1891 = vsyncadd [#allocation4], 4294967040 }
  0x35   :  { %1892 = dma.done.wait [#allocation7], 65600  }
  0x36   :  { %1893 = vsyncadd [#allocation7], 4294901696  ;;  %v61_v0 = vld [vmem:[#allocation6 + $0x8] sm:$0xff]  ;;  %v63_v2 = vld [vmem:[#allocation6 + $0x18] sm:$0xff]  ;;  %s1902_s2 = smov [#allocation9]  }
  0x37   :  { %v65_v1 = vld [vmem:[#allocation6 + $0x28] sm:$0xff]  ;;  %v67_v4 = vld [vmem:[#allocation6 + $0x38] sm:$0xff]  ;;  %v60_v5 = vld [vmem:[#allocation6] sm:$0xff]  ;;  %s1259_s21 = sshll.u32 %s1902_s2, 4  ;;  %s1260_s21 = int_to_ptr.vmem [resolvable:$true] %s1259_s21 }
  0x38   :  { %v1269_v3 = vpack.c.bf16 %v65_v1, %v61_v0  ;;  %v64_v6 = vld [vmem:[#allocation6 + $0x20] sm:$0xff]  ;;  %v1525_v7 = vpack.c.bf16 %v67_v4, %v63_v2  ;;  %v62_v9 = vld [vmem:[#allocation6 + $0x10] sm:$0xff]  ;;  %v69_v11 = vld [vmem:[#allocation6 + $0x48] sm:$0xff]  ;;  %s1868_s22 = scalar_lea.vmem %s1260_s21, 128  ;;  %p1873_p11 = scmp.lt.s32.totalorder %s1260_s21, %s1260_s21 }
  0x39   :  { %v1271_v8 = vpack.c.bf16 %v64_v6, %v60_v5  ;;  %v66_v10 = vld [vmem:[#allocation6 + $0x30] sm:$0xff]  ;;  %v73_v13 = vld [vmem:[#allocation6 + $0x68] sm:$0xff]  ;;  %v71_v14 = vld [vmem:[#allocation6 + $0x58] sm:$0xff]  ;;  %p1869_p10 = scmp.ne.s32.totalorder %s1260_s21, %s1868_s22  ;;  %p1874_p12 = scmp.lt.s32.totalorder %s1868_s22, %s1868_s22 }
  0x3a   :  { %1270 = vmatprep.subr.bf16.mxu0 %v1269_v3  ;;  %v1527_v12 = vpack.c.bf16 %v66_v10, %v62_v9  ;;  %v75_v15 = vld [vmem:[#allocation6 + $0x78] sm:$0xff]  ;;  %1526 = vmatprep.subr.bf16.mxu1 %v1525_v7  ;;  %v1273_v16 = vpack.c.bf16 %v73_v13, %v69_v11  ;;  %v68_v18 = vld [vmem:[#allocation6 + $0x40] sm:$0xff]  ;;  %v70_v20 = vld [vmem:[#allocation6 + $0x50] sm:$0xff] }
  0x3b   :  { %1272 = vmatpush1.bf16.msra.mxu0 %v1271_v8  ;;  %v1529_v17 = vpack.c.bf16 %v75_v15, %v71_v14  ;;  %v72_v19 = vld [vmem:[#allocation6 + $0x60] sm:$0xff]  ;;  %v74_v22 = vld [vmem:[#allocation6 + $0x70] sm:$0xff]  ;;  %v77_v23 = vld [vmem:[#allocation6 + $0x88] sm:$0xff]  ;;  %p1875_p13 = por %p1874_p12, %p1873_p11 }
  0x3c   :  { %1528 = vmatpush1.bf16.msra.mxu1 %v1527_v12  ;;  %v1275_v21 = vpack.c.bf16 %v72_v19, %v68_v18  ;;  %v81_v24 = vld [vmem:[#allocation6 + $0xa8] sm:$0xff]  ;;  %1274 = vmatprep.subr.bf16.mxu0 %v1273_v16  ;;  %v1531_v25 = vpack.c.bf16 %v74_v22, %v70_v20  ;;  %v79_v27 = vld [vmem:[#allocation6 + $0x98] sm:$0xff]  ;;  %v76_v29 = vld [vmem:[#allocation6 + $0x80] sm:$0xff] }
  0x3d   :  { %1530 = vmatprep.subr.bf16.mxu1 %v1529_v17  ;;  %v1277_v26 = vpack.c.bf16 %v81_v24, %v77_v23  ;;  %v83_v28 = vld [vmem:[#allocation6 + $0xb8] sm:$0xff]  ;;  %v80_v31 = vld [vmem:[#allocation6 + $0xa0] sm:$0xff]  ;;  %v78_v32 = vld [vmem:[#allocation6 + $0x90] sm:$0xff]  ;;  %p1876_p0 = pnand %p1875_p13, %p1869_p10 }
  0x3e   :  { %v1533_v30 = vpack.c.bf16 %v83_v28, %v79_v27  ;;  %v82_v33 = vld [vmem:[#allocation6 + $0xb0] sm:$0xff]  ;;  %v1279_v34 = vpack.c.bf16 %v80_v31, %v76_v29  ;;  %v85_v35 = vld [vmem:[#allocation6 + $0xc8] sm:$0xff]  ;;  %v87_v37 = vld [vmem:[#allocation6 + $0xd8] sm:$0xff] }
  0x3f   :  { %1276 = vmatpush1.bf16.msra.mxu0 %v1275_v21  ;;  %v89_v36 = vld [vmem:[#allocation6 + $0xe8] sm:$0xff]  ;;  %v1535_v38 = vpack.c.bf16 %v82_v33, %v78_v32  ;;  %v91_v40 = vld [vmem:[#allocation6 + $0xf8] sm:$0xff]  ;;  %v84_v41 = vld [vmem:[#allocation6 + $0xc0] sm:$0xff] }
  0x40   :  { %1532 = vmatpush1.bf16.msra.mxu1 %v1531_v25  ;;  %1278 = vmatprep.subr.bf16.mxu0 %v1277_v26  ;;  %v1281_v39 = vpack.c.bf16 %v89_v36, %v85_v35  ;;  %v88_v42 = vld [vmem:[#allocation6 + $0xe0] sm:$0xff]  ;;  %v1537_v43 = vpack.c.bf16 %v91_v40, %v87_v37  ;;  %v86_v44 = vld [vmem:[#allocation6 + $0xd0] sm:$0xff]  ;;  %v93_v46 = vld [vmem:[#allocation6 + $0x108] sm:$0xff] }
  0x41   :  { %1534 = vmatprep.subr.bf16.mxu1 %v1533_v30  ;;  %v90_v45 = vld [vmem:[#allocation6 + $0xf0] sm:$0xff]  ;;  %v97_v47 = vld [vmem:[#allocation6 + $0x128] sm:$0xff]  ;;  %v95_v48 = vld [vmem:[#allocation6 + $0x118] sm:$0xff]  ;;  %v1283_v50 = vpack.c.bf16 %v88_v42, %v84_v41 }
  0x42   :  { %v99_v49 = vld [vmem:[#allocation6 + $0x138] sm:$0xff]  ;;  %v1539_v51 = vpack.c.bf16 %v90_v45, %v86_v44  ;;  %v1285_v52 = vpack.c.bf16 %v97_v47, %v93_v46  ;;  %v92_v53 = vld [vmem:[#allocation6 + $0x100] sm:$0xff]  ;;  %v94_v55 = vld [vmem:[#allocation6 + $0x110] sm:$0xff]  ;;  %v1901_v46 = vmov 1983009808  }
  0x43   :  { %1280 = vmatpush1.bf16.msra.mxu0 %v1279_v34  ;;  %v96_v54 = vld [vmem:[#allocation6 + $0x120] sm:$0xff]  ;;  %v1541_v56 = vpack.c.bf16 %v99_v49, %v95_v48  ;;  %v98_v57 = vld [vmem:[#allocation6 + $0x130] sm:$0xff]  ;;  %v101_v58 = vld [vmem:[#allocation6 + $0x148] sm:$0xff]  ;;  %v576_v47 = vunpack.c.l.s4 %v1901_v46  ;;  %v578_v48 = vlaneseq }
  0x44   :  { %1536 = vmatpush1.bf16.msra.mxu1 %v1535_v38  ;;  %1282 = vmatprep.subr.bf16.mxu0 %v1281_v39  ;;  %v105_v59 = vld [vmem:[#allocation6 + $0x168] sm:$0xff]  ;;  %v103_v60 = vld [vmem:[#allocation6 + $0x158] sm:$0xff]  ;;  %v1287_v62 = vpack.c.bf16 %v96_v54, %v92_v53  ;;  %v1543_v63 = vpack.c.bf16 %v98_v57, %v94_v55  ;;  %v100_v1 = vld [vmem:[#allocation6 + $0x140] sm:$0xff] }
  0x45   :  { %1538 = vmatprep.subr.bf16.mxu1 %v1537_v43  ;;  %v107_v61 = vld [vmem:[#allocation6 + $0x178] sm:$0xff]  ;;  %v1289_v0 = vpack.c.bf16 %v105_v59, %v101_v58  ;;  %v104_v2 = vld [vmem:[#allocation6 + $0x160] sm:$0xff]  ;;  %v102_v3 = vld [vmem:[#allocation6 + $0x150] sm:$0xff] }
  0x46   :  { %v1545_v4 = vpack.c.bf16 %v107_v61, %v103_v60  ;;  %v106_v5 = vld [vmem:[#allocation6 + $0x170] sm:$0xff]  ;;  %v109_v6 = vld [vmem:[#allocation6 + $0x188] sm:$0xff]  ;;  %v111_v8 = vld [vmem:[#allocation6 + $0x198] sm:$0xff]  ;;  %v1291_v10 = vpack.c.bf16 %v104_v2, %v100_v1  ;;  %v577_v61 = vunpack.c.0.s8 %v576_v47 }
  0x47   :  { %1284 = vmatpush1.bf16.msra.mxu0 %v1283_v50  ;;  %v113_v7 = vld [vmem:[#allocation6 + $0x1a8] sm:$0xff]  ;;  %v115_v9 = vld [vmem:[#allocation6 + $0x1b8] sm:$0xff]  ;;  %v1547_v11 = vpack.c.bf16 %v106_v5, %v102_v3  ;;  %v108_v13 = vld [vmem:[#allocation6 + $0x180] sm:$0xff] }
  0x48   :  { %1540 = vmatpush1.bf16.msra.mxu1 %v1539_v51  ;;  %1286 = vmatprep.subr.bf16.mxu0 %v1285_v52  ;;  %v1293_v12 = vpack.c.bf16 %v113_v7, %v109_v6  ;;  %v112_v14 = vld [vmem:[#allocation6 + $0x1a0] sm:$0xff]  ;;  %v110_v15 = vld [vmem:[#allocation6 + $0x190] sm:$0xff]  ;;  %v1549_v16 = vpack.c.bf16 %v115_v9, %v111_v8  ;;  %v117_v18 = vld [vmem:[#allocation6 + $0x1c8] sm:$0xff] }
  0x49   :  { %1542 = vmatprep.subr.bf16.mxu1 %v1541_v56  ;;  %v114_v17 = vld [vmem:[#allocation6 + $0x1b0] sm:$0xff]  ;;  %v121_v19 = vld [vmem:[#allocation6 + $0x1e8] sm:$0xff]  ;;  %v119_v20 = vld [vmem:[#allocation6 + $0x1d8] sm:$0xff]  ;;  %v1295_v22 = vpack.c.bf16 %v112_v14, %v108_v13 }
  0x4a   :  { %v123_v21 = vld [vmem:[#allocation6 + $0x1f8] sm:$0xff]  ;;  %v1551_v23 = vpack.c.bf16 %v114_v17, %v110_v15  ;;  %v1297_v24 = vpack.c.bf16 %v121_v19, %v117_v18  ;;  %v116_v25 = vld [vmem:[#allocation6 + $0x1c0] sm:$0xff]  ;;  %v118_v27 = vld [vmem:[#allocation6 + $0x1d0] sm:$0xff] }
  0x4b   :  { %1288 = vmatpush1.bf16.msra.mxu0 %v1287_v62  ;;  %v120_v26 = vld [vmem:[#allocation6 + $0x1e0] sm:$0xff]  ;;  %v1553_v28 = vpack.c.bf16 %v123_v21, %v119_v20  ;;  %v122_v29 = vld [vmem:[#allocation6 + $0x1f0] sm:$0xff]  ;;  %v125_v30 = vld [vmem:[#allocation6 + $0x208] sm:$0xff]  ;;  %v1959_v62 = vshrl.u32 %v578_v48, 7 }
  0x4c   :  { %1544 = vmatpush1.bf16.msra.mxu1 %v1543_v63  ;;  %1290 = vmatprep.subr.bf16.mxu0 %v1289_v0  ;;  %v129_v31 = vld [vmem:[#allocation6 + $0x228] sm:$0xff]  ;;  %v127_v32 = vld [vmem:[#allocation6 + $0x218] sm:$0xff]  ;;  %v1299_v34 = vpack.c.bf16 %v120_v26, %v116_v25  ;;  %v1555_v35 = vpack.c.bf16 %v122_v29, %v118_v27  ;;  %v124_v37 = vld [vmem:[#allocation6 + $0x200] sm:$0xff] }
  0x4d   :  { %1546 = vmatprep.subr.bf16.mxu1 %v1545_v4  ;;  %v131_v33 = vld [vmem:[#allocation6 + $0x238] sm:$0xff]  ;;  %v1301_v36 = vpack.c.bf16 %v129_v31, %v125_v30  ;;  %v128_v38 = vld [vmem:[#allocation6 + $0x220] sm:$0xff]  ;;  %v126_v39 = vld [vmem:[#allocation6 + $0x210] sm:$0xff] }
  0x4e   :  { %v1557_v40 = vpack.c.bf16 %v131_v33, %v127_v32  ;;  %v130_v41 = vld [vmem:[#allocation6 + $0x230] sm:$0xff]  ;;  %v133_v42 = vld [vmem:[#allocation6 + $0x248] sm:$0xff]  ;;  %v135_v44 = vld [vmem:[#allocation6 + $0x258] sm:$0xff]  ;;  %v1303_v49 = vpack.c.bf16 %v128_v38, %v124_v37 }
  0x4f   :  { %1292 = vmatpush1.bf16.msra.mxu0 %v1291_v10  ;;  %v137_v43 = vld [vmem:[#allocation6 + $0x268] sm:$0xff]  ;;  %v139_v45 = vld [vmem:[#allocation6 + $0x278] sm:$0xff]  ;;  %v1559_v50 = vpack.c.bf16 %v130_v41, %v126_v39  ;;  %v132_v52 = vld [vmem:[#allocation6 + $0x240] sm:$0xff] }
  0x50   :  { %1548 = vmatpush1.bf16.msra.mxu1 %v1547_v11  ;;  %1294 = vmatprep.subr.bf16.mxu0 %v1293_v12  ;;  %v1305_v51 = vpack.c.bf16 %v137_v43, %v133_v42  ;;  %v136_v53 = vld [vmem:[#allocation6 + $0x260] sm:$0xff]  ;;  %v134_v54 = vld [vmem:[#allocation6 + $0x250] sm:$0xff]  ;;  %v1561_v55 = vpack.c.bf16 %v139_v45, %v135_v44  ;;  %v141_v57 = vld [vmem:[#allocation6 + $0x288] sm:$0xff]  ;;  %v1962_v11 = vsub.s32 %v577_v61, %v1959_v62 }
  0x51   :  { %1550 = vmatprep.subr.bf16.mxu1 %v1549_v16  ;;  %v138_v56 = vld [vmem:[#allocation6 + $0x270] sm:$0xff]  ;;  %v145_v58 = vld [vmem:[#allocation6 + $0x2a8] sm:$0xff]  ;;  %v143_v59 = vld [vmem:[#allocation6 + $0x298] sm:$0xff]  ;;  %v1307_v63 = vpack.c.bf16 %v136_v53, %v132_v52 }
  0x52   :  { %v147_v60 = vld [vmem:[#allocation6 + $0x2b8] sm:$0xff]  ;;  %v1563_v0 = vpack.c.bf16 %v138_v56, %v134_v54  ;;  %v1309_v1 = vpack.c.bf16 %v145_v58, %v141_v57  ;;  %v140_v2 = vld [vmem:[#allocation6 + $0x280] sm:$0xff]  ;;  %v142_v4 = vld [vmem:[#allocation6 + $0x290] sm:$0xff] }
  0x53   :  { %1296 = vmatpush1.bf16.msra.mxu0 %v1295_v22  ;;  %v144_v3 = vld [vmem:[#allocation6 + $0x2a0] sm:$0xff]  ;;  %v1565_v5 = vpack.c.bf16 %v147_v60, %v143_v59  ;;  %v146_v6 = vld [vmem:[#allocation6 + $0x2b0] sm:$0xff]  ;;  %v149_v7 = vld [vmem:[#allocation6 + $0x2c8] sm:$0xff] }
  0x54   :  { %1552 = vmatpush1.bf16.msra.mxu1 %v1551_v23  ;;  %1298 = vmatprep.subr.bf16.mxu0 %v1297_v24  ;;  %v153_v8 = vld [vmem:[#allocation6 + $0x2e8] sm:$0xff]  ;;  %v151_v9 = vld [vmem:[#allocation6 + $0x2d8] sm:$0xff]  ;;  %v1311_v12 = vpack.c.bf16 %v144_v3, %v140_v2  ;;  %v148_v13 = vld [vmem:[#allocation6 + $0x2c0] sm:$0xff]  ;;  %v1567_v14 = vpack.c.bf16 %v146_v6, %v142_v4 }
  0x55   :  { %1554 = vmatprep.subr.bf16.mxu1 %v1553_v28  ;;  %v155_v10 = vld [vmem:[#allocation6 + $0x2f8] sm:$0xff]  ;;  %v1313_v15 = vpack.c.bf16 %v153_v8, %v149_v7  ;;  %v152_v16 = vld [vmem:[#allocation6 + $0x2e0] sm:$0xff]  ;;  %v150_v17 = vld [vmem:[#allocation6 + $0x2d0] sm:$0xff] }
  0x56   :  { %v154_v18 = vld [vmem:[#allocation6 + $0x2f0] sm:$0xff]  ;;  %v1569_v19 = vpack.c.bf16 %v155_v10, %v151_v9  ;;  %v157_v20 = vld [vmem:[#allocation6 + $0x308] sm:$0xff]  ;;  %v159_v23 = vld [vmem:[#allocation6 + $0x318] sm:$0xff]  ;;  %v1315_v26 = vpack.c.bf16 %v152_v16, %v148_v13 }
  0x57   :  { %1300 = vmatpush1.bf16.msra.mxu0 %v1299_v34  ;;  %v161_v21 = vld [vmem:[#allocation6 + $0x328] sm:$0xff]  ;;  %v1964_v22 = vld [vmem:[#allocation3] sm:$0xff]  ;;  %v163_v24 = vld [vmem:[#allocation6 + $0x338] sm:$0xff]  ;;  %v1571_v27 = vpack.c.bf16 %v154_v18, %v150_v17 }
  0x58   :  { %1556 = vmatpush1.bf16.msra.mxu1 %v1555_v35  ;;  %1302 = vmatprep.subr.bf16.mxu0 %v1301_v36  ;;  %v1968_v25 = vrot.slane %v1964_v22, %v1962_v11  ;;  %v1317_v28 = vpack.c.bf16 %v161_v21, %v157_v20  ;;  %v156_v29 = vld [vmem:[#allocation6 + $0x300] sm:$0xff]  ;;  %v158_v31 = vld [vmem:[#allocation6 + $0x310] sm:$0xff]  ;;  %v1573_v33 = vpack.c.bf16 %v163_v24, %v159_v23  ;;  %v165_v35 = vld [vmem:[#allocation6 + $0x348] sm:$0xff] }
  0x59   :  { %1558 = vmatprep.subr.bf16.mxu1 %v1557_v40  ;;  %v160_v30 = vld [vmem:[#allocation6 + $0x320] sm:$0xff]  ;;  %v162_v34 = vld [vmem:[#allocation6 + $0x330] sm:$0xff]  ;;  %v169_v36 = vld [vmem:[#allocation6 + $0x368] sm:$0xff]  ;;  %v574_v8 = vcombine.high %v1964_v22, %v1964_v22 }
  0x5a   :  { %v589_v32 = vcombine.high %v1968_v25, %v1968_v25  ;;  %v167_v37 = vld [vmem:[#allocation6 + $0x358] sm:$0xff]  ;;  %v1319_v39 = vpack.c.bf16 %v160_v30, %v156_v29  ;;  %v1575_v40 = vpack.c.bf16 %v162_v34, %v158_v31  ;;  %v1321_v41 = vpack.c.bf16 %v169_v36, %v165_v35  ;;  %v164_v42 = vld [vmem:[#allocation6 + $0x340] sm:$0xff]  ;;  %v166_v44 = vld [vmem:[#allocation6 + $0x350] sm:$0xff] }
  0x5b   :  { %1304 = vmatpush1.bf16.msra.mxu0 %v1303_v49  ;;  %v171_v38 = vld [vmem:[#allocation6 + $0x378] sm:$0xff]  ;;  %v168_v43 = vld [vmem:[#allocation6 + $0x360] sm:$0xff]  ;;  %v170_v46 = vld [vmem:[#allocation6 + $0x370] sm:$0xff]  ;;  %v1975_v22 = vrot.slane %v574_v8, %v1962_v11 }
  0x5c   :  { %1560 = vmatpush1.bf16.msra.mxu1 %v1559_v50  ;;  %1306 = vmatprep.subr.bf16.mxu0 %v1305_v51  ;;  %v1577_v45 = vpack.c.bf16 %v171_v38, %v167_v37  ;;  %v173_v47 = vld [vmem:[#allocation6 + $0x388] sm:$0xff]  ;;  %v175_v49 = vld [vmem:[#allocation6 + $0x398] sm:$0xff]  ;;  %v1323_v51 = vpack.c.bf16 %v168_v43, %v164_v42  ;;  %v1579_v52 = vpack.c.bf16 %v170_v46, %v166_v44  ;;  %v172_v54 = vld [vmem:[#allocation6 + $0x380] sm:$0xff] }
  0x5d   :  { %1562 = vmatprep.subr.bf16.mxu1 %v1561_v55  ;;  %680 = vmatprep.mubr.f32.mxu0 %v589_v32  ;;  %v177_v48 = vld [vmem:[#allocation6 + $0x3a8] sm:$0xff]  ;;  %v179_v50 = vld [vmem:[#allocation6 + $0x3b8] sm:$0xff]  ;;  %v176_v55 = vld [vmem:[#allocation6 + $0x3a0] sm:$0xff]  ;;  %v590_v38 = vcombine.high %v1975_v22, %v1975_v22 }
  0x5e   :  { %964 = vmatprep.mubr.f32.mxu1 %v589_v32  ;;  %v1325_v53 = vpack.c.bf16 %v177_v48, %v173_v47  ;;  %v174_v56 = vld [vmem:[#allocation6 + $0x390] sm:$0xff]  ;;  %v1581_v57 = vpack.c.bf16 %v179_v50, %v175_v49  ;;  %v181_v59 = vld [vmem:[#allocation6 + $0x3c8] sm:$0xff]  ;;  %v183_v61 = vld [vmem:[#allocation6 + $0x3d8] sm:$0xff] }
  0x5f   :  { %1308 = vmatpush1.bf16.msra.mxu0 %v1307_v63  ;;  %v178_v58 = vld [vmem:[#allocation6 + $0x3b0] sm:$0xff]  ;;  %v185_v60 = vld [vmem:[#allocation6 + $0x3e8] sm:$0xff]  ;;  %v187_v63 = vld [vmem:[#allocation6 + $0x3f8] sm:$0xff] }
  0x60   :  { %1564 = vmatpush1.bf16.msra.mxu1 %v1563_v0  ;;  %1310 = vmatprep.subr.bf16.mxu0 %v1309_v1  ;;  %v1327_v0 = vpack.c.bf16 %v176_v55, %v172_v54  ;;  %v1583_v1 = vpack.c.bf16 %v178_v58, %v174_v56  ;;  %v1329_v2 = vpack.c.bf16 %v185_v60, %v181_v59  ;;  %v180_v3 = vld [vmem:[#allocation6 + $0x3c0] sm:$0xff]  ;;  %v186_v7 = vld [vmem:[#allocation6 + $0x3f0] sm:$0xff]  ;;  %v189_v9 = vld [vmem:[#allocation6 + $0x408] sm:$0xff] }
  0x61   :  { %1566 = vmatprep.subr.bf16.mxu1 %v1565_v5  ;;  %v184_v4 = vld [vmem:[#allocation6 + $0x3e0] sm:$0xff]  ;;  %v182_v5 = vld [vmem:[#allocation6 + $0x3d0] sm:$0xff]  ;;  %v1585_v6 = vpack.c.bf16 %v187_v63, %v183_v61  ;;  %v193_v10 = vld [vmem:[#allocation6 + $0x428] sm:$0xff] }
  0x62   :  { %v195_v13 = vld [vmem:[#allocation6 + $0x438] sm:$0xff]  ;;  %v1333_v16 = vpack.c.bf16 %v193_v10, %v189_v9  ;;  %v188_v17 = vld [vmem:[#allocation6 + $0x400] sm:$0xff]  ;;  %v194_v21 = vld [vmem:[#allocation6 + $0x430] sm:$0xff] }
  0x63   :  { %1312 = vmatpush1.bf16.msra.mxu0 %v1311_v12  ;;  %v191_v12 = vld [vmem:[#allocation6 + $0x418] sm:$0xff]  ;;  %v192_v18 = vld [vmem:[#allocation6 + $0x420] sm:$0xff]  ;;  %v197_v23 = vld [vmem:[#allocation6 + $0x448] sm:$0xff] }
  0x64   :  { %1568 = vmatpush1.bf16.msra.mxu1 %v1567_v14  ;;  %1314 = vmatprep.subr.bf16.mxu0 %v1313_v15  ;;  %v1331_v14 = vpack.c.bf16 %v184_v4, %v180_v3  ;;  %v1587_v15 = vpack.c.bf16 %v186_v7, %v182_v5  ;;  %v1589_v20 = vpack.c.bf16 %v195_v13, %v191_v12  ;;  %v201_v24 = vld [vmem:[#allocation6 + $0x468] sm:$0xff]  ;;  %v196_v31 = vld [vmem:[#allocation6 + $0x440] sm:$0xff]  ;;  %v202_v35 = vld [vmem:[#allocation6 + $0x470] sm:$0xff] }
  0x65   :  { %1570 = vmatprep.subr.bf16.mxu1 %v1569_v19  ;;  %v190_v19 = vld [vmem:[#allocation6 + $0x410] sm:$0xff]  ;;  %v1337_v30 = vpack.c.bf16 %v201_v24, %v197_v23  ;;  %v200_v32 = vld [vmem:[#allocation6 + $0x460] sm:$0xff]  ;;  %v205_v36 = vld [vmem:[#allocation6 + $0x488] sm:$0xff] }
  0x66   :  { %v1591_v29 = vpack.c.bf16 %v194_v21, %v190_v19  ;;  %v209_v37 = vld [vmem:[#allocation6 + $0x4a8] sm:$0xff]  ;;  %v204_v44 = vld [vmem:[#allocation6 + $0x480] sm:$0xff]  ;;  %v206_v46 = vld [vmem:[#allocation6 + $0x490] sm:$0xff] }
  0x67   :  { %1316 = vmatpush1.bf16.msra.mxu0 %v1315_v26  ;;  %v199_v26 = vld [vmem:[#allocation6 + $0x458] sm:$0xff]  ;;  %v1341_v43 = vpack.c.bf16 %v209_v37, %v205_v36  ;;  %v210_v48 = vld [vmem:[#allocation6 + $0x4b0] sm:$0xff]  ;;  %v213_v49 = vld [vmem:[#allocation6 + $0x4c8] sm:$0xff] }
  0x68   :  { %1572 = vmatpush1.bf16.msra.mxu1 %v1571_v27  ;;  %1318 = vmatprep.subr.bf16.mxu0 %v1317_v28  ;;  %v203_v27 = vld [vmem:[#allocation6 + $0x478] sm:$0xff]  ;;  %v1335_v28 = vpack.c.bf16 %v192_v18, %v188_v17  ;;  %v217_v50 = vld [vmem:[#allocation6 + $0x4e8] sm:$0xff]  ;;  %v212_v55 = vld [vmem:[#allocation6 + $0x4c0] sm:$0xff] }
  0x69   :  { %1574 = vmatprep.subr.bf16.mxu1 %v1573_v33  ;;  %v198_v33 = vld [vmem:[#allocation6 + $0x450] sm:$0xff]  ;;  %v1593_v34 = vpack.c.bf16 %v203_v27, %v199_v26  ;;  %v1345_v54 = vpack.c.bf16 %v217_v50, %v213_v49  ;;  %v216_v56 = vld [vmem:[#allocation6 + $0x4e0] sm:$0xff]  ;;  %v221_v60 = vld [vmem:[#allocation6 + $0x508] sm:$0xff] }
  0x6a   :  { %v1595_v42 = vpack.c.bf16 %v202_v35, %v198_v33  ;;  %v218_v59 = vld [vmem:[#allocation6 + $0x4f0] sm:$0xff]  ;;  %v225_v61 = vld [vmem:[#allocation6 + $0x528] sm:$0xff]  ;;  %v223_v63 = vld [vmem:[#allocation6 + $0x518] sm:$0xff] }
  0x6b   :  { %1320 = vmatpush1.bf16.msra.mxu0 %v1319_v39  ;;  %v207_v39 = vld [vmem:[#allocation6 + $0x498] sm:$0xff]  ;;  %v1349_v3 = vpack.c.bf16 %v225_v61, %v221_v60  ;;  %v220_v4 = vld [vmem:[#allocation6 + $0x500] sm:$0xff]  ;;  %v226_v8 = vld [vmem:[#allocation6 + $0x530] sm:$0xff] }
  0x6c   :  { %1576 = vmatpush1.bf16.msra.mxu1 %v1575_v40  ;;  %1322 = vmatprep.subr.bf16.mxu0 %v1321_v41  ;;  %v211_v40 = vld [vmem:[#allocation6 + $0x4b8] sm:$0xff]  ;;  %v1339_v41 = vpack.c.bf16 %v200_v32, %v196_v31  ;;  %v224_v5 = vld [vmem:[#allocation6 + $0x520] sm:$0xff]  ;;  %v229_v9 = vld [vmem:[#allocation6 + $0x548] sm:$0xff] }
  0x6d   :  { %1578 = vmatprep.subr.bf16.mxu1 %v1577_v45  ;;  %v208_v45 = vld [vmem:[#allocation6 + $0x4a0] sm:$0xff]  ;;  %v1597_v47 = vpack.c.bf16 %v211_v40, %v207_v39  ;;  %v233_v10 = vld [vmem:[#allocation6 + $0x568] sm:$0xff]  ;;  %v231_v12 = vld [vmem:[#allocation6 + $0x558] sm:$0xff] }
  0x6e   :  { %v235_v13 = vld [vmem:[#allocation6 + $0x578] sm:$0xff]  ;;  %v228_v17 = vld [vmem:[#allocation6 + $0x540] sm:$0xff]  ;;  %v230_v19 = vld [vmem:[#allocation6 + $0x550] sm:$0xff] }
  0x6f   :  { %1324 = vmatpush1.bf16.msra.mxu0 %v1323_v51  ;;  %v215_v51 = vld [vmem:[#allocation6 + $0x4d8] sm:$0xff]  ;;  %v232_v18 = vld [vmem:[#allocation6 + $0x560] sm:$0xff]  ;;  %v234_v21 = vld [vmem:[#allocation6 + $0x570] sm:$0xff] }
  0x70   :  { %1580 = vmatpush1.bf16.msra.mxu1 %v1579_v52  ;;  %1326 = vmatprep.subr.bf16.mxu0 %v1325_v53  ;;  %v219_v52 = vld [vmem:[#allocation6 + $0x4f8] sm:$0xff]  ;;  %v1343_v53 = vpack.c.bf16 %v208_v45, %v204_v44  ;;  %v237_v23 = vld [vmem:[#allocation6 + $0x588] sm:$0xff]  ;;  %v236_v31 = vld [vmem:[#allocation6 + $0x580] sm:$0xff] }
  0x71   :  { %1582 = vmatprep.subr.bf16.mxu1 %v1581_v57  ;;  %v214_v57 = vld [vmem:[#allocation6 + $0x4d0] sm:$0xff]  ;;  %v1601_v58 = vpack.c.bf16 %v219_v52, %v215_v51  ;;  %v241_v24 = vld [vmem:[#allocation6 + $0x5a8] sm:$0xff]  ;;  %v239_v26 = vld [vmem:[#allocation6 + $0x598] sm:$0xff] }
  0x72   :  { %v243_v27 = vld [vmem:[#allocation6 + $0x5b8] sm:$0xff]  ;;  %v240_v32 = vld [vmem:[#allocation6 + $0x5a0] sm:$0xff]  ;;  %v238_v33 = vld [vmem:[#allocation6 + $0x590] sm:$0xff] }
  0x73   :  { %1328 = vmatpush1.bf16.msra.mxu0 %v1327_v0  ;;  %v227_v0 = vld [vmem:[#allocation6 + $0x538] sm:$0xff]  ;;  %v242_v35 = vld [vmem:[#allocation6 + $0x5b0] sm:$0xff]  ;;  %v245_v36 = vld [vmem:[#allocation6 + $0x5c8] sm:$0xff]  ;;  %v1359_v40 = vpack.c.bf16 %v240_v32, %v236_v31 }
  0x74   :  { %1584 = vmatpush1.bf16.msra.mxu1 %v1583_v1  ;;  %1330 = vmatprep.subr.bf16.mxu0 %v1329_v2  ;;  %v1347_v1 = vpack.c.bf16 %v216_v56, %v212_v55  ;;  %v1603_v2 = vpack.c.bf16 %v218_v59, %v214_v57  ;;  %v1605_v7 = vpack.c.bf16 %v227_v0, %v223_v63  ;;  %v249_v37 = vld [vmem:[#allocation6 + $0x5e8] sm:$0xff]  ;;  %v251_v39 = vld [vmem:[#allocation6 + $0x5f8] sm:$0xff]  ;;  %v248_v44 = vld [vmem:[#allocation6 + $0x5e0] sm:$0xff] }
  0x75   :  { %1586 = vmatprep.subr.bf16.mxu1 %v1585_v6  ;;  %v222_v6 = vld [vmem:[#allocation6 + $0x510] sm:$0xff]  ;;  %v257_v49 = vld [vmem:[#allocation6 + $0x628] sm:$0xff]  ;;  %v255_v50 = vld [vmem:[#allocation6 + $0x618] sm:$0xff] }
  0x76   :  { %v246_v45 = vld [vmem:[#allocation6 + $0x5d0] sm:$0xff]  ;;  %v259_v51 = vld [vmem:[#allocation6 + $0x638] sm:$0xff]  ;;  %v256_v55 = vld [vmem:[#allocation6 + $0x620] sm:$0xff] }
  0x77   :  { %1332 = vmatpush1.bf16.msra.mxu0 %v1331_v14  ;;  %v1351_v14 = vpack.c.bf16 %v224_v5, %v220_v4  ;;  %v254_v56 = vld [vmem:[#allocation6 + $0x610] sm:$0xff]  ;;  %v1621_v57 = vpack.c.bf16 %v259_v51, %v255_v50  ;;  %v261_v59 = vld [vmem:[#allocation6 + $0x648] sm:$0xff]  ;;  %v263_v61 = vld [vmem:[#allocation6 + $0x658] sm:$0xff] }
  0x78   :  { %1588 = vmatpush1.bf16.msra.mxu1 %v1587_v15  ;;  %1334 = vmatprep.subr.bf16.mxu0 %v1333_v16  ;;  %v1607_v15 = vpack.c.bf16 %v226_v8, %v222_v6  ;;  %v1353_v16 = vpack.c.bf16 %v233_v10, %v229_v9  ;;  %v265_v60 = vld [vmem:[#allocation6 + $0x668] sm:$0xff]  ;;  %v267_v63 = vld [vmem:[#allocation6 + $0x678] sm:$0xff]  ;;  %v264_v4 = vld [vmem:[#allocation6 + $0x660] sm:$0xff] }
  0x79   :  { %1590 = vmatprep.subr.bf16.mxu1 %v1589_v20  ;;  %v1609_v20 = vpack.c.bf16 %v235_v13, %v231_v12  ;;  %v262_v5 = vld [vmem:[#allocation6 + $0x650] sm:$0xff]  ;;  %v1625_v6 = vpack.c.bf16 %v267_v63, %v263_v61  ;;  %v269_v8 = vld [vmem:[#allocation6 + $0x688] sm:$0xff]  ;;  %v271_v10 = vld [vmem:[#allocation6 + $0x698] sm:$0xff] }
  0x7a   :  { %681 = vmatmul.mubr.f32.vlgmr.msra.gmra.mrb[0].mxu0 %v1968_v25  ;;  %v273_v9 = vld [vmem:[#allocation6 + $0x6a8] sm:$0xff]  ;;  %v275_v12 = vld [vmem:[#allocation6 + $0x6b8] sm:$0xff]  ;;  %v280_v31 = vld [vmem:[#allocation6 + $0x6e0] sm:$0xff] }
  0x7b   :  { %1336 = vmatpush1.bf16.msra.mxu0 %v1335_v28  ;;  %965 = vmatmul.mubr.f32.vlgmr.msra.gmra.mrb[0].mxu1 %v1968_v25  ;;  %v1599_v25 = vpack.c.bf16 %v210_v48, %v206_v46  ;;  %v1355_v28 = vpack.c.bf16 %v232_v18, %v228_v17  ;;  %v253_v48 = vld [vmem:[#allocation6 + $0x608] sm:$0xff]  ;;  %v272_v17 = vld [vmem:[#allocation6 + $0x6a0] sm:$0xff]  ;;  %v270_v18 = vld [vmem:[#allocation6 + $0x690] sm:$0xff] }
  0x7c   :  { %1592 = vmatpush1.bf16.msra.mxu1 %v1591_v29  ;;  %1338 = vmatprep.subr.bf16.mxu0 %v1337_v30  ;;  %v1611_v29 = vpack.c.bf16 %v234_v21, %v230_v19  ;;  %v1357_v30 = vpack.c.bf16 %v241_v24, %v237_v23  ;;  %v1629_v19 = vpack.c.bf16 %v275_v12, %v271_v10  ;;  %v277_v21 = vld [vmem:[#allocation6 + $0x6c8] sm:$0xff]  ;;  %v279_v24 = vld [vmem:[#allocation6 + $0x6d8] sm:$0xff]  ;;  %v278_v32 = vld [vmem:[#allocation6 + $0x6d0] sm:$0xff] }
  0x7d   :  { %1594 = vmatprep.subr.bf16.mxu1 %v1593_v34  ;;  %751 = vmatprep.mubr.f32.mxu0 %v590_v38  ;;  %v1613_v34 = vpack.c.bf16 %v243_v27, %v239_v26  ;;  %v281_v23 = vld [vmem:[#allocation6 + $0x6e8] sm:$0xff]  ;;  %v283_v26 = vld [vmem:[#allocation6 + $0x6f8] sm:$0xff] }
  0x7e   :  { %1035 = vmatprep.mubr.f32.mxu1 %v590_v38  ;;  %v247_v38 = vld [vmem:[#allocation6 + $0x5d8] sm:$0xff] }
  0x7f   :  { %1340 = vmatpush1.bf16.msra.mxu0 %v1339_v41  ;;  %v1615_v41 = vpack.c.bf16 %v242_v35, %v238_v33  ;;  %v1617_v46 = vpack.c.bf16 %v251_v39, %v247_v38  ;;  %v1633_v33 = vpack.c.bf16 %v283_v26, %v279_v24  ;;  %v285_v35 = vld [vmem:[#allocation6 + $0x708] sm:$0xff]  ;;  %v291_v38 = vld [vmem:[#allocation6 + $0x738] sm:$0xff] }
  0x80   :  { %1596 = vmatpush1.bf16.msra.mxu1 %v1595_v42  ;;  %1342 = vmatprep.subr.bf16.mxu0 %v1341_v43  ;;  %v1361_v42 = vpack.c.bf16 %v249_v37, %v245_v36  ;;  %v244_v43 = vld [vmem:[#allocation6 + $0x5c0] sm:$0xff]  ;;  %v289_v36 = vld [vmem:[#allocation6 + $0x728] sm:$0xff]  ;;  %v287_v37 = vld [vmem:[#allocation6 + $0x718] sm:$0xff] }
  0x81   :  { %1598 = vmatprep.subr.bf16.mxu1 %v1597_v47  ;;  %v250_v47 = vld [vmem:[#allocation6 + $0x5f0] sm:$0xff]  ;;  %v1363_v52 = vpack.c.bf16 %v248_v44, %v244_v43  ;;  %v288_v43 = vld [vmem:[#allocation6 + $0x720] sm:$0xff]  ;;  %v299_v50 = vld [vmem:[#allocation6 + $0x778] sm:$0xff] }
  0x82   :  { %v286_v44 = vld [vmem:[#allocation6 + $0x710] sm:$0xff]  ;;  %v307_v61 = vld [vmem:[#allocation6 + $0x7b8] sm:$0xff] }
  0x83   :  { %1344 = vmatpush1.bf16.msra.mxu0 %v1343_v53  ;;  %v1619_v53 = vpack.c.bf16 %v250_v47, %v246_v45  ;;  %v1637_v45 = vpack.c.bf16 %v291_v38, %v287_v37  ;;  %v293_v47 = vld [vmem:[#allocation6 + $0x748] sm:$0xff]  ;;  %v315_v10 = vld [vmem:[#allocation6 + $0x7f8] sm:$0xff] }
  0x84   :  { %1600 = vmatpush1.bf16.msra.mxu1 %v1599_v25  ;;  %1346 = vmatprep.subr.bf16.mxu0 %v1345_v54  ;;  %v1365_v25 = vpack.c.bf16 %v257_v49, %v253_v48  ;;  %v252_v54 = vld [vmem:[#allocation6 + $0x600] sm:$0xff]  ;;  %v297_v48 = vld [vmem:[#allocation6 + $0x768] sm:$0xff]  ;;  %v295_v49 = vld [vmem:[#allocation6 + $0x758] sm:$0xff] }
  0x85   :  { %1602 = vmatprep.subr.bf16.mxu1 %v1601_v58  ;;  %v258_v58 = vld [vmem:[#allocation6 + $0x630] sm:$0xff]  ;;  %v1367_v0 = vpack.c.bf16 %v256_v55, %v252_v54  ;;  %v296_v54 = vld [vmem:[#allocation6 + $0x760] sm:$0xff]  ;;  %v323_v24 = vld [vmem:[#allocation6 + $0x838] sm:$0xff] }
  0x86   :  { %v294_v55 = vld [vmem:[#allocation6 + $0x750] sm:$0xff]  ;;  %v331_v37 = vld [vmem:[#allocation6 + $0x878] sm:$0xff] }
  0x87   :  { %1348 = vmatpush1.bf16.msra.mxu0 %v1347_v1  ;;  %v1623_v1 = vpack.c.bf16 %v258_v58, %v254_v56  ;;  %v1641_v56 = vpack.c.bf16 %v299_v50, %v295_v49  ;;  %v301_v58 = vld [vmem:[#allocation6 + $0x788] sm:$0xff]  ;;  %v335_v50 = vld [vmem:[#allocation6 + $0x898] sm:$0xff] }
  0x88   :  { %1604 = vmatpush1.bf16.msra.mxu1 %v1603_v2  ;;  %1350 = vmatprep.subr.bf16.mxu0 %v1349_v3  ;;  %v1369_v2 = vpack.c.bf16 %v265_v60, %v261_v59  ;;  %v260_v3 = vld [vmem:[#allocation6 + $0x640] sm:$0xff]  ;;  %v305_v59 = vld [vmem:[#allocation6 + $0x7a8] sm:$0xff]  ;;  %v303_v60 = vld [vmem:[#allocation6 + $0x798] sm:$0xff] }
  0x89   :  { %1606 = vmatprep.subr.bf16.mxu1 %v1605_v7  ;;  %v266_v7 = vld [vmem:[#allocation6 + $0x670] sm:$0xff]  ;;  %v1371_v13 = vpack.c.bf16 %v264_v4, %v260_v3  ;;  %v304_v3 = vld [vmem:[#allocation6 + $0x7a0] sm:$0xff]  ;;  %v337_v49 = vld [vmem:[#allocation6 + $0x8a8] sm:$0xff] }
  0x8a   :  { %v302_v4 = vld [vmem:[#allocation6 + $0x790] sm:$0xff] }
  0x8b   :  { %1352 = vmatpush1.bf16.msra.mxu0 %v1351_v14  ;;  %v1627_v14 = vpack.c.bf16 %v266_v7, %v262_v5  ;;  %v1645_v5 = vpack.c.bf16 %v307_v61, %v303_v60  ;;  %v309_v7 = vld [vmem:[#allocation6 + $0x7c8] sm:$0xff] }
  0x8c   :  { %1608 = vmatpush1.bf16.msra.mxu1 %v1607_v15  ;;  %1354 = vmatprep.subr.bf16.mxu0 %v1353_v16  ;;  %v1373_v15 = vpack.c.bf16 %v273_v9, %v269_v8  ;;  %v268_v16 = vld [vmem:[#allocation6 + $0x680] sm:$0xff]  ;;  %v313_v8 = vld [vmem:[#allocation6 + $0x7e8] sm:$0xff]  ;;  %v311_v9 = vld [vmem:[#allocation6 + $0x7d8] sm:$0xff] }
  0x8d   :  { %1610 = vmatprep.subr.bf16.mxu1 %v1609_v20  ;;  %v274_v20 = vld [vmem:[#allocation6 + $0x6b0] sm:$0xff]  ;;  %v1375_v27 = vpack.c.bf16 %v272_v17, %v268_v16  ;;  %v312_v16 = vld [vmem:[#allocation6 + $0x7e0] sm:$0xff]  ;;  %v341_v60 = vld [vmem:[#allocation6 + $0x8c8] sm:$0xff] }
  0x8e   :  { %v310_v17 = vld [vmem:[#allocation6 + $0x7d0] sm:$0xff]  ;;  %v345_v61 = vld [vmem:[#allocation6 + $0x8e8] sm:$0xff] }
  0x8f   :  { %1356 = vmatpush1.bf16.msra.mxu0 %v1355_v28  ;;  %v1631_v28 = vpack.c.bf16 %v274_v20, %v270_v18  ;;  %v1649_v18 = vpack.c.bf16 %v315_v10, %v311_v9  ;;  %v317_v20 = vld [vmem:[#allocation6 + $0x808] sm:$0xff]  ;;  %v351_v10 = vld [vmem:[#allocation6 + $0x918] sm:$0xff] }
  0x90   :  { %1612 = vmatpush1.bf16.msra.mxu1 %v1611_v29  ;;  %1358 = vmatprep.subr.bf16.mxu0 %v1357_v30  ;;  %v1377_v29 = vpack.c.bf16 %v281_v23, %v277_v21  ;;  %v276_v30 = vld [vmem:[#allocation6 + $0x6c0] sm:$0xff]  ;;  %v321_v21 = vld [vmem:[#allocation6 + $0x828] sm:$0xff]  ;;  %v319_v23 = vld [vmem:[#allocation6 + $0x818] sm:$0xff] }
  0x91   :  { %1614 = vmatprep.subr.bf16.mxu1 %v1613_v34  ;;  %v282_v34 = vld [vmem:[#allocation6 + $0x6f0] sm:$0xff]  ;;  %v1379_v39 = vpack.c.bf16 %v280_v31, %v276_v30  ;;  %v320_v30 = vld [vmem:[#allocation6 + $0x820] sm:$0xff]  ;;  %v353_v9 = vld [vmem:[#allocation6 + $0x928] sm:$0xff] }
  0x92   :  { %v318_v31 = vld [vmem:[#allocation6 + $0x810] sm:$0xff] }
  0x93   :  { %1360 = vmatpush1.bf16.msra.mxu0 %v1359_v40  ;;  %v1635_v40 = vpack.c.bf16 %v282_v34, %v278_v32  ;;  %v1653_v32 = vpack.c.bf16 %v323_v24, %v319_v23  ;;  %v325_v34 = vld [vmem:[#allocation6 + $0x848] sm:$0xff]  ;;  %v359_v24 = vld [vmem:[#allocation6 + $0x958] sm:$0xff] }
  0x94   :  { %1616 = vmatpush1.bf16.msra.mxu1 %v1615_v41  ;;  %1362 = vmatprep.subr.bf16.mxu0 %v1361_v42  ;;  %v1381_v41 = vpack.c.bf16 %v289_v36, %v285_v35  ;;  %v284_v42 = vld [vmem:[#allocation6 + $0x700] sm:$0xff]  ;;  %v329_v35 = vld [vmem:[#allocation6 + $0x868] sm:$0xff]  ;;  %v327_v36 = vld [vmem:[#allocation6 + $0x858] sm:$0xff] }
  0x95   :  { %1618 = vmatprep.subr.bf16.mxu1 %v1617_v46  ;;  %v290_v46 = vld [vmem:[#allocation6 + $0x730] sm:$0xff]  ;;  %v1383_v51 = vpack.c.bf16 %v288_v43, %v284_v42  ;;  %v324_v42 = vld [vmem:[#allocation6 + $0x840] sm:$0xff]  ;;  %v361_v23 = vld [vmem:[#allocation6 + $0x968] sm:$0xff] }
  0x96   :  { %v328_v43 = vld [vmem:[#allocation6 + $0x860] sm:$0xff] }
  0x97   :  { %1364 = vmatpush1.bf16.msra.mxu0 %v1363_v52  ;;  %v1639_v52 = vpack.c.bf16 %v290_v46, %v286_v44  ;;  %v326_v44 = vld [vmem:[#allocation6 + $0x850] sm:$0xff]  ;;  %v1657_v46 = vpack.c.bf16 %v331_v37, %v327_v36  ;;  %v369_v36 = vld [vmem:[#allocation6 + $0x9a8] sm:$0xff]  ;;  %v367_v37 = vld [vmem:[#allocation6 + $0x998] sm:$0xff] }
  0x98   :  { %1620 = vmatpush1.bf16.msra.mxu1 %v1619_v53  ;;  %1366 = vmatprep.subr.bf16.mxu0 %v1365_v25  ;;  %v1385_v53 = vpack.c.bf16 %v297_v48, %v293_v47  ;;  %v292_v25 = vld [vmem:[#allocation6 + $0x740] sm:$0xff]  ;;  %v330_v47 = vld [vmem:[#allocation6 + $0x870] sm:$0xff]  ;;  %v333_v48 = vld [vmem:[#allocation6 + $0x888] sm:$0xff] }
  0x99   :  { %1622 = vmatprep.subr.bf16.mxu1 %v1621_v57  ;;  %v298_v57 = vld [vmem:[#allocation6 + $0x770] sm:$0xff]  ;;  %v1387_v63 = vpack.c.bf16 %v296_v54, %v292_v25  ;;  %v1659_v25 = vpack.c.bf16 %v330_v47, %v326_v44  ;;  %v1405_v54 = vpack.c.bf16 %v337_v49, %v333_v48  ;;  %v368_v44 = vld [vmem:[#allocation6 + $0x9a0] sm:$0xff]  ;;  %v373_v49 = vld [vmem:[#allocation6 + $0x9c8] sm:$0xff] }
  0x9a   :  { %v370_v48 = vld [vmem:[#allocation6 + $0x9b0] sm:$0xff] }
  0x9b   :  { %1368 = vmatpush1.bf16.msra.mxu0 %v1367_v0  ;;  %v1643_v0 = vpack.c.bf16 %v298_v57, %v294_v55  ;;  %v332_v55 = vld [vmem:[#allocation6 + $0x880] sm:$0xff]  ;;  %v334_v57 = vld [vmem:[#allocation6 + $0x890] sm:$0xff] }
  0x9c   :  { %1624 = vmatpush1.bf16.msra.mxu1 %v1623_v1  ;;  %1370 = vmatprep.subr.bf16.mxu0 %v1369_v2  ;;  %v1389_v1 = vpack.c.bf16 %v305_v59, %v301_v58  ;;  %v300_v2 = vld [vmem:[#allocation6 + $0x780] sm:$0xff]  ;;  %v338_v59 = vld [vmem:[#allocation6 + $0x8b0] sm:$0xff] }
  0x9d   :  { %1626 = vmatprep.subr.bf16.mxu1 %v1625_v6  ;;  %v306_v6 = vld [vmem:[#allocation6 + $0x7b0] sm:$0xff]  ;;  %v1391_v12 = vpack.c.bf16 %v304_v3, %v300_v2  ;;  %v1409_v2 = vpack.c.bf16 %v345_v61, %v341_v60  ;;  %v340_v3 = vld [vmem:[#allocation6 + $0x8c0] sm:$0xff]  ;;  %v381_v60 = vld [vmem:[#allocation6 + $0xa08] sm:$0xff] }
  0x9e   :  { %v385_v61 = vld [vmem:[#allocation6 + $0xa28] sm:$0xff] }
  0x9f   :  { %1372 = vmatpush1.bf16.msra.mxu0 %v1371_v13  ;;  %v1647_v13 = vpack.c.bf16 %v306_v6, %v302_v4  ;;  %v344_v4 = vld [vmem:[#allocation6 + $0x8e0] sm:$0xff] }
  0xa0   :  { %1628 = vmatpush1.bf16.msra.mxu1 %v1627_v14  ;;  %1374 = vmatprep.subr.bf16.mxu0 %v1373_v15  ;;  %v1393_v14 = vpack.c.bf16 %v313_v8, %v309_v7  ;;  %v308_v15 = vld [vmem:[#allocation6 + $0x7c0] sm:$0xff]  ;;  %v346_v7 = vld [vmem:[#allocation6 + $0x8f0] sm:$0xff]  ;;  %v349_v8 = vld [vmem:[#allocation6 + $0x908] sm:$0xff] }
  0xa1   :  { %1630 = vmatprep.subr.bf16.mxu1 %v1629_v19  ;;  %v314_v19 = vld [vmem:[#allocation6 + $0x7f0] sm:$0xff]  ;;  %v1395_v26 = vpack.c.bf16 %v312_v16, %v308_v15  ;;  %v1413_v15 = vpack.c.bf16 %v353_v9, %v349_v8  ;;  %v348_v16 = vld [vmem:[#allocation6 + $0x900] sm:$0xff]  ;;  %v389_v8 = vld [vmem:[#allocation6 + $0xa48] sm:$0xff] }
  0xa2   :  { %v393_v9 = vld [vmem:[#allocation6 + $0xa68] sm:$0xff] }
  0xa3   :  { %1376 = vmatpush1.bf16.msra.mxu0 %v1375_v27  ;;  %v1651_v27 = vpack.c.bf16 %v314_v19, %v310_v17  ;;  %v352_v17 = vld [vmem:[#allocation6 + $0x920] sm:$0xff] }
  0xa4   :  { %1632 = vmatpush1.bf16.msra.mxu1 %v1631_v28  ;;  %1378 = vmatprep.subr.bf16.mxu0 %v1377_v29  ;;  %v1397_v28 = vpack.c.bf16 %v321_v21, %v317_v20  ;;  %v316_v29 = vld [vmem:[#allocation6 + $0x800] sm:$0xff]  ;;  %v354_v20 = vld [vmem:[#allocation6 + $0x930] sm:$0xff]  ;;  %v357_v21 = vld [vmem:[#allocation6 + $0x948] sm:$0xff] }
  0xa5   :  { %1634 = vmatprep.subr.bf16.mxu1 %v1633_v33  ;;  %v322_v33 = vld [vmem:[#allocation6 + $0x830] sm:$0xff]  ;;  %v1399_v38 = vpack.c.bf16 %v320_v30, %v316_v29  ;;  %v1417_v29 = vpack.c.bf16 %v361_v23, %v357_v21  ;;  %v356_v30 = vld [vmem:[#allocation6 + $0x940] sm:$0xff]  ;;  %v397_v21 = vld [vmem:[#allocation6 + $0xa88] sm:$0xff] }
  0xa6   :  { %v401_v23 = vld [vmem:[#allocation6 + $0xaa8] sm:$0xff] }
  0xa7   :  { %1380 = vmatpush1.bf16.msra.mxu0 %v1379_v39  ;;  %v1981_v39 = vld [vmem:[#allocation3 + $0x8] sm:$0xff] }
  0xa8   :  { %1636 = vmatpush1.bf16.msra.mxu1 %v1635_v40  ;;  %1382 = vmatprep.subr.bf16.mxu0 %v1381_v41  ;;  %v1655_v40 = vpack.c.bf16 %v322_v33, %v318_v31  ;;  %v1401_v41 = vpack.c.bf16 %v329_v35, %v325_v34  ;;  %v360_v31 = vld [vmem:[#allocation6 + $0x960] sm:$0xff]  ;;  %v362_v34 = vld [vmem:[#allocation6 + $0x970] sm:$0xff]  ;;  %v365_v35 = vld [vmem:[#allocation6 + $0x988] sm:$0xff] }
  0xa9   :  { %1638 = vmatprep.subr.bf16.mxu1 %v1637_v45  ;;  %v1985_v45 = vrot.slane %v1981_v39, %v1962_v11 }
  0xab   :  { %1384 = vmatpush1.bf16.msra.mxu0 %v1383_v51  ;;  %v339_v51 = vld [vmem:[#allocation6 + $0x8b8] sm:$0xff] }
  0xac   :  { %1640 = vmatpush1.bf16.msra.mxu1 %v1639_v52  ;;  %1386 = vmatprep.subr.bf16.mxu0 %v1385_v53  ;;  %v606_v52 = vcombine.high %v1985_v45, %v1985_v45  ;;  %v1403_v53 = vpack.c.bf16 %v328_v43, %v324_v42  ;;  %v1661_v58 = vpack.c.bf16 %v339_v51, %v335_v50  ;;  %v364_v43 = vld [vmem:[#allocation6 + $0x980] sm:$0xff]  ;;  %v377_v50 = vld [vmem:[#allocation6 + $0x9e8] sm:$0xff]  ;;  %v375_v51 = vld [vmem:[#allocation6 + $0x9d8] sm:$0xff] }
  0xad   :  { %1642 = vmatprep.subr.bf16.mxu1 %v1641_v56  ;;  %v336_v56 = vld [vmem:[#allocation6 + $0x8a0] sm:$0xff]  ;;  %v1421_v42 = vpack.c.bf16 %v369_v36, %v365_v35  ;;  %v405_v35 = vld [vmem:[#allocation6 + $0xac8] sm:$0xff] }
  0xae   :  { %v409_v36 = vld [vmem:[#allocation6 + $0xae8] sm:$0xff] }
  0xaf   :  { %1388 = vmatpush1.bf16.msra.mxu0 %v1387_v63  ;;  %v343_v63 = vld [vmem:[#allocation6 + $0x8d8] sm:$0xff] }
  0xb0   :  { %1644 = vmatpush1.bf16.msra.mxu1 %v1643_v0  ;;  %1390 = vmatprep.subr.bf16.mxu0 %v1389_v1  ;;  %v347_v0 = vld [vmem:[#allocation6 + $0x8f8] sm:$0xff]  ;;  %v1407_v1 = vpack.c.bf16 %v336_v56, %v332_v55  ;;  %v372_v55 = vld [vmem:[#allocation6 + $0x9c0] sm:$0xff] }
  0xb1   :  { %1646 = vmatprep.subr.bf16.mxu1 %v1645_v5  ;;  %v342_v5 = vld [vmem:[#allocation6 + $0x8d0] sm:$0xff]  ;;  %v1665_v6 = vpack.c.bf16 %v347_v0, %v343_v63  ;;  %v376_v56 = vld [vmem:[#allocation6 + $0x9e0] sm:$0xff]  ;;  %v383_v63 = vld [vmem:[#allocation6 + $0xa18] sm:$0xff] }
  0xb2   :  { %v387_v0 = vld [vmem:[#allocation6 + $0xa38] sm:$0xff] }
  0xb3   :  { %1392 = vmatpush1.bf16.msra.mxu0 %v1391_v12  ;;  %v355_v12 = vld [vmem:[#allocation6 + $0x938] sm:$0xff] }
  0xb4   :  { %1648 = vmatpush1.bf16.msra.mxu1 %v1647_v13  ;;  %1394 = vmatprep.subr.bf16.mxu0 %v1393_v14  ;;  %v1411_v13 = vpack.c.bf16 %v344_v4, %v340_v3  ;;  %v1667_v14 = vpack.c.bf16 %v346_v7, %v342_v5  ;;  %v1669_v19 = vpack.c.bf16 %v355_v12, %v351_v10  ;;  %v380_v3 = vld [vmem:[#allocation6 + $0xa00] sm:$0xff]  ;;  %v382_v5 = vld [vmem:[#allocation6 + $0xa10] sm:$0xff]  ;;  %v391_v10 = vld [vmem:[#allocation6 + $0xa58] sm:$0xff] }
  0xb5   :  { %1650 = vmatprep.subr.bf16.mxu1 %v1649_v18  ;;  %v350_v18 = vld [vmem:[#allocation6 + $0x910] sm:$0xff]  ;;  %v384_v4 = vld [vmem:[#allocation6 + $0xa20] sm:$0xff]  ;;  %v395_v12 = vld [vmem:[#allocation6 + $0xa78] sm:$0xff] }
  0xb6   :  { %v386_v7 = vld [vmem:[#allocation6 + $0xa30] sm:$0xff] }
  0xb7   :  { %1396 = vmatpush1.bf16.msra.mxu0 %v1395_v26  ;;  %v363_v26 = vld [vmem:[#allocation6 + $0x978] sm:$0xff] }
  0xb8   :  { %1652 = vmatpush1.bf16.msra.mxu1 %v1651_v27  ;;  %1398 = vmatprep.subr.bf16.mxu0 %v1397_v28  ;;  %v1415_v27 = vpack.c.bf16 %v352_v17, %v348_v16  ;;  %v1671_v28 = vpack.c.bf16 %v354_v20, %v350_v18  ;;  %v1673_v33 = vpack.c.bf16 %v363_v26, %v359_v24  ;;  %v388_v16 = vld [vmem:[#allocation6 + $0xa40] sm:$0xff]  ;;  %v390_v18 = vld [vmem:[#allocation6 + $0xa50] sm:$0xff]  ;;  %v399_v24 = vld [vmem:[#allocation6 + $0xa98] sm:$0xff] }
  0xb9   :  { %1654 = vmatprep.subr.bf16.mxu1 %v1653_v32  ;;  %v358_v32 = vld [vmem:[#allocation6 + $0x950] sm:$0xff]  ;;  %v392_v17 = vld [vmem:[#allocation6 + $0xa60] sm:$0xff]  ;;  %v403_v26 = vld [vmem:[#allocation6 + $0xab8] sm:$0xff] }
  0xba   :  { %752 = vmatmul.mubr.f32.vlgmr.msra.gmra.mrb[0].mxu0 %v1975_v22  ;;  %v394_v20 = vld [vmem:[#allocation6 + $0xa70] sm:$0xff] }
  0xbb   :  { %1400 = vmatpush1.bf16.msra.mxu0 %v1399_v38  ;;  %1036 = vmatmul.mubr.f32.vlgmr.msra.gmra.mrb[0].mxu1 %v1975_v22  ;;  %v1663_v22 = vpack.c.bf16 %v338_v59, %v334_v57  ;;  %v371_v38 = vld [vmem:[#allocation6 + $0x9b8] sm:$0xff]  ;;  %v374_v57 = vld [vmem:[#allocation6 + $0x9d0] sm:$0xff] }
  0xbc   :  { %1656 = vmatpush1.bf16.msra.mxu1 %v1655_v40  ;;  %1402 = vmatprep.subr.bf16.mxu0 %v1401_v41  ;;  %v1419_v40 = vpack.c.bf16 %v360_v31, %v356_v30  ;;  %v1675_v41 = vpack.c.bf16 %v362_v34, %v358_v32  ;;  %v1677_v47 = vpack.c.bf16 %v371_v38, %v367_v37  ;;  %v378_v59 = vld [vmem:[#allocation6 + $0x9f0] sm:$0xff]  ;;  %v396_v30 = vld [vmem:[#allocation6 + $0xa80] sm:$0xff]  ;;  %v407_v37 = vld [vmem:[#allocation6 + $0xad8] sm:$0xff] }
  0xbd   :  { %1658 = vmatprep.subr.bf16.mxu1 %v1657_v46  ;;  %822 = vmatprep.mubr.f32.mxu0 %v606_v52  ;;  %v366_v46 = vld [vmem:[#allocation6 + $0x990] sm:$0xff]  ;;  %v400_v31 = vld [vmem:[#allocation6 + $0xaa0] sm:$0xff]  ;;  %v411_v38 = vld [vmem:[#allocation6 + $0xaf8] sm:$0xff] }
  0xbe   :  { %1106 = vmatprep.mubr.f32.mxu1 %v606_v52  ;;  %v379_v52 = vld [vmem:[#allocation6 + $0x9f8] sm:$0xff]  ;;  %v398_v32 = vld [vmem:[#allocation6 + $0xa90] sm:$0xff] }
  0xbf   :  { %1404 = vmatpush1.bf16.msra.mxu0 %v1403_v53  ;;  %v1423_v53 = vpack.c.bf16 %v368_v44, %v364_v43  ;;  %v402_v34 = vld [vmem:[#allocation6 + $0xab0] sm:$0xff]  ;;  %v404_v43 = vld [vmem:[#allocation6 + $0xac0] sm:$0xff] }
  0xc0   :  { %1660 = vmatpush1.bf16.msra.mxu1 %v1659_v25  ;;  %1406 = vmatprep.subr.bf16.mxu0 %v1405_v54  ;;  %v1679_v25 = vpack.c.bf16 %v370_v48, %v366_v46  ;;  %v1425_v54 = vpack.c.bf16 %v377_v50, %v373_v49  ;;  %v408_v44 = vld [vmem:[#allocation6 + $0xae0] sm:$0xff]  ;;  %v406_v46 = vld [vmem:[#allocation6 + $0xad0] sm:$0xff]  ;;  %v413_v49 = vld [vmem:[#allocation6 + $0xb08] sm:$0xff] }
  0xc1   :  { %1662 = vmatprep.subr.bf16.mxu1 %v1661_v58  ;;  %v1681_v58 = vpack.c.bf16 %v379_v52, %v375_v51  ;;  %v410_v48 = vld [vmem:[#allocation6 + $0xaf0] sm:$0xff]  ;;  %v417_v50 = vld [vmem:[#allocation6 + $0xb28] sm:$0xff]  ;;  %v415_v51 = vld [vmem:[#allocation6 + $0xb18] sm:$0xff] }
  0xc2   :  { %v419_v52 = vld [vmem:[#allocation6 + $0xb38] sm:$0xff] }
  0xc3   :  { %1408 = vmatpush1.bf16.msra.mxu0 %v1407_v1  ;;  %v1427_v1 = vpack.c.bf16 %v376_v56, %v372_v55  ;;  %v412_v55 = vld [vmem:[#allocation6 + $0xb00] sm:$0xff] }
  0xc4   :  { %1664 = vmatpush1.bf16.msra.mxu1 %v1663_v22  ;;  %1410 = vmatprep.subr.bf16.mxu0 %v1409_v2  ;;  %v1683_v22 = vpack.c.bf16 %v378_v59, %v374_v57  ;;  %v1429_v2 = vpack.c.bf16 %v385_v61, %v381_v60  ;;  %v416_v56 = vld [vmem:[#allocation6 + $0xb20] sm:$0xff]  ;;  %v414_v57 = vld [vmem:[#allocation6 + $0xb10] sm:$0xff]  ;;  %v421_v60 = vld [vmem:[#allocation6 + $0xb48] sm:$0xff] }
  0xc5   :  { %1666 = vmatprep.subr.bf16.mxu1 %v1665_v6  ;;  %v1685_v6 = vpack.c.bf16 %v387_v0, %v383_v63  ;;  %v418_v59 = vld [vmem:[#allocation6 + $0xb30] sm:$0xff]  ;;  %v425_v61 = vld [vmem:[#allocation6 + $0xb68] sm:$0xff]  ;;  %v423_v63 = vld [vmem:[#allocation6 + $0xb58] sm:$0xff] }
  0xc6   :  { %v427_v0 = vld [vmem:[#allocation6 + $0xb78] sm:$0xff] }
  0xc7   :  { %1412 = vmatpush1.bf16.msra.mxu0 %v1411_v13  ;;  %v1431_v13 = vpack.c.bf16 %v384_v4, %v380_v3  ;;  %v420_v3 = vld [vmem:[#allocation6 + $0xb40] sm:$0xff] }
  0xc8   :  { %1668 = vmatpush1.bf16.msra.mxu1 %v1667_v14  ;;  %1414 = vmatprep.subr.bf16.mxu0 %v1413_v15  ;;  %v1687_v14 = vpack.c.bf16 %v386_v7, %v382_v5  ;;  %v1433_v15 = vpack.c.bf16 %v393_v9, %v389_v8  ;;  %v424_v4 = vld [vmem:[#allocation6 + $0xb60] sm:$0xff]  ;;  %v422_v5 = vld [vmem:[#allocation6 + $0xb50] sm:$0xff]  ;;  %v429_v8 = vld [vmem:[#allocation6 + $0xb88] sm:$0xff] }
  0xc9   :  { %1670 = vmatprep.subr.bf16.mxu1 %v1669_v19  ;;  %v1689_v19 = vpack.c.bf16 %v395_v12, %v391_v10  ;;  %v426_v7 = vld [vmem:[#allocation6 + $0xb70] sm:$0xff]  ;;  %v433_v9 = vld [vmem:[#allocation6 + $0xba8] sm:$0xff]  ;;  %v431_v10 = vld [vmem:[#allocation6 + $0xb98] sm:$0xff] }
  0xca   :  { %v435_v12 = vld [vmem:[#allocation6 + $0xbb8] sm:$0xff] }
  0xcb   :  { %1416 = vmatpush1.bf16.msra.mxu0 %v1415_v27  ;;  %v1435_v27 = vpack.c.bf16 %v392_v17, %v388_v16  ;;  %v428_v16 = vld [vmem:[#allocation6 + $0xb80] sm:$0xff] }
  0xcc   :  { %1672 = vmatpush1.bf16.msra.mxu1 %v1671_v28  ;;  %1418 = vmatprep.subr.bf16.mxu0 %v1417_v29  ;;  %v1691_v28 = vpack.c.bf16 %v394_v20, %v390_v18  ;;  %v1437_v29 = vpack.c.bf16 %v401_v23, %v397_v21  ;;  %v432_v17 = vld [vmem:[#allocation6 + $0xba0] sm:$0xff]  ;;  %v430_v18 = vld [vmem:[#allocation6 + $0xb90] sm:$0xff]  ;;  %v437_v21 = vld [vmem:[#allocation6 + $0xbc8] sm:$0xff] }
  0xcd   :  { %1674 = vmatprep.subr.bf16.mxu1 %v1673_v33  ;;  %v1693_v33 = vpack.c.bf16 %v403_v26, %v399_v24  ;;  %v434_v20 = vld [vmem:[#allocation6 + $0xbb0] sm:$0xff]  ;;  %v441_v23 = vld [vmem:[#allocation6 + $0xbe8] sm:$0xff]  ;;  %v439_v24 = vld [vmem:[#allocation6 + $0xbd8] sm:$0xff] }
  0xce   :  { %v443_v26 = vld [vmem:[#allocation6 + $0xbf8] sm:$0xff] }
  0xcf   :  { %1420 = vmatpush1.bf16.msra.mxu0 %v1419_v40  ;;  %v1439_v40 = vpack.c.bf16 %v400_v31, %v396_v30  ;;  %v436_v30 = vld [vmem:[#allocation6 + $0xbc0] sm:$0xff] }
  0xd0   :  { %1676 = vmatpush1.bf16.msra.mxu1 %v1675_v41  ;;  %1422 = vmatprep.subr.bf16.mxu0 %v1421_v42  ;;  %v1695_v41 = vpack.c.bf16 %v402_v34, %v398_v32  ;;  %v1441_v42 = vpack.c.bf16 %v409_v36, %v405_v35  ;;  %v440_v31 = vld [vmem:[#allocation6 + $0xbe0] sm:$0xff]  ;;  %v438_v32 = vld [vmem:[#allocation6 + $0xbd0] sm:$0xff]  ;;  %v445_v35 = vld [vmem:[#allocation6 + $0xc08] sm:$0xff] }
  0xd1   :  { %1678 = vmatprep.subr.bf16.mxu1 %v1677_v47  ;;  %v1697_v47 = vpack.c.bf16 %v411_v38, %v407_v37  ;;  %v442_v34 = vld [vmem:[#allocation6 + $0xbf0] sm:$0xff]  ;;  %v449_v36 = vld [vmem:[#allocation6 + $0xc28] sm:$0xff]  ;;  %v591_v37 = vcombine.high %v1981_v39, %v1981_v39  ;;  %v447_v38 = vld [vmem:[#allocation6 + $0xc18] sm:$0xff] }
  0xd2   :  { %v455_v39 = vld [vmem:[#allocation6 + $0xc58] sm:$0xff] }
  0xd3   :  { %1424 = vmatpush1.bf16.msra.mxu0 %v1423_v53  ;;  %v1443_v53 = vpack.c.bf16 %v408_v44, %v404_v43  ;;  %v1461_v43 = vpack.c.bf16 %v449_v36, %v445_v35  ;;  %v444_v44 = vld [vmem:[#allocation6 + $0xc00] sm:$0xff]  ;;  %v482_v35 = vld [vmem:[#allocation6 + $0xd30] sm:$0xff]  ;;  %v485_v36 = vld [vmem:[#allocation6 + $0xd48] sm:$0xff] }
  0xd4   :  { %1680 = vmatpush1.bf16.msra.mxu1 %v1679_v25  ;;  %1426 = vmatprep.subr.bf16.mxu0 %v1425_v54  ;;  %v1699_v25 = vpack.c.bf16 %v410_v48, %v406_v46  ;;  %v1445_v54 = vpack.c.bf16 %v417_v50, %v413_v49  ;;  %v448_v46 = vld [vmem:[#allocation6 + $0xc20] sm:$0xff]  ;;  %v450_v49 = vld [vmem:[#allocation6 + $0xc30] sm:$0xff]  ;;  %v453_v50 = vld [vmem:[#allocation6 + $0xc48] sm:$0xff] }
  0xd5   :  { %1682 = vmatprep.subr.bf16.mxu1 %v1681_v58  ;;  %v1701_v58 = vpack.c.bf16 %v419_v52, %v415_v51  ;;  %v457_v51 = vld [vmem:[#allocation6 + $0xc68] sm:$0xff]  ;;  %v1994_v52 = vrot.slane %v591_v37, %v1962_v11 }
  0xd6   :  { %v489_v37 = vld [vmem:[#allocation6 + $0xd68] sm:$0xff] }
  0xd7   :  { %1428 = vmatpush1.bf16.msra.mxu0 %v1427_v1  ;;  %v1447_v1 = vpack.c.bf16 %v416_v56, %v412_v55  ;;  %v1465_v55 = vpack.c.bf16 %v457_v51, %v453_v50  ;;  %v452_v56 = vld [vmem:[#allocation6 + $0xc40] sm:$0xff]  ;;  %v493_v50 = vld [vmem:[#allocation6 + $0xd88] sm:$0xff] }
  0xd8   :  { %1684 = vmatpush1.bf16.msra.mxu1 %v1683_v22  ;;  %1430 = vmatprep.subr.bf16.mxu0 %v1429_v2  ;;  %v1703_v22 = vpack.c.bf16 %v418_v59, %v414_v57  ;;  %v1449_v2 = vpack.c.bf16 %v425_v61, %v421_v60  ;;  %v456_v57 = vld [vmem:[#allocation6 + $0xc60] sm:$0xff]  ;;  %v458_v60 = vld [vmem:[#allocation6 + $0xc70] sm:$0xff]  ;;  %v461_v61 = vld [vmem:[#allocation6 + $0xc88] sm:$0xff] }
  0xd9   :  { %1686 = vmatprep.subr.bf16.mxu1 %v1685_v6  ;;  %v1705_v6 = vpack.c.bf16 %v427_v0, %v423_v63  ;;  %v465_v63 = vld [vmem:[#allocation6 + $0xca8] sm:$0xff]  ;;  %v607_v0 = vcombine.high %v1994_v52, %v1994_v52 }
  0xda   :  { %v497_v51 = vld [vmem:[#allocation6 + $0xda8] sm:$0xff] }
  0xdb   :  { %1432 = vmatpush1.bf16.msra.mxu0 %v1431_v13  ;;  %v1451_v13 = vpack.c.bf16 %v424_v4, %v420_v3  ;;  %v1469_v4 = vpack.c.bf16 %v465_v63, %v461_v61  ;;  %v501_v61 = vld [vmem:[#allocation6 + $0xdc8] sm:$0xff] }
  0xdc   :  { %1688 = vmatpush1.bf16.msra.mxu1 %v1687_v14  ;;  %1434 = vmatprep.subr.bf16.mxu0 %v1433_v15  ;;  %v1707_v14 = vpack.c.bf16 %v426_v7, %v422_v5  ;;  %v1453_v15 = vpack.c.bf16 %v433_v9, %v429_v8  ;;  %v460_v5 = vld [vmem:[#allocation6 + $0xc80] sm:$0xff]  ;;  %v462_v7 = vld [vmem:[#allocation6 + $0xc90] sm:$0xff]  ;;  %v505_v63 = vld [vmem:[#allocation6 + $0xde8] sm:$0xff] }
  0xdd   :  { %1690 = vmatprep.subr.bf16.mxu1 %v1689_v19  ;;  %v1709_v19 = vpack.c.bf16 %v435_v12, %v431_v10  ;;  %v466_v9 = vld [vmem:[#allocation6 + $0xcb0] sm:$0xff]  ;;  %v469_v10 = vld [vmem:[#allocation6 + $0xcc8] sm:$0xff] }
  0xde   :  { %v473_v12 = vld [vmem:[#allocation6 + $0xce8] sm:$0xff] }
  0xdf   :  { %1436 = vmatpush1.bf16.msra.mxu0 %v1435_v27  ;;  %v1455_v27 = vpack.c.bf16 %v432_v17, %v428_v16  ;;  %v1473_v16 = vpack.c.bf16 %v473_v12, %v469_v10  ;;  %v468_v17 = vld [vmem:[#allocation6 + $0xcc0] sm:$0xff]  ;;  %v513_v10 = vld [vmem:[#allocation6 + $0xe28] sm:$0xff]  ;;  %v511_v12 = vld [vmem:[#allocation6 + $0xe18] sm:$0xff] }
  0xe0   :  { %1692 = vmatpush1.bf16.msra.mxu1 %v1691_v28  ;;  %1438 = vmatprep.subr.bf16.mxu0 %v1437_v29  ;;  %v1711_v28 = vpack.c.bf16 %v434_v20, %v430_v18  ;;  %v1457_v29 = vpack.c.bf16 %v441_v23, %v437_v21  ;;  %v472_v18 = vld [vmem:[#allocation6 + $0xce0] sm:$0xff]  ;;  %v474_v21 = vld [vmem:[#allocation6 + $0xcf0] sm:$0xff]  ;;  %v477_v23 = vld [vmem:[#allocation6 + $0xd08] sm:$0xff] }
  0xe1   :  { %1694 = vmatprep.subr.bf16.mxu1 %v1693_v33  ;;  %v1713_v33 = vpack.c.bf16 %v443_v26, %v439_v24  ;;  %v481_v24 = vld [vmem:[#allocation6 + $0xd28] sm:$0xff]  ;;  %v479_v26 = vld [vmem:[#allocation6 + $0xd18] sm:$0xff] }
  0xe3   :  { %1440 = vmatpush1.bf16.msra.mxu0 %v1439_v40  ;;  %v451_v40 = vld [vmem:[#allocation6 + $0xc38] sm:$0xff] }
  0xe4   :  { %1696 = vmatpush1.bf16.msra.mxu1 %v1695_v41  ;;  %1442 = vmatprep.subr.bf16.mxu0 %v1441_v42  ;;  %v1459_v41 = vpack.c.bf16 %v440_v31, %v436_v30  ;;  %v1715_v42 = vpack.c.bf16 %v442_v34, %v438_v32  ;;  %v1717_v48 = vpack.c.bf16 %v451_v40, %v447_v38  ;;  %v476_v31 = vld [vmem:[#allocation6 + $0xd00] sm:$0xff]  ;;  %v487_v38 = vld [vmem:[#allocation6 + $0xd58] sm:$0xff] }
  0xe5   :  { %1698 = vmatprep.subr.bf16.mxu1 %v1697_v47  ;;  %v446_v47 = vld [vmem:[#allocation6 + $0xc10] sm:$0xff]  ;;  %v1477_v30 = vpack.c.bf16 %v481_v24, %v477_v23  ;;  %v480_v32 = vld [vmem:[#allocation6 + $0xd20] sm:$0xff]  ;;  %v491_v40 = vld [vmem:[#allocation6 + $0xd78] sm:$0xff] }
  0xe6   :  { %v521_v23 = vld [vmem:[#allocation6 + $0xe68] sm:$0xff]  ;;  %v519_v24 = vld [vmem:[#allocation6 + $0xe58] sm:$0xff] }
  0xe7   :  { %1444 = vmatpush1.bf16.msra.mxu0 %v1443_v53  ;;  %v459_v53 = vld [vmem:[#allocation6 + $0xc78] sm:$0xff] }
  0xe8   :  { %1700 = vmatpush1.bf16.msra.mxu1 %v1699_v25  ;;  %1446 = vmatprep.subr.bf16.mxu0 %v1445_v54  ;;  %v1463_v25 = vpack.c.bf16 %v448_v46, %v444_v44  ;;  %v1719_v54 = vpack.c.bf16 %v450_v49, %v446_v47  ;;  %v1721_v59 = vpack.c.bf16 %v459_v53, %v455_v39  ;;  %v484_v44 = vld [vmem:[#allocation6 + $0xd40] sm:$0xff]  ;;  %v486_v47 = vld [vmem:[#allocation6 + $0xd50] sm:$0xff]  ;;  %v495_v39 = vld [vmem:[#allocation6 + $0xd98] sm:$0xff] }
  0xe9   :  { %1702 = vmatprep.subr.bf16.mxu1 %v1701_v58  ;;  %v454_v58 = vld [vmem:[#allocation6 + $0xc50] sm:$0xff]  ;;  %v488_v46 = vld [vmem:[#allocation6 + $0xd60] sm:$0xff]  ;;  %v499_v53 = vld [vmem:[#allocation6 + $0xdb8] sm:$0xff] }
  0xea   :  { %v1723_v3 = vpack.c.bf16 %v458_v60, %v454_v58  ;;  %v490_v49 = vld [vmem:[#allocation6 + $0xd70] sm:$0xff] }
  0xeb   :  { %1448 = vmatpush1.bf16.msra.mxu0 %v1447_v1  ;;  %v463_v1 = vld [vmem:[#allocation6 + $0xc98] sm:$0xff]  ;;  %v494_v58 = vld [vmem:[#allocation6 + $0xd90] sm:$0xff] }
  0xec   :  { %1704 = vmatpush1.bf16.msra.mxu1 %v1703_v22  ;;  %1450 = vmatprep.subr.bf16.mxu0 %v1449_v2  ;;  %v467_v22 = vld [vmem:[#allocation6 + $0xcb8] sm:$0xff]  ;;  %v1467_v2 = vpack.c.bf16 %v456_v57, %v452_v56  ;;  %v492_v56 = vld [vmem:[#allocation6 + $0xd80] sm:$0xff]  ;;  %v498_v60 = vld [vmem:[#allocation6 + $0xdb0] sm:$0xff] }
  0xed   :  { %1706 = vmatprep.subr.bf16.mxu1 %v1705_v6  ;;  %v464_v6 = vld [vmem:[#allocation6 + $0xca0] sm:$0xff]  ;;  %v1725_v8 = vpack.c.bf16 %v467_v22, %v463_v1  ;;  %v507_v1 = vld [vmem:[#allocation6 + $0xdf8] sm:$0xff] }
  0xee   :  { %v496_v57 = vld [vmem:[#allocation6 + $0xda0] sm:$0xff] }
  0xef   :  { %1452 = vmatpush1.bf16.msra.mxu0 %v1451_v13  ;;  %v471_v13 = vld [vmem:[#allocation6 + $0xcd8] sm:$0xff]  ;;  %v1487_v22 = vpack.c.bf16 %v496_v57, %v492_v56  ;;  %v536_v56 = vld [vmem:[#allocation6 + $0xee0] sm:$0xff]  ;;  %v534_v57 = vld [vmem:[#allocation6 + $0xed0] sm:$0xff] }
  0xf0   :  { %1708 = vmatpush1.bf16.msra.mxu1 %v1707_v14  ;;  %1454 = vmatprep.subr.bf16.mxu0 %v1453_v15  ;;  %v475_v14 = vld [vmem:[#allocation6 + $0xcf8] sm:$0xff]  ;;  %v1471_v15 = vpack.c.bf16 %v464_v6, %v460_v5  ;;  %v504_v5 = vld [vmem:[#allocation6 + $0xde0] sm:$0xff]  ;;  %v502_v6 = vld [vmem:[#allocation6 + $0xdd0] sm:$0xff] }
  0xf1   :  { %1710 = vmatprep.subr.bf16.mxu1 %v1709_v19  ;;  %v470_v19 = vld [vmem:[#allocation6 + $0xcd0] sm:$0xff]  ;;  %v1729_v20 = vpack.c.bf16 %v475_v14, %v471_v13  ;;  %v515_v13 = vld [vmem:[#allocation6 + $0xe38] sm:$0xff] }
  0xf3   :  { %1456 = vmatpush1.bf16.msra.mxu0 %v1455_v27  ;;  %v483_v27 = vld [vmem:[#allocation6 + $0xd38] sm:$0xff] }
  0xf4   :  { %1712 = vmatpush1.bf16.msra.mxu1 %v1711_v28  ;;  %1458 = vmatprep.subr.bf16.mxu0 %v1457_v29  ;;  %v1475_v28 = vpack.c.bf16 %v472_v18, %v468_v17  ;;  %v1731_v29 = vpack.c.bf16 %v474_v21, %v470_v19  ;;  %v1733_v34 = vpack.c.bf16 %v483_v27, %v479_v26  ;;  %v512_v17 = vld [vmem:[#allocation6 + $0xe20] sm:$0xff]  ;;  %v510_v18 = vld [vmem:[#allocation6 + $0xe10] sm:$0xff]  ;;  %v517_v21 = vld [vmem:[#allocation6 + $0xe48] sm:$0xff] }
  0xf5   :  { %1714 = vmatprep.subr.bf16.mxu1 %v1713_v33  ;;  %v478_v33 = vld [vmem:[#allocation6 + $0xd10] sm:$0xff]  ;;  %v1749_v19 = vpack.c.bf16 %v515_v13, %v511_v12  ;;  %v523_v26 = vld [vmem:[#allocation6 + $0xe78] sm:$0xff] }
  0xf6   :  { %v555_v12 = vld [vmem:[#allocation6 + $0xf78] sm:$0xff] }
  0xf7   :  { %1460 = vmatpush1.bf16.msra.mxu0 %v1459_v41  ;;  %v1479_v41 = vpack.c.bf16 %v480_v32, %v476_v31  ;;  %v520_v31 = vld [vmem:[#allocation6 + $0xe60] sm:$0xff]  ;;  %v518_v32 = vld [vmem:[#allocation6 + $0xe50] sm:$0xff] }
  0xf8   :  { %1716 = vmatpush1.bf16.msra.mxu1 %v1715_v42  ;;  %1462 = vmatprep.subr.bf16.mxu0 %v1461_v43  ;;  %v1735_v42 = vpack.c.bf16 %v482_v35, %v478_v33  ;;  %v1481_v43 = vpack.c.bf16 %v489_v37, %v485_v36  ;;  %v1753_v33 = vpack.c.bf16 %v523_v26, %v519_v24  ;;  %v525_v35 = vld [vmem:[#allocation6 + $0xe88] sm:$0xff]  ;;  %v527_v37 = vld [vmem:[#allocation6 + $0xe98] sm:$0xff] }
  0xf9   :  { %1718 = vmatprep.subr.bf16.mxu1 %v1717_v48  ;;  %v1737_v48 = vpack.c.bf16 %v491_v40, %v487_v38  ;;  %v529_v36 = vld [vmem:[#allocation6 + $0xea8] sm:$0xff]  ;;  %v531_v38 = vld [vmem:[#allocation6 + $0xeb8] sm:$0xff] }
  0xfa   :  { %823 = vmatmul.mubr.f32.vlgmr.msra.gmra.mrb[0].mxu0 %v1985_v45  ;;  %v563_v24 = vld [vmem:[#allocation6 + $0xfb8] sm:$0xff] }
  0xfb   :  { %1464 = vmatpush1.bf16.msra.mxu0 %v1463_v25  ;;  %1107 = vmatmul.mubr.f32.vlgmr.msra.gmra.mrb[0].mxu1 %v1985_v45  ;;  %v1727_v45 = vpack.c.bf16 %v466_v9, %v462_v7  ;;  %v1483_v25 = vpack.c.bf16 %v488_v46, %v484_v44  ;;  %v509_v9 = vld [vmem:[#allocation6 + $0xe08] sm:$0xff]  ;;  %v528_v44 = vld [vmem:[#allocation6 + $0xea0] sm:$0xff]  ;;  %v526_v46 = vld [vmem:[#allocation6 + $0xe90] sm:$0xff] }
  0xfc   :  { %1720 = vmatpush1.bf16.msra.mxu1 %v1719_v54  ;;  %1466 = vmatprep.subr.bf16.mxu0 %v1465_v55  ;;  %v1739_v54 = vpack.c.bf16 %v490_v49, %v486_v47  ;;  %v1485_v55 = vpack.c.bf16 %v497_v51, %v493_v50  ;;  %v1757_v47 = vpack.c.bf16 %v531_v38, %v527_v37  ;;  %v533_v49 = vld [vmem:[#allocation6 + $0xec8] sm:$0xff]  ;;  %v535_v51 = vld [vmem:[#allocation6 + $0xed8] sm:$0xff] }
  0xfd   :  { %1722 = vmatprep.subr.bf16.mxu1 %v1721_v59  ;;  %893 = vmatprep.mubr.f32.mxu0 %v607_v0  ;;  %v1741_v59 = vpack.c.bf16 %v499_v53, %v495_v39  ;;  %v537_v50 = vld [vmem:[#allocation6 + $0xee8] sm:$0xff]  ;;  %v539_v39 = vld [vmem:[#allocation6 + $0xef8] sm:$0xff] }
  0xfe   :  { %1177 = vmatprep.mubr.f32.mxu1 %v607_v0  ;;  %v503_v0 = vld [vmem:[#allocation6 + $0xdd8] sm:$0xff] }
  0xff   :  { %1468 = vmatpush1.bf16.msra.mxu0 %v1467_v2  ;;  %v1743_v2 = vpack.c.bf16 %v498_v60, %v494_v58  ;;  %v1745_v7 = vpack.c.bf16 %v507_v1, %v503_v0  ;;  %v1761_v58 = vpack.c.bf16 %v539_v39, %v535_v51  ;;  %v541_v60 = vld [vmem:[#allocation6 + $0xf08] sm:$0xff]  ;;  %v547_v0 = vld [vmem:[#allocation6 + $0xf38] sm:$0xff]  ;;  %v1220_v51 = vsub.s32 1, %v1959_v62 }
 0x100   :  { %1724 = vmatpush1.bf16.msra.mxu1 %v1723_v3  ;;  %1470 = vmatprep.subr.bf16.mxu0 %v1469_v4  ;;  %v1489_v3 = vpack.c.bf16 %v505_v63, %v501_v61  ;;  %v500_v4 = vld [vmem:[#allocation6 + $0xdc0] sm:$0xff]  ;;  %v545_v61 = vld [vmem:[#allocation6 + $0xf28] sm:$0xff]  ;;  %v543_v63 = vld [vmem:[#allocation6 + $0xf18] sm:$0xff]  ;;  %v1224_v39 = vsub.s32 2, %v1959_v62 }
 0x101   :  { %1726 = vmatprep.subr.bf16.mxu1 %v1725_v8  ;;  %v506_v8 = vld [vmem:[#allocation6 + $0xdf0] sm:$0xff]  ;;  %v1491_v14 = vpack.c.bf16 %v504_v5, %v500_v4  ;;  %v544_v4 = vld [vmem:[#allocation6 + $0xf20] sm:$0xff]  ;;  %v571_v37 = vld [vmem:[#allocation6 + $0xff8] sm:$0xff] }
 0x102   :  { %v542_v5 = vld [vmem:[#allocation6 + $0xf10] sm:$0xff] }
 0x103   :  { %1472 = vmatpush1.bf16.msra.mxu0 %v1471_v15  ;;  %v1747_v15 = vpack.c.bf16 %v506_v8, %v502_v6  ;;  %v1765_v6 = vpack.c.bf16 %v547_v0, %v543_v63  ;;  %v549_v8 = vld [vmem:[#allocation6 + $0xf48] sm:$0xff] }
 0x104   :  { %1728 = vmatpush1.bf16.msra.mxu1 %v1727_v45  ;;  %1474 = vmatprep.subr.bf16.mxu0 %v1473_v16  ;;  %v1493_v45 = vpack.c.bf16 %v513_v10, %v509_v9  ;;  %v508_v16 = vld [vmem:[#allocation6 + $0xe00] sm:$0xff]  ;;  %v553_v9 = vld [vmem:[#allocation6 + $0xf68] sm:$0xff]  ;;  %v551_v10 = vld [vmem:[#allocation6 + $0xf58] sm:$0xff] }
 0x105   :  { %1730 = vmatprep.subr.bf16.mxu1 %v1729_v20  ;;  %v514_v20 = vld [vmem:[#allocation6 + $0xe30] sm:$0xff]  ;;  %v1495_v27 = vpack.c.bf16 %v512_v17, %v508_v16  ;;  %v552_v16 = vld [vmem:[#allocation6 + $0xf60] sm:$0xff] }
 0x106   :  { %v550_v17 = vld [vmem:[#allocation6 + $0xf50] sm:$0xff] }
 0x107   :  { %1476 = vmatpush1.bf16.msra.mxu0 %v1475_v28  ;;  %v1751_v28 = vpack.c.bf16 %v514_v20, %v510_v18  ;;  %v1769_v18 = vpack.c.bf16 %v555_v12, %v551_v10  ;;  %v557_v20 = vld [vmem:[#allocation6 + $0xf88] sm:$0xff] }
 0x108   :  { %1732 = vmatpush1.bf16.msra.mxu1 %v1731_v29  ;;  %1478 = vmatprep.subr.bf16.mxu0 %v1477_v30  ;;  %v1497_v29 = vpack.c.bf16 %v521_v23, %v517_v21  ;;  %v516_v30 = vld [vmem:[#allocation6 + $0xe40] sm:$0xff]  ;;  %v561_v21 = vld [vmem:[#allocation6 + $0xfa8] sm:$0xff]  ;;  %v559_v23 = vld [vmem:[#allocation6 + $0xf98] sm:$0xff] }
 0x109   :  { %1734 = vmatprep.subr.bf16.mxu1 %v1733_v34  ;;  %v522_v34 = vld [vmem:[#allocation6 + $0xe70] sm:$0xff]  ;;  %v1499_v40 = vpack.c.bf16 %v520_v31, %v516_v30  ;;  %v560_v30 = vld [vmem:[#allocation6 + $0xfa0] sm:$0xff] }
 0x10a   :  { %v558_v31 = vld [vmem:[#allocation6 + $0xf90] sm:$0xff] }
 0x10b   :  { %1480 = vmatpush1.bf16.msra.mxu0 %v1479_v41  ;;  %v1755_v41 = vpack.c.bf16 %v522_v34, %v518_v32  ;;  %v1773_v32 = vpack.c.bf16 %v563_v24, %v559_v23  ;;  %v565_v34 = vld [vmem:[#allocation6 + $0xfc8] sm:$0xff] }
 0x10c   :  { %1736 = vmatpush1.bf16.msra.mxu1 %v1735_v42  ;;  %1482 = vmatprep.subr.bf16.mxu0 %v1481_v43  ;;  %v1501_v42 = vpack.c.bf16 %v529_v36, %v525_v35  ;;  %v524_v43 = vld [vmem:[#allocation6 + $0xe80] sm:$0xff]  ;;  %v569_v35 = vld [vmem:[#allocation6 + $0xfe8] sm:$0xff]  ;;  %v567_v36 = vld [vmem:[#allocation6 + $0xfd8] sm:$0xff] }
 0x10d   :  { %1738 = vmatprep.subr.bf16.mxu1 %v1737_v48  ;;  %v530_v48 = vld [vmem:[#allocation6 + $0xeb0] sm:$0xff]  ;;  %v1503_v53 = vpack.c.bf16 %v528_v44, %v524_v43  ;;  %v568_v43 = vld [vmem:[#allocation6 + $0xfe0] sm:$0xff]  ;;  %v1777_v44 = vpack.c.bf16 %v571_v37, %v567_v36 }
 0x10f   :  { %1484 = vmatpush1.bf16.msra.mxu0 %v1483_v25  ;;  %v1759_v25 = vpack.c.bf16 %v530_v48, %v526_v46  ;;  %v566_v46 = vld [vmem:[#allocation6 + $0xfd0] sm:$0xff] }
 0x110   :  { %1740 = vmatpush1.bf16.msra.mxu1 %v1739_v54  ;;  %1486 = vmatprep.subr.bf16.mxu0 %v1485_v55  ;;  %v1505_v54 = vpack.c.bf16 %v537_v50, %v533_v49  ;;  %v532_v55 = vld [vmem:[#allocation6 + $0xec0] sm:$0xff]  ;;  %v1216_v50 = vsub.s32 0, %v1959_v62 }
 0x111   :  { %1742 = vmatprep.subr.bf16.mxu1 %v1741_v59  ;;  %v538_v59 = vld [vmem:[#allocation6 + $0xef0] sm:$0xff]  ;;  %v1507_v1 = vpack.c.bf16 %v536_v56, %v532_v55 }
 0x113   :  { %1488 = vmatpush1.bf16.msra.mxu0 %v1487_v22  ;;  %v1763_v22 = vpack.c.bf16 %v538_v59, %v534_v57 }
 0x114   :  { %1744 = vmatpush1.bf16.msra.mxu1 %v1743_v2  ;;  %1490 = vmatprep.subr.bf16.mxu0 %v1489_v3  ;;  %v1509_v2 = vpack.c.bf16 %v545_v61, %v541_v60  ;;  %v540_v3 = vld [vmem:[#allocation6 + $0xf00] sm:$0xff] }
 0x115   :  { %1746 = vmatprep.subr.bf16.mxu1 %v1745_v7  ;;  %v546_v7 = vld [vmem:[#allocation6 + $0xf30] sm:$0xff]  ;;  %v1511_v13 = vpack.c.bf16 %v544_v4, %v540_v3 }
 0x117   :  { %1492 = vmatpush1.bf16.msra.mxu0 %v1491_v14  ;;  %v1767_v14 = vpack.c.bf16 %v546_v7, %v542_v5 }
 0x118   :  { %1748 = vmatpush1.bf16.msra.mxu1 %v1747_v15  ;;  %1494 = vmatprep.subr.bf16.mxu0 %v1493_v45  ;;  %v1513_v15 = vpack.c.bf16 %v553_v9, %v549_v8  ;;  %v548_v45 = vld [vmem:[#allocation6 + $0xf40] sm:$0xff] }
 0x119   :  { %1750 = vmatprep.subr.bf16.mxu1 %v1749_v19  ;;  %v554_v19 = vld [vmem:[#allocation6 + $0xf70] sm:$0xff]  ;;  %v1515_v26 = vpack.c.bf16 %v552_v16, %v548_v45 }
 0x11b   :  { %1496 = vmatpush1.bf16.msra.mxu0 %v1495_v27  ;;  %v1771_v27 = vpack.c.bf16 %v554_v19, %v550_v17 }
 0x11c   :  { %1752 = vmatpush1.bf16.msra.mxu1 %v1751_v28  ;;  %1498 = vmatprep.subr.bf16.mxu0 %v1497_v29  ;;  %v1517_v28 = vpack.c.bf16 %v561_v21, %v557_v20  ;;  %v556_v29 = vld [vmem:[#allocation6 + $0xf80] sm:$0xff] }
 0x11d   :  { %1754 = vmatprep.subr.bf16.mxu1 %v1753_v33  ;;  %v562_v33 = vld [vmem:[#allocation6 + $0xfb0] sm:$0xff]  ;;  %v1519_v38 = vpack.c.bf16 %v560_v30, %v556_v29 }
 0x11f   :  { %1500 = vmatpush1.bf16.msra.mxu0 %v1499_v40  ;;  %v1775_v40 = vpack.c.bf16 %v562_v33, %v558_v31 }
 0x120   :  { %1756 = vmatpush1.bf16.msra.mxu1 %v1755_v41  ;;  %1502 = vmatprep.subr.bf16.mxu0 %v1501_v42  ;;  %v1521_v41 = vpack.c.bf16 %v569_v35, %v565_v34  ;;  %v564_v42 = vld [vmem:[#allocation6 + $0xfc0] sm:$0xff] }
 0x121   :  { %1758 = vmatprep.subr.bf16.mxu1 %v1757_v47  ;;  %v570_v47 = vld [vmem:[#allocation6 + $0xff0] sm:$0xff]  ;;  %v1523_v48 = vpack.c.bf16 %v568_v43, %v564_v42 }
 0x122   :  { %v1779_v49 = vpack.c.bf16 %v570_v47, %v566_v46 }
 0x123   :  { %1504 = vmatpush1.bf16.msra.mxu0 %v1503_v53  ;;  %v1228_v53 = vsub.s32 3, %v1959_v62 }
 0x124   :  { %1760 = vmatpush1.bf16.msra.mxu1 %v1759_v25  ;;  %1506 = vmatprep.subr.bf16.mxu0 %v1505_v54  ;;  %v1212_v25 = vld [vmem:[#allocation8] sm:$0xf] }
 0x125   :  { %1762 = vmatprep.subr.bf16.mxu1 %v1761_v58  ;;  %v1217_v54 = vrot.slane %v1212_v25, %v1216_v50  ;;  %v1221_v55 = vrot.slane %v1212_v25, %v1220_v51  ;;  %v1225_v56 = vrot.slane %v1212_v25, %v1224_v39  ;;  %v1229_v57 = vrot.slane %v1212_v25, %v1228_v53 }
 0x127   :  { %1508 = vmatpush1.bf16.msra.mxu0 %v1507_v1  ;;  %v1230_v58 = vcombine.low %v1217_v54, %v1221_v55  ;;  %v1231_v59 = vcombine.low %v1225_v56, %v1229_v57 }
 0x128   :  { %1764 = vmatpush1.bf16.msra.mxu1 %v1763_v22  ;;  %1510 = vmatprep.subr.bf16.mxu0 %v1509_v2 }
 0x129   :  { %1766 = vmatprep.subr.bf16.mxu1 %v1765_v6  ;;  %v1245_v0 = vrot.slane %v1231_v59, %v1962_v11 }
 0x12b   :  { %1512 = vmatpush1.bf16.msra.mxu0 %v1511_v13 }
 0x12c   :  { %1768 = vmatpush1.bf16.msra.mxu1 %v1767_v14  ;;  %1514 = vmatprep.subr.bf16.mxu0 %v1513_v15 }
 0x12d   :  { %1770 = vmatprep.subr.bf16.mxu1 %v1769_v18 }
 0x12f   :  { %1516 = vmatpush1.bf16.msra.mxu0 %v1515_v26 }
 0x130   :  { %1772 = vmatpush1.bf16.msra.mxu1 %v1771_v27  ;;  %1518 = vmatprep.subr.bf16.mxu0 %v1517_v28 }
 0x131   :  { %1774 = vmatprep.subr.bf16.mxu1 %v1773_v32 }
 0x133   :  { %1520 = vmatpush1.bf16.msra.mxu0 %v1519_v38 }
 0x134   :  { %1776 = vmatpush1.bf16.msra.mxu1 %v1775_v40  ;;  %1522 = vmatprep.subr.bf16.mxu0 %v1521_v41 }
 0x135   :  { %1778 = vmatprep.subr.bf16.mxu1 %v1777_v44 }
 0x137   :  { %1524 = vmatpush1.bf16.msra.mxu0 %v1523_v48 }
 0x138   :  { %1780 = vmatpush1.bf16.msra.mxu1 %v1779_v49 }
 0x13a   :  { %894 = vmatmul.mubr.f32.vlgmr.msra.gmra.mrb[0].mxu0 %v1994_v52 }
 0x13b   :  { %1178 = vmatmul.mubr.f32.vlgmr.msra.gmra.mrb[0].mxu1 %v1994_v52  ;;  %v1238_v52 = vrot.slane %v1230_v58, %v1962_v11 }
 0x13d   :  { %v1246_v4 = vcombine.low %v1238_v52, %v1245_v0 }
 0x20d   :  { %v895_v60 = vpop.f32.mrb[0].mxu0 }
 0x20e   :  { %v1179_v61 = vpop.f32.mrb[0].mxu1  ;;  %v897_v63 = vpop.f32.mrb[1].mxu0 }
 0x20f   :  { %v1188_v1 = vcombine.low %v895_v60, %v897_v63  ;;  %v1181_v22 = vpop.f32.mrb[1].mxu1 }
 0x210   :  { %v1189_v2 = vcombine.low %v1179_v61, %v1181_v22 }
 0x211   :  { %v1196_v3 = vrot.slane %v1188_v1, %v1962_v11 }
 0x212   :  { %v1203_v62 = vrot.slane %v1189_v2, %v1962_v11 }
 0x214   :  { %v1204_v5 = vcombine.low %v1196_v3, %v1203_v62 }
 0x216   :  { %v1248_v6 = vadd.f32 %v1246_v4, %v1204_v5 }
 0x218   :  { %vm1249_vm0 = vcmp.ge.f32.partialorder %v1248_v6, 0.0  ;;  %v1250_v7 = vmul.f32 0.2, %v1248_v6 }
 0x21a   :  { %v1251_v8 = vsel %vm1249_vm0, %v1248_v6, %v1250_v7 }
 0x21b   :  { %1252 = vst [vmem:[#allocation9] sm:$0xff] %v1251_v8 }
 0x21c   :  { %1879 = shalt.err (!%p1876_p0)
}
 0x21d   :  { %s1880_s25 = scalar_lea.hbm %s2025_s3, 128 }
 0x21e   :  { %p1881_p1 = scmp.ne.s32.totalorder %s2025_s3, %s1880_s25  ;;  %p1884_p2 = scmp.lt.u32.totalorder %s1880_s25, %s2025_s3 }
 0x220   :  { %p1886_p3 = pnand %p1884_p2, %p1881_p1 }
 0x222   :  { %1889 = shalt.err (!%p1886_p3)
}
 0x223   :  { %1262 = dma.vmem_to_hbm [thread:$0]  %s1260_s21, 128, %s2025_s3, [#allocation5]  }
 0x224   :  { %1894 = dma.done.wait [#allocation5], 128  }
 0x225   :  { %1895 = vsyncadd [#allocation5], 4294967168 }
 0x226   :  { %1266 = vsyncpa [#allocation4], 1 }
 0x227   :  { %1267 = vsyncpa [#allocation7], 1 }
 0x228   :  { %1268 = vsyncpa [#allocation5], 1 }

// kernel: inf_model_forward.16
= control target key start
LH: loop header
LB: loop body
LE: loop exit
PB: predicated region body
PF: predicated region fallthrough
CT: control target
= control target key end

     0   :  { %8 = vsyncpa [#allocation4], 0  ;;  %s633_s0 = inlined_call_operand.hbm [shape: f32[2,512], index: 0, kind: input, shape index: {}]   ;;  %s634_s1 = inlined_call_operand.hbm [shape: f32[512,128], index: 1, kind: input, shape index: {}]   ;;  %s635_s2 = inlined_call_operand.hbm [shape: f32[1,128], index: 2, kind: input, shape index: {}]   ;;  %s636_s3 = inlined_call_operand.hbm [shape: f32[2,128], index: 3, kind: output, shape index: {}]  }
   0x1   :  { %9 = vsyncpa [#allocation7], 0 }
   0x2   :  { %10 = vsyncpa [#allocation5], 0  ;;  %s557_s12 = smov [#allocation6]   ;;  %s463_s16 = scalar_lea.hbm %s634_s1, 8192 }
   0x3   :  { %s26_s13 = sshll.u32 %s557_s12, 4  ;;  %p464_p0 = scmp.ne.s32.totalorder %s634_s1, %s463_s16  ;;  %s27_s13 = int_to_ptr.vmem [resolvable:$true] %s26_s13 }
   0x4   :  { %p467_p1 = scmp.lt.u32.totalorder %s463_s16, %s634_s1 }
   0x6   :  { %p469_p2 = pnand %p467_p1, %p464_p0 }
   0x8   :  { %472 = shalt.err (!%p469_p2)
}
   0x9   :  { %s473_s21 = scalar_lea.vmem %s27_s13, 8192  ;;  %p478_p4 = scmp.lt.s32.totalorder %s27_s13, %s27_s13 }
   0xa   :  { %p474_p3 = scmp.ne.s32.totalorder %s27_s13, %s473_s21  ;;  %p479_p5 = scmp.lt.s32.totalorder %s473_s21, %s473_s21 }
   0xc   :  { %p480_p6 = por %p479_p5, %p478_p4 }
   0xe   :  { %p481_p7 = pnand %p480_p6, %p474_p3 }
  0x10   :  { %484 = shalt.err (!%p481_p7)
}
  0x11   :  { %s558_s22 = smov 128   ;;  %s559_s23 = smov 8  }
  0x12   :  { %32 = dma.hbm_to_vmem [thread:$0]  %s634_s1, 8192, %s27_s13, [#allocation7], %s558_s22, %s558_s22, %s559_s23  }
  0x13   :  { %s560_s26 = smov [#allocation3]   ;;  %s561_s28 = smov [#allocation8]  }
  0x14   :  { %s17_s27 = sshll.u32 %s560_s26, 4  ;;  %s39_s29 = sshll.u32 %s561_s28, 4  ;;  %s18_s27 = int_to_ptr.vmem [resolvable:$true] %s17_s27  ;;  %s40_s29 = int_to_ptr.vmem [resolvable:$true] %s39_s29 }
  0x15   :  { %s485_s5 = scalar_lea.hbm %s633_s0, 128 }
  0x16   :  { %p486_p8 = scmp.ne.s32.totalorder %s633_s0, %s485_s5  ;;  %p489_p9 = scmp.lt.u32.totalorder %s485_s5, %s633_s0 }
  0x18   :  { %p491_p10 = pnand %p489_p9, %p486_p8 }
  0x1a   :  { %494 = shalt.err (!%p491_p10)
}
  0x1b   :  { %s495_s1 = scalar_lea.vmem %s18_s27, 128  ;;  %p500_p12 = scmp.lt.s32.totalorder %s18_s27, %s18_s27 }
  0x1c   :  { %p496_p11 = scmp.ne.s32.totalorder %s18_s27, %s495_s1  ;;  %p501_p13 = scmp.lt.s32.totalorder %s495_s1, %s495_s1 }
  0x1e   :  { %p502_p0 = por %p501_p13, %p500_p12 }
  0x20   :  { %p503_p1 = pnand %p502_p0, %p496_p11 }
  0x22   :  { %506 = shalt.err (!%p503_p1)
}
  0x23   :  { %20 = dma.hbm_to_vmem [thread:$0]  %s633_s0, 128, %s18_s27, [#allocation4]  }
  0x24   :  { %s507_s14 = scalar_lea.hbm %s635_s2, 16 }
  0x25   :  { %p508_p2 = scmp.ne.s32.totalorder %s635_s2, %s507_s14  ;;  %p511_p3 = scmp.lt.u32.totalorder %s507_s14, %s635_s2 }
  0x27   :  { %p513_p4 = pnand %p511_p3, %p508_p2 }
  0x29   :  { %516 = shalt.err (!%p513_p4)
}
  0x2a   :  { %s517_s19 = scalar_lea.vmem %s40_s29, 16  ;;  %s521_s20 = scalar_lea.vmem %s40_s29, 32 }
  0x2b   :  { %p518_p5 = scmp.ne.s32.totalorder %s40_s29, %s517_s19  ;;  %p522_p6 = scmp.lt.s32.totalorder %s40_s29, %s40_s29 }
  0x2c   :  { %p523_p7 = scmp.lt.s32.totalorder %s521_s20, %s517_s19 }
  0x2e   :  { %p524_p8 = por %p523_p7, %p522_p6 }
  0x30   :  { %p525_p9 = pnand %p524_p8, %p518_p5 }
  0x32   :  { %528 = shalt.err (!%p525_p9)
}
  0x33   :  { %42 = dma.hbm_to_vmem [thread:$0]  %s635_s2, 16, %s40_s29, [#allocation7]  }
  0x34   :  { %551 = dma.done.wait [#allocation4], 128  }
  0x35   :  { %552 = vsyncadd [#allocation4], 4294967168 }
  0x36   :  { %553 = dma.done.wait [#allocation7], 8208  }
  0x37   :  { %554 = vsyncadd [#allocation7], 4294959088  ;;  %v75_v0 = vld [vmem:[#allocation6 + $0x80] sm:$0xff]  ;;  %v76_v1 = vld [vmem:[#allocation6 + $0x88] sm:$0xff]  ;;  %v562_v47 = vmov 1983009808   ;;  %v128_v49 = vlaneseq }
  0x38   :  { %v107_v2 = vld [vmem:[#allocation6 + $0x180] sm:$0xff]  ;;  %v390_v3 = vpack.c.bf16 %v76_v1, %v75_v0  ;;  %v108_v4 = vld [vmem:[#allocation6 + $0x188] sm:$0xff]  ;;  %v77_v11 = vld [vmem:[#allocation6 + $0x90] sm:$0xff]  ;;  %v126_v48 = vunpack.c.l.s4 %v562_v47  ;;  %s564_s2 = smov [#allocation9]  }
  0x39   :  { %v59_v5 = vld [vmem:[#allocation6] sm:$0xff]  ;;  %v60_v6 = vld [vmem:[#allocation6 + $0x8] sm:$0xff]  ;;  %v422_v7 = vpack.c.bf16 %v108_v4, %v107_v2  ;;  %v78_v13 = vld [vmem:[#allocation6 + $0x98] sm:$0xff]  ;;  %v129_v0 = vshrl.u32 %v128_v49, 7  ;;  %s309_s22 = sshll.u32 %s564_s2, 4  ;;  %s310_s22 = int_to_ptr.vmem [resolvable:$true] %s309_s22 }
  0x3a   :  { %v392_v8 = vpack.c.bf16 %v60_v6, %v59_v5  ;;  %v91_v9 = vld [vmem:[#allocation6 + $0x100] sm:$0xff]  ;;  %v92_v10 = vld [vmem:[#allocation6 + $0x108] sm:$0xff]  ;;  %391 = vmatprep.subr.bf16.mxu0 %v390_v3  ;;  %v109_v14 = vld [vmem:[#allocation6 + $0x190] sm:$0xff]  ;;  %v394_v16 = vpack.c.bf16 %v78_v13, %v77_v11  ;;  %v127_v63 = vunpack.c.0.s8 %v126_v48  ;;  %s529_s23 = scalar_lea.vmem %s310_s22, 32  ;;  %p534_p11 = scmp.lt.s32.totalorder %s310_s22, %s310_s22 }
  0x3b   :  { %v424_v12 = vpack.c.bf16 %v92_v10, %v91_v9  ;;  %v110_v15 = vld [vmem:[#allocation6 + $0x198] sm:$0xff]  ;;  %423 = vmatprep.subr.bf16.mxu1 %v422_v7  ;;  %v61_v18 = vld [vmem:[#allocation6 + $0x10] sm:$0xff]  ;;  %v79_v23 = vld [vmem:[#allocation6 + $0xa0] sm:$0xff]  ;;  %p530_p10 = scmp.ne.s32.totalorder %s310_s22, %s529_s23  ;;  %p535_p12 = scmp.lt.s32.totalorder %s529_s23, %s529_s23 }
  0x3c   :  { %393 = vmatpush3.bf16.msra.mxu0 %v392_v8  ;;  %v426_v17 = vpack.c.bf16 %v110_v15, %v109_v14  ;;  %v62_v19 = vld [vmem:[#allocation6 + $0x18] sm:$0xff]  ;;  %v93_v20 = vld [vmem:[#allocation6 + $0x110] sm:$0xff]  ;;  %v80_v24 = vld [vmem:[#allocation6 + $0xa8] sm:$0xff]  ;;  %v130_v13 = vsub.s32 %v127_v63, %v129_v0 }
  0x3d   :  { %425 = vmatpush3.bf16.msra.mxu1 %v424_v12  ;;  %v396_v21 = vpack.c.bf16 %v62_v19, %v61_v18  ;;  %v94_v22 = vld [vmem:[#allocation6 + $0x118] sm:$0xff]  ;;  %395 = vmatprep.subr.bf16.mxu0 %v394_v16  ;;  %v398_v26 = vpack.c.bf16 %v80_v24, %v79_v23  ;;  %v111_v27 = vld [vmem:[#allocation6 + $0x1a0] sm:$0xff]  ;;  %v112_v28 = vld [vmem:[#allocation6 + $0x1a8] sm:$0xff]  ;;  %p536_p13 = por %p535_p12, %p534_p11 }
  0x3e   :  { %427 = vmatprep.subr.bf16.mxu1 %v426_v17  ;;  %v428_v25 = vpack.c.bf16 %v94_v22, %v93_v20  ;;  %v63_v29 = vld [vmem:[#allocation6 + $0x20] sm:$0xff]  ;;  %v430_v30 = vpack.c.bf16 %v112_v28, %v111_v27  ;;  %v64_v31 = vld [vmem:[#allocation6 + $0x28] sm:$0xff]  ;;  %v81_v35 = vld [vmem:[#allocation6 + $0xb0] sm:$0xff] }
  0x3f   :  { %v95_v32 = vld [vmem:[#allocation6 + $0x120] sm:$0xff]  ;;  %v96_v33 = vld [vmem:[#allocation6 + $0x128] sm:$0xff]  ;;  %v400_v34 = vpack.c.bf16 %v64_v31, %v63_v29  ;;  %v82_v36 = vld [vmem:[#allocation6 + $0xb8] sm:$0xff]  ;;  %p537_p0 = pnand %p536_p13, %p530_p10 }
  0x40   :  { %397 = vmatpush3.bf16.msra.mxu0 %v396_v21  ;;  %v113_v37 = vld [vmem:[#allocation6 + $0x1b0] sm:$0xff]  ;;  %v432_v38 = vpack.c.bf16 %v96_v33, %v95_v32  ;;  %v402_v39 = vpack.c.bf16 %v82_v36, %v81_v35  ;;  %v114_v40 = vld [vmem:[#allocation6 + $0x1b8] sm:$0xff]  ;;  %v83_v46 = vld [vmem:[#allocation6 + $0xc0] sm:$0xff] }
  0x41   :  { %429 = vmatpush3.bf16.msra.mxu1 %v428_v25  ;;  %399 = vmatprep.subr.bf16.mxu0 %v398_v26  ;;  %v65_v41 = vld [vmem:[#allocation6 + $0x30] sm:$0xff]  ;;  %v66_v42 = vld [vmem:[#allocation6 + $0x38] sm:$0xff]  ;;  %v434_v43 = vpack.c.bf16 %v114_v40, %v113_v37  ;;  %v84_v50 = vld [vmem:[#allocation6 + $0xc8] sm:$0xff] }
  0x42   :  { %431 = vmatprep.subr.bf16.mxu1 %v430_v30  ;;  %v97_v44 = vld [vmem:[#allocation6 + $0x130] sm:$0xff]  ;;  %v98_v45 = vld [vmem:[#allocation6 + $0x138] sm:$0xff]  ;;  %v115_v51 = vld [vmem:[#allocation6 + $0x1c0] sm:$0xff]  ;;  %v404_v53 = vpack.c.bf16 %v66_v42, %v65_v41  ;;  %v406_v55 = vpack.c.bf16 %v84_v50, %v83_v46 }
  0x43   :  { %v116_v52 = vld [vmem:[#allocation6 + $0x1c8] sm:$0xff]  ;;  %v436_v54 = vpack.c.bf16 %v98_v45, %v97_v44  ;;  %v67_v56 = vld [vmem:[#allocation6 + $0x40] sm:$0xff]  ;;  %v85_v61 = vld [vmem:[#allocation6 + $0xd0] sm:$0xff]  ;;  %v563_v44 = vmov 0.0  }
  0x44   :  { %401 = vmatpush3.bf16.msra.mxu0 %v400_v34  ;;  %v68_v57 = vld [vmem:[#allocation6 + $0x48] sm:$0xff]  ;;  %v99_v58 = vld [vmem:[#allocation6 + $0x140] sm:$0xff]  ;;  %v438_v59 = vpack.c.bf16 %v116_v52, %v115_v51  ;;  %v86_v62 = vld [vmem:[#allocation6 + $0xd8] sm:$0xff]  ;;  %56 = vst [vmem:[#allocation2] sm:$0x3] %v563_v44 }
  0x45   :  { %433 = vmatpush3.bf16.msra.mxu1 %v432_v38  ;;  %403 = vmatprep.subr.bf16.mxu0 %v402_v39  ;;  %v100_v60 = vld [vmem:[#allocation6 + $0x148] sm:$0xff]  ;;  %v117_v1 = vld [vmem:[#allocation6 + $0x1d0] sm:$0xff]  ;;  %v118_v2 = vld [vmem:[#allocation6 + $0x1d8] sm:$0xff]  ;;  %v408_v3 = vpack.c.bf16 %v68_v57, %v67_v56  ;;  %v410_v5 = vpack.c.bf16 %v86_v62, %v85_v61 }
  0x46   :  { %435 = vmatprep.subr.bf16.mxu1 %v434_v43  ;;  %v440_v4 = vpack.c.bf16 %v100_v60, %v99_v58  ;;  %v69_v6 = vld [vmem:[#allocation6 + $0x50] sm:$0xff]  ;;  %v70_v7 = vld [vmem:[#allocation6 + $0x58] sm:$0xff]  ;;  %v442_v9 = vpack.c.bf16 %v118_v2, %v117_v1  ;;  %v87_v11 = vld [vmem:[#allocation6 + $0xe0] sm:$0xff] }
  0x47   :  { %v101_v8 = vld [vmem:[#allocation6 + $0x150] sm:$0xff]  ;;  %v102_v10 = vld [vmem:[#allocation6 + $0x158] sm:$0xff]  ;;  %v88_v12 = vld [vmem:[#allocation6 + $0xe8] sm:$0xff]  ;;  %v412_v16 = vpack.c.bf16 %v70_v7, %v69_v6 }
  0x48   :  { %405 = vmatpush3.bf16.msra.mxu0 %v404_v53  ;;  %v119_v14 = vld [vmem:[#allocation6 + $0x1e0] sm:$0xff]  ;;  %v120_v15 = vld [vmem:[#allocation6 + $0x1e8] sm:$0xff]  ;;  %v444_v18 = vpack.c.bf16 %v102_v10, %v101_v8  ;;  %v414_v19 = vpack.c.bf16 %v88_v12, %v87_v11  ;;  %v58_v22 = vld [vmem:[#allocation3] sm:$0xff] }
  0x49   :  { %437 = vmatpush3.bf16.msra.mxu1 %v436_v54  ;;  %407 = vmatprep.subr.bf16.mxu0 %v406_v55  ;;  %v71_v17 = vld [vmem:[#allocation6 + $0x60] sm:$0xff]  ;;  %v72_v20 = vld [vmem:[#allocation6 + $0x68] sm:$0xff]  ;;  %v446_v23 = vpack.c.bf16 %v120_v15, %v119_v14  ;;  %v89_v25 = vld [vmem:[#allocation6 + $0xf0] sm:$0xff]  ;;  %v131_v27 = vrot.slane %v58_v22, %v130_v13  ;;  %v124_v28 = vcombine.high %v58_v22, %v58_v22 }
  0x4a   :  { %439 = vmatprep.subr.bf16.mxu1 %v438_v59  ;;  %v103_v21 = vld [vmem:[#allocation6 + $0x160] sm:$0xff]  ;;  %v104_v24 = vld [vmem:[#allocation6 + $0x168] sm:$0xff]  ;;  %v90_v26 = vld [vmem:[#allocation6 + $0xf8] sm:$0xff]  ;;  %v416_v31 = vpack.c.bf16 %v72_v20, %v71_v17 }
  0x4b   :  { %v121_v29 = vld [vmem:[#allocation6 + $0x1f0] sm:$0xff]  ;;  %v122_v30 = vld [vmem:[#allocation6 + $0x1f8] sm:$0xff]  ;;  %v139_v32 = vcombine.high %v131_v27, %v131_v27  ;;  %v138_v33 = vrot.slane %v124_v28, %v130_v13  ;;  %v448_v34 = vpack.c.bf16 %v104_v24, %v103_v21  ;;  %v418_v35 = vpack.c.bf16 %v90_v26, %v89_v25  ;;  %v319_v54 = vld [vmem:[#allocation8] ss:$0 sm:$0xff] }
  0x4c   :  { %409 = vmatpush3.bf16.msra.mxu0 %v408_v3  ;;  %v73_v36 = vld [vmem:[#allocation6 + $0x70] sm:$0xff]  ;;  %v74_v37 = vld [vmem:[#allocation6 + $0x78] sm:$0xff]  ;;  %v450_v38 = vpack.c.bf16 %v122_v30, %v121_v29 }
  0x4d   :  { %441 = vmatpush3.bf16.msra.mxu1 %v440_v4  ;;  %411 = vmatprep.subr.bf16.mxu0 %v410_v5  ;;  %v105_v39 = vld [vmem:[#allocation6 + $0x170] sm:$0xff]  ;;  %v106_v40 = vld [vmem:[#allocation6 + $0x178] sm:$0xff]  ;;  %v140_v41 = vcombine.high %v138_v33, %v138_v33  ;;  %v420_v42 = vpack.c.bf16 %v74_v37, %v73_v36 }
  0x4e   :  { %443 = vmatprep.subr.bf16.mxu1 %v442_v9  ;;  %209 = vmatprep.mubr.f32.mxu0 %v139_v32  ;;  %v452_v43 = vpack.c.bf16 %v106_v40, %v105_v39  ;;  %v57_v51 = vld [vmem:[#allocation2] sm:$0x3] }
  0x4f   :  { %279 = vmatprep.mubr.f32.mxu1 %v140_v41 }
  0x50   :  { %413 = vmatpush3.bf16.msra.mxu0 %v412_v16 }
  0x51   :  { %445 = vmatpush3.bf16.msra.mxu1 %v444_v18  ;;  %415 = vmatprep.subr.bf16.mxu0 %v414_v19 }
  0x52   :  { %447 = vmatprep.subr.bf16.mxu1 %v446_v23 }
  0x54   :  { %417 = vmatpush3.bf16.msra.mxu0 %v416_v31 }
  0x55   :  { %449 = vmatpush3.bf16.msra.mxu1 %v448_v34  ;;  %419 = vmatprep.subr.bf16.mxu0 %v418_v35 }
  0x56   :  { %451 = vmatprep.subr.bf16.mxu1 %v450_v38 }
  0x58   :  { %421 = vmatpush3.bf16.msra.mxu0 %v420_v42 }
  0x59   :  { %453 = vmatpush3.bf16.msra.mxu1 %v452_v43 }
  0x5b   :  { %210 = vmatmul.mubr.f32.vlgmr.msra.gmra.mrb[0].mxu0 %v131_v27 }
  0x5c   :  { %280 = vmatmul.mubr.f32.vlgmr.msra.gmra.mrb[0].mxu1 %v138_v33 }
 0x12e   :  { %v352_v45 = vpop.f32.mrb[0].mxu0 }
 0x12f   :  { %v387_v46 = vpop.f32.mrb[0].mxu1  ;;  %v353_v47 = vpop.f32.mrb[1].mxu0 }
 0x130   :  { %v354_v48 = vadd.f32 %v353_v47, %v352_v45  ;;  %v388_v49 = vpop.f32.mrb[1].mxu1 }
 0x131   :  { %v389_v50 = vadd.f32 %v388_v49, %v387_v46 }
 0x133   :  { %v282_v52 = vadd.f32 %v389_v50, %v354_v48 }
 0x135   :  { %v285_v53 = vadd.f32 %v282_v52, %v57_v51 }
 0x137   :  { %286 = vst [vmem:[#allocation2] sm:$0x3] %v285_v53 }
 0x13e   :  { %v290_v55 = vld [vmem:[#allocation2] sm:$0x3] }
 0x13f   :  { %v298_v56 = vadd.f32 %v319_v54, %v290_v55 }
 0x141   :  { %vm299_vm0 = vcmp.ge.f32.partialorder %v298_v56, 0.0  ;;  %v300_v57 = vmul.f32 0.2, %v298_v56 }
 0x143   :  { %v301_v58 = vsel %vm299_vm0, %v298_v56, %v300_v57 }
 0x144   :  { %302 = vst [vmem:[#allocation9] sm:$0x3] %v301_v58 }
 0x145   :  { %540 = shalt.err (!%p537_p0)
}
 0x146   :  { %s541_s26 = scalar_lea.hbm %s636_s3, 32 }
 0x147   :  { %p542_p1 = scmp.ne.s32.totalorder %s636_s3, %s541_s26  ;;  %p545_p2 = scmp.lt.u32.totalorder %s541_s26, %s636_s3 }
 0x149   :  { %p547_p3 = pnand %p545_p2, %p542_p1 }
 0x14b   :  { %550 = shalt.err (!%p547_p3)
}
 0x14c   :  { %312 = dma.vmem_to_hbm [thread:$0]  %s310_s22, 32, %s636_s3, [#allocation5]  }
 0x14d   :  { %555 = dma.done.wait [#allocation5], 32  }
 0x14e   :  { %556 = vsyncadd [#allocation5], 4294967264 }
 0x14f   :  { %316 = vsyncpa [#allocation4], 1 }
 0x150   :  { %317 = vsyncpa [#allocation7], 1 }
 0x151   :  { %318 = vsyncpa [#allocation5], 1 }

// kernel: inf_model_forward.17
= control target key start
LH: loop header
LB: loop body
LE: loop exit
PB: predicated region body
PF: predicated region fallthrough
CT: control target
= control target key end

     0   :  { %8 = vsyncpa [#allocation4], 0  ;;  %s438_s0 = inlined_call_operand.hbm [shape: f32[2,128], index: 0, kind: input, shape index: {}]   ;;  %s439_s1 = inlined_call_operand.hbm [shape: f32[128,100], index: 1, kind: input, shape index: {}]   ;;  %s440_s2 = inlined_call_operand.hbm [shape: f32[1,100], index: 2, kind: input, shape index: {}]   ;;  %s441_s3 = inlined_call_operand.hbm [shape: f32[2,100], index: 3, kind: output, shape index: {}]  }
   0x1   :  { %9 = vsyncpa [#allocation7], 0 }
   0x2   :  { %10 = vsyncpa [#allocation5], 0  ;;  %s358_s12 = smov [#allocation6]   ;;  %s264_s16 = scalar_lea.hbm %s439_s1, 2048 }
   0x3   :  { %s26_s13 = sshll.u32 %s358_s12, 4  ;;  %p265_p0 = scmp.ne.s32.totalorder %s439_s1, %s264_s16  ;;  %s27_s13 = int_to_ptr.vmem [resolvable:$true] %s26_s13 }
   0x4   :  { %p268_p1 = scmp.lt.u32.totalorder %s264_s16, %s439_s1 }
   0x6   :  { %p270_p2 = pnand %p268_p1, %p265_p0 }
   0x8   :  { %273 = shalt.err (!%p270_p2)
}
   0x9   :  { %s274_s21 = scalar_lea.vmem %s27_s13, 2048  ;;  %p279_p4 = scmp.lt.s32.totalorder %s27_s13, %s27_s13 }
   0xa   :  { %p275_p3 = scmp.ne.s32.totalorder %s27_s13, %s274_s21  ;;  %p280_p5 = scmp.lt.s32.totalorder %s274_s21, %s274_s21 }
   0xc   :  { %p281_p6 = por %p280_p5, %p279_p4 }
   0xe   :  { %p282_p7 = pnand %p281_p6, %p275_p3 }
  0x10   :  { %285 = shalt.err (!%p282_p7)
}
  0x11   :  { %s359_s22 = smov 128   ;;  %s360_s23 = smov 8  }
  0x12   :  { %32 = dma.hbm_to_vmem [thread:$0]  %s439_s1, 2048, %s27_s13, [#allocation7], %s359_s22, %s359_s22, %s360_s23  }
  0x13   :  { %s361_s26 = smov [#allocation3]   ;;  %s362_s28 = smov [#allocation8]  }
  0x14   :  { %s17_s27 = sshll.u32 %s361_s26, 4  ;;  %s39_s29 = sshll.u32 %s362_s28, 4  ;;  %s18_s27 = int_to_ptr.vmem [resolvable:$true] %s17_s27  ;;  %s40_s29 = int_to_ptr.vmem [resolvable:$true] %s39_s29 }
  0x15   :  { %s286_s5 = scalar_lea.hbm %s438_s0, 32 }
  0x16   :  { %p287_p8 = scmp.ne.s32.totalorder %s438_s0, %s286_s5  ;;  %p290_p9 = scmp.lt.u32.totalorder %s286_s5, %s438_s0 }
  0x18   :  { %p292_p10 = pnand %p290_p9, %p287_p8 }
  0x1a   :  { %295 = shalt.err (!%p292_p10)
}
  0x1b   :  { %s296_s1 = scalar_lea.vmem %s18_s27, 32  ;;  %p301_p12 = scmp.lt.s32.totalorder %s18_s27, %s18_s27 }
  0x1c   :  { %p297_p11 = scmp.ne.s32.totalorder %s18_s27, %s296_s1  ;;  %p302_p13 = scmp.lt.s32.totalorder %s296_s1, %s296_s1 }
  0x1e   :  { %p303_p0 = por %p302_p13, %p301_p12 }
  0x20   :  { %p304_p1 = pnand %p303_p0, %p297_p11 }
  0x22   :  { %307 = shalt.err (!%p304_p1)
}
  0x23   :  { %20 = dma.hbm_to_vmem [thread:$0]  %s438_s0, 32, %s18_s27, [#allocation4]  }
  0x24   :  { %s308_s14 = scalar_lea.hbm %s440_s2, 16 }
  0x25   :  { %p309_p2 = scmp.ne.s32.totalorder %s440_s2, %s308_s14  ;;  %p312_p3 = scmp.lt.u32.totalorder %s308_s14, %s440_s2 }
  0x27   :  { %p314_p4 = pnand %p312_p3, %p309_p2 }
  0x29   :  { %317 = shalt.err (!%p314_p4)
}
  0x2a   :  { %s318_s19 = scalar_lea.vmem %s40_s29, 16  ;;  %s322_s20 = scalar_lea.vmem %s40_s29, 32 }
  0x2b   :  { %p319_p5 = scmp.ne.s32.totalorder %s40_s29, %s318_s19  ;;  %p323_p6 = scmp.lt.s32.totalorder %s40_s29, %s40_s29 }
  0x2c   :  { %p324_p7 = scmp.lt.s32.totalorder %s322_s20, %s318_s19 }
  0x2e   :  { %p325_p8 = por %p324_p7, %p323_p6 }
  0x30   :  { %p326_p9 = pnand %p325_p8, %p319_p5 }
  0x32   :  { %329 = shalt.err (!%p326_p9)
}
  0x33   :  { %42 = dma.hbm_to_vmem [thread:$0]  %s440_s2, 16, %s40_s29, [#allocation7]  }
  0x34   :  { %352 = dma.done.wait [#allocation4], 32  }
  0x35   :  { %353 = vsyncadd [#allocation4], 4294967264 }
  0x36   :  { %354 = dma.done.wait [#allocation7], 2064  }
  0x37   :  { %355 = vsyncadd [#allocation7], 4294965232  ;;  %vm56_vm0 = vcmask 812032   ;;  %v363_v0 = vmov 0.0|0.0   ;;  %v364_v1 = vmov 0.0   ;;  %vm365_vm1 = vmmov 0  }
  0x38   :  { %231 = vmatprep.subr.bf16.mxu0 %v363_v0  ;;  %57 = vst.msk [vmem:[#allocation2] sm:$0x3] %vm56_vm0, %v364_v1  ;;  %228 = vmatprep.mubr.msk.f32.mxu0 %vm365_vm1, %v364_v1  ;;  %v60_v2 = vld [vmem:[#allocation6] sm:$0xff]  ;;  %v61_v3 = vld [vmem:[#allocation6 + $0x8] sm:$0xff]  ;;  %v62_v4 = vld [vmem:[#allocation6 + $0x10] sm:$0xff]  ;;  %s366_s2 = smov [#allocation9]  }
  0x39   :  { %v232_v5 = vpack.c.bf16 %v61_v3, %v60_v2  ;;  %v63_v6 = vld [vmem:[#allocation6 + $0x18] sm:$0xff]  ;;  %v64_v8 = vld [vmem:[#allocation6 + $0x20] sm:$0xff]  ;;  %v65_v9 = vld [vmem:[#allocation6 + $0x28] sm:$0xff]  ;;  %s168_s22 = sshll.u32 %s366_s2, 4  ;;  %s169_s22 = int_to_ptr.vmem [resolvable:$true] %s168_s22 }
  0x3a   :  { %v235_v7 = vpack.c.bf16 %v63_v6, %v62_v4  ;;  %v238_v10 = vpack.c.bf16 %v65_v9, %v64_v8  ;;  %v66_v11 = vld [vmem:[#allocation6 + $0x30] sm:$0xff]  ;;  %v67_v12 = vld [vmem:[#allocation6 + $0x38] sm:$0xff]  ;;  %v68_v14 = vld [vmem:[#allocation6 + $0x40] sm:$0xff]  ;;  %s330_s23 = scalar_lea.vmem %s169_s22, 32  ;;  %p335_p11 = scmp.lt.s32.totalorder %s169_s22, %s169_s22 }
  0x3b   :  { %233 = vmatpush3.bf16.msra.mxu0 %v232_v5  ;;  %v241_v13 = vpack.c.bf16 %v67_v12, %v66_v11  ;;  %v69_v15 = vld [vmem:[#allocation6 + $0x48] sm:$0xff]  ;;  %v70_v17 = vld [vmem:[#allocation6 + $0x50] sm:$0xff]  ;;  %v71_v18 = vld [vmem:[#allocation6 + $0x58] sm:$0xff]  ;;  %p331_p10 = scmp.ne.s32.totalorder %s169_s22, %s330_s23  ;;  %p336_p12 = scmp.lt.s32.totalorder %s330_s23, %s330_s23 }
  0x3c   :  { %234 = vmatprep.subr.bf16.mxu0 %v363_v0  ;;  %v244_v16 = vpack.c.bf16 %v69_v15, %v68_v14  ;;  %v247_v19 = vpack.c.bf16 %v71_v18, %v70_v17  ;;  %v72_v20 = vld [vmem:[#allocation6 + $0x60] sm:$0xff]  ;;  %v73_v21 = vld [vmem:[#allocation6 + $0x68] sm:$0xff]  ;;  %v74_v23 = vld [vmem:[#allocation6 + $0x70] sm:$0xff] }
  0x3d   :  { %v250_v22 = vpack.c.bf16 %v73_v21, %v72_v20  ;;  %v75_v24 = vld [vmem:[#allocation6 + $0x78] sm:$0xff]  ;;  %v178_v31 = vld [vmem:[#allocation8] ss:$0 sm:$0xff]  ;;  %p337_p13 = por %p336_p12, %p335_p11 }
  0x3e   :  { %v253_v25 = vpack.c.bf16 %v75_v24, %v74_v23  ;;  %v59_v26 = vld [vmem:[#allocation3] sm:$0x3] }
  0x3f   :  { %236 = vmatpush3.bf16.msra.mxu0 %v235_v7  ;;  %v58_v27 = vld [vmem:[#allocation2] sm:$0x3]  ;;  %p338_p0 = pnand %p337_p13, %p331_p10 }
  0x40   :  { %237 = vmatprep.subr.bf16.mxu0 %v363_v0 }
  0x43   :  { %239 = vmatpush3.bf16.msra.mxu0 %v238_v10 }
  0x44   :  { %240 = vmatprep.subr.bf16.mxu0 %v363_v0 }
  0x47   :  { %242 = vmatpush3.bf16.msra.mxu0 %v241_v13 }
  0x48   :  { %243 = vmatprep.subr.bf16.mxu0 %v363_v0 }
  0x4b   :  { %245 = vmatpush3.bf16.msra.mxu0 %v244_v16 }
  0x4c   :  { %246 = vmatprep.subr.bf16.mxu0 %v363_v0 }
  0x4f   :  { %248 = vmatpush3.bf16.msra.mxu0 %v247_v19 }
  0x50   :  { %249 = vmatprep.subr.bf16.mxu0 %v363_v0 }
  0x53   :  { %251 = vmatpush3.bf16.msra.mxu0 %v250_v22 }
  0x54   :  { %252 = vmatprep.subr.bf16.mxu0 %v363_v0 }
  0x57   :  { %254 = vmatpush3.bf16.msra.mxu0 %v253_v25 }
  0x5a   :  { %229 = vmatmul.mubr.f32.vlgmr.msra.gmra.mrb[0].mxu0 %v59_v26 }
 0x12d   :  { %v142_v28 = vpop.f32.mrb[0].mxu0 }
 0x12e   :  { %v146_v29 = vadd.f32 %v142_v28, %v58_v27  ;;  %v230_v30 = vpop.f32.mrb[1].mxu0 }
 0x130   :  { %148 = vst.msk [vmem:[#allocation2] sm:$0x3] %vm56_vm0, %v146_v29 }
 0x137   :  { %v152_v32 = vld [vmem:[#allocation2] sm:$0x3] }
 0x138   :  { %v160_v33 = vadd.f32 %v178_v31, %v152_v32 }
 0x13a   :  { %161 = vst.msk [vmem:[#allocation9] sm:$0x3] %vm56_vm0, %v160_v33 }
 0x13b   :  { %341 = shalt.err (!%p338_p0)
}
 0x13c   :  { %s342_s26 = scalar_lea.hbm %s441_s3, 32 }
 0x13d   :  { %p343_p1 = scmp.ne.s32.totalorder %s441_s3, %s342_s26  ;;  %p346_p2 = scmp.lt.u32.totalorder %s342_s26, %s441_s3 }
 0x13f   :  { %p348_p3 = pnand %p346_p2, %p343_p1 }
 0x141   :  { %351 = shalt.err (!%p348_p3)
}
 0x142   :  { %171 = dma.vmem_to_hbm [thread:$0]  %s169_s22, 32, %s441_s3, [#allocation5]  }
 0x143   :  { %356 = dma.done.wait [#allocation5], 32  }
 0x144   :  { %357 = vsyncadd [#allocation5], 4294967264 }
 0x145   :  { %175 = vsyncpa [#allocation4], 1 }
 0x146   :  { %176 = vsyncpa [#allocation7], 1 }
 0x147   :  { %177 = vsyncpa [#allocation5], 1 }

// kernel: inf_model_forward.19
= control target key start
LH: loop header
LB: loop body
LE: loop exit
PB: predicated region body
PF: predicated region fallthrough
CT: control target
= control target key end

     0   :  { %8 = vsyncpa [#allocation3], 0  ;;  %s248_s0 = inlined_call_operand.hbm [shape: f32[2,100], index: 0, kind: input, shape index: {}]   ;;  %s249_s1 = inlined_call_operand.hbm [shape: f32[2,100], index: 1, kind: input, shape index: {}]   ;;  %s250_s2 = inlined_call_operand.hbm [shape: f32[2,100], index: 2, kind: input, shape index: {}]   ;;  %s251_s3 = inlined_call_operand.hbm [shape: f32[2,100], index: 3, kind: output, shape index: {}]  }
   0x1   :  { %9 = vsyncpa [#allocation6], 0 }
   0x2   :  { %10 = vsyncpa [#allocation4], 0  ;;  %s176_s12 = smov [#allocation5]   ;;  %s177_s14 = smov [#allocation2]  }
   0x3   :  { %s27_s13 = sshll.u32 %s176_s12, 4  ;;  %s17_s15 = sshll.u32 %s177_s14, 4  ;;  %s28_s13 = int_to_ptr.vmem [resolvable:$true] %s27_s13  ;;  %s18_s15 = int_to_ptr.vmem [resolvable:$true] %s17_s15 }
   0x4   :  { %s82_s18 = scalar_lea.hbm %s249_s1, 32 }
   0x5   :  { %p83_p0 = scmp.ne.s32.totalorder %s249_s1, %s82_s18  ;;  %p86_p1 = scmp.lt.u32.totalorder %s82_s18, %s249_s1 }
   0x7   :  { %p88_p2 = pnand %p86_p1, %p83_p0 }
   0x9   :  { %91 = shalt.err (!%p88_p2)
}
   0xa   :  { %s92_s23 = scalar_lea.vmem %s28_s13, 32  ;;  %p97_p4 = scmp.lt.s32.totalorder %s28_s13, %s28_s13 }
   0xb   :  { %p93_p3 = scmp.ne.s32.totalorder %s28_s13, %s92_s23  ;;  %p98_p5 = scmp.lt.s32.totalorder %s92_s23, %s92_s23 }
   0xd   :  { %p99_p6 = por %p98_p5, %p97_p4 }
   0xf   :  { %p100_p7 = pnand %p99_p6, %p93_p3 }
  0x11   :  { %103 = shalt.err (!%p100_p7)
}
  0x12   :  { %30 = dma.hbm_to_vmem [thread:$0]  %s249_s1, 32, %s28_s13, [#allocation6]  }
  0x13   :  { %s104_s28 = scalar_lea.hbm %s248_s0, 32 }
  0x14   :  { %p105_p8 = scmp.ne.s32.totalorder %s248_s0, %s104_s28  ;;  %p108_p9 = scmp.lt.u32.totalorder %s104_s28, %s248_s0 }
  0x16   :  { %p110_p10 = pnand %p108_p9, %p105_p8 }
  0x18   :  { %113 = shalt.err (!%p110_p10)
}
  0x19   :  { %s114_s6 = scalar_lea.vmem %s18_s15, 32  ;;  %p119_p12 = scmp.lt.s32.totalorder %s18_s15, %s18_s15 }
  0x1a   :  { %p115_p11 = scmp.ne.s32.totalorder %s18_s15, %s114_s6  ;;  %p120_p13 = scmp.lt.s32.totalorder %s114_s6, %s114_s6 }
  0x1c   :  { %p121_p0 = por %p120_p13, %p119_p12 }
  0x1e   :  { %p122_p1 = pnand %p121_p0, %p115_p11 }
  0x20   :  { %125 = shalt.err (!%p122_p1)
}
  0x21   :  { %20 = dma.hbm_to_vmem [thread:$0]  %s248_s0, 32, %s18_s15, [#allocation3]  }
  0x22   :  { %s178_s8 = smov [#allocation7]   ;;  %s126_s12 = scalar_lea.hbm %s250_s2, 32 }
  0x23   :  { %s37_s9 = sshll.u32 %s178_s8, 4  ;;  %p127_p2 = scmp.ne.s32.totalorder %s250_s2, %s126_s12  ;;  %s38_s9 = int_to_ptr.vmem [resolvable:$true] %s37_s9 }
  0x24   :  { %p130_p3 = scmp.lt.u32.totalorder %s126_s12, %s250_s2 }
  0x26   :  { %p132_p4 = pnand %p130_p3, %p127_p2 }
  0x28   :  { %135 = shalt.err (!%p132_p4)
}
  0x29   :  { %s136_s18 = scalar_lea.vmem %s38_s9, 32  ;;  %p141_p6 = scmp.lt.s32.totalorder %s38_s9, %s38_s9 }
  0x2a   :  { %p137_p5 = scmp.ne.s32.totalorder %s38_s9, %s136_s18  ;;  %p142_p7 = scmp.lt.s32.totalorder %s136_s18, %s136_s18 }
  0x2c   :  { %p143_p8 = por %p142_p7, %p141_p6 }
  0x2e   :  { %p144_p9 = pnand %p143_p8, %p137_p5 }
  0x30   :  { %147 = shalt.err (!%p144_p9)
}
  0x31   :  { %40 = dma.hbm_to_vmem [thread:$0]  %s250_s2, 32, %s38_s9, [#allocation6]  }
  0x32   :  { %170 = dma.done.wait [#allocation3], 32  }
  0x33   :  { %171 = vsyncadd [#allocation3], 4294967264 }
  0x34   :  { %172 = dma.done.wait [#allocation6], 64  }
  0x35   :  { %173 = vsyncadd [#allocation6], 4294967232  ;;  %v51_v0 = vld [vmem:[#allocation5] sm:$0x3]  ;;  %v55_v3 = vld [vmem:[#allocation7] sm:$0x3] }
  0x36   :  { %v52_v1 = vmul.f32 0.5, %v51_v0  ;;  %v50_v5 = vld [vmem:[#allocation2] sm:$0x3]  ;;  %s179_s19 = smov [#allocation8]   ;;  %vm58_vm0 = vcmask 812032  }
  0x37   :  { %s66_s20 = sshll.u32 %s179_s19, 4  ;;  %s67_s20 = int_to_ptr.vmem [resolvable:$true] %s66_s20 }
  0x38   :  { %v53_v2 = vmul.f32 1.442695, %v52_v1  ;;  %s148_s21 = scalar_lea.vmem %s67_s20, 32  ;;  %p153_p11 = scmp.lt.s32.totalorder %s67_s20, %s67_s20 }
  0x39   :  { %p149_p10 = scmp.ne.s32.totalorder %s67_s20, %s148_s21  ;;  %p154_p12 = scmp.lt.s32.totalorder %s148_s21, %s148_s21 }
  0x3a   :  { %80 = vpow2.f32 %v53_v2 }
  0x3b   :  { %p155_p13 = por %p154_p12, %p153_p11 }
  0x3d   :  { %p156_p0 = pnand %p155_p13, %p149_p10 }
  0x44   :  { %v81_v4 = vpop.eup %80 }
  0x45   :  { %v56_v6 = vmul.f32 %v81_v4, %v55_v3 }
  0x47   :  { %v57_v7 = vadd.f32 %v56_v6, %v50_v5 }
  0x49   :  { %59 = vst.msk [vmem:[#allocation8] sm:$0x3] %vm58_vm0, %v57_v7 }
  0x4a   :  { %159 = shalt.err (!%p156_p0)
}
  0x4b   :  { %s160_s23 = scalar_lea.hbm %s251_s3, 32 }
  0x4c   :  { %p161_p1 = scmp.ne.s32.totalorder %s251_s3, %s160_s23  ;;  %p164_p2 = scmp.lt.u32.totalorder %s160_s23, %s251_s3 }
  0x4e   :  { %p166_p3 = pnand %p164_p2, %p161_p1 }
  0x50   :  { %169 = shalt.err (!%p166_p3)
}
  0x51   :  { %69 = dma.vmem_to_hbm [thread:$0]  %s67_s20, 32, %s251_s3, [#allocation4]  }
  0x52   :  { %174 = dma.done.wait [#allocation4], 32  }
  0x53   :  { %175 = vsyncadd [#allocation4], 4294967264 }
  0x54   :  { %73 = vsyncpa [#allocation3], 1 }
  0x55   :  { %74 = vsyncpa [#allocation6], 1 }
  0x56   :  { %75 = vsyncpa [#allocation4], 1 }

</bundles_post_ra>
